<compile_context>
chip_gen: v6e
topology: v6e:2x2x1
jax: 0.10.0
libtpu: 0.0.40
codegen_flags: <defaults>
</compile_context>

<pallas_src>
import functools

import jax
import jax.numpy as jnp
import numpy as np
from jax.experimental import pallas as pl
from jax.experimental.pallas import tpu as pltpu

_SQRT1_2 = 0.7071067811865476
_BN_EPS = 1e-5


# ----------------------------------------------------------------------------
# small in-kernel helpers
# ----------------------------------------------------------------------------
def _erf_approx(x):
    # TODO(synk): lax.erf lowering on Mosaic is not guaranteed; use
    # Abramowitz & Stegun 7.1.26 polynomial (|abs err| < 1.5e-7, ~f32 precision).
    a1, a2, a3, a4, a5 = (0.254829592, -0.284496736, 1.421413741,
                          -1.453152027, 1.061405429)
    p = 0.3275911
    s = jnp.where(x >= 0.0, 1.0, -1.0)
    ax = jnp.abs(x)
    t = 1.0 / (1.0 + p * ax)
    poly = ((((a5 * t + a4) * t + a3) * t + a2) * t + a1) * t
    return s * (1.0 - poly * jnp.exp(-ax * ax))


def _gelu_exact(x):
    return 0.5 * x * (1.0 + _erf_approx(x * _SQRT1_2))


def _dwconv3x3(src, wdw_ref, pad_ref, H, W, C):
    """Depthwise 3x3 conv (stride 1, padding 1, no bias) of an (H*W, C) value.

    Channels stay on the lane axis.  `pad_ref` is an (H+2, W+2, C) zero-padded VMEM
    scratch.  Fully vectorised: one zero fill, one interior store, then 9 whole-image
    shifted-window MACs.  With W % 8 == 0 the (H*W, C) <-> (H, W, C) reshapes are pure
    layout reinterpretations (no data movement).
    """
    pad_ref[...] = jnp.zeros((H + 2, W + 2, C), jnp.float32)
    pad_ref[1:H + 1, 1:W + 1, :] = src.reshape(H, W, C)
    acc = jnp.zeros((H, W, C), jnp.float32)
    for di in range(3):
        for dj in range(3):
            tap = wdw_ref[di, dj:dj + 1, :].reshape(1, 1, C)      # (1, 1, C)
            acc = acc + pad_ref[di:di + H, dj:dj + W, :] * tap
    return acc.reshape(H * W, C)


# ----------------------------------------------------------------------------
# Kernel 1: BatchNorm batch statistics -> per-channel (scale, offset)
#   scale  = gamma / sqrt(var + eps)
#   offset = beta - mean * scale
# so that BN(x) == x * scale + offset, folded into the branch kernels.
# ----------------------------------------------------------------------------
def _bn_stats_kernel(x_ref, gamma_ref, beta_ref, so_ref):
    x = x_ref[...]                                            # (N, C)
    mean = jnp.mean(x, axis=0, keepdims=True)                 # (1, C)
    var = jnp.mean((x - mean) ** 2, axis=0, keepdims=True)    # biased, like PyTorch
    scale = gamma_ref[...] * jax.lax.rsqrt(var + _BN_EPS)
    so_ref[0:1, :] = scale
    so_ref[1:2, :] = beta_ref[...] - mean * scale


def bn_scale_offset(x2d, gamma, beta):
    N, C = x2d.shape
    return pl.pallas_call(
        _bn_stats_kernel,
        out_shape=jax.ShapeDtypeStruct((2, C), jnp.float32),
        grid=(1,),
        in_specs=[pl.BlockSpec((N, C), lambda i: (0, 0)),
                  pl.BlockSpec((1, C), lambda i: (0, 0)),
                  pl.BlockSpec((1, C), lambda i: (0, 0))],
        out_specs=pl.BlockSpec((2, C), lambda i: (0, 0)),
    )(x2d, gamma.reshape(1, C), beta.reshape(1, C))


# ----------------------------------------------------------------------------
# Kernel 2: fused attention branch (one grid step per batch element)
#   out = x + proj( MDTA( dwconv3x3( conv1x1_qkv( BN(x) ) ) ) )
# ----------------------------------------------------------------------------
def _make_attn_branch_kernel(H, W, C, num_heads):
    HW = H * W
    C3 = 3 * C
    cph = C // num_heads

    def kernel(x_ref, so_ref, wqkv_ref, wdw_ref, wproj_ref, temp_ref,
               o_ref, pad_ref):
        x = x_ref[...]                                        # (HW, C)
        scale = so_ref[0:1, :]
        offset = so_ref[1:2, :]
        xb = x * scale + offset                               # BatchNorm folded in

        # 1x1 qkv conv: (HW, C) @ (C, 3C)
        qkv = jnp.dot(xb, wqkv_ref[...], preferred_element_type=jnp.float32)

        # depthwise 3x3 conv (padding=1) on all 3C channels at once
        dw = _dwconv3x3(qkv, wdw_ref, pad_ref, H, W, C3)      # (HW, 3C)

        # MDTA attention.  Heads are contiguous lane slices of the channel axis,
        # so q/k/v per head are (HW, cph) and everything contracts over HW --
        # no transposes.  project_out is accumulated head-by-head.
        wp = wproj_ref[...]                                   # (C, C)
        out = x                                               # residual
        for h in range(num_heads):
            qh = dw[:, h * cph:(h + 1) * cph]                 # (HW, cph)
            kh = dw[:, C + h * cph:C + (h + 1) * cph]
            vh = dw[:, 2 * C + h * cph:2 * C + (h + 1) * cph]
            # F.normalize(., dim=-1): x / max(||x||, 1e-12) == x * rsqrt(max(||x||^2, 1e-24))
            qn = qh * jax.lax.rsqrt(
                jnp.maximum(jnp.sum(qh * qh, axis=0, keepdims=True), 1e-24))
            kn = kh * jax.lax.rsqrt(
                jnp.maximum(jnp.sum(kh * kh, axis=0, keepdims=True), 1e-24))
            # attn = q @ k^T * temperature  -> (cph, cph), contracting over HW
            attn = jax.lax.dot_general(qn, kn, (((0,), (0,)), ((), ())),
                                       preferred_element_type=jnp.float32)
            attn = attn * temp_ref[h]
            attn = attn - jnp.max(attn, axis=-1, keepdims=True)
            e = jnp.exp(attn)
            p = e * pl.reciprocal(jnp.sum(e, axis=-1, keepdims=True), approx=False)
            # (attn @ v) kept in (HW, cph) layout
            oh = jax.lax.dot_general(vh, p, (((1,), (1,)), ((), ())),
                                     preferred_element_type=jnp.float32)
            # this head's slice of the 1x1 projection
            out = out + jnp.dot(oh, wp[h * cph:(h + 1) * cph, :],
                                preferred_element_type=jnp.float32)
        o_ref[...] = out

    return kernel


def attn_branch(x, so, params, num_heads, H, W):
    B, HW, C = x.shape
    kernel = _make_attn_branch_kernel(H, W, C, num_heads)
    return pl.pallas_call(
        kernel,
        out_shape=jax.ShapeDtypeStruct((B, HW, C), jnp.float32),
        grid=(B,),
        in_specs=[
            pl.BlockSpec((None, HW, C), lambda b: (b, 0, 0)),           # x
            pl.BlockSpec((2, C), lambda b: (0, 0)),                     # BN scale/offset
            pl.BlockSpec((C, 3 * C), lambda b: (0, 0)),                 # w_qkv
            pl.BlockSpec((3, 3, 3 * C), lambda b: (0, 0, 0)),           # w_qkv_dw
            pl.BlockSpec((C, C), lambda b: (0, 0)),                     # w_proj
            pl.BlockSpec(memory_space=pltpu.MemorySpace.SMEM),          # temperature
        ],
        out_specs=pl.BlockSpec((None, HW, C), lambda b: (b, 0, 0)),
        scratch_shapes=[pltpu.VMEM((H + 2, W + 2, 3 * C), jnp.float32)],
        compiler_params=pltpu.CompilerParams(dimension_semantics=("parallel",)),
    )(x, so, params['w_qkv'], params['w_qkv_dw'], params['w_proj'],
      params['temperature'])


# ----------------------------------------------------------------------------
# Kernel 3: fused gated-dconv FFN branch (one grid step per batch element)
#   out = x + proj_out( gelu(x1) * x2 ),  [x1 | x2] = dwconv3x3( conv1x1_in( BN(x) ) )
# ----------------------------------------------------------------------------
def _make_ffn_branch_kernel(H, W, C, hf):
    HW = H * W
    C2 = 2 * hf

    def kernel(x_ref, so_ref, win_ref, wdw_ref, wout_ref, o_ref, pad_ref):
        x = x_ref[...]                                        # (HW, C)
        scale = so_ref[0:1, :]
        offset = so_ref[1:2, :]
        xb = x * scale + offset                               # BatchNorm folded in

        h12 = jnp.dot(xb, win_ref[...], preferred_element_type=jnp.float32)   # (HW, 2*hf)
        dw = _dwconv3x3(h12, wdw_ref, pad_ref, H, W, C2)                       # (HW, 2*hf)

        # chunk(2, dim=channels) done as lane slices in-kernel
        g = _gelu_exact(dw[:, :hf]) * dw[:, hf:2 * hf]
        o_ref[...] = x + jnp.dot(g, wout_ref[...], preferred_element_type=jnp.float32)

    return kernel


def ffn_branch(x, so, params, H, W):
    B, HW, C = x.shape
    hf = params['w_out'].shape[0]
    kernel = _make_ffn_branch_kernel(H, W, C, hf)
    return pl.pallas_call(
        kernel,
        out_shape=jax.ShapeDtypeStruct((B, HW, C), jnp.float32),
        grid=(B,),
        in_specs=[
            pl.BlockSpec((None, HW, C), lambda b: (b, 0, 0)),           # x
            pl.BlockSpec((2, C), lambda b: (0, 0)),                     # BN scale/offset
            pl.BlockSpec((C, 2 * hf), lambda b: (0, 0)),                # w_in
            pl.BlockSpec((3, 3, 2 * hf), lambda b: (0, 0, 0)),          # w_dw
            pl.BlockSpec((hf, C), lambda b: (0, 0)),                    # w_out
        ],
        out_specs=pl.BlockSpec((None, HW, C), lambda b: (b, 0, 0)),
        scratch_shapes=[pltpu.VMEM((H + 2, W + 2, 2 * hf), jnp.float32)],
        compiler_params=pltpu.CompilerParams(dimension_semantics=("parallel",)),
    )(x, so, params['w_in'], params['w_dw'], params['w_out'])


# ----------------------------------------------------------------------------
# Full block
# ----------------------------------------------------------------------------
def transformer_block(x_nchw, params, num_heads=4):
    x = jnp.transpose(x_nchw, (0, 2, 3, 1)).astype(jnp.float32)   # NCHW -> NHWC
    B, H, W, C = x.shape
    HW = H * W
    x = x.reshape(B, HW, C)

    so1 = bn_scale_offset(x.reshape(B * HW, C), params['bn1_gamma'], params['bn1_beta'])
    x = attn_branch(x, so1, params, num_heads, H, W)              # includes +residual

    so2 = bn_scale_offset(x.reshape(B * HW, C), params['bn2_gamma'], params['bn2_beta'])
    x = ffn_branch(x, so2, params, H, W)                          # includes +residual

    return jnp.transpose(x.reshape(B, H, W, C), (0, 3, 1, 2))     # NHWC -> NCHW


# ----------------------------------------------------------------------------
# Pure-JAX reference (for correctness check)
# ----------------------------------------------------------------------------
def _ref_bn(x, gamma, beta, eps=1e-5):
    mean = x.mean(axis=(0, 1, 2), keepdims=True)
    var = ((x - mean) ** 2).mean(axis=(0, 1, 2), keepdims=True)
    return (x - mean) / jnp.sqrt(var + eps) * gamma + beta


def _ref_conv1x1(x, w):
    return jnp.einsum('bhwc,cd->bhwd', x, w)


def _ref_dwconv(x, w):
    xp = jnp.pad(x, ((0, 0), (1, 1), (1, 1), (0, 0)))
    H, W = x.shape[1], x.shape[2]
    out = jnp.zeros_like(x)
    for di in range(3):
        for dj in range(3):
            out = out + xp[:, di:di + H, dj:dj + W, :] * w[di, dj, :]
    return out


def _ref_attn(x, p, num_heads):
    B, H, W, C = x.shape
    cph = C // num_heads
    HW = H * W
    qkv = _ref_dwconv(_ref_conv1x1(x, p['w_qkv']), p['w_qkv_dw'])
    q, k, v = jnp.split(qkv, 3, axis=-1)

    def heads(t):
        return jnp.transpose(t.reshape(B, H, W, num_heads, cph),
                             (0, 3, 4, 1, 2)).reshape(B, num_heads, cph, HW)

    q, k, v = heads(q), heads(k), heads(v)
    qn = q / jnp.maximum(jnp.linalg.norm(q, axis=-1, keepdims=True), 1e-12)
    kn = k / jnp.maximum(jnp.linalg.norm(k, axis=-1, keepdims=True), 1e-12)
    attn = jnp.einsum('bhcx,bhdx->bhcd', qn, kn) * p['temperature'][None, :, None, None]
    attn = jax.nn.softmax(attn, axis=-1)
    o = jnp.einsum('bhcd,bhdx->bhcx', attn, v)
    o = jnp.transpose(o.reshape(B, num_heads, cph, H, W),
                      (0, 3, 4, 1, 2)).reshape(B, H, W, C)
    return _ref_conv1x1(o, p['w_proj'])


def _ref_ffn(x, p):
    hf = p['w_out'].shape[0]
    x = _ref_dwconv(_ref_conv1x1(x, p['w_in']), p['w_dw'])
    x1, x2 = x[..., :hf], x[..., hf:]
    return _ref_conv1x1(jax.nn.gelu(x1, approximate=False) * x2, p['w_out'])


def _ref_block(x_nchw, p, num_heads):
    x = jnp.transpose(x_nchw, (0, 2, 3, 1)).astype(jnp.float32)
    x = x + _ref_attn(_ref_bn(x, p['bn1_gamma'], p['bn1_beta']), p, num_heads)
    x = x + _ref_ffn(_ref_bn(x, p['bn2_gamma'], p['bn2_beta']), p)
    return jnp.transpose(x, (0, 3, 1, 2))


# ----------------------------------------------------------------------------
if __name__ == "__main__":
    key = jax.random.PRNGKey(0)
    B, dim, H, W = 2, 16, 16, 16
    num_heads = 4
    hf = int(dim * 2.66)  # 42 hidden features

    keys = jax.random.split(key, 12)

    def w(k, shape, scale=0.1):
        return (scale * jax.random.normal(k, shape)).astype(jnp.float32)

    params = {
        'bn1_gamma': (1.0 + w(keys[0], (dim,))).astype(jnp.float32),
        'bn1_beta': w(keys[1], (dim,)),
        'temperature': (1.0 + w(keys[2], (num_heads,))).astype(jnp.float32),
        'w_qkv': w(keys[3], (dim, 3 * dim)),          # Conv2d(dim, 3*dim, 1), (Cin, Cout)
        'w_qkv_dw': w(keys[4], (3, 3, 3 * dim)),      # depthwise 3x3, groups=3*dim
        'w_proj': w(keys[5], (dim, dim)),             # Conv2d(dim, dim, 1)
        'bn2_gamma': (1.0 + w(keys[6], (dim,))).astype(jnp.float32),
        'bn2_beta': w(keys[7], (dim,)),
        'w_in': w(keys[8], (dim, 2 * hf)),            # Conv2d(dim, 2*hf, 1)
        'w_dw': w(keys[9], (3, 3, 2 * hf)),           # depthwise 3x3, groups=2*hf
        'w_out': w(keys[10], (hf, dim)),              # Conv2d(hf, dim, 1)
    }

    x = jax.random.normal(keys[11], (B, dim, H, W), dtype=jnp.float32)

    block_fn = jax.jit(functools.partial(transformer_block, num_heads=num_heads))
    out = jax.block_until_ready(block_fn(x, params))
    ref = jax.block_until_ready(_ref_block(x, params, num_heads))

    np.testing.assert_allclose(np.asarray(out), np.asarray(ref), rtol=5e-3, atol=5e-3)
    assert out.shape == (B, dim, H, W)
    print("KERNEL_OK")
</pallas_src>

<mosaic_0001>
module attributes {stable_mosaic.version = 11 : i64} {
  func.func @_bn_stats_kernel(%arg0: i32, %arg1: memref<512x16xf32, #tpu.memory_space<vmem>>, %arg2: memref<1x16xf32, #tpu.memory_space<vmem>>, %arg3: memref<1x16xf32, #tpu.memory_space<vmem>>, %arg4: memref<2x16xf32, #tpu.memory_space<vmem>>) attributes {dimension_semantics = [#tpu.dimension_semantics<arbitrary>], iteration_bounds = array<i64: 1>, scalar_prefetch = 0 : i64, scratch_operands = 0 : i64, tpu.core_type = #tpu.core_type<tc>, window_params = [{pipeline_mode = #tpu.pipeline_mode<synchronous>, transform_indices = @transform_0, window_bounds = array<i64: 512, 16>}, {pipeline_mode = #tpu.pipeline_mode<synchronous>, transform_indices = @transform_1, window_bounds = array<i64: 1, 16>}, {pipeline_mode = #tpu.pipeline_mode<synchronous>, transform_indices = @transform_2, window_bounds = array<i64: 1, 16>}, {pipeline_mode = #tpu.pipeline_mode<synchronous>, transform_indices = @transform_3, window_bounds = array<i64: 2, 16>}]} {
    %c0 = arith.constant 0 : index
    %c0_0 = arith.constant 0 : index
    %0 = vector.load %arg1[%c0, %c0_0] : memref<512x16xf32, #tpu.memory_space<vmem>>, vector<512x16xf32>
    %cst = arith.constant dense<0.000000e+00> : vector<16xf32>
    %1 = vector.multi_reduction <add>, %0, %cst [0] : vector<512x16xf32> to vector<16xf32>
    %2 = vector.shape_cast %1 : vector<16xf32> to vector<1x16xf32>
    %cst_1 = arith.constant 5.120000e+02 : f32
    %3 = vector.broadcast %cst_1 : f32 to vector<1x16xf32>
    %4 = arith.divf %2, %3 : vector<1x16xf32>
    %5 = vector.broadcast %4 : vector<1x16xf32> to vector<512x16xf32>
    %6 = arith.subf %0, %5 : vector<512x16xf32>
    %7 = arith.mulf %6, %6 : vector<512x16xf32>
    %cst_2 = arith.constant dense<0.000000e+00> : vector<16xf32>
    %8 = vector.multi_reduction <add>, %7, %cst_2 [0] : vector<512x16xf32> to vector<16xf32>
    %9 = vector.shape_cast %8 : vector<16xf32> to vector<1x16xf32>
    %cst_3 = arith.constant 5.120000e+02 : f32
    %10 = vector.broadcast %cst_3 : f32 to vector<1x16xf32>
    %11 = arith.divf %9, %10 : vector<1x16xf32>
    %c0_4 = arith.constant 0 : index
    %c0_5 = arith.constant 0 : index
    %12 = vector.load %arg2[%c0_4, %c0_5] : memref<1x16xf32, #tpu.memory_space<vmem>>, vector<1x16xf32>
    %cst_6 = arith.constant 9.99999974E-6 : f32
    %13 = vector.broadcast %cst_6 : f32 to vector<1x16xf32>
    %14 = arith.addf %11, %13 : vector<1x16xf32>
    %15 = math.rsqrt %14 : vector<1x16xf32>
    %16 = arith.mulf %12, %15 : vector<1x16xf32>
    %c0_7 = arith.constant 0 : index
    %c0_8 = arith.constant 0 : index
    %17 = vector.load %arg4[%c0_7, %c0_8] : memref<2x16xf32, #tpu.memory_space<vmem>>, vector<1x16xf32>
    tpu.vector_store %arg4[%c0_7, %c0_8], %16 {strides = array<i32>} : memref<2x16xf32, #tpu.memory_space<vmem>>, vector<1x16xf32>,
    %c0_9 = arith.constant 0 : index
    %c0_10 = arith.constant 0 : index
    %18 = vector.load %arg3[%c0_9, %c0_10] : memref<1x16xf32, #tpu.memory_space<vmem>>, vector<1x16xf32>
    %19 = arith.mulf %4, %16 : vector<1x16xf32>
    %20 = arith.subf %18, %19 : vector<1x16xf32>
    %c1 = arith.constant 1 : index
    %c0_11 = arith.constant 0 : index
    %21 = vector.load %arg4[%c1, %c0_11] : memref<2x16xf32, #tpu.memory_space<vmem>>, vector<1x16xf32>
    tpu.vector_store %arg4[%c1, %c0_11], %20 {strides = array<i32>} : memref<2x16xf32, #tpu.memory_space<vmem>>, vector<1x16xf32>,
    return
  }
  func.func @transform_0(%arg0: i32) -> (i32, i32) {
    %c0_i32 = arith.constant 0 : i32
    %c0_i32_0 = arith.constant 0 : i32
    %c0_i32_1 = arith.constant 0 : i32
    return %c0_i32, %c0_i32_0 : i32, i32
  }
  func.func @transform_1(%arg0: i32) -> (i32, i32) {
    %c0_i32 = arith.constant 0 : i32
    %c0_i32_0 = arith.constant 0 : i32
    %c0_i32_1 = arith.constant 0 : i32
    return %c0_i32, %c0_i32_0 : i32, i32
  }
  func.func @transform_2(%arg0: i32) -> (i32, i32) {
    %c0_i32 = arith.constant 0 : i32
    %c0_i32_0 = arith.constant 0 : i32
    %c0_i32_1 = arith.constant 0 : i32
    return %c0_i32, %c0_i32_0 : i32, i32
  }
  func.func @transform_3(%arg0: i32) -> (i32, i32) {
    %c0_i32 = arith.constant 0 : i32
    %c0_i32_0 = arith.constant 0 : i32
    %c0_i32_1 = arith.constant 0 : i32
    return %c0_i32, %c0_i32_0 : i32, i32
  }
}

module attributes {stable_mosaic.version = 11 : i64} {
  func.func @kernel(%arg0: i32, %arg1: memref<1x256x16xf32, #tpu.memory_space<vmem>>, %arg2: memref<2x16xf32, #tpu.memory_space<vmem>>, %arg3: memref<16x48xf32, #tpu.memory_space<vmem>>, %arg4: memref<3x3x48xf32, #tpu.memory_space<vmem>>, %arg5: memref<16x16xf32, #tpu.memory_space<vmem>>, %arg6: memref<4xf32, #tpu.memory_space<smem>>, %arg7: memref<1x256x16xf32, #tpu.memory_space<vmem>>, %arg8: memref<18x18x48xf32, #tpu.memory_space<vmem>>) attributes {dimension_semantics = [#tpu.dimension_semantics<parallel>], iteration_bounds = array<i64: 2>, scalar_prefetch = 0 : i64, scratch_operands = 1 : i64, tpu.core_type = #tpu.core_type<tc>, window_params = [{transform_indices = @transform_0, window_bounds = array<i64: 1, 256, 16>}, {pipeline_mode = #tpu.pipeline_mode<synchronous>, transform_indices = @transform_1, window_bounds = array<i64: 2, 16>}, {pipeline_mode = #tpu.pipeline_mode<synchronous>, transform_indices = @transform_2, window_bounds = array<i64: 16, 48>}, {pipeline_mode = #tpu.pipeline_mode<synchronous>, transform_indices = @transform_3, window_bounds = array<i64: 3, 3, 48>}, {pipeline_mode = #tpu.pipeline_mode<synchronous>, transform_indices = @transform_4, window_bounds = array<i64: 16, 16>}, {transform_indices = @transform_5, window_bounds = array<i64: 4>}, {transform_indices = @transform_6, window_bounds = array<i64: 1, 256, 16>}]} {
    %c0 = arith.constant 0 : index
    %c0_0 = arith.constant 0 : index
    %c0_1 = arith.constant 0 : index
    %0 = vector.load %arg1[%c0, %c0_0, %c0_1] : memref<1x256x16xf32, #tpu.memory_space<vmem>>, vector<1x256x16xf32>
    %1 = vector.shape_cast %0 : vector<1x256x16xf32> to vector<256x16xf32>
    %c0_2 = arith.constant 0 : index
    %c0_3 = arith.constant 0 : index
    %2 = vector.load %arg2[%c0_2, %c0_3] : memref<2x16xf32, #tpu.memory_space<vmem>>, vector<1x16xf32>
    %c1 = arith.constant 1 : index
    %c0_4 = arith.constant 0 : index
    %3 = vector.load %arg2[%c1, %c0_4] : memref<2x16xf32, #tpu.memory_space<vmem>>, vector<1x16xf32>
    %4 = vector.broadcast %2 : vector<1x16xf32> to vector<256x16xf32>
    %5 = arith.mulf %1, %4 : vector<256x16xf32>
    %6 = vector.broadcast %3 : vector<1x16xf32> to vector<256x16xf32>
    %7 = arith.addf %5, %6 : vector<256x16xf32>
    %c0_5 = arith.constant 0 : index
    %c0_6 = arith.constant 0 : index
    %8 = vector.load %arg3[%c0_5, %c0_6] : memref<16x48xf32, #tpu.memory_space<vmem>>, vector<16x48xf32>
    %cst = arith.constant dense<0.000000e+00> : vector<256x48xf32>
    %9 = tpu.matmul %7, %8, %cst {dimension_numbers = #tpu.dot_dimension_numbers<[1], [0], [0], [1], [0, 0, 1, 1], [], []>} : vector<256x16xf32>, vector<16x48xf32>, vector<256x48xf32> -> vector<256x48xf32>
    %cst_7 = arith.constant 0.000000e+00 : f32
    %10 = vector.broadcast %cst_7 : f32 to vector<18x18x48xf32>
    %c0_8 = arith.constant 0 : index
    %c0_9 = arith.constant 0 : index
    %c0_10 = arith.constant 0 : index
    %11 = vector.load %arg8[%c0_8, %c0_9, %c0_10] : memref<18x18x48xf32, #tpu.memory_space<vmem>>, vector<18x18x48xf32>
    tpu.vector_store %arg8[%c0_8, %c0_9, %c0_10], %10 {strides = array<i32>} : memref<18x18x48xf32, #tpu.memory_space<vmem>>, vector<18x18x48xf32>,
    %12 = vector.shape_cast %9 : vector<256x48xf32> to vector<16x16x48xf32>
    %c1_11 = arith.constant 1 : index
    %c1_12 = arith.constant 1 : index
    %c0_13 = arith.constant 0 : index
    %13 = vector.load %arg8[%c1_11, %c1_12, %c0_13] : memref<18x18x48xf32, #tpu.memory_space<vmem>>, vector<16x16x48xf32>
    tpu.vector_store %arg8[%c1_11, %c1_12, %c0_13], %12 {strides = array<i32>} : memref<18x18x48xf32, #tpu.memory_space<vmem>>, vector<16x16x48xf32>,
    %cst_14 = arith.constant 0.000000e+00 : f32
    %14 = vector.broadcast %cst_14 : f32 to vector<16x16x48xf32>
    %c0_15 = arith.constant 0 : index
    %c0_16 = arith.constant 0 : index
    %c0_17 = arith.constant 0 : index
    %15 = vector.load %arg4[%c0_15, %c0_16, %c0_17] : memref<3x3x48xf32, #tpu.memory_space<vmem>>, vector<1x1x48xf32>
    %16 = vector.shape_cast %15 : vector<1x1x48xf32> to vector<1x48xf32>
    %17 = vector.shape_cast %16 : vector<1x48xf32> to vector<1x1x48xf32>
    %c0_18 = arith.constant 0 : index
    %c0_19 = arith.constant 0 : index
    %c0_20 = arith.constant 0 : index
    %18 = vector.load %arg8[%c0_18, %c0_19, %c0_20] : memref<18x18x48xf32, #tpu.memory_space<vmem>>, vector<16x16x48xf32>
    %19 = vector.broadcast %17 : vector<1x1x48xf32> to vector<16x16x48xf32>
    %20 = arith.mulf %18, %19 : vector<16x16x48xf32>
    %21 = arith.addf %14, %20 : vector<16x16x48xf32>
    %c0_21 = arith.constant 0 : index
    %c1_22 = arith.constant 1 : index
    %c0_23 = arith.constant 0 : index
    %22 = vector.load %arg4[%c0_21, %c1_22, %c0_23] : memref<3x3x48xf32, #tpu.memory_space<vmem>>, vector<1x1x48xf32>
    %23 = vector.shape_cast %22 : vector<1x1x48xf32> to vector<1x48xf32>
    %24 = vector.shape_cast %23 : vector<1x48xf32> to vector<1x1x48xf32>
    %c0_24 = arith.constant 0 : index
    %c1_25 = arith.constant 1 : index
    %c0_26 = arith.constant 0 : index
    %25 = vector.load %arg8[%c0_24, %c1_25, %c0_26] : memref<18x18x48xf32, #tpu.memory_space<vmem>>, vector<16x16x48xf32>
    %26 = vector.broadcast %24 : vector<1x1x48xf32> to vector<16x16x48xf32>
    %27 = arith.mulf %25, %26 : vector<16x16x48xf32>
    %28 = arith.addf %21, %27 : vector<16x16x48xf32>
    %c0_27 = arith.constant 0 : index
    %c2 = arith.constant 2 : index
    %c0_28 = arith.constant 0 : index
    %29 = vector.load %arg4[%c0_27, %c2, %c0_28] : memref<3x3x48xf32, #tpu.memory_space<vmem>>, vector<1x1x48xf32>
    %30 = vector.shape_cast %29 : vector<1x1x48xf32> to vector<1x48xf32>
    %31 = vector.shape_cast %30 : vector<1x48xf32> to vector<1x1x48xf32>
    %c0_29 = arith.constant 0 : index
    %c2_30 = arith.constant 2 : index
    %c0_31 = arith.constant 0 : index
    %32 = vector.load %arg8[%c0_29, %c2_30, %c0_31] : memref<18x18x48xf32, #tpu.memory_space<vmem>>, vector<16x16x48xf32>
    %33 = vector.broadcast %31 : vector<1x1x48xf32> to vector<16x16x48xf32>
    %34 = arith.mulf %32, %33 : vector<16x16x48xf32>
    %35 = arith.addf %28, %34 : vector<16x16x48xf32>
    %c1_32 = arith.constant 1 : index
    %c0_33 = arith.constant 0 : index
    %c0_34 = arith.constant 0 : index
    %36 = vector.load %arg4[%c1_32, %c0_33, %c0_34] : memref<3x3x48xf32, #tpu.memory_space<vmem>>, vector<1x1x48xf32>
    %37 = vector.shape_cast %36 : vector<1x1x48xf32> to vector<1x48xf32>
    %38 = vector.shape_cast %37 : vector<1x48xf32> to vector<1x1x48xf32>
    %c1_35 = arith.constant 1 : index
    %c0_36 = arith.constant 0 : index
    %c0_37 = arith.constant 0 : index
    %39 = vector.load %arg8[%c1_35, %c0_36, %c0_37] : memref<18x18x48xf32, #tpu.memory_space<vmem>>, vector<16x16x48xf32>
    %40 = vector.broadcast %38 : vector<1x1x48xf32> to vector<16x16x48xf32>
    %41 = arith.mulf %39, %40 : vector<16x16x48xf32>
    %42 = arith.addf %35, %41 : vector<16x16x48xf32>
    %c1_38 = arith.constant 1 : index
    %c1_39 = arith.constant 1 : index
    %c0_40 = arith.constant 0 : index
    %43 = vector.load %arg4[%c1_38, %c1_39, %c0_40] : memref<3x3x48xf32, #tpu.memory_space<vmem>>, vector<1x1x48xf32>
    %44 = vector.shape_cast %43 : vector<1x1x48xf32> to vector<1x48xf32>
    %45 = vector.shape_cast %44 : vector<1x48xf32> to vector<1x1x48xf32>
    %c1_41 = arith.constant 1 : index
    %c1_42 = arith.constant 1 : index
    %c0_43 = arith.constant 0 : index
    %46 = vector.load %arg8[%c1_41, %c1_42, %c0_43] : memref<18x18x48xf32, #tpu.memory_space<vmem>>, vector<16x16x48xf32>
    %47 = vector.broadcast %45 : vector<1x1x48xf32> to vector<16x16x48xf32>
    %48 = arith.mulf %46, %47 : vector<16x16x48xf32>
    %49 = arith.addf %42, %48 : vector<16x16x48xf32>
    %c1_44 = arith.constant 1 : index
    %c2_45 = arith.constant 2 : index
    %c0_46 = arith.constant 0 : index
    %50 = vector.load %arg4[%c1_44, %c2_45, %c0_46] : memref<3x3x48xf32, #tpu.memory_space<vmem>>, vector<1x1x48xf32>
    %51 = vector.shape_cast %50 : vector<1x1x48xf32> to vector<1x48xf32>
    %52 = vector.shape_cast %51 : vector<1x48xf32> to vector<1x1x48xf32>
    %c1_47 = arith.constant 1 : index
    %c2_48 = arith.constant 2 : index
    %c0_49 = arith.constant 0 : index
    %53 = vector.load %arg8[%c1_47, %c2_48, %c0_49] : memref<18x18x48xf32, #tpu.memory_space<vmem>>, vector<16x16x48xf32>
    %54 = vector.broadcast %52 : vector<1x1x48xf32> to vector<16x16x48xf32>
    %55 = arith.mulf %53, %54 : vector<16x16x48xf32>
    %56 = arith.addf %49, %55 : vector<16x16x48xf32>
    %c2_50 = arith.constant 2 : index
    %c0_51 = arith.constant 0 : index
    %c0_52 = arith.constant 0 : index
    %57 = vector.load %arg4[%c2_50, %c0_51, %c0_52] : memref<3x3x48xf32, #tpu.memory_space<vmem>>, vector<1x1x48xf32>
    %58 = vector.shape_cast %57 : vector<1x1x48xf32> to vector<1x48xf32>
    %59 = vector.shape_cast %58 : vector<1x48xf32> to vector<1x1x48xf32>
    %c2_53 = arith.constant 2 : index
    %c0_54 = arith.constant 0 : index
    %c0_55 = arith.constant 0 : index
    %60 = vector.load %arg8[%c2_53, %c0_54, %c0_55] : memref<18x18x48xf32, #tpu.memory_space<vmem>>, vector<16x16x48xf32>
    %61 = vector.broadcast %59 : vector<1x1x48xf32> to vector<16x16x48xf32>
    %62 = arith.mulf %60, %61 : vector<16x16x48xf32>
    %63 = arith.addf %56, %62 : vector<16x16x48xf32>
    %c2_56 = arith.constant 2 : index
    %c1_57 = arith.constant 1 : index
    %c0_58 = arith.constant 0 : index
    %64 = vector.load %arg4[%c2_56, %c1_57, %c0_58] : memref<3x3x48xf32, #tpu.memory_space<vmem>>, vector<1x1x48xf32>
    %65 = vector.shape_cast %64 : vector<1x1x48xf32> to vector<1x48xf32>
    %66 = vector.shape_cast %65 : vector<1x48xf32> to vector<1x1x48xf32>
    %c2_59 = arith.constant 2 : index
    %c1_60 = arith.constant 1 : index
    %c0_61 = arith.constant 0 : index
    %67 = vector.load %arg8[%c2_59, %c1_60, %c0_61] : memref<18x18x48xf32, #tpu.memory_space<vmem>>, vector<16x16x48xf32>
    %68 = vector.broadcast %66 : vector<1x1x48xf32> to vector<16x16x48xf32>
    %69 = arith.mulf %67, %68 : vector<16x16x48xf32>
    %70 = arith.addf %63, %69 : vector<16x16x48xf32>
    %c2_62 = arith.constant 2 : index
    %c2_63 = arith.constant 2 : index
    %c0_64 = arith.constant 0 : index
    %71 = vector.load %arg4[%c2_62, %c2_63, %c0_64] : memref<3x3x48xf32, #tpu.memory_space<vmem>>, vector<1x1x48xf32>
    %72 = vector.shape_cast %71 : vector<1x1x48xf32> to vector<1x48xf32>
    %73 = vector.shape_cast %72 : vector<1x48xf32> to vector<1x1x48xf32>
    %c2_65 = arith.constant 2 : index
    %c2_66 = arith.constant 2 : index
    %c0_67 = arith.constant 0 : index
    %74 = vector.load %arg8[%c2_65, %c2_66, %c0_67] : memref<18x18x48xf32, #tpu.memory_space<vmem>>, vector<16x16x48xf32>
    %75 = vector.broadcast %73 : vector<1x1x48xf32> to vector<16x16x48xf32>
    %76 = arith.mulf %74, %75 : vector<16x16x48xf32>
    %77 = arith.addf %70, %76 : vector<16x16x48xf32>
    %78 = vector.shape_cast %77 : vector<16x16x48xf32> to vector<256x48xf32>
    %c0_68 = arith.constant 0 : index
    %c0_69 = arith.constant 0 : index
    %79 = vector.load %arg5[%c0_68, %c0_69] : memref<16x16xf32, #tpu.memory_space<vmem>>, vector<16x16xf32>
    %80 = vector.extract_strided_slice %78 {offsets = [0, 0], sizes = [256, 4], strides = [1, 1]} : vector<256x48xf32> to vector<256x4xf32>
    %81 = vector.extract_strided_slice %78 {offsets = [0, 16], sizes = [256, 4], strides = [1, 1]} : vector<256x48xf32> to vector<256x4xf32>
    %82 = vector.extract_strided_slice %78 {offsets = [0, 32], sizes = [256, 4], strides = [1, 1]} : vector<256x48xf32> to vector<256x4xf32>
    %83 = arith.mulf %80, %80 : vector<256x4xf32>
    %cst_70 = arith.constant dense<0.000000e+00> : vector<4xf32>
    %84 = vector.multi_reduction <add>, %83, %cst_70 [0] : vector<256x4xf32> to vector<4xf32>
    %85 = vector.shape_cast %84 : vector<4xf32> to vector<1x4xf32>
    %cst_71 = arith.constant 1.000000e-24 : f32
    %86 = vector.broadcast %cst_71 : f32 to vector<1x4xf32>
    %87 = arith.maximumf %85, %86 : vector<1x4xf32>
    %88 = math.rsqrt %87 : vector<1x4xf32>
    %89 = vector.broadcast %88 : vector<1x4xf32> to vector<256x4xf32>
    %90 = arith.mulf %80, %89 : vector<256x4xf32>
    %91 = arith.mulf %81, %81 : vector<256x4xf32>
    %cst_72 = arith.constant dense<0.000000e+00> : vector<4xf32>
    %92 = vector.multi_reduction <add>, %91, %cst_72 [0] : vector<256x4xf32> to vector<4xf32>
    %93 = vector.shape_cast %92 : vector<4xf32> to vector<1x4xf32>
    %cst_73 = arith.constant 1.000000e-24 : f32
    %94 = vector.broadcast %cst_73 : f32 to vector<1x4xf32>
    %95 = arith.maximumf %93, %94 : vector<1x4xf32>
    %96 = math.rsqrt %95 : vector<1x4xf32>
    %97 = vector.broadcast %96 : vector<1x4xf32> to vector<256x4xf32>
    %98 = arith.mulf %81, %97 : vector<256x4xf32>
    %cst_74 = arith.constant dense<0.000000e+00> : vector<4x4xf32>
    %99 = tpu.matmul %90, %98, %cst_74 {dimension_numbers = #tpu.dot_dimension_numbers<[0], [0], [1], [1], [0, 1, 1, 1], [], []>} : vector<256x4xf32>, vector<256x4xf32>, vector<4x4xf32> -> vector<4x4xf32>
    %c0_75 = arith.constant 0 : index
    %100 = memref.load %arg6[%c0_75] : memref<4xf32, #tpu.memory_space<smem>>
    %101 = vector.broadcast %100 : f32 to vector<4x4xf32>
    %102 = arith.mulf %99, %101 : vector<4x4xf32>
    %cst_76 = arith.constant dense<0xFF800000> : vector<4xf32>
    %103 = vector.multi_reduction <maximumf>, %102, %cst_76 [1] : vector<4x4xf32> to vector<4xf32>
    %104 = vector.shape_cast %103 : vector<4xf32> to vector<4x1xf32>
    %105 = vector.broadcast %104 : vector<4x1xf32> to vector<4x4xf32>
    %106 = arith.subf %102, %105 : vector<4x4xf32>
    %107 = math.exp %106 : vector<4x4xf32>
    %cst_77 = arith.constant dense<0.000000e+00> : vector<4xf32>
    %108 = vector.multi_reduction <add>, %107, %cst_77 [1] : vector<4x4xf32> to vector<4xf32>
    %109 = vector.shape_cast %108 : vector<4xf32> to vector<4x1xf32>
    %110 = tpu.reciprocal %109 : vector<4x1xf32> -> vector<4x1xf32>
    %111 = vector.broadcast %110 : vector<4x1xf32> to vector<4x4xf32>
    %112 = arith.mulf %107, %111 : vector<4x4xf32>
    %cst_78 = arith.constant dense<0.000000e+00> : vector<256x4xf32>
    %113 = tpu.matmul %82, %112, %cst_78 {dimension_numbers = #tpu.dot_dimension_numbers<[1], [1], [0], [0], [0, 0, 1, 0], [], []>} : vector<256x4xf32>, vector<4x4xf32>, vector<256x4xf32> -> vector<256x4xf32>
    %114 = vector.extract_strided_slice %79 {offsets = [0, 0], sizes = [4, 16], strides = [1, 1]} : vector<16x16xf32> to vector<4x16xf32>
    %cst_79 = arith.constant dense<0.000000e+00> : vector<256x16xf32>
    %115 = tpu.matmul %113, %114, %cst_79 {dimension_numbers = #tpu.dot_dimension_numbers<[1], [0], [0], [1], [0, 0, 1, 1], [], []>} : vector<256x4xf32>, vector<4x16xf32>, vector<256x16xf32> -> vector<256x16xf32>
    %116 = arith.addf %1, %115 : vector<256x16xf32>
    %117 = vector.extract_strided_slice %78 {offsets = [0, 4], sizes = [256, 4], strides = [1, 1]} : vector<256x48xf32> to vector<256x4xf32>
    %118 = vector.extract_strided_slice %78 {offsets = [0, 20], sizes = [256, 4], strides = [1, 1]} : vector<256x48xf32> to vector<256x4xf32>
    %119 = vector.extract_strided_slice %78 {offsets = [0, 36], sizes = [256, 4], strides = [1, 1]} : vector<256x48xf32> to vector<256x4xf32>
    %120 = arith.mulf %117, %117 : vector<256x4xf32>
    %cst_80 = arith.constant dense<0.000000e+00> : vector<4xf32>
    %121 = vector.multi_reduction <add>, %120, %cst_80 [0] : vector<256x4xf32> to vector<4xf32>
    %122 = vector.shape_cast %121 : vector<4xf32> to vector<1x4xf32>
    %cst_81 = arith.constant 1.000000e-24 : f32
    %123 = vector.broadcast %cst_81 : f32 to vector<1x4xf32>
    %124 = arith.maximumf %122, %123 : vector<1x4xf32>
    %125 = math.rsqrt %124 : vector<1x4xf32>
    %126 = vector.broadcast %125 : vector<1x4xf32> to vector<256x4xf32>
    %127 = arith.mulf %117, %126 : vector<256x4xf32>
    %128 = arith.mulf %118, %118 : vector<256x4xf32>
    %cst_82 = arith.constant dense<0.000000e+00> : vector<4xf32>
    %129 = vector.multi_reduction <add>, %128, %cst_82 [0] : vector<256x4xf32> to vector<4xf32>
    %130 = vector.shape_cast %129 : vector<4xf32> to vector<1x4xf32>
    %cst_83 = arith.constant 1.000000e-24 : f32
    %131 = vector.broadcast %cst_83 : f32 to vector<1x4xf32>
    %132 = arith.maximumf %130, %131 : vector<1x4xf32>
    %133 = math.rsqrt %132 : vector<1x4xf32>
    %134 = vector.broadcast %133 : vector<1x4xf32> to vector<256x4xf32>
    %135 = arith.mulf %118, %134 : vector<256x4xf32>
    %cst_84 = arith.constant dense<0.000000e+00> : vector<4x4xf32>
    %136 = tpu.matmul %127, %135, %cst_84 {dimension_numbers = #tpu.dot_dimension_numbers<[0], [0], [1], [1], [0, 1, 1, 1], [], []>} : vector<256x4xf32>, vector<256x4xf32>, vector<4x4xf32> -> vector<4x4xf32>
    %c1_85 = arith.constant 1 : index
    %137 = memref.load %arg6[%c1_85] : memref<4xf32, #tpu.memory_space<smem>>
    %138 = vector.broadcast %137 : f32 to vector<4x4xf32>
    %139 = arith.mulf %136, %138 : vector<4x4xf32>
    %cst_86 = arith.constant dense<0xFF800000> : vector<4xf32>
    %140 = vector.multi_reduction <maximumf>, %139, %cst_86 [1] : vector<4x4xf32> to vector<4xf32>
    %141 = vector.shape_cast %140 : vector<4xf32> to vector<4x1xf32>
    %142 = vector.broadcast %141 : vector<4x1xf32> to vector<4x4xf32>
    %143 = arith.subf %139, %142 : vector<4x4xf32>
    %144 = math.exp %143 : vector<4x4xf32>
    %cst_87 = arith.constant dense<0.000000e+00> : vector<4xf32>
    %145 = vector.multi_reduction <add>, %144, %cst_87 [1] : vector<4x4xf32> to vector<4xf32>
    %146 = vector.shape_cast %145 : vector<4xf32> to vector<4x1xf32>
    %147 = tpu.reciprocal %146 : vector<4x1xf32> -> vector<4x1xf32>
    %148 = vector.broadcast %147 : vector<4x1xf32> to vector<4x4xf32>
    %149 = arith.mulf %144, %148 : vector<4x4xf32>
    %cst_88 = arith.constant dense<0.000000e+00> : vector<256x4xf32>
    %150 = tpu.matmul %119, %149, %cst_88 {dimension_numbers = #tpu.dot_dimension_numbers<[1], [1], [0], [0], [0, 0, 1, 0], [], []>} : vector<256x4xf32>, vector<4x4xf32>, vector<256x4xf32> -> vector<256x4xf32>
    %151 = vector.extract_strided_slice %79 {offsets = [4, 0], sizes = [4, 16], strides = [1, 1]} : vector<16x16xf32> to vector<4x16xf32>
    %cst_89 = arith.constant dense<0.000000e+00> : vector<256x16xf32>
    %152 = tpu.matmul %150, %151, %cst_89 {dimension_numbers = #tpu.dot_dimension_numbers<[1], [0], [0], [1], [0, 0, 1, 1], [], []>} : vector<256x4xf32>, vector<4x16xf32>, vector<256x16xf32> -> vector<256x16xf32>
    %153 = arith.addf %116, %152 : vector<256x16xf32>
    %154 = vector.extract_strided_slice %78 {offsets = [0, 8], sizes = [256, 4], strides = [1, 1]} : vector<256x48xf32> to vector<256x4xf32>
    %155 = vector.extract_strided_slice %78 {offsets = [0, 24], sizes = [256, 4], strides = [1, 1]} : vector<256x48xf32> to vector<256x4xf32>
    %156 = vector.extract_strided_slice %78 {offsets = [0, 40], sizes = [256, 4], strides = [1, 1]} : vector<256x48xf32> to vector<256x4xf32>
    %157 = arith.mulf %154, %154 : vector<256x4xf32>
    %cst_90 = arith.constant dense<0.000000e+00> : vector<4xf32>
    %158 = vector.multi_reduction <add>, %157, %cst_90 [0] : vector<256x4xf32> to vector<4xf32>
    %159 = vector.shape_cast %158 : vector<4xf32> to vector<1x4xf32>
    %cst_91 = arith.constant 1.000000e-24 : f32
    %160 = vector.broadcast %cst_91 : f32 to vector<1x4xf32>
    %161 = arith.maximumf %159, %160 : vector<1x4xf32>
    %162 = math.rsqrt %161 : vector<1x4xf32>
    %163 = vector.broadcast %162 : vector<1x4xf32> to vector<256x4xf32>
    %164 = arith.mulf %154, %163 : vector<256x4xf32>
    %165 = arith.mulf %155, %155 : vector<256x4xf32>
    %cst_92 = arith.constant dense<0.000000e+00> : vector<4xf32>
    %166 = vector.multi_reduction <add>, %165, %cst_92 [0] : vector<256x4xf32> to vector<4xf32>
    %167 = vector.shape_cast %166 : vector<4xf32> to vector<1x4xf32>
    %cst_93 = arith.constant 1.000000e-24 : f32
    %168 = vector.broadcast %cst_93 : f32 to vector<1x4xf32>
    %169 = arith.maximumf %167, %168 : vector<1x4xf32>
    %170 = math.rsqrt %169 : vector<1x4xf32>
    %171 = vector.broadcast %170 : vector<1x4xf32> to vector<256x4xf32>
    %172 = arith.mulf %155, %171 : vector<256x4xf32>
    %cst_94 = arith.constant dense<0.000000e+00> : vector<4x4xf32>
    %173 = tpu.matmul %164, %172, %cst_94 {dimension_numbers = #tpu.dot_dimension_numbers<[0], [0], [1], [1], [0, 1, 1, 1], [], []>} : vector<256x4xf32>, vector<256x4xf32>, vector<4x4xf32> -> vector<4x4xf32>
    %c2_95 = arith.constant 2 : index
    %174 = memref.load %arg6[%c2_95] : memref<4xf32, #tpu.memory_space<smem>>
    %175 = vector.broadcast %174 : f32 to vector<4x4xf32>
    %176 = arith.mulf %173, %175 : vector<4x4xf32>
    %cst_96 = arith.constant dense<0xFF800000> : vector<4xf32>
    %177 = vector.multi_reduction <maximumf>, %176, %cst_96 [1] : vector<4x4xf32> to vector<4xf32>
    %178 = vector.shape_cast %177 : vector<4xf32> to vector<4x1xf32>
    %179 = vector.broadcast %178 : vector<4x1xf32> to vector<4x4xf32>
    %180 = arith.subf %176, %179 : vector<4x4xf32>
    %181 = math.exp %180 : vector<4x4xf32>
    %cst_97 = arith.constant dense<0.000000e+00> : vector<4xf32>
    %182 = vector.multi_reduction <add>, %181, %cst_97 [1] : vector<4x4xf32> to vector<4xf32>
    %183 = vector.shape_cast %182 : vector<4xf32> to vector<4x1xf32>
    %184 = tpu.reciprocal %183 : vector<4x1xf32> -> vector<4x1xf32>
    %185 = vector.broadcast %184 : vector<4x1xf32> to vector<4x4xf32>
    %186 = arith.mulf %181, %185 : vector<4x4xf32>
    %cst_98 = arith.constant dense<0.000000e+00> : vector<256x4xf32>
    %187 = tpu.matmul %156, %186, %cst_98 {dimension_numbers = #tpu.dot_dimension_numbers<[1], [1], [0], [0], [0, 0, 1, 0], [], []>} : vector<256x4xf32>, vector<4x4xf32>, vector<256x4xf32> -> vector<256x4xf32>
    %188 = vector.extract_strided_slice %79 {offsets = [8, 0], sizes = [4, 16], strides = [1, 1]} : vector<16x16xf32> to vector<4x16xf32>
    %cst_99 = arith.constant dense<0.000000e+00> : vector<256x16xf32>
    %189 = tpu.matmul %187, %188, %cst_99 {dimension_numbers = #tpu.dot_dimension_numbers<[1], [0], [0], [1], [0, 0, 1, 1], [], []>} : vector<256x4xf32>, vector<4x16xf32>, vector<256x16xf32> -> vector<256x16xf32>
    %190 = arith.addf %153, %189 : vector<256x16xf32>
    %191 = vector.extract_strided_slice %78 {offsets = [0, 12], sizes = [256, 4], strides = [1, 1]} : vector<256x48xf32> to vector<256x4xf32>
    %192 = vector.extract_strided_slice %78 {offsets = [0, 28], sizes = [256, 4], strides = [1, 1]} : vector<256x48xf32> to vector<256x4xf32>
    %193 = vector.extract_strided_slice %78 {offsets = [0, 44], sizes = [256, 4], strides = [1, 1]} : vector<256x48xf32> to vector<256x4xf32>
    %194 = arith.mulf %191, %191 : vector<256x4xf32>
    %cst_100 = arith.constant dense<0.000000e+00> : vector<4xf32>
    %195 = vector.multi_reduction <add>, %194, %cst_100 [0] : vector<256x4xf32> to vector<4xf32>
    %196 = vector.shape_cast %195 : vector<4xf32> to vector<1x4xf32>
    %cst_101 = arith.constant 1.000000e-24 : f32
    %197 = vector.broadcast %cst_101 : f32 to vector<1x4xf32>
    %198 = arith.maximumf %196, %197 : vector<1x4xf32>
    %199 = math.rsqrt %198 : vector<1x4xf32>
    %200 = vector.broadcast %199 : vector<1x4xf32> to vector<256x4xf32>
    %201 = arith.mulf %191, %200 : vector<256x4xf32>
    %202 = arith.mulf %192, %192 : vector<256x4xf32>
    %cst_102 = arith.constant dense<0.000000e+00> : vector<4xf32>
    %203 = vector.multi_reduction <add>, %202, %cst_102 [0] : vector<256x4xf32> to vector<4xf32>
    %204 = vector.shape_cast %203 : vector<4xf32> to vector<1x4xf32>
    %cst_103 = arith.constant 1.000000e-24 : f32
    %205 = vector.broadcast %cst_103 : f32 to vector<1x4xf32>
    %206 = arith.maximumf %204, %205 : vector<1x4xf32>
    %207 = math.rsqrt %206 : vector<1x4xf32>
    %208 = vector.broadcast %207 : vector<1x4xf32> to vector<256x4xf32>
    %209 = arith.mulf %192, %208 : vector<256x4xf32>
    %cst_104 = arith.constant dense<0.000000e+00> : vector<4x4xf32>
    %210 = tpu.matmul %201, %209, %cst_104 {dimension_numbers = #tpu.dot_dimension_numbers<[0], [0], [1], [1], [0, 1, 1, 1], [], []>} : vector<256x4xf32>, vector<256x4xf32>, vector<4x4xf32> -> vector<4x4xf32>
    %c3 = arith.constant 3 : index
    %211 = memref.load %arg6[%c3] : memref<4xf32, #tpu.memory_space<smem>>
    %212 = vector.broadcast %211 : f32 to vector<4x4xf32>
    %213 = arith.mulf %210, %212 : vector<4x4xf32>
    %cst_105 = arith.constant dense<0xFF800000> : vector<4xf32>
    %214 = vector.multi_reduction <maximumf>, %213, %cst_105 [1] : vector<4x4xf32> to vector<4xf32>
    %215 = vector.shape_cast %214 : vector<4xf32> to vector<4x1xf32>
    %216 = vector.broadcast %215 : vector<4x1xf32> to vector<4x4xf32>
    %217 = arith.subf %213, %216 : vector<4x4xf32>
    %218 = math.exp %217 : vector<4x4xf32>
    %cst_106 = arith.constant dense<0.000000e+00> : vector<4xf32>
    %219 = vector.multi_reduction <add>, %218, %cst_106 [1] : vector<4x4xf32> to vector<4xf32>
    %220 = vector.shape_cast %219 : vector<4xf32> to vector<4x1xf32>
    %221 = tpu.reciprocal %220 : vector<4x1xf32> -> vector<4x1xf32>
    %222 = vector.broadcast %221 : vector<4x1xf32> to vector<4x4xf32>
    %223 = arith.mulf %218, %222 : vector<4x4xf32>
    %cst_107 = arith.constant dense<0.000000e+00> : vector<256x4xf32>
    %224 = tpu.matmul %193, %223, %cst_107 {dimension_numbers = #tpu.dot_dimension_numbers<[1], [1], [0], [0], [0, 0, 1, 0], [], []>} : vector<256x4xf32>, vector<4x4xf32>, vector<256x4xf32> -> vector<256x4xf32>
    %225 = vector.extract_strided_slice %79 {offsets = [12, 0], sizes = [4, 16], strides = [1, 1]} : vector<16x16xf32> to vector<4x16xf32>
    %cst_108 = arith.constant dense<0.000000e+00> : vector<256x16xf32>
    %226 = tpu.matmul %224, %225, %cst_108 {dimension_numbers = #tpu.dot_dimension_numbers<[1], [0], [0], [1], [0, 0, 1, 1], [], []>} : vector<256x4xf32>, vector<4x16xf32>, vector<256x16xf32> -> vector<256x16xf32>
    %227 = arith.addf %190, %226 : vector<256x16xf32>
    %c0_109 = arith.constant 0 : index
    %c0_110 = arith.constant 0 : index
    %c0_111 = arith.constant 0 : index
    %228 = vector.load %arg7[%c0_109, %c0_110, %c0_111] : memref<1x256x16xf32, #tpu.memory_space<vmem>>, vector<1x256x16xf32>
    %229 = vector.shape_cast %228 : vector<1x256x16xf32> to vector<256x16xf32>
    %230 = vector.shape_cast %227 : vector<256x16xf32> to vector<1x256x16xf32>
    tpu.vector_store %arg7[%c0_109, %c0_110, %c0_111], %230 {strides = array<i32>} : memref<1x256x16xf32, #tpu.memory_space<vmem>>, vector<1x256x16xf32>,
    return
  }
  func.func @transform_0(%arg0: i32) -> (i32, i32, i32) {
    %c0_i32 = arith.constant 0 : i32
    %c0_i32_0 = arith.constant 0 : i32
    %c0_i32_1 = arith.constant 0 : i32
    return %arg0, %c0_i32, %c0_i32_0 : i32, i32, i32
  }
  func.func @transform_1(%arg0: i32) -> (i32, i32) {
    %c0_i32 = arith.constant 0 : i32
    %c0_i32_0 = arith.constant 0 : i32
    %c0_i32_1 = arith.constant 0 : i32
    return %c0_i32, %c0_i32_0 : i32, i32
  }
  func.func @transform_2(%arg0: i32) -> (i32, i32) {
    %c0_i32 = arith.constant 0 : i32
    %c0_i32_0 = arith.constant 0 : i32
    %c0_i32_1 = arith.constant 0 : i32
    return %c0_i32, %c0_i32_0 : i32, i32
  }
  func.func @transform_3(%arg0: i32) -> (i32, i32, i32) {
    %c0_i32 = arith.constant 0 : i32
    %c0_i32_0 = arith.constant 0 : i32
    %c0_i32_1 = arith.constant 0 : i32
    %c0_i32_2 = arith.constant 0 : i32
    return %c0_i32, %c0_i32_0, %c0_i32_1 : i32, i32, i32
  }
  func.func @transform_4(%arg0: i32) -> (i32, i32) {
    %c0_i32 = arith.constant 0 : i32
    %c0_i32_0 = arith.constant 0 : i32
    %c0_i32_1 = arith.constant 0 : i32
    return %c0_i32, %c0_i32_0 : i32, i32
  }
  func.func @transform_5(%arg0: i32) -> i32 {
    %c0_i32 = arith.constant 0 : i32
    %c0_i32_0 = arith.constant 0 : i32
    return %c0_i32 : i32
  }
  func.func @transform_6(%arg0: i32) -> (i32, i32, i32) {
    %c0_i32 = arith.constant 0 : i32
    %c0_i32_0 = arith.constant 0 : i32
    %c0_i32_1 = arith.constant 0 : i32
    return %arg0, %c0_i32, %c0_i32_0 : i32, i32, i32
  }
}

module attributes {stable_mosaic.version = 11 : i64} {
  func.func @kernel(%arg0: i32, %arg1: memref<1x256x16xf32, #tpu.memory_space<vmem>>, %arg2: memref<2x16xf32, #tpu.memory_space<vmem>>, %arg3: memref<16x84xf32, #tpu.memory_space<vmem>>, %arg4: memref<3x3x84xf32, #tpu.memory_space<vmem>>, %arg5: memref<42x16xf32, #tpu.memory_space<vmem>>, %arg6: memref<1x256x16xf32, #tpu.memory_space<vmem>>, %arg7: memref<18x18x84xf32, #tpu.memory_space<vmem>>) attributes {dimension_semantics = [#tpu.dimension_semantics<parallel>], iteration_bounds = array<i64: 2>, scalar_prefetch = 0 : i64, scratch_operands = 1 : i64, tpu.core_type = #tpu.core_type<tc>, window_params = [{transform_indices = @transform_0, window_bounds = array<i64: 1, 256, 16>}, {pipeline_mode = #tpu.pipeline_mode<synchronous>, transform_indices = @transform_1, window_bounds = array<i64: 2, 16>}, {pipeline_mode = #tpu.pipeline_mode<synchronous>, transform_indices = @transform_2, window_bounds = array<i64: 16, 84>}, {pipeline_mode = #tpu.pipeline_mode<synchronous>, transform_indices = @transform_3, window_bounds = array<i64: 3, 3, 84>}, {pipeline_mode = #tpu.pipeline_mode<synchronous>, transform_indices = @transform_4, window_bounds = array<i64: 42, 16>}, {transform_indices = @transform_5, window_bounds = array<i64: 1, 256, 16>}]} {
    %c0 = arith.constant 0 : index
    %c0_0 = arith.constant 0 : index
    %c0_1 = arith.constant 0 : index
    %0 = vector.load %arg1[%c0, %c0_0, %c0_1] : memref<1x256x16xf32, #tpu.memory_space<vmem>>, vector<1x256x16xf32>
    %1 = vector.shape_cast %0 : vector<1x256x16xf32> to vector<256x16xf32>
    %c0_2 = arith.constant 0 : index
    %c0_3 = arith.constant 0 : index
    %2 = vector.load %arg2[%c0_2, %c0_3] : memref<2x16xf32, #tpu.memory_space<vmem>>, vector<1x16xf32>
    %c1 = arith.constant 1 : index
    %c0_4 = arith.constant 0 : index
    %3 = vector.load %arg2[%c1, %c0_4] : memref<2x16xf32, #tpu.memory_space<vmem>>, vector<1x16xf32>
    %4 = vector.broadcast %2 : vector<1x16xf32> to vector<256x16xf32>
    %5 = arith.mulf %1, %4 : vector<256x16xf32>
    %6 = vector.broadcast %3 : vector<1x16xf32> to vector<256x16xf32>
    %7 = arith.addf %5, %6 : vector<256x16xf32>
    %c0_5 = arith.constant 0 : index
    %c0_6 = arith.constant 0 : index
    %8 = vector.load %arg3[%c0_5, %c0_6] : memref<16x84xf32, #tpu.memory_space<vmem>>, vector<16x84xf32>
    %cst = arith.constant dense<0.000000e+00> : vector<256x84xf32>
    %9 = tpu.matmul %7, %8, %cst {dimension_numbers = #tpu.dot_dimension_numbers<[1], [0], [0], [1], [0, 0, 1, 1], [], []>} : vector<256x16xf32>, vector<16x84xf32>, vector<256x84xf32> -> vector<256x84xf32>
    %cst_7 = arith.constant 0.000000e+00 : f32
    %10 = vector.broadcast %cst_7 : f32 to vector<18x18x84xf32>
    %c0_8 = arith.constant 0 : index
    %c0_9 = arith.constant 0 : index
    %c0_10 = arith.constant 0 : index
    %11 = vector.load %arg7[%c0_8, %c0_9, %c0_10] : memref<18x18x84xf32, #tpu.memory_space<vmem>>, vector<18x18x84xf32>
    tpu.vector_store %arg7[%c0_8, %c0_9, %c0_10], %10 {strides = array<i32>} : memref<18x18x84xf32, #tpu.memory_space<vmem>>, vector<18x18x84xf32>,
    %12 = vector.shape_cast %9 : vector<256x84xf32> to vector<16x16x84xf32>
    %c1_11 = arith.constant 1 : index
    %c1_12 = arith.constant 1 : index
    %c0_13 = arith.constant 0 : index
    %13 = vector.load %arg7[%c1_11, %c1_12, %c0_13] : memref<18x18x84xf32, #tpu.memory_space<vmem>>, vector<16x16x84xf32>
    tpu.vector_store %arg7[%c1_11, %c1_12, %c0_13], %12 {strides = array<i32>} : memref<18x18x84xf32, #tpu.memory_space<vmem>>, vector<16x16x84xf32>,
    %cst_14 = arith.constant 0.000000e+00 : f32
    %14 = vector.broadcast %cst_14 : f32 to vector<16x16x84xf32>
    %c0_15 = arith.constant 0 : index
    %c0_16 = arith.constant 0 : index
    %c0_17 = arith.constant 0 : index
    %15 = vector.load %arg4[%c0_15, %c0_16, %c0_17] : memref<3x3x84xf32, #tpu.memory_space<vmem>>, vector<1x1x84xf32>
    %16 = vector.shape_cast %15 : vector<1x1x84xf32> to vector<1x84xf32>
    %17 = vector.shape_cast %16 : vector<1x84xf32> to vector<1x1x84xf32>
    %c0_18 = arith.constant 0 : index
    %c0_19 = arith.constant 0 : index
    %c0_20 = arith.constant 0 : index
    %18 = vector.load %arg7[%c0_18, %c0_19, %c0_20] : memref<18x18x84xf32, #tpu.memory_space<vmem>>, vector<16x16x84xf32>
    %19 = vector.broadcast %17 : vector<1x1x84xf32> to vector<16x16x84xf32>
    %20 = arith.mulf %18, %19 : vector<16x16x84xf32>
    %21 = arith.addf %14, %20 : vector<16x16x84xf32>
    %c0_21 = arith.constant 0 : index
    %c1_22 = arith.constant 1 : index
    %c0_23 = arith.constant 0 : index
    %22 = vector.load %arg4[%c0_21, %c1_22, %c0_23] : memref<3x3x84xf32, #tpu.memory_space<vmem>>, vector<1x1x84xf32>
    %23 = vector.shape_cast %22 : vector<1x1x84xf32> to vector<1x84xf32>
    %24 = vector.shape_cast %23 : vector<1x84xf32> to vector<1x1x84xf32>
    %c0_24 = arith.constant 0 : index
    %c1_25 = arith.constant 1 : index
    %c0_26 = arith.constant 0 : index
    %25 = vector.load %arg7[%c0_24, %c1_25, %c0_26] : memref<18x18x84xf32, #tpu.memory_space<vmem>>, vector<16x16x84xf32>
    %26 = vector.broadcast %24 : vector<1x1x84xf32> to vector<16x16x84xf32>
    %27 = arith.mulf %25, %26 : vector<16x16x84xf32>
    %28 = arith.addf %21, %27 : vector<16x16x84xf32>
    %c0_27 = arith.constant 0 : index
    %c2 = arith.constant 2 : index
    %c0_28 = arith.constant 0 : index
    %29 = vector.load %arg4[%c0_27, %c2, %c0_28] : memref<3x3x84xf32, #tpu.memory_space<vmem>>, vector<1x1x84xf32>
    %30 = vector.shape_cast %29 : vector<1x1x84xf32> to vector<1x84xf32>
    %31 = vector.shape_cast %30 : vector<1x84xf32> to vector<1x1x84xf32>
    %c0_29 = arith.constant 0 : index
    %c2_30 = arith.constant 2 : index
    %c0_31 = arith.constant 0 : index
    %32 = vector.load %arg7[%c0_29, %c2_30, %c0_31] : memref<18x18x84xf32, #tpu.memory_space<vmem>>, vector<16x16x84xf32>
    %33 = vector.broadcast %31 : vector<1x1x84xf32> to vector<16x16x84xf32>
    %34 = arith.mulf %32, %33 : vector<16x16x84xf32>
    %35 = arith.addf %28, %34 : vector<16x16x84xf32>
    %c1_32 = arith.constant 1 : index
    %c0_33 = arith.constant 0 : index
    %c0_34 = arith.constant 0 : index
    %36 = vector.load %arg4[%c1_32, %c0_33, %c0_34] : memref<3x3x84xf32, #tpu.memory_space<vmem>>, vector<1x1x84xf32>
    %37 = vector.shape_cast %36 : vector<1x1x84xf32> to vector<1x84xf32>
    %38 = vector.shape_cast %37 : vector<1x84xf32> to vector<1x1x84xf32>
    %c1_35 = arith.constant 1 : index
    %c0_36 = arith.constant 0 : index
    %c0_37 = arith.constant 0 : index
    %39 = vector.load %arg7[%c1_35, %c0_36, %c0_37] : memref<18x18x84xf32, #tpu.memory_space<vmem>>, vector<16x16x84xf32>
    %40 = vector.broadcast %38 : vector<1x1x84xf32> to vector<16x16x84xf32>
    %41 = arith.mulf %39, %40 : vector<16x16x84xf32>
    %42 = arith.addf %35, %41 : vector<16x16x84xf32>
    %c1_38 = arith.constant 1 : index
    %c1_39 = arith.constant 1 : index
    %c0_40 = arith.constant 0 : index
    %43 = vector.load %arg4[%c1_38, %c1_39, %c0_40] : memref<3x3x84xf32, #tpu.memory_space<vmem>>, vector<1x1x84xf32>
    %44 = vector.shape_cast %43 : vector<1x1x84xf32> to vector<1x84xf32>
    %45 = vector.shape_cast %44 : vector<1x84xf32> to vector<1x1x84xf32>
    %c1_41 = arith.constant 1 : index
    %c1_42 = arith.constant 1 : index
    %c0_43 = arith.constant 0 : index
    %46 = vector.load %arg7[%c1_41, %c1_42, %c0_43] : memref<18x18x84xf32, #tpu.memory_space<vmem>>, vector<16x16x84xf32>
    %47 = vector.broadcast %45 : vector<1x1x84xf32> to vector<16x16x84xf32>
    %48 = arith.mulf %46, %47 : vector<16x16x84xf32>
    %49 = arith.addf %42, %48 : vector<16x16x84xf32>
    %c1_44 = arith.constant 1 : index
    %c2_45 = arith.constant 2 : index
    %c0_46 = arith.constant 0 : index
    %50 = vector.load %arg4[%c1_44, %c2_45, %c0_46] : memref<3x3x84xf32, #tpu.memory_space<vmem>>, vector<1x1x84xf32>
    %51 = vector.shape_cast %50 : vector<1x1x84xf32> to vector<1x84xf32>
    %52 = vector.shape_cast %51 : vector<1x84xf32> to vector<1x1x84xf32>
    %c1_47 = arith.constant 1 : index
    %c2_48 = arith.constant 2 : index
    %c0_49 = arith.constant 0 : index
    %53 = vector.load %arg7[%c1_47, %c2_48, %c0_49] : memref<18x18x84xf32, #tpu.memory_space<vmem>>, vector<16x16x84xf32>
    %54 = vector.broadcast %52 : vector<1x1x84xf32> to vector<16x16x84xf32>
    %55 = arith.mulf %53, %54 : vector<16x16x84xf32>
    %56 = arith.addf %49, %55 : vector<16x16x84xf32>
    %c2_50 = arith.constant 2 : index
    %c0_51 = arith.constant 0 : index
    %c0_52 = arith.constant 0 : index
    %57 = vector.load %arg4[%c2_50, %c0_51, %c0_52] : memref<3x3x84xf32, #tpu.memory_space<vmem>>, vector<1x1x84xf32>
    %58 = vector.shape_cast %57 : vector<1x1x84xf32> to vector<1x84xf32>
    %59 = vector.shape_cast %58 : vector<1x84xf32> to vector<1x1x84xf32>
    %c2_53 = arith.constant 2 : index
    %c0_54 = arith.constant 0 : index
    %c0_55 = arith.constant 0 : index
    %60 = vector.load %arg7[%c2_53, %c0_54, %c0_55] : memref<18x18x84xf32, #tpu.memory_space<vmem>>, vector<16x16x84xf32>
    %61 = vector.broadcast %59 : vector<1x1x84xf32> to vector<16x16x84xf32>
    %62 = arith.mulf %60, %61 : vector<16x16x84xf32>
    %63 = arith.addf %56, %62 : vector<16x16x84xf32>
    %c2_56 = arith.constant 2 : index
    %c1_57 = arith.constant 1 : index
    %c0_58 = arith.constant 0 : index
    %64 = vector.load %arg4[%c2_56, %c1_57, %c0_58] : memref<3x3x84xf32, #tpu.memory_space<vmem>>, vector<1x1x84xf32>
    %65 = vector.shape_cast %64 : vector<1x1x84xf32> to vector<1x84xf32>
    %66 = vector.shape_cast %65 : vector<1x84xf32> to vector<1x1x84xf32>
    %c2_59 = arith.constant 2 : index
    %c1_60 = arith.constant 1 : index
    %c0_61 = arith.constant 0 : index
    %67 = vector.load %arg7[%c2_59, %c1_60, %c0_61] : memref<18x18x84xf32, #tpu.memory_space<vmem>>, vector<16x16x84xf32>
    %68 = vector.broadcast %66 : vector<1x1x84xf32> to vector<16x16x84xf32>
    %69 = arith.mulf %67, %68 : vector<16x16x84xf32>
    %70 = arith.addf %63, %69 : vector<16x16x84xf32>
    %c2_62 = arith.constant 2 : index
    %c2_63 = arith.constant 2 : index
    %c0_64 = arith.constant 0 : index
    %71 = vector.load %arg4[%c2_62, %c2_63, %c0_64] : memref<3x3x84xf32, #tpu.memory_space<vmem>>, vector<1x1x84xf32>
    %72 = vector.shape_cast %71 : vector<1x1x84xf32> to vector<1x84xf32>
    %73 = vector.shape_cast %72 : vector<1x84xf32> to vector<1x1x84xf32>
    %c2_65 = arith.constant 2 : index
    %c2_66 = arith.constant 2 : index
    %c0_67 = arith.constant 0 : index
    %74 = vector.load %arg7[%c2_65, %c2_66, %c0_67] : memref<18x18x84xf32, #tpu.memory_space<vmem>>, vector<16x16x84xf32>
    %75 = vector.broadcast %73 : vector<1x1x84xf32> to vector<16x16x84xf32>
    %76 = arith.mulf %74, %75 : vector<16x16x84xf32>
    %77 = arith.addf %70, %76 : vector<16x16x84xf32>
    %78 = vector.shape_cast %77 : vector<16x16x84xf32> to vector<256x84xf32>
    %79 = vector.extract_strided_slice %78 {offsets = [0, 0], sizes = [256, 42], strides = [1, 1]} : vector<256x84xf32> to vector<256x42xf32>
    %cst_68 = arith.constant 5.000000e-01 : f32
    %80 = vector.broadcast %cst_68 : f32 to vector<256x42xf32>
    %81 = arith.mulf %80, %79 : vector<256x42xf32>
    %cst_69 = arith.constant 0.707106769 : f32
    %82 = vector.broadcast %cst_69 : f32 to vector<256x42xf32>
    %83 = arith.mulf %79, %82 : vector<256x42xf32>
    %cst_70 = arith.constant 0.000000e+00 : f32
    %84 = vector.broadcast %cst_70 : f32 to vector<256x42xf32>
    %85 = arith.cmpf oge, %83, %84 : vector<256x42xf32>
    %cst_71 = arith.constant 1.000000e+00 : f32
    %cst_72 = arith.constant -1.000000e+00 : f32
    %86 = vector.broadcast %cst_71 : f32 to vector<256x42xf32>
    %87 = vector.broadcast %cst_72 : f32 to vector<256x42xf32>
    %88 = arith.select %85, %86, %87 : vector<256x42xi1>, vector<256x42xf32>
    %89 = math.absf %83 : vector<256x42xf32>
    %cst_73 = arith.constant 0.327591091 : f32
    %90 = vector.broadcast %cst_73 : f32 to vector<256x42xf32>
    %91 = arith.mulf %90, %89 : vector<256x42xf32>
    %cst_74 = arith.constant 1.000000e+00 : f32
    %92 = vector.broadcast %cst_74 : f32 to vector<256x42xf32>
    %93 = arith.addf %92, %91 : vector<256x42xf32>
    %cst_75 = arith.constant 1.000000e+00 : f32
    %94 = vector.broadcast %cst_75 : f32 to vector<256x42xf32>
    %95 = arith.divf %94, %93 : vector<256x42xf32>
    %cst_76 = arith.constant 1.06140542 : f32
    %96 = vector.broadcast %cst_76 : f32 to vector<256x42xf32>
    %97 = arith.mulf %96, %95 : vector<256x42xf32>
    %cst_77 = arith.constant -1.45315206 : f32
    %98 = vector.broadcast %cst_77 : f32 to vector<256x42xf32>
    %99 = arith.addf %97, %98 : vector<256x42xf32>
    %100 = arith.mulf %99, %95 : vector<256x42xf32>
    %cst_78 = arith.constant 1.42141378 : f32
    %101 = vector.broadcast %cst_78 : f32 to vector<256x42xf32>
    %102 = arith.addf %100, %101 : vector<256x42xf32>
    %103 = arith.mulf %102, %95 : vector<256x42xf32>
    %cst_79 = arith.constant -0.284496725 : f32
    %104 = vector.broadcast %cst_79 : f32 to vector<256x42xf32>
    %105 = arith.addf %103, %104 : vector<256x42xf32>
    %106 = arith.mulf %105, %95 : vector<256x42xf32>
    %cst_80 = arith.constant 0.254829586 : f32
    %107 = vector.broadcast %cst_80 : f32 to vector<256x42xf32>
    %108 = arith.addf %106, %107 : vector<256x42xf32>
    %109 = arith.mulf %108, %95 : vector<256x42xf32>
    %cst_81 = arith.constant 0.000000e+00 : f32
    %110 = vector.broadcast %cst_81 : f32 to vector<256x42xf32>
    %111 = arith.subf %110, %89 : vector<256x42xf32>
    %112 = arith.mulf %111, %89 : vector<256x42xf32>
    %113 = math.exp %112 : vector<256x42xf32>
    %114 = arith.mulf %109, %113 : vector<256x42xf32>
    %cst_82 = arith.constant 1.000000e+00 : f32
    %115 = vector.broadcast %cst_82 : f32 to vector<256x42xf32>
    %116 = arith.subf %115, %114 : vector<256x42xf32>
    %117 = arith.mulf %88, %116 : vector<256x42xf32>
    %cst_83 = arith.constant 1.000000e+00 : f32
    %118 = vector.broadcast %cst_83 : f32 to vector<256x42xf32>
    %119 = arith.addf %118, %117 : vector<256x42xf32>
    %120 = arith.mulf %81, %119 : vector<256x42xf32>
    %121 = vector.extract_strided_slice %78 {offsets = [0, 42], sizes = [256, 42], strides = [1, 1]} : vector<256x84xf32> to vector<256x42xf32>
    %122 = arith.mulf %120, %121 : vector<256x42xf32>
    %c0_84 = arith.constant 0 : index
    %c0_85 = arith.constant 0 : index
    %123 = vector.load %arg5[%c0_84, %c0_85] : memref<42x16xf32, #tpu.memory_space<vmem>>, vector<42x16xf32>
    %cst_86 = arith.constant dense<0.000000e+00> : vector<256x16xf32>
    %124 = tpu.matmul %122, %123, %cst_86 {dimension_numbers = #tpu.dot_dimension_numbers<[1], [0], [0], [1], [0, 0, 1, 1], [], []>} : vector<256x42xf32>, vector<42x16xf32>, vector<256x16xf32> -> vector<256x16xf32>
    %125 = arith.addf %1, %124 : vector<256x16xf32>
    %c0_87 = arith.constant 0 : index
    %c0_88 = arith.constant 0 : index
    %c0_89 = arith.constant 0 : index
    %126 = vector.load %arg6[%c0_87, %c0_88, %c0_89] : memref<1x256x16xf32, #tpu.memory_space<vmem>>, vector<1x256x16xf32>
    %127 = vector.shape_cast %126 : vector<1x256x16xf32> to vector<256x16xf32>
    %128 = vector.shape_cast %125 : vector<256x16xf32> to vector<1x256x16xf32>
    tpu.vector_store %arg6[%c0_87, %c0_88, %c0_89], %128 {strides = array<i32>} : memref<1x256x16xf32, #tpu.memory_space<vmem>>, vector<1x256x16xf32>,
    return
  }
  func.func @transform_0(%arg0: i32) -> (i32, i32, i32) {
    %c0_i32 = arith.constant 0 : i32
    %c0_i32_0 = arith.constant 0 : i32
    %c0_i32_1 = arith.constant 0 : i32
    return %arg0, %c0_i32, %c0_i32_0 : i32, i32, i32
  }
  func.func @transform_1(%arg0: i32) -> (i32, i32) {
    %c0_i32 = arith.constant 0 : i32
    %c0_i32_0 = arith.constant 0 : i32
    %c0_i32_1 = arith.constant 0 : i32
    return %c0_i32, %c0_i32_0 : i32, i32
  }
  func.func @transform_2(%arg0: i32) -> (i32, i32) {
    %c0_i32 = arith.constant 0 : i32
    %c0_i32_0 = arith.constant 0 : i32
    %c0_i32_1 = arith.constant 0 : i32
    return %c0_i32, %c0_i32_0 : i32, i32
  }
  func.func @transform_3(%arg0: i32) -> (i32, i32, i32) {
    %c0_i32 = arith.constant 0 : i32
    %c0_i32_0 = arith.constant 0 : i32
    %c0_i32_1 = arith.constant 0 : i32
    %c0_i32_2 = arith.constant 0 : i32
    return %c0_i32, %c0_i32_0, %c0_i32_1 : i32, i32, i32
  }
  func.func @transform_4(%arg0: i32) -> (i32, i32) {
    %c0_i32 = arith.constant 0 : i32
    %c0_i32_0 = arith.constant 0 : i32
    %c0_i32_1 = arith.constant 0 : i32
    return %c0_i32, %c0_i32_0 : i32, i32
  }
  func.func @transform_5(%arg0: i32) -> (i32, i32, i32) {
    %c0_i32 = arith.constant 0 : i32
    %c0_i32_0 = arith.constant 0 : i32
    %c0_i32_1 = arith.constant 0 : i32
    return %arg0, %c0_i32, %c0_i32_0 : i32, i32, i32
  }
}

</mosaic_0001>

<bundles_post_ra>
// kernel: transformer_block.4
= control target key start
LH: loop header
LB: loop body
LE: loop exit
PB: predicated region body
PF: predicated region fallthrough
CT: control target
= control target key end

     0   :  { %vm78_vm0 = vcmask 130048   ;;  %vm480_vm1 = vcmask 122880   ;;  %s1167_s0 = inlined_call_operand.vmem [shape: f32[512,16], index: 0, kind: input, shape index: {}]   ;;  %s1168_s1 = inlined_call_operand.vmem [shape: f32[1,16], index: 1, kind: input, shape index: {}]   ;;  %s1169_s2 = inlined_call_operand.vmem [shape: f32[1,16], index: 2, kind: input, shape index: {}]   ;;  %s1170_s3 = inlined_call_operand.vmem [shape: f32[2,16], index: 3, kind: output, shape index: {}]  }
   0x1   :  { %v515_v0 = vld [vmem:[%s1167_s0] sm:$0xff]  ;;  %v520_v1 = vld [vmem:[%s1167_s0 + $0x8] sm:$0xff]  ;;  %v525_v2 = vld [vmem:[%s1167_s0 + $0x10] sm:$0xff] }
   0x2   :  { %v530_v3 = vld [vmem:[%s1167_s0 + $0x18] sm:$0xff]  ;;  %v79_v4 = vsel %vm78_vm0, %v515_v0, 0.0  ;;  %v80_v5 = vsel %vm78_vm0, %v520_v1, 0.0  ;;  %v82_v6 = vsel %vm78_vm0, %v525_v2, 0.0  ;;  %v541_v7 = vld [vmem:[%s1167_s0 + $0x20] sm:$0xff]  ;;  %v548_v10 = vld [vmem:[%s1167_s0 + $0x28] sm:$0xff] }
   0x3   :  { %v81_v8 = vadd.f32 %v80_v5, %v79_v4  ;;  %v84_v9 = vsel %vm78_vm0, %v530_v3, 0.0  ;;  %v86_v12 = vsel %vm78_vm0, %v541_v7, 0.0  ;;  %v555_v13 = vld [vmem:[%s1167_s0 + $0x30] sm:$0xff]  ;;  %v88_v15 = vsel %vm78_vm0, %v548_v10, 0.0  ;;  %v562_v16 = vld [vmem:[%s1167_s0 + $0x38] sm:$0xff]  ;;  %v569_v19 = vld [vmem:[%s1167_s0 + $0x40] sm:$0xff] }
   0x4   :  { %v90_v18 = vsel %vm78_vm0, %v555_v13, 0.0  ;;  %v92_v21 = vsel %vm78_vm0, %v562_v16, 0.0  ;;  %v576_v22 = vld [vmem:[%s1167_s0 + $0x48] sm:$0xff]  ;;  %v94_v24 = vsel %vm78_vm0, %v569_v19, 0.0  ;;  %v583_v25 = vld [vmem:[%s1167_s0 + $0x50] sm:$0xff]  ;;  %v590_v28 = vld [vmem:[%s1167_s0 + $0x58] sm:$0xff] }
   0x5   :  { %v83_v11 = vadd.f32 %v82_v6, %v81_v8  ;;  %v96_v27 = vsel %vm78_vm0, %v576_v22, 0.0  ;;  %v98_v30 = vsel %vm78_vm0, %v583_v25, 0.0  ;;  %v597_v31 = vld [vmem:[%s1167_s0 + $0x60] sm:$0xff]  ;;  %v100_v33 = vsel %vm78_vm0, %v590_v28, 0.0  ;;  %v604_v34 = vld [vmem:[%s1167_s0 + $0x68] sm:$0xff]  ;;  %v611_v37 = vld [vmem:[%s1167_s0 + $0x70] sm:$0xff] }
   0x6   :  { %v102_v36 = vsel %vm78_vm0, %v597_v31, 0.0  ;;  %v104_v39 = vsel %vm78_vm0, %v604_v34, 0.0  ;;  %v618_v40 = vld [vmem:[%s1167_s0 + $0x78] sm:$0xff]  ;;  %v106_v42 = vsel %vm78_vm0, %v611_v37, 0.0  ;;  %v625_v43 = vld [vmem:[%s1167_s0 + $0x80] sm:$0xff]  ;;  %v632_v46 = vld [vmem:[%s1167_s0 + $0x88] sm:$0xff] }
   0x7   :  { %v85_v14 = vadd.f32 %v84_v9, %v83_v11  ;;  %v108_v45 = vsel %vm78_vm0, %v618_v40, 0.0  ;;  %v110_v48 = vsel %vm78_vm0, %v625_v43, 0.0  ;;  %v639_v49 = vld [vmem:[%s1167_s0 + $0x90] sm:$0xff]  ;;  %v112_v51 = vsel %vm78_vm0, %v632_v46, 0.0  ;;  %v646_v52 = vld [vmem:[%s1167_s0 + $0x98] sm:$0xff]  ;;  %v653_v55 = vld [vmem:[%s1167_s0 + $0xa0] sm:$0xff] }
   0x8   :  { %v114_v54 = vsel %vm78_vm0, %v639_v49, 0.0  ;;  %v116_v57 = vsel %vm78_vm0, %v646_v52, 0.0  ;;  %v660_v58 = vld [vmem:[%s1167_s0 + $0xa8] sm:$0xff]  ;;  %v118_v60 = vsel %vm78_vm0, %v653_v55, 0.0  ;;  %v667_v61 = vld [vmem:[%s1167_s0 + $0xb0] sm:$0xff]  ;;  %v674_v4 = vld [vmem:[%s1167_s0 + $0xb8] sm:$0xff] }
   0x9   :  { %v87_v17 = vadd.f32 %v86_v12, %v85_v14  ;;  %v120_v63 = vsel %vm78_vm0, %v660_v58, 0.0  ;;  %v122_v6 = vsel %vm78_vm0, %v667_v61, 0.0  ;;  %v681_v8 = vld [vmem:[%s1167_s0 + $0xc0] sm:$0xff]  ;;  %v124_v11 = vsel %vm78_vm0, %v674_v4, 0.0  ;;  %v688_v12 = vld [vmem:[%s1167_s0 + $0xc8] sm:$0xff] }
   0xb   :  { %v89_v20 = vadd.f32 %v88_v15, %v87_v17  ;;  %v126_v15 = vsel %vm78_vm0, %v681_v8, 0.0  ;;  %v695_v17 = vld [vmem:[%s1167_s0 + $0xd0] sm:$0xff] }
   0xd   :  { %v91_v23 = vadd.f32 %v90_v18, %v89_v20  ;;  %v128_v20 = vsel %vm78_vm0, %v688_v12, 0.0 }
   0xf   :  { %v93_v26 = vadd.f32 %v92_v21, %v91_v23  ;;  %v702_v21 = vld [vmem:[%s1167_s0 + $0xd8] sm:$0xff] }
  0x11   :  { %v95_v29 = vadd.f32 %v94_v24, %v93_v26  ;;  %v130_v24 = vsel %vm78_vm0, %v695_v17, 0.0  ;;  %v709_v26 = vld [vmem:[%s1167_s0 + $0xe0] sm:$0xff] }
  0x13   :  { %v97_v32 = vadd.f32 %v96_v27, %v95_v29  ;;  %v132_v29 = vsel %vm78_vm0, %v702_v21, 0.0 }
  0x15   :  { %v99_v35 = vadd.f32 %v98_v30, %v97_v32  ;;  %v716_v30 = vld [vmem:[%s1167_s0 + $0xe8] sm:$0xff] }
  0x17   :  { %v101_v38 = vadd.f32 %v100_v33, %v99_v35  ;;  %v134_v33 = vsel %vm78_vm0, %v709_v26, 0.0  ;;  %v723_v35 = vld [vmem:[%s1167_s0 + $0xf0] sm:$0xff] }
  0x19   :  { %v103_v41 = vadd.f32 %v102_v36, %v101_v38  ;;  %v136_v38 = vsel %vm78_vm0, %v716_v30, 0.0 }
  0x1b   :  { %v105_v44 = vadd.f32 %v104_v39, %v103_v41  ;;  %v730_v39 = vld [vmem:[%s1167_s0 + $0xf8] sm:$0xff] }
  0x1d   :  { %v107_v47 = vadd.f32 %v106_v42, %v105_v44  ;;  %v138_v42 = vsel %vm78_vm0, %v723_v35, 0.0  ;;  %v737_v44 = vld [vmem:[%s1167_s0 + $0x100] sm:$0xff] }
  0x1f   :  { %v109_v50 = vadd.f32 %v108_v45, %v107_v47  ;;  %v140_v47 = vsel %vm78_vm0, %v730_v39, 0.0 }
  0x21   :  { %v111_v53 = vadd.f32 %v110_v48, %v109_v50  ;;  %v744_v48 = vld [vmem:[%s1167_s0 + $0x108] sm:$0xff] }
  0x23   :  { %v113_v56 = vadd.f32 %v112_v51, %v111_v53  ;;  %v142_v51 = vsel %vm78_vm0, %v737_v44, 0.0  ;;  %v751_v53 = vld [vmem:[%s1167_s0 + $0x110] sm:$0xff] }
  0x25   :  { %v115_v59 = vadd.f32 %v114_v54, %v113_v56  ;;  %v144_v56 = vsel %vm78_vm0, %v744_v48, 0.0 }
  0x27   :  { %v117_v62 = vadd.f32 %v116_v57, %v115_v59  ;;  %v758_v57 = vld [vmem:[%s1167_s0 + $0x118] sm:$0xff] }
  0x29   :  { %v119_v5 = vadd.f32 %v118_v60, %v117_v62  ;;  %v146_v60 = vsel %vm78_vm0, %v751_v53, 0.0  ;;  %v765_v62 = vld [vmem:[%s1167_s0 + $0x120] sm:$0xff] }
  0x2b   :  { %v121_v9 = vadd.f32 %v120_v63, %v119_v5  ;;  %v148_v5 = vsel %vm78_vm0, %v758_v57, 0.0 }
  0x2d   :  { %v123_v14 = vadd.f32 %v122_v6, %v121_v9  ;;  %v772_v6 = vld [vmem:[%s1167_s0 + $0x128] sm:$0xff] }
  0x2f   :  { %v125_v18 = vadd.f32 %v124_v11, %v123_v14  ;;  %v150_v11 = vsel %vm78_vm0, %v765_v62, 0.0  ;;  %v779_v14 = vld [vmem:[%s1167_s0 + $0x130] sm:$0xff] }
  0x31   :  { %v127_v23 = vadd.f32 %v126_v15, %v125_v18  ;;  %v152_v18 = vsel %vm78_vm0, %v772_v6, 0.0 }
  0x33   :  { %v129_v27 = vadd.f32 %v128_v20, %v127_v23  ;;  %v786_v20 = vld [vmem:[%s1167_s0 + $0x138] sm:$0xff] }
  0x35   :  { %v131_v32 = vadd.f32 %v130_v24, %v129_v27  ;;  %v154_v24 = vsel %vm78_vm0, %v779_v14, 0.0  ;;  %v793_v27 = vld [vmem:[%s1167_s0 + $0x140] sm:$0xff] }
  0x37   :  { %v133_v36 = vadd.f32 %v132_v29, %v131_v32  ;;  %v156_v32 = vsel %vm78_vm0, %v786_v20, 0.0 }
  0x39   :  { %v135_v41 = vadd.f32 %v134_v33, %v133_v36  ;;  %v800_v33 = vld [vmem:[%s1167_s0 + $0x148] sm:$0xff] }
  0x3b   :  { %v137_v45 = vadd.f32 %v136_v38, %v135_v41  ;;  %v158_v38 = vsel %vm78_vm0, %v793_v27, 0.0  ;;  %v807_v41 = vld [vmem:[%s1167_s0 + $0x150] sm:$0xff] }
  0x3d   :  { %v139_v50 = vadd.f32 %v138_v42, %v137_v45  ;;  %v160_v45 = vsel %vm78_vm0, %v800_v33, 0.0 }
  0x3f   :  { %v141_v54 = vadd.f32 %v140_v47, %v139_v50  ;;  %v814_v47 = vld [vmem:[%s1167_s0 + $0x158] sm:$0xff] }
  0x41   :  { %v143_v59 = vadd.f32 %v142_v51, %v141_v54  ;;  %v162_v51 = vsel %vm78_vm0, %v807_v41, 0.0  ;;  %v821_v54 = vld [vmem:[%s1167_s0 + $0x160] sm:$0xff] }
  0x43   :  { %v145_v63 = vadd.f32 %v144_v56, %v143_v59  ;;  %v164_v59 = vsel %vm78_vm0, %v814_v47, 0.0 }
  0x45   :  { %v147_v9 = vadd.f32 %v146_v60, %v145_v63  ;;  %v828_v60 = vld [vmem:[%s1167_s0 + $0x168] sm:$0xff] }
  0x47   :  { %v149_v15 = vadd.f32 %v148_v5, %v147_v9  ;;  %v166_v5 = vsel %vm78_vm0, %v821_v54, 0.0  ;;  %v835_v9 = vld [vmem:[%s1167_s0 + $0x170] sm:$0xff] }
  0x49   :  { %v151_v23 = vadd.f32 %v150_v11, %v149_v15  ;;  %v168_v15 = vsel %vm78_vm0, %v828_v60, 0.0 }
  0x4b   :  { %v153_v29 = vadd.f32 %v152_v18, %v151_v23  ;;  %v842_v18 = vld [vmem:[%s1167_s0 + $0x178] sm:$0xff] }
  0x4d   :  { %v155_v36 = vadd.f32 %v154_v24, %v153_v29  ;;  %v170_v24 = vsel %vm78_vm0, %v835_v9, 0.0  ;;  %v849_v29 = vld [vmem:[%s1167_s0 + $0x180] sm:$0xff] }
  0x4f   :  { %v157_v42 = vadd.f32 %v156_v32, %v155_v36  ;;  %v172_v36 = vsel %vm78_vm0, %v842_v18, 0.0 }
  0x51   :  { %v159_v50 = vadd.f32 %v158_v38, %v157_v42  ;;  %v856_v38 = vld [vmem:[%s1167_s0 + $0x188] sm:$0xff] }
  0x52   :  { %1185 = vst [vmem:[#allocation2_spill] sm:$0xff] %v856_v38 }
  0x53   :  { %v161_v56 = vadd.f32 %v160_v45, %v159_v50  ;;  %v174_v45 = vsel %vm78_vm0, %v849_v29, 0.0  ;;  %v863_v50 = vld [vmem:[%s1167_s0 + $0x190] sm:$0xff] }
  0x54   :  { %1186 = vst [vmem:[#allocation3_spill] sm:$0xff] %v863_v50 }
  0x55   :  { %v163_v63 = vadd.f32 %v162_v51, %v161_v56  ;;  %v176_v56 = vsel %vm78_vm0, %v856_v38, 0.0 }
  0x57   :  { %v165_v11 = vadd.f32 %v164_v59, %v163_v63  ;;  %v870_v59 = vld [vmem:[%s1167_s0 + $0x198] sm:$0xff] }
  0x58   :  { %1187 = vst [vmem:[#allocation4_spill] sm:$0xff] %v870_v59 }
  0x59   :  { %v167_v23 = vadd.f32 %v166_v5, %v165_v11  ;;  %v178_v5 = vsel %vm78_vm0, %v863_v50, 0.0  ;;  %v877_v11 = vld [vmem:[%s1167_s0 + $0x1a0] sm:$0xff] }
  0x5a   :  { %1188 = vst [vmem:[#allocation5_spill] sm:$0xff] %v877_v11 }
  0x5b   :  { %v169_v32 = vadd.f32 %v168_v15, %v167_v23  ;;  %v180_v23 = vsel %vm78_vm0, %v870_v59, 0.0 }
  0x5d   :  { %v171_v42 = vadd.f32 %v170_v24, %v169_v32  ;;  %v884_v24 = vld [vmem:[%s1167_s0 + $0x1a8] sm:$0xff] }
  0x5e   :  { %1189 = vst [vmem:[#allocation6_spill] sm:$0xff] %v884_v24 }
  0x5f   :  { %v173_v51 = vadd.f32 %v172_v36, %v171_v42  ;;  %v182_v36 = vsel %vm78_vm0, %v877_v11, 0.0  ;;  %v891_v42 = vld [vmem:[%s1167_s0 + $0x1b0] sm:$0xff] }
  0x60   :  { %1190 = vst [vmem:[#allocation7_spill] sm:$0xff] %v891_v42 }
  0x61   :  { %v175_v63 = vadd.f32 %v174_v45, %v173_v51  ;;  %v184_v51 = vsel %vm78_vm0, %v884_v24, 0.0 }
  0x63   :  { %v177_v15 = vadd.f32 %v176_v56, %v175_v63  ;;  %v898_v56 = vld [vmem:[%s1167_s0 + $0x1b8] sm:$0xff] }
  0x64   :  { %1191 = vst [vmem:[#allocation8_spill] sm:$0xff] %v898_v56 }
  0x65   :  { %v179_v32 = vadd.f32 %v178_v5, %v177_v15  ;;  %v186_v5 = vsel %vm78_vm0, %v891_v42, 0.0  ;;  %v905_v15 = vld [vmem:[%s1167_s0 + $0x1c0] sm:$0xff] }
  0x66   :  { %1192 = vst [vmem:[#allocation9_spill] sm:$0xff] %v905_v15 }
  0x67   :  { %v181_v45 = vadd.f32 %v180_v23, %v179_v32  ;;  %v188_v23 = vsel %vm78_vm0, %v898_v56, 0.0  ;;  %v912_v32 = vld [vmem:[%s1167_s0 + $0x1c8] sm:$0xff] }
  0x68   :  { %1193 = vst [vmem:[#allocation10_spill] sm:$0xff] %v912_v32 }
  0x69   :  { %v183_v63 = vadd.f32 %v182_v36, %v181_v45  ;;  %v190_v36 = vsel %vm78_vm0, %v905_v15, 0.0  ;;  %v919_v45 = vld [vmem:[%s1167_s0 + $0x1d0] sm:$0xff] }
  0x6a   :  { %1194 = vst [vmem:[#allocation11_spill] sm:$0xff] %v919_v45 }
  0x6b   :  { %v185_v11 = vadd.f32 %v184_v51, %v183_v63  ;;  %v192_v51 = vsel %vm78_vm0, %v912_v32, 0.0  ;;  %v926_v63 = vld [vmem:[%s1167_s0 + $0x1d8] sm:$0xff] }
  0x6c   :  { %1195 = vst [vmem:[#allocation12_spill] sm:$0xff] %v926_v63  ;;  %v196_v15 = vsel %vm78_vm0, %v926_v63, 0.0 }
  0x6d   :  { %v187_v24 = vadd.f32 %v186_v5, %v185_v11  ;;  %v194_v11 = vsel %vm78_vm0, %v919_v45, 0.0 }
  0x6f   :  { %v189_v42 = vadd.f32 %v188_v23, %v187_v24  ;;  %v935_v24 = vld [vmem:[%s1167_s0 + $0x1e0] sm:$0xff] }
  0x70   :  { %1196 = vst [vmem:[#allocation13_spill] sm:$0xff] %v935_v24  ;;  %v198_v59 = vsel %vm78_vm0, %v935_v24, 0.0 }
  0x71   :  { %v191_v56 = vadd.f32 %v190_v36, %v189_v42  ;;  %v942_v42 = vld [vmem:[%s1167_s0 + $0x1e8] sm:$0xff] }
  0x72   :  { %1197 = vst [vmem:[#allocation14_spill] sm:$0xff] %v942_v42 }
  0x73   :  { %v193_v5 = vadd.f32 %v192_v51, %v191_v56  ;;  %v200_v56 = vsel %vm78_vm0, %v942_v42, 0.0  ;;  %v949_v51 = vld [vmem:[%s1167_s0 + $0x1f0] sm:$0xff] }
  0x74   :  { %1198 = vst [vmem:[#allocation15_spill] sm:$0xff] %v949_v51 }
  0x75   :  { %v195_v23 = vadd.f32 %v194_v11, %v193_v5  ;;  %v956_v11 = vld [vmem:[%s1167_s0 + $0x1f8] sm:$0xff] }
  0x77   :  { %v197_v32 = vadd.f32 %v196_v15, %v195_v23  ;;  %v202_v15 = vsel %vm78_vm0, %v949_v51, 0.0 }
  0x79   :  { %v199_v36 = vadd.f32 %v198_v59, %v197_v32  ;;  %v204_v59 = vsel %vm78_vm0, %v956_v11, 0.0 }
  0x7b   :  { %v201_v63 = vadd.f32 %v200_v56, %v199_v36 }
  0x7d   :  { %v203_v5 = vadd.f32 %v202_v15, %v201_v63 }
  0x7f   :  { %v205_v32 = vadd.f32 %v204_v59, %v203_v5 }
  0x81   :  { %v206_v23 = vrot.slane %v205_v32, 4 }
  0x83   :  { %v207_v42 = vadd.f32 %v206_v23, %v205_v32 }
  0x85   :  { %v208_v24 = vrot.slane %v207_v42, 2 }
  0x87   :  { %v209_v45 = vadd.f32 %v208_v24, %v207_v42 }
  0x89   :  { %v210_v50 = vrot.slane %v209_v45, 1 }
  0x8b   :  { %v211_v38 = vadd.f32 %v210_v50, %v209_v45 }
  0x8d   :  { %v960_v36 = vmul.f32 0.001953125, %v211_v38 }
  0x8f   :  { %v214_v56 = vsub.f32 %v515_v0, %v960_v36  ;;  %v215_v51 = vsub.f32 %v520_v1, %v960_v36  ;;  %v216_v63 = vsub.f32 %v525_v2, %v960_v36  ;;  %v217_v15 = vsub.f32 %v530_v3, %v960_v36 }
  0x90   :  { %v218_v5 = vsub.f32 %v541_v7, %v960_v36  ;;  %v219_v38 = vsub.f32 %v548_v10, %v960_v36  ;;  %v220_v0 = vsub.f32 %v555_v13, %v960_v36  ;;  %v221_v7 = vsub.f32 %v562_v16, %v960_v36 }
  0x91   :  { %v278_v24 = vmul.f32 %v214_v56, %v214_v56  ;;  %v279_v42 = vmul.f32 %v215_v51, %v215_v51  ;;  %v280_v50 = vmul.f32 %v216_v63, %v216_v63  ;;  %v281_v45 = vmul.f32 %v217_v15, %v217_v15 }
  0x92   :  { %v282_v1 = vmul.f32 %v218_v5, %v218_v5  ;;  %v283_v51 = vmul.f32 %v219_v38, %v219_v38  ;;  %v222_v10 = vsub.f32 %v569_v19, %v960_v36  ;;  %v284_v63 = vmul.f32 %v220_v0, %v220_v0 }
  0x93   :  { %v342_v59 = vsel %vm78_vm0, %v278_v24, 0.0  ;;  %v343_v2 = vsel %vm78_vm0, %v279_v42, 0.0  ;;  %v345_v3 = vsel %vm78_vm0, %v280_v50, 0.0  ;;  %v347_v23 = vsel %vm78_vm0, %v281_v45, 0.0 }
  0x94   :  { %v344_v32 = vadd.f32 %v343_v2, %v342_v59  ;;  %v349_v13 = vsel %vm78_vm0, %v282_v1, 0.0  ;;  %v223_v5 = vsub.f32 %v576_v22, %v960_v36  ;;  %v285_v24 = vmul.f32 %v221_v7, %v221_v7 }
  0x95   :  { %v351_v42 = vsel %vm78_vm0, %v283_v51, 0.0  ;;  %v224_v16 = vsub.f32 %v583_v25, %v960_v36  ;;  %v286_v38 = vmul.f32 %v222_v10, %v222_v10  ;;  %v353_v45 = vsel %vm78_vm0, %v284_v63, 0.0 }
  0x96   :  { %v346_v56 = vadd.f32 %v345_v3, %v344_v32  ;;  %v225_v19 = vsub.f32 %v590_v28, %v960_v36  ;;  %v287_v0 = vmul.f32 %v223_v5, %v223_v5  ;;  %v355_v1 = vsel %vm78_vm0, %v285_v24, 0.0 }
  0x97   :  { %v226_v22 = vsub.f32 %v597_v31, %v960_v36  ;;  %v288_v3 = vmul.f32 %v224_v16, %v224_v16  ;;  %v357_v32 = vsel %vm78_vm0, %v286_v38, 0.0  ;;  %v227_v25 = vsub.f32 %v604_v34, %v960_v36 }
  0x98   :  { %v348_v15 = vadd.f32 %v347_v23, %v346_v56  ;;  %v289_v51 = vmul.f32 %v225_v19, %v225_v19  ;;  %v359_v23 = vsel %vm78_vm0, %v287_v0, 0.0  ;;  %v228_v28 = vsub.f32 %v611_v37, %v960_v36 }
  0x99   :  { %v290_v10 = vmul.f32 %v226_v22, %v226_v22  ;;  %v361_v63 = vsel %vm78_vm0, %v288_v3, 0.0  ;;  %v229_v31 = vsub.f32 %v618_v40, %v960_v36  ;;  %v230_v34 = vsub.f32 %v625_v43, %v960_v36 }
  0x9a   :  { %v350_v50 = vadd.f32 %v349_v13, %v348_v15  ;;  %v291_v15 = vmul.f32 %v227_v25, %v227_v25  ;;  %v363_v5 = vsel %vm78_vm0, %v289_v51, 0.0  ;;  %v231_v37 = vsub.f32 %v632_v46, %v960_v36 }
  0x9b   :  { %v293_v38 = vmul.f32 %v229_v31, %v229_v31  ;;  %v232_v40 = vsub.f32 %v639_v49, %v960_v36  ;;  %v294_v19 = vmul.f32 %v230_v34, %v230_v34  ;;  %v233_v43 = vsub.f32 %v646_v52, %v960_v36 }
  0x9c   :  { %v352_v59 = vadd.f32 %v351_v42, %v350_v50  ;;  %v292_v42 = vmul.f32 %v228_v28, %v228_v28  ;;  %v365_v50 = vsel %vm78_vm0, %v290_v10, 0.0  ;;  %v234_v46 = vsub.f32 %v653_v55, %v960_v36 }
  0x9d   :  { %v371_v22 = vsel %vm78_vm0, %v293_v38, 0.0  ;;  %v235_v49 = vsub.f32 %v660_v58, %v960_v36  ;;  %v297_v51 = vmul.f32 %v233_v43, %v233_v43  ;;  %v236_v52 = vsub.f32 %v667_v61, %v960_v36 }
  0x9e   :  { %v354_v2 = vadd.f32 %v353_v45, %v352_v59  ;;  %v367_v45 = vsel %vm78_vm0, %v291_v15, 0.0  ;;  %v369_v0 = vsel %vm78_vm0, %v292_v42, 0.0  ;;  %v298_v28 = vmul.f32 %v234_v46, %v234_v46 }
  0x9f   :  { %v237_v55 = vsub.f32 %v674_v4, %v960_v36  ;;  %v379_v31 = vsel %vm78_vm0, %v297_v51, 0.0  ;;  %v238_v58 = vsub.f32 %v681_v8, %v960_v36  ;;  %v239_v61 = vsub.f32 %v688_v12, %v960_v36 }
  0xa0   :  { %v356_v7 = vadd.f32 %v355_v1, %v354_v2  ;;  %v295_v2 = vmul.f32 %v231_v37, %v231_v37  ;;  %v240_v4 = vsub.f32 %v695_v17, %v960_v36  ;;  %v241_v8 = vsub.f32 %v702_v21, %v960_v36 }
  0xa1   :  { %v301_v42 = vmul.f32 %v237_v55, %v237_v55  ;;  %v302_v37 = vmul.f32 %v238_v58, %v238_v58  ;;  %v242_v12 = vsub.f32 %v709_v26, %v960_v36  ;;  %v243_v17 = vsub.f32 %v716_v30, %v960_v36 }
  0xa2   :  { %v358_v56 = vadd.f32 %v357_v32, %v356_v7  ;;  %v296_v32 = vmul.f32 %v232_v40, %v232_v40  ;;  %v373_v7 = vsel %vm78_vm0, %v294_v19, 0.0  ;;  %v244_v21 = vsub.f32 %v723_v35, %v960_v36 }
  0xa3   :  { %v387_v40 = vsel %vm78_vm0, %v301_v42, 0.0  ;;  %v306_v46 = vmul.f32 %v242_v12, %v242_v12  ;;  %v245_v26 = vsub.f32 %v730_v39, %v960_v36  ;;  %v246_v30 = vsub.f32 %v737_v44, %v960_v36 }
  0xa4   :  { %v360_v13 = vadd.f32 %v359_v23, %v358_v56  ;;  %v375_v23 = vsel %vm78_vm0, %v295_v2, 0.0  ;;  %v377_v10 = vsel %vm78_vm0, %v296_v32, 0.0  ;;  %v305_v2 = vmul.f32 %v241_v8, %v241_v8 }
  0xa5   :  { %v247_v35 = vsub.f32 %v744_v48, %v960_v36  ;;  %v248_v39 = vsub.f32 %v751_v53, %v960_v36  ;;  %v310_v55 = vmul.f32 %v246_v30, %v246_v30  ;;  %v249_v44 = vsub.f32 %v758_v57, %v960_v36 }
  0xa6   :  { %v362_v24 = vadd.f32 %v361_v63, %v360_v13  ;;  %v299_v13 = vmul.f32 %v235_v49, %v235_v49  ;;  %v395_v49 = vsel %vm78_vm0, %v305_v2, 0.0  ;;  %v250_v48 = vsub.f32 %v765_v62, %v960_v36 }
  0xa7   :  { %v251_v53 = vsub.f32 %v772_v6, %v960_v36  ;;  %v313_v42 = vmul.f32 %v249_v44, %v249_v44  ;;  %v252_v57 = vsub.f32 %v779_v14, %v960_v36  ;;  %v253_v62 = vsub.f32 %v786_v20, %v960_v36 }
  0xa8   :  { %v364_v16 = vadd.f32 %v363_v5, %v362_v24  ;;  %v300_v5 = vmul.f32 %v236_v52, %v236_v52  ;;  %v381_v24 = vsel %vm78_vm0, %v298_v28, 0.0  ;;  %v309_v28 = vmul.f32 %v245_v26, %v245_v26 }
  0xa9   :  { %v411_v8 = vsel %vm78_vm0, %v313_v42, 0.0  ;;  %v254_v6 = vsub.f32 %v793_v27, %v960_v36  ;;  %v255_v14 = vsub.f32 %v800_v33, %v960_v36  ;;  %v256_v20 = vsub.f32 %v807_v41, %v960_v36  ;;  %v1202_v42 = vld [vmem:[#allocation5_spill] sm:$0xff] }
  0xaa   :  { %v366_v59 = vadd.f32 %v365_v50, %v364_v16  ;;  %v383_v50 = vsel %vm78_vm0, %v299_v13, 0.0  ;;  %v385_v38 = vsel %vm78_vm0, %v300_v5, 0.0  ;;  %v403_v58 = vsel %vm78_vm0, %v309_v28, 0.0 }
  0xab   :  { %v257_v27 = vsub.f32 %v814_v47, %v960_v36  ;;  %v258_v33 = vsub.f32 %v821_v54, %v960_v36  ;;  %v259_v41 = vsub.f32 %v828_v60, %v960_v36  ;;  %v260_v47 = vsub.f32 %v835_v9, %v960_v36  ;;  %v1199_v9 = vld [vmem:[#allocation2_spill] sm:$0xff] }
  0xac   :  { %v368_v1 = vadd.f32 %v367_v45, %v366_v59  ;;  %v303_v59 = vmul.f32 %v239_v61, %v239_v61  ;;  %v261_v54 = vsub.f32 %v842_v18, %v960_v36  ;;  %v262_v60 = vsub.f32 %v849_v29, %v960_v36  ;;  %v1200_v18 = vld [vmem:[#allocation3_spill] sm:$0xff]  ;;  %v1201_v29 = vld [vmem:[#allocation4_spill] sm:$0xff] }
  0xad   :  { %v322_v30 = vmul.f32 %v258_v33, %v258_v33 }
  0xae   :  { %v370_v3 = vadd.f32 %v369_v0, %v368_v1  ;;  %v304_v0 = vmul.f32 %v240_v4, %v240_v4  ;;  %v389_v1 = vsel %vm78_vm0, %v302_v37, 0.0  ;;  %v314_v4 = vmul.f32 %v250_v48, %v250_v48 }
  0xb0   :  { %v372_v25 = vadd.f32 %v371_v22, %v370_v3  ;;  %v391_v22 = vsel %vm78_vm0, %v303_v59, 0.0  ;;  %v393_v32 = vsel %vm78_vm0, %v304_v0, 0.0  ;;  %v317_v0 = vmul.f32 %v253_v62, %v253_v62 }
  0xb2   :  { %v374_v56 = vadd.f32 %v373_v7, %v372_v25  ;;  %v307_v25 = vmul.f32 %v243_v17, %v243_v17  ;;  %v318_v17 = vmul.f32 %v254_v6, %v254_v6 }
  0xb4   :  { %v376_v63 = vadd.f32 %v375_v23, %v374_v56  ;;  %v308_v23 = vmul.f32 %v244_v21, %v244_v21  ;;  %v397_v56 = vsel %vm78_vm0, %v306_v46, 0.0  ;;  %v419_v21 = vsel %vm78_vm0, %v317_v0, 0.0 }
  0xb6   :  { %v378_v15 = vadd.f32 %v377_v10, %v376_v63  ;;  %v399_v10 = vsel %vm78_vm0, %v307_v25, 0.0  ;;  %v401_v13 = vsel %vm78_vm0, %v308_v23, 0.0  ;;  %v321_v25 = vmul.f32 %v257_v27, %v257_v27 }
  0xb8   :  { %v380_v34 = vadd.f32 %v379_v31, %v378_v15  ;;  %v311_v15 = vmul.f32 %v247_v35, %v247_v35  ;;  %v427_v35 = vsel %vm78_vm0, %v321_v25, 0.0 }
  0xba   :  { %v382_v16 = vadd.f32 %v381_v24, %v380_v34  ;;  %v312_v24 = vmul.f32 %v248_v39, %v248_v39  ;;  %v405_v34 = vsel %vm78_vm0, %v310_v55, 0.0  ;;  %v263_v55 = vsub.f32 %v1199_v9, %v960_v36 }
  0xbc   :  { %v384_v45 = vadd.f32 %v383_v50, %v382_v16  ;;  %v407_v50 = vsel %vm78_vm0, %v311_v15, 0.0  ;;  %v409_v37 = vsel %vm78_vm0, %v312_v24, 0.0  ;;  %v264_v15 = vsub.f32 %v1200_v18, %v960_v36 }
  0xbd   :  { %v265_v24 = vsub.f32 %v1201_v29, %v960_v36 }
  0xbe   :  { %v386_v19 = vadd.f32 %v385_v38, %v384_v45  ;;  %v315_v45 = vmul.f32 %v251_v53, %v251_v53 }
  0xbf   :  { %v329_v62 = vmul.f32 %v265_v24, %v265_v24 }
  0xc0   :  { %v388_v43 = vadd.f32 %v387_v40, %v386_v19  ;;  %v316_v40 = vmul.f32 %v252_v57, %v252_v57  ;;  %v413_v19 = vsel %vm78_vm0, %v314_v4, 0.0 }
  0xc2   :  { %v390_v3 = vadd.f32 %v389_v1, %v388_v43  ;;  %v415_v1 = vsel %vm78_vm0, %v315_v45, 0.0  ;;  %v417_v2 = vsel %vm78_vm0, %v316_v40, 0.0 }
  0xc4   :  { %v392_v7 = vadd.f32 %v391_v22, %v390_v3  ;;  %v319_v3 = vmul.f32 %v255_v14, %v255_v14  ;;  %v1205_v14 = vld [vmem:[#allocation8_spill] sm:$0xff] }
  0xc5   :  { %v269_v0 = vsub.f32 %v1205_v14, %v960_v36  ;;  %v476_v14 = vld [vmem:[%s1168_s1] sm:$0x1] }
  0xc6   :  { %v394_v51 = vadd.f32 %v393_v32, %v392_v7  ;;  %v320_v32 = vmul.f32 %v256_v20, %v256_v20  ;;  %v421_v7 = vsel %vm78_vm0, %v318_v17, 0.0  ;;  %v1206_v17 = vld [vmem:[#allocation9_spill] sm:$0xff] }
  0xc7   :  { %v333_v33 = vmul.f32 %v269_v0, %v269_v0 }
  0xc8   :  { %v396_v52 = vadd.f32 %v395_v49, %v394_v51  ;;  %v423_v49 = vsel %vm78_vm0, %v319_v3, 0.0  ;;  %v425_v23 = vsel %vm78_vm0, %v320_v32, 0.0 }
  0xca   :  { %v398_v63 = vadd.f32 %v397_v56, %v396_v52  ;;  %v323_v52 = vmul.f32 %v259_v41, %v259_v41 }
  0xcc   :  { %v400_v31 = vadd.f32 %v399_v10, %v398_v63  ;;  %v324_v10 = vmul.f32 %v260_v47, %v260_v47  ;;  %v429_v63 = vsel %vm78_vm0, %v322_v30, 0.0  ;;  %v1209_v47 = vld [vmem:[#allocation12_spill] sm:$0xff] }
  0xcd   :  { %v273_v30 = vsub.f32 %v1209_v47, %v960_v36 }
  0xce   :  { %v402_v5 = vadd.f32 %v401_v13, %v400_v31  ;;  %v325_v13 = vmul.f32 %v261_v54, %v261_v54  ;;  %v431_v31 = vsel %vm78_vm0, %v323_v52, 0.0  ;;  %v1210_v52 = vld [vmem:[#allocation13_spill] sm:$0xff] }
  0xcf   :  { %v337_v9 = vmul.f32 %v273_v30, %v273_v30 }
  0xd0   :  { %v404_v61 = vadd.f32 %v403_v58, %v402_v5  ;;  %v326_v58 = vmul.f32 %v262_v60, %v262_v60  ;;  %v433_v5 = vsel %vm78_vm0, %v324_v10, 0.0 }
  0xd1   :  { %v459_v29 = vsel %vm78_vm0, %v337_v9, 0.0 }
  0xd2   :  { %v406_v16 = vadd.f32 %v405_v34, %v404_v61  ;;  %v327_v34 = vmul.f32 %v263_v55, %v263_v55  ;;  %v435_v61 = vsel %vm78_vm0, %v325_v13, 0.0  ;;  %v437_v57 = vsel %vm78_vm0, %v326_v58, 0.0 }
  0xd4   :  { %v408_v38 = vadd.f32 %v407_v50, %v406_v16  ;;  %v266_v50 = vsub.f32 %v1202_v42, %v960_v36  ;;  %v328_v16 = vmul.f32 %v264_v15, %v264_v15  ;;  %v439_v45 = vsel %vm78_vm0, %v327_v34, 0.0 }
  0xd6   :  { %v410_v59 = vadd.f32 %v409_v37, %v408_v38  ;;  %v1203_v37 = vld [vmem:[#allocation6_spill] sm:$0xff]  ;;  %v330_v40 = vmul.f32 %v266_v50, %v266_v50 }
  0xd7   :  { %v267_v38 = vsub.f32 %v1203_v37, %v960_v36 }
  0xd8   :  { %v412_v12 = vadd.f32 %v411_v8, %v410_v59  ;;  %v1204_v59 = vld [vmem:[#allocation7_spill] sm:$0xff]  ;;  %v445_v27 = vsel %vm78_vm0, %v330_v40, 0.0 }
  0xd9   :  { %v268_v6 = vsub.f32 %v1204_v59, %v960_v36 }
  0xda   :  { %v414_v43 = vadd.f32 %v413_v19, %v412_v12  ;;  %v441_v19 = vsel %vm78_vm0, %v328_v16, 0.0 }
  0xdc   :  { %v416_v22 = vadd.f32 %v415_v1, %v414_v43  ;;  %v331_v1 = vmul.f32 %v267_v38, %v267_v38  ;;  %v443_v43 = vsel %vm78_vm0, %v329_v62, 0.0 }
  0xde   :  { %v418_v46 = vadd.f32 %v417_v2, %v416_v22  ;;  %v270_v2 = vsub.f32 %v1206_v17, %v960_v36  ;;  %v332_v22 = vmul.f32 %v268_v6, %v268_v6  ;;  %v447_v32 = vsel %vm78_vm0, %v331_v1, 0.0 }
  0xe0   :  { %v420_v26 = vadd.f32 %v419_v21, %v418_v46  ;;  %v1207_v21 = vld [vmem:[#allocation10_spill] sm:$0xff]  ;;  %v334_v25 = vmul.f32 %v270_v2, %v270_v2 }
  0xe1   :  { %v271_v46 = vsub.f32 %v1207_v21, %v960_v36 }
  0xe2   :  { %v422_v51 = vadd.f32 %v421_v7, %v420_v26  ;;  %v1208_v26 = vld [vmem:[#allocation11_spill] sm:$0xff]  ;;  %v453_v60 = vsel %vm78_vm0, %v334_v25, 0.0 }
  0xe3   :  { %v272_v41 = vsub.f32 %v1208_v26, %v960_v36 }
  0xe4   :  { %v424_v56 = vadd.f32 %v423_v49, %v422_v51  ;;  %v449_v49 = vsel %vm78_vm0, %v332_v22, 0.0 }
  0xe6   :  { %v426_v28 = vadd.f32 %v425_v23, %v424_v56  ;;  %v335_v23 = vmul.f32 %v271_v46, %v271_v46  ;;  %v451_v56 = vsel %vm78_vm0, %v333_v33, 0.0 }
  0xe8   :  { %v428_v39 = vadd.f32 %v427_v35, %v426_v28  ;;  %v274_v35 = vsub.f32 %v1210_v52, %v960_v36  ;;  %v336_v28 = vmul.f32 %v272_v41, %v272_v41  ;;  %v455_v55 = vsel %vm78_vm0, %v335_v23, 0.0 }
  0xea   :  { %v430_v44 = vadd.f32 %v429_v63, %v428_v39  ;;  %v1211_v63 = vld [vmem:[#allocation14_spill] sm:$0xff]  ;;  %v338_v18 = vmul.f32 %v274_v35, %v274_v35  ;;  %v457_v15 = vsel %vm78_vm0, %v336_v28, 0.0 }
  0xeb   :  { %v275_v39 = vsub.f32 %v1211_v63, %v960_v36 }
  0xec   :  { %v432_v48 = vadd.f32 %v431_v31, %v430_v44  ;;  %v1212_v31 = vld [vmem:[#allocation15_spill] sm:$0xff] }
  0xed   :  { %v276_v44 = vsub.f32 %v1212_v31, %v960_v36 }
  0xee   :  { %v434_v53 = vadd.f32 %v433_v5, %v432_v48  ;;  %v277_v5 = vsub.f32 %v956_v11, %v960_v36  ;;  %v339_v48 = vmul.f32 %v275_v39, %v275_v39 }
  0xef   :  { %v340_v34 = vmul.f32 %v276_v44, %v276_v44 }
  0xf0   :  { %v436_v4 = vadd.f32 %v435_v61, %v434_v53  ;;  %v461_v61 = vsel %vm78_vm0, %v338_v18, 0.0  ;;  %v341_v42 = vmul.f32 %v277_v5, %v277_v5  ;;  %v463_v50 = vsel %vm78_vm0, %v339_v48, 0.0 }
  0xf2   :  { %v438_v8 = vadd.f32 %v437_v57, %v436_v4  ;;  %v465_v57 = vsel %vm78_vm0, %v340_v34, 0.0  ;;  %v467_v37 = vsel %vm78_vm0, %v341_v42, 0.0 }
  0xf4   :  { %v440_v12 = vadd.f32 %v439_v45, %v438_v8 }
  0xf6   :  { %v442_v20 = vadd.f32 %v441_v19, %v440_v12 }
  0xf8   :  { %v444_v3 = vadd.f32 %v443_v43, %v442_v20  ;;  %v482_v43 = vld [vmem:[%s1169_s2] sm:$0x1] }
  0xfa   :  { %v446_v7 = vadd.f32 %v445_v27, %v444_v3 }
  0xfc   :  { %v448_v51 = vadd.f32 %v447_v32, %v446_v7 }
  0xfe   :  { %v450_v54 = vadd.f32 %v449_v49, %v448_v51 }
 0x100   :  { %v452_v10 = vadd.f32 %v451_v56, %v450_v54 }
 0x102   :  { %v454_v13 = vadd.f32 %v453_v60, %v452_v10 }
 0x104   :  { %v456_v58 = vadd.f32 %v455_v55, %v454_v13 }
 0x106   :  { %v458_v24 = vadd.f32 %v457_v15, %v456_v58 }
 0x108   :  { %v460_v53 = vadd.f32 %v459_v29, %v458_v24 }
 0x10a   :  { %v462_v16 = vadd.f32 %v461_v61, %v460_v53 }
 0x10c   :  { %v464_v4 = vadd.f32 %v463_v50, %v462_v16 }
 0x10e   :  { %v466_v38 = vadd.f32 %v465_v57, %v464_v4 }
 0x110   :  { %v468_v62 = vadd.f32 %v467_v37, %v466_v38 }
 0x112   :  { %v469_v11 = vrot.slane %v468_v62, 4 }
 0x114   :  { %v470_v45 = vadd.f32 %v469_v11, %v468_v62 }
 0x116   :  { %v471_v8 = vrot.slane %v470_v45, 2 }
 0x118   :  { %v472_v59 = vadd.f32 %v471_v8, %v470_v45 }
 0x11a   :  { %v473_v6 = vrot.slane %v472_v59, 1 }
 0x11c   :  { %v474_v40 = vadd.f32 %v473_v6, %v472_v59 }
 0x11e   :  { %v475_v19 = vmul.f32 0.001953125, %v474_v40 }
 0x120   :  { %v477_v12 = vadd.f32 1e-05, %v475_v19 }
 0x122   :  { %490 = vrsqrt.f32 %v477_v12 }
 0x12f   :  { %v491_v0 = vpop.eup %490 }
 0x130   :  { %v479_v1 = vmul.f32 %v491_v0, %v476_v14 }
 0x132   :  { %481 = vst.msk [vmem:[%s1170_s3] sm:$0x1] %vm480_vm1, %v479_v1  ;;  %v483_v20 = vmul.f32 %v479_v1, %v960_v36 }
 0x134   :  { %v484_v17 = vsub.f32 %v482_v43, %v483_v20 }
 0x136   :  { %485 = vst.msk [vmem:[%s1170_s3 + $0x1] sm:$0x1] %vm480_vm1, %v484_v17 }

// kernel: transformer_block.7
= control target key start
LH: loop header
LB: loop body
LE: loop exit
PB: predicated region body
PF: predicated region fallthrough
CT: control target
= control target key end

     0   :  { %s3643_s18 = smov 0   ;;  %s5565_s0 = inlined_call_operand.vmem [shape: f32[2,256,16], index: 0, kind: input, shape index: {}]   ;;  %s5566_s1 = inlined_call_operand.vmem [shape: f32[2,16], index: 1, kind: input, shape index: {}]   ;;  %s5567_s2 = inlined_call_operand.vmem [shape: f32[16,84], index: 2, kind: input, shape index: {}]   ;;  %s5568_s3 = inlined_call_operand.vmem [shape: f32[3,3,84], index: 3, kind: input, shape index: {}]   ;;  %s5569_s4 = inlined_call_operand.vmem [shape: f32[42,16], index: 4, kind: input, shape index: {}]   ;;  %s5570_s5 = inlined_call_operand.vmem [shape: f32[2,256,16], index: 5, kind: output, shape index: {}]  }
   0x1 LB: > { %s3131_s19 = sadd.s32 4294967295, %s3608_s18   ;;  %p3135_p0 = scmp.ge.s32.totalorder %s3608_s18, 1  ;;  %s3608_s18 = sphi %s3643_s18, %s15_s18  }
   0x2   : > { %p187_p1 = scmp.lt.s32.totalorder %s3608_s18, 3 }
   0x4   : > { %p188_p2 = pnand %p3135_p0, %p187_p1 }
   0x6   : > { %191 = sbr.rel (%p188_p2) target bundleno = 788 (0x314), region = 40 }
   0xb   : > { %v332_v0 = vld [vmem:[%s5567_s2 + $0x8] sm:$0xff]  ;;  %v331_v1 = vld [vmem:[%s5567_s2] sm:$0xff]  ;;  %p215_p3 = scmp.lt.s32.totalorder %s3131_s19, 1  ;;  %vm333_vm0 = vcmask 130048   ;;  %vm655_vm1 = vcmask 687104   ;;  %vm658_vm2 = vcmask 680960  }
   0xc   : > { %3298 = vmatprep.subr.mxu0 %v332_v0  ;;  %v3663_v2 = vld [vmem:[%s5566_s1] ss:$0 sm:$0xff]  ;;  %v3675_v3 = vld [vmem:[%s5566_s1 + $0x1] ss:$0 sm:$0xff]  ;;  %s3611_s28 = smov 86   ;;  %vm2783_vm3 = vcmask 1041408  }
   0xd   : > { %3299 = vmatpush3.msra.mxu0 %v332_v0  ;;  %s5823_s19 = smov (!%p215_p3, %s3131_s19), 1  ;;  %vm2686_vm8 = vcmask 343040  }
   0xe   : > { %3300 = vmatprep.subr.mxu0 %v331_v1  ;;  %s3224_s24 = sshll.u32 %s5823_s19, 8 }
   0xf   : > { %3301 = vmatpush3.msra.mxu0 %v331_v1  ;;  %s3670_s29 = scalar_lea.vmem %s5565_s0, %s3224_s24  ;;  %s5464_s16 = scalar_lea.vmem %s5570_s5, %s3224_s24 }
  0x10   : > { %v225_v4 = vld [vmem:[%s3670_s29] sm:$0xff]  ;;  %v226_v5 = vld [vmem:[%s3670_s29 + $0x8] sm:$0xff]  ;;  %v227_v6 = vld [vmem:[%s3670_s29 + $0x10] sm:$0xff] }
  0x11   : > { %v263_v7 = vmul.f32 %v3663_v2, %v225_v4  ;;  %v264_v8 = vmul.f32 %v3663_v2, %v226_v5  ;;  %v265_v9 = vmul.f32 %v3663_v2, %v227_v6  ;;  %v228_v10 = vld [vmem:[%s3670_s29 + $0x18] sm:$0xff]  ;;  %v229_v11 = vld [vmem:[%s3670_s29 + $0x20] sm:$0xff]  ;;  %v230_v17 = vld [vmem:[%s3670_s29 + $0x28] sm:$0xff] }
  0x12   : > { %v266_v12 = vmul.f32 %v3663_v2, %v228_v10  ;;  %v267_v16 = vmul.f32 %v3663_v2, %v229_v11  ;;  %v231_v18 = vld [vmem:[%s3670_s29 + $0x30] sm:$0xff]  ;;  %v268_v20 = vmul.f32 %v3663_v2, %v230_v17  ;;  %v232_v23 = vld [vmem:[%s3670_s29 + $0x38] sm:$0xff]  ;;  %v233_v24 = vld [vmem:[%s3670_s29 + $0x40] sm:$0xff] }
  0x13   : > { %v299_v13 = vadd.f32 %v3675_v3, %v263_v7  ;;  %v300_v14 = vadd.f32 %v3675_v3, %v264_v8  ;;  %v301_v15 = vadd.f32 %v3675_v3, %v265_v9  ;;  %v269_v22 = vmul.f32 %v3663_v2, %v231_v18  ;;  %v234_v29 = vld [vmem:[%s3670_s29 + $0x48] sm:$0xff]  ;;  %v235_v30 = vld [vmem:[%s3670_s29 + $0x50] sm:$0xff]  ;;  %v236_v35 = vld [vmem:[%s3670_s29 + $0x58] sm:$0xff] }
  0x14   : > { %v302_v19 = vadd.f32 %v3675_v3, %v266_v12  ;;  %v303_v21 = vadd.f32 %v3675_v3, %v267_v16  ;;  %v304_v25 = vadd.f32 %v3675_v3, %v268_v20  ;;  %v270_v26 = vmul.f32 %v3663_v2, %v232_v23  ;;  %v237_v36 = vld [vmem:[%s3670_s29 + $0x60] sm:$0xff]  ;;  %v238_v41 = vld [vmem:[%s3670_s29 + $0x68] sm:$0xff]  ;;  %v239_v42 = vld [vmem:[%s3670_s29 + $0x70] sm:$0xff] }
  0x15   : > { %3302 = vmatprep.mubr.msk.f32.mxu0 %vm333_vm0, %v299_v13  ;;  %v305_v27 = vadd.f32 %v3675_v3, %v269_v22  ;;  %v271_v28 = vmul.f32 %v3663_v2, %v233_v24  ;;  %v272_v32 = vmul.f32 %v3663_v2, %v234_v29  ;;  %v273_v34 = vmul.f32 %v3663_v2, %v235_v30  ;;  %v240_v47 = vld [vmem:[%s3670_s29 + $0x78] sm:$0xff]  ;;  %v241_v48 = vld [vmem:[%s3670_s29 + $0x80] sm:$0xff]  ;;  %v242_v53 = vld [vmem:[%s3670_s29 + $0x88] sm:$0xff] }
  0x16   : > { %3303 = vmatmul.mubr.msk.f32.vlgmr.msra.gmra.mxu0 %vm333_vm0, %v300_v14  ;;  %v306_v31 = vadd.f32 %v3675_v3, %v270_v26  ;;  %v274_v38 = vmul.f32 %v3663_v2, %v236_v35  ;;  %v275_v40 = vmul.f32 %v3663_v2, %v237_v36  ;;  %v276_v44 = vmul.f32 %v3663_v2, %v238_v41  ;;  %v243_v54 = vld [vmem:[%s3670_s29 + $0x90] sm:$0xff]  ;;  %v244_v59 = vld [vmem:[%s3670_s29 + $0x98] sm:$0xff]  ;;  %v245_v60 = vld [vmem:[%s3670_s29 + $0xa0] sm:$0xff] }
  0x17   : > { %3305 = vmatprep.mubr.msk.f32.mxu0 %vm333_vm0, %v301_v15  ;;  %v307_v33 = vadd.f32 %v3675_v3, %v271_v28  ;;  %v308_v37 = vadd.f32 %v3675_v3, %v272_v32  ;;  %v309_v39 = vadd.f32 %v3675_v3, %v273_v34  ;;  %v277_v46 = vmul.f32 %v3663_v2, %v239_v42  ;;  %v246_v1 = vld [vmem:[%s3670_s29 + $0xa8] sm:$0xff]  ;;  %v247_v4 = vld [vmem:[%s3670_s29 + $0xb0] sm:$0xff]  ;;  %v248_v9 = vld [vmem:[%s3670_s29 + $0xb8] sm:$0xff] }
  0x18   : > { %v310_v43 = vadd.f32 %v3675_v3, %v274_v38  ;;  %v311_v45 = vadd.f32 %v3675_v3, %v275_v40  ;;  %v312_v49 = vadd.f32 %v3675_v3, %v276_v44  ;;  %v278_v50 = vmul.f32 %v3663_v2, %v240_v47  ;;  %v249_v10 = vld [vmem:[%s3670_s29 + $0xc0] sm:$0xff]  ;;  %v250_v15 = vld [vmem:[%s3670_s29 + $0xc8] sm:$0xff]  ;;  %v251_v16 = vld [vmem:[%s3670_s29 + $0xd0] sm:$0xff] }
  0x19   : > { %v313_v51 = vadd.f32 %v3675_v3, %v277_v46  ;;  %v279_v52 = vmul.f32 %v3663_v2, %v241_v48  ;;  %v280_v56 = vmul.f32 %v3663_v2, %v242_v53  ;;  %v281_v58 = vmul.f32 %v3663_v2, %v243_v54  ;;  %v253_v22 = vld [vmem:[%s3670_s29 + $0xe0] sm:$0xff]  ;;  %v255_v28 = vld [vmem:[%s3670_s29 + $0xf0] sm:$0xff] }
  0x1a   : > { %3306 = vmatmul.mubr.msk.f32.gmra.mxu0 %vm333_vm0, %v302_v19  ;;  %v314_v55 = vadd.f32 %v3675_v3, %v278_v50  ;;  %v282_v62 = vmul.f32 %v3663_v2, %v244_v59  ;;  %v283_v0 = vmul.f32 %v3663_v2, %v245_v60  ;;  %v284_v6 = vmul.f32 %v3663_v2, %v246_v1  ;;  %v3866_v42 = vld [vmem:[%s5568_s3] ss:$0 sm:$0xff] }
  0x1b   : > { %3308 = vmatprep.mubr.msk.f32.mxu0 %vm333_vm0, %v303_v21  ;;  %v315_v57 = vadd.f32 %v3675_v3, %v279_v52  ;;  %v316_v61 = vadd.f32 %v3675_v3, %v280_v56  ;;  %v317_v63 = vadd.f32 %v3675_v3, %v281_v58  ;;  %v285_v8 = vmul.f32 %v3663_v2, %v247_v4  ;;  %v252_v21 = vld [vmem:[%s3670_s29 + $0xd8] sm:$0xff]  ;;  %v3880_v52 = vld [vmem:[%s5568_s3 + $0x2] ss:$0 sm:$0xff] }
  0x1c   : > { %v318_v5 = vadd.f32 %v3675_v3, %v282_v62  ;;  %v319_v7 = vadd.f32 %v3675_v3, %v283_v0  ;;  %v320_v11 = vadd.f32 %v3675_v3, %v284_v6  ;;  %v286_v12 = vmul.f32 %v3663_v2, %v248_v9  ;;  %v3889_v62 = vld [vmem:[%s5568_s3 + $0x4] ss:$0 sm:$0xff]  ;;  %v3899_v0 = vld [vmem:[%s5568_s3 + $0x6] ss:$0 sm:$0xff] }
  0x1d   : > { %v321_v13 = vadd.f32 %v3675_v3, %v285_v8  ;;  %v287_v14 = vmul.f32 %v3663_v2, %v249_v10  ;;  %v288_v18 = vmul.f32 %v3663_v2, %v250_v15  ;;  %v289_v20 = vmul.f32 %v3663_v2, %v251_v16 }
  0x1e   : > { %3309 = vmatmul.mubr.msk.f32.gmra.mxu0 %vm333_vm0, %v304_v25  ;;  %v322_v17 = vadd.f32 %v3675_v3, %v286_v12  ;;  %v290_v24 = vmul.f32 %v3663_v2, %v252_v21  ;;  %v291_v26 = vmul.f32 %v3663_v2, %v253_v22  ;;  %v293_v32 = vmul.f32 %v3663_v2, %v255_v28  ;;  %v3929_v28 = vld [vmem:[%s5568_s3 + $0x8] ss:$0 sm:$0xff] }
  0x1f   : > { %3311 = vmatprep.mubr.msk.f32.mxu0 %vm333_vm0, %v305_v27  ;;  %v323_v19 = vadd.f32 %v3675_v3, %v287_v14  ;;  %v324_v23 = vadd.f32 %v3675_v3, %v288_v18  ;;  %v325_v25 = vadd.f32 %v3675_v3, %v289_v20  ;;  %v254_v27 = vld [vmem:[%s3670_s29 + $0xe8] sm:$0xff]  ;;  %v3610_v38 = vmov 0.0  }
  0x20   : > { %v326_v29 = vadd.f32 %v3675_v3, %v290_v24  ;;  %v292_v30 = vmul.f32 %v3663_v2, %v254_v27  ;;  %v329_v36 = vadd.f32 %v3675_v3, %v293_v32  ;;  %661 = vst.msk [vmem:[#allocation2 + $0x20] sm:$0xff] %vm655_vm1, %v3610_v38  ;;  %656 = vst.msk [vmem:[#allocation2] sm:$0xff] %vm655_vm1, %v3610_v38  ;;  %v3914_v18 = vld [vmem:[%s5568_s3 + $0x9] ss:$0 sm:$0xff] }
  0x21   : > { %662 = vst.msk [vmem:[#allocation2 + $0x28] sm:$0x3] %vm658_vm2, %v3610_v38  ;;  %659 = vst.msk [vmem:[#allocation2 + $0x10] sm:$0x3] %vm658_vm2, %v3610_v38 }
  0x22   : > { %3312 = vmatmul.mubr.msk.f32.gmra.mxu0 %vm333_vm0, %v306_v31  ;;  %v327_v31 = vadd.f32 %v3675_v3, %v291_v26  ;;  %v328_v34 = vadd.f32 %v3675_v3, %v292_v30  ;;  %657 = vst.msk [vmem:[#allocation2 + $0x8] sm:$0xff] %vm655_vm1, %v3610_v38  ;;  %660 = vst.msk [vmem:[#allocation2 + $0x18] sm:$0xff] %vm655_vm1, %v3610_v38 }
  0x23   : > { %3314 = vmatprep.mubr.msk.f32.mxu0 %vm333_vm0, %v307_v33  ;;  %v256_v33 = vld [vmem:[%s3670_s29 + $0xf8] sm:$0xff]  ;;  %663 = vst.msk [vmem:[#allocation2 + $0x30] sm:$0xff] %vm655_vm1, %v3610_v38  ;;  %664 = vst.msk [vmem:[#allocation2 + $0x38] sm:$0xff] %vm655_vm1, %v3610_v38 }
  0x24   : > { %v294_v35 = vmul.f32 %v3663_v2, %v256_v33  ;;  %665 = vst.msk [vmem:[#allocation2 + $0x40] sm:$0x3] %vm658_vm2, %v3610_v38  ;;  %668 = vst.msk [vmem:[#allocation2 + $0x58] sm:$0x3] %vm658_vm2, %v3610_v38 }
  0x25   : > { %666 = vst.msk [vmem:[#allocation2 + $0x48] sm:$0xff] %vm655_vm1, %v3610_v38  ;;  %667 = vst.msk [vmem:[#allocation2 + $0x50] sm:$0xff] %vm655_vm1, %v3610_v38 }
  0x26   : > { %3315 = vmatmul.mubr.msk.f32.gmra.mxu0 %vm333_vm0, %v308_v37  ;;  %v330_v37 = vadd.f32 %v3675_v3, %v294_v35  ;;  %669 = vst.msk [vmem:[#allocation2 + $0x60] sm:$0xff] %vm655_vm1, %v3610_v38  ;;  %670 = vst.msk [vmem:[#allocation2 + $0x68] sm:$0xff] %vm655_vm1, %v3610_v38 }
  0x27   : > { %3317 = vmatprep.mubr.msk.f32.mxu0 %vm333_vm0, %v309_v39  ;;  %671 = vst.msk [vmem:[#allocation2 + $0x70] sm:$0x3] %vm658_vm2, %v3610_v38  ;;  %674 = vst.msk [vmem:[#allocation2 + $0x88] sm:$0x3] %vm658_vm2, %v3610_v38 }
  0x28   : > { %672 = vst.msk [vmem:[#allocation2 + $0x78] sm:$0xff] %vm655_vm1, %v3610_v38  ;;  %673 = vst.msk [vmem:[#allocation2 + $0x80] sm:$0xff] %vm655_vm1, %v3610_v38 }
  0x29   : > { %675 = vst.msk [vmem:[#allocation2 + $0x90] sm:$0xff] %vm655_vm1, %v3610_v38  ;;  %676 = vst.msk [vmem:[#allocation2 + $0x98] sm:$0xff] %vm655_vm1, %v3610_v38 }
  0x2a   : > { %3318 = vmatmul.mubr.msk.f32.gmra.mxu0 %vm333_vm0, %v310_v43  ;;  %677 = vst.msk [vmem:[#allocation2 + $0xa0] sm:$0x3] %vm658_vm2, %v3610_v38  ;;  %680 = vst.msk [vmem:[#allocation2 + $0xb8] sm:$0x3] %vm658_vm2, %v3610_v38  ;;  %v3872_v43 = vld [vmem:[%s5568_s3 + $0x1] ss:$0 sm:$0xff] }
  0x2b   : > { %3320 = vmatprep.mubr.msk.f32.mxu0 %vm333_vm0, %v311_v45  ;;  %678 = vst.msk [vmem:[#allocation2 + $0xa8] sm:$0xff] %vm655_vm1, %v3610_v38  ;;  %679 = vst.msk [vmem:[#allocation2 + $0xb0] sm:$0xff] %vm655_vm1, %v3610_v38  ;;  %v745_v45 = vld [vmem:[#allocation2] sm:$0xff] }
  0x2c   : > { %681 = vst.msk [vmem:[#allocation2 + $0xc0] sm:$0xff] %vm655_vm1, %v3610_v38  ;;  %682 = vst.msk [vmem:[#allocation2 + $0xc8] sm:$0xff] %vm655_vm1, %v3610_v38  ;;  %v3902_v1 = vmul.f32 %v3866_v42, %v745_v45 }
  0x2d   : > { %683 = vst.msk [vmem:[#allocation2 + $0xd0] sm:$0x3] %vm658_vm2, %v3610_v38  ;;  %686 = vst.msk [vmem:[#allocation2 + $0xe8] sm:$0x3] %vm658_vm2, %v3610_v38 }
  0x2e   : > { %3321 = vmatmul.mubr.msk.f32.gmra.mxu0 %vm333_vm0, %v312_v49  ;;  %684 = vst.msk [vmem:[#allocation2 + $0xd8] sm:$0xff] %vm655_vm1, %v3610_v38  ;;  %685 = vst.msk [vmem:[#allocation2 + $0xe0] sm:$0xff] %vm655_vm1, %v3610_v38 }
  0x2f   : > { %3323 = vmatprep.mubr.msk.f32.mxu0 %vm333_vm0, %v313_v51  ;;  %687 = vst.msk [vmem:[#allocation2 + $0xf0] sm:$0xff] %vm655_vm1, %v3610_v38  ;;  %688 = vst.msk [vmem:[#allocation2 + $0xf8] sm:$0xff] %vm655_vm1, %v3610_v38 }
  0x30   : > { %689 = vst.msk [vmem:[#allocation2 + $0x100] sm:$0x3] %vm658_vm2, %v3610_v38  ;;  %692 = vst.msk [vmem:[#allocation2 + $0x118] sm:$0x3] %vm658_vm2, %v3610_v38 }
  0x31   : > { %690 = vst.msk [vmem:[#allocation2 + $0x108] sm:$0xff] %vm655_vm1, %v3610_v38  ;;  %691 = vst.msk [vmem:[#allocation2 + $0x110] sm:$0xff] %vm655_vm1, %v3610_v38 }
  0x32   : > { %3324 = vmatmul.mubr.msk.f32.gmra.mxu0 %vm333_vm0, %v314_v55  ;;  %693 = vst.msk [vmem:[#allocation2 + $0x120] sm:$0xff] %vm655_vm1, %v3610_v38  ;;  %694 = vst.msk [vmem:[#allocation2 + $0x128] sm:$0xff] %vm655_vm1, %v3610_v38 }
  0x33   : > { %3326 = vmatprep.mubr.msk.f32.mxu0 %vm333_vm0, %v315_v57  ;;  %695 = vst.msk [vmem:[#allocation2 + $0x130] sm:$0x3] %vm658_vm2, %v3610_v38  ;;  %698 = vst.msk [vmem:[#allocation2 + $0x148] sm:$0x3] %vm658_vm2, %v3610_v38 }
  0x34   : > { %696 = vst.msk [vmem:[#allocation2 + $0x138] sm:$0xff] %vm655_vm1, %v3610_v38  ;;  %697 = vst.msk [vmem:[#allocation2 + $0x140] sm:$0xff] %vm655_vm1, %v3610_v38 }
  0x35   : > { %699 = vst.msk [vmem:[#allocation2 + $0x150] sm:$0xff] %vm655_vm1, %v3610_v38  ;;  %700 = vst.msk [vmem:[#allocation2 + $0x158] sm:$0xff] %vm655_vm1, %v3610_v38 }
  0x36   : > { %3327 = vmatmul.mubr.msk.f32.gmra.mxu0 %vm333_vm0, %v316_v61  ;;  %701 = vst.msk [vmem:[#allocation2 + $0x160] sm:$0x3] %vm658_vm2, %v3610_v38  ;;  %704 = vst.msk [vmem:[#allocation2 + $0x178] sm:$0x3] %vm658_vm2, %v3610_v38 }
  0x37   : > { %3329 = vmatprep.mubr.msk.f32.mxu0 %vm333_vm0, %v317_v63  ;;  %702 = vst.msk [vmem:[#allocation2 + $0x168] sm:$0xff] %vm655_vm1, %v3610_v38  ;;  %703 = vst.msk [vmem:[#allocation2 + $0x170] sm:$0xff] %vm655_vm1, %v3610_v38  ;;  %v3894_v63 = vld [vmem:[%s5568_s3 + $0x5] ss:$0 sm:$0xff] }
  0x38   : > { %705 = vst.msk [vmem:[#allocation2 + $0x180] sm:$0xff] %vm655_vm1, %v3610_v38  ;;  %706 = vst.msk [vmem:[#allocation2 + $0x188] sm:$0xff] %vm655_vm1, %v3610_v38 }
  0x39   : > { %707 = vst.msk [vmem:[#allocation2 + $0x190] sm:$0x3] %vm658_vm2, %v3610_v38  ;;  %710 = vst.msk [vmem:[#allocation2 + $0x1a8] sm:$0x3] %vm658_vm2, %v3610_v38 }
  0x3a   : > { %3330 = vmatmul.mubr.msk.f32.gmra.mxu0 %vm333_vm0, %v318_v5  ;;  %708 = vst.msk [vmem:[#allocation2 + $0x198] sm:$0xff] %vm655_vm1, %v3610_v38  ;;  %709 = vst.msk [vmem:[#allocation2 + $0x1a0] sm:$0xff] %vm655_vm1, %v3610_v38 }
  0x3b   : > { %3332 = vmatprep.mubr.msk.f32.mxu0 %vm333_vm0, %v319_v7 }
  0x3e   : > { %3333 = vmatmul.mubr.msk.f32.gmra.mxu0 %vm333_vm0, %v320_v11 }
  0x3f   : > { %3335 = vmatprep.mubr.msk.f32.mxu0 %vm333_vm0, %v321_v13 }
  0x42   : > { %3336 = vmatmul.mubr.msk.f32.gmra.mxu0 %vm333_vm0, %v322_v17 }
  0x43   : > { %3338 = vmatprep.mubr.msk.f32.mxu0 %vm333_vm0, %v323_v19 }
  0x46   : > { %3339 = vmatmul.mubr.msk.f32.gmra.mxu0 %vm333_vm0, %v324_v23 }
  0x47   : > { %3341 = vmatprep.mubr.msk.f32.mxu0 %vm333_vm0, %v325_v25 }
  0x4a   : > { %3342 = vmatmul.mubr.msk.f32.gmra.mxu0 %vm333_vm0, %v326_v29  ;;  %v3934_v29 = vld [vmem:[%s5568_s3 + $0xa] ss:$0 sm:$0xff] }
  0x4b   : > { %3344 = vmatprep.mubr.msk.f32.mxu0 %vm333_vm0, %v327_v31 }
  0x4e   : > { %3345 = vmatmul.mubr.msk.f32.gmra.mxu0 %vm333_vm0, %v328_v34 }
  0x4f   : > { %3347 = vmatprep.mubr.msk.f32.mxu0 %vm333_vm0, %v329_v36 }
  0x52   : > { %3348 = vmatmul.mubr.msk.f32.gmra.mxu0 %vm333_vm0, %v330_v37 }
  0xd6   : > { %v3304_v2 = vpop.f32.mrf.mxu0 }
  0xd7   : > { %713 = vst.msk [vmem:[#allocation2 + $0x21] sm:$0xff] %vm655_vm1, %v3304_v2 }
  0xd8   : > { %v496_v3 = vpop.f32.mrf.mxu0 }
  0xd9   : > { %712 = vst.msk [vmem:[#allocation2 + $0x19] sm:$0xff] %vm655_vm1, %v496_v3 }
  0xda   : > { %v3307_v39 = vpop.f32.mrf.mxu0 }
  0xdb   : > { %715 = vst.msk [vmem:[#allocation2 + $0x39] sm:$0xff] %vm655_vm1, %v3307_v39 }
  0xdc   : > { %v506_v40 = vpop.f32.mrf.mxu0 }
  0xdd   : > { %714 = vst.msk [vmem:[#allocation2 + $0x31] sm:$0xff] %vm655_vm1, %v506_v40 }
  0xde   : > { %v3310_v41 = vpop.f32.mrf.mxu0  ;;  %v849_v44 = vld [vmem:[#allocation2 + $0x21] sm:$0xff] }
  0xdf   : > { %717 = vst.msk [vmem:[#allocation2 + $0x51] sm:$0xff] %vm655_vm1, %v3310_v41  ;;  %v950_v54 = vld [vmem:[#allocation2 + $0x22] sm:$0xff]  ;;  %v885_v57 = vmul.f32 %v3872_v43, %v849_v44 }
  0xe0   : > { %v516_v46 = vpop.f32.mrf.mxu0  ;;  %v747_v47 = vld [vmem:[#allocation2 + $0x18] sm:$0xff]  ;;  %v748_v53 = vld [vmem:[#allocation2 + $0x20] sm:$0xff]  ;;  %v986_v9 = vmul.f32 %v3880_v52, %v950_v54 }
  0xe1   : > { %v848_v48 = vld [vmem:[#allocation2 + $0x19] sm:$0xff]  ;;  %716 = vst.msk [vmem:[#allocation2 + $0x49] sm:$0xff] %vm655_vm1, %v516_v46  ;;  %v783_v50 = vmul.f32 %v3866_v42, %v747_v47  ;;  %v784_v56 = vmul.f32 %v3866_v42, %v748_v53 }
  0xe2   : > { %v949_v49 = vld [vmem:[#allocation2 + $0x1a] sm:$0xff]  ;;  %v884_v51 = vmul.f32 %v3872_v43, %v848_v48  ;;  %v3313_v55 = vpop.f32.mrf.mxu0 }
  0xe3   : > { %v1153_v58 = vld [vmem:[#allocation2 + $0x39] sm:$0xff]  ;;  %719 = vst.msk [vmem:[#allocation2 + $0x69] sm:$0xff] %vm655_vm1, %v3313_v55  ;;  %v985_v61 = vmul.f32 %v3880_v52, %v949_v49  ;;  %v917_v8 = vadd.f32 %v885_v57, %v784_v56 }
  0xe4   : > { %v1254_v59 = vld [vmem:[#allocation2 + $0x3a] sm:$0xff]  ;;  %v916_v60 = vadd.f32 %v884_v51, %v783_v50  ;;  %v526_v4 = vpop.f32.mrf.mxu0  ;;  %v1051_v5 = vld [vmem:[#allocation2 + $0x30] sm:$0xff]  ;;  %v1189_v10 = vmul.f32 %v3894_v63, %v1153_v58  ;;  %v887_v15 = vmul.f32 %v3872_v43, %v1153_v58 }
  0xe5   : > { %v1152_v6 = vld [vmem:[#allocation2 + $0x31] sm:$0xff]  ;;  %v1290_v11 = vmul.f32 %v3899_v0, %v1254_v59  ;;  %718 = vst.msk [vmem:[#allocation2 + $0x61] sm:$0xff] %vm655_vm1, %v526_v4  ;;  %v1087_v13 = vmul.f32 %v3889_v62, %v1051_v5  ;;  %v988_v16 = vmul.f32 %v3880_v52, %v1254_v59  ;;  %v1018_v19 = vadd.f32 %v986_v9, %v917_v8 }
  0xe6   : > { %v1253_v7 = vld [vmem:[#allocation2 + $0x32] sm:$0xff]  ;;  %v1017_v12 = vadd.f32 %v985_v61, %v916_v60  ;;  %v3316_v17 = vpop.f32.mrf.mxu0  ;;  %v785_v23 = vmul.f32 %v3866_v42, %v1051_v5  ;;  %v886_v24 = vmul.f32 %v3872_v43, %v1152_v6  ;;  %v1188_v26 = vmul.f32 %v3894_v63, %v1152_v6 }
  0xe7   : > { %v1052_v14 = vld [vmem:[#allocation2 + $0x38] sm:$0xff]  ;;  %721 = vst.msk [vmem:[#allocation2 + $0x81] sm:$0xff] %vm655_vm1, %v3316_v17  ;;  %v1289_v27 = vmul.f32 %v3899_v0, %v1253_v7  ;;  %v987_v37 = vmul.f32 %v3880_v52, %v1253_v7 }
  0xe8   : > { %v1088_v20 = vmul.f32 %v3889_v62, %v1052_v14  ;;  %v3917_v21 = vld [vmem:[#allocation2 + $0x51] sm:$0xff]  ;;  %v1119_v25 = vadd.f32 %v1087_v13, %v1017_v12  ;;  %v536_v31 = vpop.f32.mrf.mxu0  ;;  %v1356_v32 = vld [vmem:[#allocation2 + $0x48] sm:$0xff]  ;;  %v918_v36 = vadd.f32 %v886_v24, %v785_v23  ;;  %v786_v38 = vmul.f32 %v3866_v42, %v1052_v14 }
  0xe9   : > { %v3919_v22 = vld [vmem:[#allocation2 + $0x52] sm:$0xff]  ;;  %v1494_v30 = vmul.f32 %v3914_v18, %v3917_v21  ;;  %v1457_v33 = vld [vmem:[#allocation2 + $0x49] sm:$0xff]  ;;  %720 = vst.msk [vmem:[#allocation2 + $0x79] sm:$0xff] %vm655_vm1, %v536_v31  ;;  %v1392_v3 = vmul.f32 %v3929_v28, %v1356_v32  ;;  %v1191_v41 = vmul.f32 %v3894_v63, %v3917_v21  ;;  %v1089_v48 = vmul.f32 %v3889_v62, %v1356_v32 }
  0xea   : > { %v1558_v34 = vld [vmem:[#allocation2 + $0x4a] sm:$0xff]  ;;  %v1120_v35 = vadd.f32 %v1088_v20, %v1018_v19  ;;  %v1220_v2 = vadd.f32 %v1188_v26, %v1119_v25  ;;  %v1595_v40 = vmul.f32 %v3934_v29, %v3919_v22  ;;  %v3319_v44 = vpop.f32.mrf.mxu0  ;;  %v1493_v45 = vmul.f32 %v3914_v18, %v1457_v33 }
  0xeb   : > { %v3942_v39 = vld [vmem:[#allocation2 + $0x50] sm:$0xff]  ;;  %v1019_v47 = vadd.f32 %v987_v37, %v918_v36  ;;  %723 = vst.msk [vmem:[#allocation2 + $0x99] sm:$0xff] %vm655_vm1, %v3319_v44  ;;  %v1594_v50 = vmul.f32 %v3934_v29, %v1558_v34  ;;  %v919_v53 = vadd.f32 %v887_v15, %v786_v38  ;;  %v1190_v57 = vmul.f32 %v3894_v63, %v1457_v33 }
  0xec   : > { %v1221_v46 = vadd.f32 %v1189_v10, %v1120_v35  ;;  %v1321_v49 = vadd.f32 %v1289_v27, %v1220_v2  ;;  %v1393_v51 = vmul.f32 %v3929_v28, %v3942_v39  ;;  %v546_v54 = vpop.f32.mrf.mxu0  ;;  %v3955_v58 = vld [vmem:[#allocation2 + $0x60] sm:$0xff]  ;;  %v1090_v61 = vmul.f32 %v3889_v62, %v3942_v39  ;;  %v3969_v8 = vld [vmem:[#allocation2 + $0x68] sm:$0xff] }
  0xed   : > { %v1121_v56 = vadd.f32 %v1089_v48, %v1019_v47  ;;  %v3957_v59 = vld [vmem:[#allocation2 + $0x61] sm:$0xff]  ;;  %722 = vst.msk [vmem:[#allocation2 + $0x91] sm:$0xff] %vm655_vm1, %v546_v54  ;;  %v1291_v5 = vmul.f32 %v3899_v0, %v1558_v34  ;;  %v1394_v6 = vmul.f32 %v3929_v28, %v3955_v58  ;;  %v1292_v7 = vmul.f32 %v3899_v0, %v3919_v22  ;;  %v3973_v14 = vld [vmem:[#allocation2 + $0x69] sm:$0xff] }
  0xee   : > { %v1322_v55 = vadd.f32 %v1290_v11, %v1221_v46  ;;  %v3959_v60 = vld [vmem:[#allocation2 + $0x62] sm:$0xff]  ;;  %v1424_v4 = vadd.f32 %v1392_v3, %v1321_v49  ;;  %v3322_v9 = vpop.f32.mrf.mxu0  ;;  %v1495_v12 = vmul.f32 %v3914_v18, %v3957_v59  ;;  %v1020_v13 = vadd.f32 %v988_v16, %v919_v53  ;;  %v3981_v27 = vld [vmem:[#allocation2 + $0x6a] sm:$0xff] }
  0xef   : > { %v1222_v11 = vadd.f32 %v1190_v57, %v1121_v56  ;;  %725 = vst.msk [vmem:[#allocation2 + $0xb1] sm:$0xff] %vm655_vm1, %v3322_v9  ;;  %v1596_v17 = vmul.f32 %v3934_v29, %v3959_v60  ;;  %v1395_v19 = vmul.f32 %v3929_v28, %v3969_v8  ;;  %v787_v20 = vmul.f32 %v3866_v42, %v1356_v32 }
  0xf0   : > { %v1425_v10 = vadd.f32 %v1393_v51, %v1322_v55  ;;  %v1525_v15 = vadd.f32 %v1493_v45, %v1424_v4  ;;  %v556_v23 = vpop.f32.mrf.mxu0  ;;  %v1122_v26 = vadd.f32 %v1090_v61, %v1020_v13  ;;  %v888_v16 = vmul.f32 %v3872_v43, %v1457_v33  ;;  %v4009_v49 = vld [vmem:[#allocation2 + $0x78] sm:$0xff]  ;;  %v846_v13 = vld [vmem:[#allocation2 + $0x1] sm:$0xff] }
  0xf1   : > { %v1323_v25 = vadd.f32 %v1291_v5, %v1222_v11  ;;  %724 = vst.msk [vmem:[#allocation2 + $0xa9] sm:$0xff] %vm655_vm1, %v556_v23  ;;  %v1496_v35 = vmul.f32 %v3914_v18, %v3973_v14  ;;  %v989_v36 = vmul.f32 %v3880_v52, %v1558_v34  ;;  %v1091_v32 = vmul.f32 %v3889_v62, %v3955_v58 }
  0xf2   : > { %v1526_v24 = vadd.f32 %v1494_v30, %v1425_v10  ;;  %v3985_v31 = vadd.f32 %v1594_v50, %v1525_v15  ;;  %v3325_v37 = vpop.f32.mrf.mxu0  ;;  %v1223_v2 = vadd.f32 %v1191_v41, %v1122_v26  ;;  %v920_v3 = vadd.f32 %v888_v16, %v787_v20 }
  0xf3   : > { %v1426_v38 = vadd.f32 %v1394_v6, %v1323_v25  ;;  %727 = vst.msk [vmem:[#allocation2 + $0xc9] sm:$0xff] %vm655_vm1, %v3325_v37  ;;  %v1597_v34 = vmul.f32 %v3934_v29, %v3981_v27  ;;  %v1192_v44 = vmul.f32 %v3894_v63, %v3957_v59  ;;  %v1396_v51 = vmul.f32 %v3929_v28, %v4009_v49 }
  0xf4   : > { %v3992_v30 = vadd.f32 %v1595_v40, %v1526_v24  ;;  %2556 = vrot.lane.b32.xlu0 %v3985_v31, %s3611_s28  ;;  %v3998_v33 = vmul.f32 0.70710677, %v3985_v31  ;;  %v1293_v40 = vmul.f32 %v3899_v0, %v3959_v60  ;;  %v566_v41 = vpop.f32.mrf.mxu0  ;;  %v1324_v47 = vadd.f32 %v1292_v7, %v1223_v2 }
  0xf5   : > { %v1527_v46 = vadd.f32 %v1495_v12, %v1426_v38  ;;  %v1021_v48 = vadd.f32 %v989_v36, %v920_v3  ;;  %726 = vst.msk [vmem:[#allocation2 + $0xc1] sm:$0xff] %vm655_vm1, %v566_v41  ;;  %v788_v53 = vmul.f32 %v3866_v42, %v3942_v39  ;;  %v889_v54 = vmul.f32 %v3872_v43, %v3917_v21 }
  0xf6   : > { %v4007_v45 = vmul.f32 0.70710677, %v3992_v30  ;;  %v1786_v50 = vand.u32 2147483647, %v3998_v33  ;;  %v3328_v55 = vpop.f32.mrf.mxu0  ;;  %v1427_v61 = vadd.f32 %v1395_v19, %v1324_v47  ;;  %v990_v39 = vmul.f32 %v3880_v52, %v3919_v22 }
  0xf7   : > { %v4020_v57 = vadd.f32 %v1596_v17, %v1527_v46  ;;  %v1123_v4 = vadd.f32 %v1091_v32, %v1021_v48  ;;  %729 = vst.msk [vmem:[#allocation2 + $0xe1] sm:$0xff] %vm655_vm1, %v3328_v55  ;;  %v921_v7 = vadd.f32 %v889_v54, %v788_v53  ;;  %v4037_v32 = vld [vmem:[#allocation2 + $0x79] sm:$0xff]  ;;  %v4042_v37 = vmul.f32 %v3872_v43, %v846_v13  ;;  %v4069_v13 = vld [vmem:[#allocation2 + $0x81] sm:$0xff] }
  0xf8   : > { %v1787_v56 = vand.u32 2147483647, %v4007_v45  ;;  %v1818_v5 = vmul.f32 0.3275911, %v1786_v50  ;;  %v2234_v6 = vsub.f32 0.0, %v1786_v50  ;;  %2558 = vrot.lane.b32.xlu0 %v3992_v30, %s3611_s28  ;;  %v576_v11 = vpop.f32.mrf.mxu0  ;;  %v1528_v12 = vadd.f32 %v1496_v35, %v1427_v61 }
  0xf9   : > { %2560 = vrot.lane.b32.xlu1 %v4020_v57, %s3611_s28  ;;  %v4030_v10 = vmul.f32 0.70710677, %v4020_v57  ;;  %728 = vst.msk [vmem:[#allocation2 + $0xd9] sm:$0xff] %vm655_vm1, %v576_v11  ;;  %v1224_v19 = vadd.f32 %v1192_v44, %v1123_v4  ;;  %v1022_v20 = vadd.f32 %v990_v39, %v921_v7  ;;  %v1092_v35 = vmul.f32 %v3889_v62, %v3969_v8  ;;  %v4048_v44 = vld [vmem:[#allocation2 + $0x7a] sm:$0xff] }
  0xfa   : > { %v1819_v9 = vmul.f32 0.3275911, %v1787_v56  ;;  %v2235_v21 = vsub.f32 0.0, %v1787_v56  ;;  %v1850_v15 = vadd.f32 1.0, %v1818_v5  ;;  %v2266_v17 = vmul.f32 %v2234_v6, %v1786_v50  ;;  %v3331_v25 = vpop.f32.mrf.mxu0 }
  0xfb   : > { %v1788_v22 = vand.u32 2147483647, %v4030_v10  ;;  %v4034_v26 = vadd.f32 %v1597_v34, %v1528_v12  ;;  %731 = vst.msk [vmem:[#allocation2 + $0xf9] sm:$0xff] %vm655_vm1, %v3331_v25  ;;  %v1325_v36 = vadd.f32 %v1293_v40, %v1224_v19  ;;  %v1497_v34 = vmul.f32 %v3914_v18, %v4037_v32 }
  0xfc   : > { %v1851_v23 = vadd.f32 1.0, %v1819_v9  ;;  %v2267_v24 = vmul.f32 %v2235_v21, %v1787_v56  ;;  %v2300_v16 = vmul.f32 1.442695, %v2266_v17  ;;  %v586_v40 = vpop.f32.mrf.mxu0  ;;  %3433 = vrcp.f32 %v1850_v15  ;;  %v4071_v15 = vld [vmem:[#allocation2 + $0x82] sm:$0xff] }
  0xfd   : > { %5648 = vst [vmem:[#allocation3_spill] sm:$0xff] %v4034_v26  ;;  %v1820_v2 = vmul.f32 0.3275911, %v1788_v22  ;;  %v2236_v3 = vsub.f32 0.0, %v1788_v22  ;;  %2562 = vrot.lane.b32.xlu1 %v4034_v26, %s3611_s28  ;;  %v4051_v41 = vmul.f32 0.70710677, %v4034_v26  ;;  %v1428_v46 = vadd.f32 %v1396_v51, %v1325_v36 }
  0xfe   : > { %v2302_v38 = vmul.f32 1.442695, %v2267_v24  ;;  %730 = vst.msk [vmem:[#allocation2 + $0xf1] sm:$0xff] %vm655_vm1, %v586_v40  ;;  %v1124_v47 = vadd.f32 %v1092_v35, %v1022_v20  ;;  %3435 = vrcp.f32 %v1851_v23  ;;  %v3334_v53 = vpop.f32.mrf.mxu0  ;;  %v1193_v54 = vmul.f32 %v3894_v63, %v3973_v14  ;;  %v4060_v51 = vld [vmem:[#allocation2 + $0x80] sm:$0xff] }
  0xff   : > { %v1852_v48 = vadd.f32 1.0, %v1820_v2  ;;  %v2268_v50 = vmul.f32 %v2236_v3, %v1788_v22  ;;  %3437 = vpow2.f32 %v2300_v16  ;;  %v1789_v55 = vand.u32 2147483647, %v4051_v41  ;;  %733 = vst.msk [vmem:[#allocation2 + $0x111] sm:$0xff] %vm655_vm1, %v3334_v53 }
 0x100   : > { %v1529_v56 = vadd.f32 %v1497_v34, %v1428_v46  ;;  %v1598_v61 = vmul.f32 %v3934_v29, %v4048_v44  ;;  %3439 = vpow2.f32 %v2302_v38  ;;  %v1225_v4 = vadd.f32 %v1193_v54, %v1124_v47  ;;  %v596_v7 = vpop.f32.mrf.mxu0 }
 0x101   : > { %v1294_v5 = vmul.f32 %v3899_v0, %v3981_v27  ;;  %v1397_v6 = vmul.f32 %v3929_v28, %v4060_v51  ;;  %v2304_v39 = vmul.f32 1.442695, %v2268_v50  ;;  %v1821_v9 = vmul.f32 0.3275911, %v1789_v55  ;;  %732 = vst.msk [vmem:[#allocation2 + $0x109] sm:$0xff] %vm655_vm1, %v596_v7 }
 0x102   : > { %v2237_v21 = vsub.f32 0.0, %v1789_v55  ;;  %v4066_v11 = vadd.f32 %v1598_v61, %v1529_v56  ;;  %3441 = vrcp.f32 %v1852_v48  ;;  %v789_v17 = vmul.f32 %v3866_v42, %v3955_v58  ;;  %v3337_v20 = vpop.f32.mrf.mxu0  ;;  %v4104_v61 = vld [vmem:[#allocation2 + $0x92] sm:$0xff] }
 0x103   : > { %v1326_v12 = vadd.f32 %v1294_v5, %v1225_v4  ;;  %v890_v19 = vmul.f32 %v3872_v43, %v3957_v59  ;;  %v1853_v23 = vadd.f32 1.0, %v1821_v9  ;;  %v1498_v25 = vmul.f32 %v3914_v18, %v4069_v13  ;;  %735 = vst.msk [vmem:[#allocation2 + $0x129] sm:$0xff] %vm655_vm1, %v3337_v20 }
 0x104   : > { %5649 = vst [vmem:[#allocation4_spill] sm:$0xff] %v4066_v11  ;;  %v2269_v24 = vmul.f32 %v2237_v21, %v1789_v55  ;;  %2564 = vrot.lane.b32.xlu0 %v4066_v11, %s3611_s28  ;;  %v4080_v22 = vmul.f32 0.70710677, %v4066_v11  ;;  %v991_v58 = vmul.f32 %v3880_v52, %v3959_v60  ;;  %v1093_v59 = vmul.f32 %v3889_v62, %v4009_v49  ;;  %v606_v35 = vpop.f32.mrf.mxu0  ;;  %v4095_v60 = vld [vmem:[#allocation2 + $0x90] sm:$0xff] }
 0x105   : > { %v1429_v16 = vadd.f32 %v1397_v6, %v1326_v12  ;;  %v922_v36 = vadd.f32 %v890_v19, %v789_v17  ;;  %3443 = vpow2.f32 %v2304_v39  ;;  %v1599_v3 = vmul.f32 %v3934_v29, %v4071_v15  ;;  %734 = vst.msk [vmem:[#allocation2 + $0x121] sm:$0xff] %vm655_vm1, %v606_v35  ;;  %v4120_v17 = vld [vmem:[#allocation2 + $0x91] sm:$0xff]  ;;  %v847_v11 = vld [vmem:[#allocation2 + $0x9] sm:$0xff] }
 0x106   : > { %5650 = vst [vmem:[#allocation5_spill] sm:$0xff] %v4080_v22  ;;  %v2306_v38 = vmul.f32 1.442695, %v2269_v24  ;;  %v1790_v2 = vand.u32 2147483647, %v4080_v22  ;;  %3445 = vrcp.f32 %v1853_v23  ;;  %v1194_v46 = vmul.f32 %v3894_v63, %v4037_v32  ;;  %v3340_v47 = vpop.f32.mrf.mxu0 }
 0x107   : > { %v1530_v34 = vadd.f32 %v1498_v25, %v1429_v16  ;;  %v1023_v40 = vadd.f32 %v991_v58, %v922_v36  ;;  %v1295_v53 = vmul.f32 %v3899_v0, %v4048_v44  ;;  %v1398_v54 = vmul.f32 %v3929_v28, %v4095_v60  ;;  %737 = vst.msk [vmem:[#allocation2 + $0x141] sm:$0xff] %vm655_vm1, %v3340_v47 }
 0x108   : > { %v1822_v48 = vmul.f32 0.3275911, %v1790_v2  ;;  %v2238_v50 = vsub.f32 0.0, %v1790_v2  ;;  %v790_v4 = vmul.f32 %v3866_v42, %v3969_v8  ;;  %v891_v5 = vmul.f32 %v3872_v43, %v3973_v14  ;;  %v616_v6 = vpop.f32.mrf.mxu0 }
 0x109   : > { %v4102_v55 = vadd.f32 %v1599_v3, %v1530_v34  ;;  %v1125_v56 = vadd.f32 %v1093_v59, %v1023_v40  ;;  %3447 = vpow2.f32 %v2306_v38  ;;  %v992_v9 = vmul.f32 %v3880_v52, %v3981_v27  ;;  %736 = vst.msk [vmem:[#allocation2 + $0x139] sm:$0xff] %vm655_vm1, %v616_v6  ;;  %v4113_v21 = vpop.eup %3433  ;;  %v4136_v38 = vld [vmem:[#allocation2 + $0x98] sm:$0xff] }
 0x10a   : > { %v1854_v7 = vadd.f32 1.0, %v1822_v48  ;;  %v2270_v39 = vmul.f32 %v2238_v50, %v1790_v2  ;;  %v923_v14 = vadd.f32 %v891_v5, %v790_v4  ;;  %v1094_v19 = vmul.f32 %v3889_v62, %v4060_v51  ;;  %v3343_v20 = vpop.f32.mrf.mxu0  ;;  %v4149_v4 = vld [vmem:[#allocation2 + $0x99] sm:$0xff] }
 0x10b   : > { %5651 = vst [vmem:[#allocation6_spill] sm:$0xff] %v4102_v55  ;;  %2566 = vrot.lane.b32.xlu1 %v4102_v55, %s3611_s28  ;;  %v4118_v12 = vmul.f32 0.70710677, %v4102_v55  ;;  %v1226_v8 = vadd.f32 %v1194_v46, %v1125_v56  ;;  %v4124_v23 = vpop.eup %3435  ;;  %v1499_v27 = vmul.f32 %v3914_v18, %v4120_v17  ;;  %v1600_v24 = vmul.f32 %v3934_v29, %v4104_v61  ;;  %v4151_v5 = vld [vmem:[#allocation2 + $0x9a] sm:$0xff] }
 0x10c   : > { %3449 = vrcp.f32 %v1854_v7  ;;  %v1195_v25 = vmul.f32 %v3894_v63, %v4069_v13  ;;  %739 = vst.msk [vmem:[#allocation2 + $0x159] sm:$0xff] %vm655_vm1, %v3343_v20  ;;  %v4133_v16 = vpop.eup %3437  ;;  %v2308_v36 = vmul.f32 1.442695, %v2270_v39  ;;  %v1024_v35 = vadd.f32 %v992_v9, %v923_v14  ;;  %v626_v2 = vpop.f32.mrf.mxu0 }
 0x10d   : > { %5652 = vst [vmem:[#allocation7_spill] sm:$0xff] %v4118_v12  ;;  %v1791_v58 = vand.u32 2147483647, %v4118_v12  ;;  %v1327_v59 = vadd.f32 %v1295_v53, %v1226_v8  ;;  %v4138_v3 = vpop.eup %3439  ;;  %v1296_v34 = vmul.f32 %v3899_v0, %v4071_v15  ;;  %v1399_v40 = vmul.f32 %v3929_v28, %v4136_v38  ;;  %738 = vst.msk [vmem:[#allocation2 + $0x151] sm:$0xff] %vm655_vm1, %v626_v2 }
 0x10e   : > { %5653 = vst [vmem:[#allocation8_spill] sm:$0xff] %v4138_v3  ;;  %v791_v46 = vmul.f32 %v3866_v42, %v4009_v49  ;;  %v892_v47 = vmul.f32 %v3872_v43, %v4037_v32  ;;  %v1126_v56 = vadd.f32 %v1094_v19, %v1024_v35  ;;  %v3346_v6 = vpop.f32.mrf.mxu0  ;;  %v1500_v39 = vmul.f32 %v3914_v18, %v4149_v4 }
 0x10f   : > { %v1823_v48 = vmul.f32 0.3275911, %v1791_v58  ;;  %v2239_v50 = vsub.f32 0.0, %v1791_v58  ;;  %v1430_v53 = vadd.f32 %v1398_v54, %v1327_v59  ;;  %v4153_v7 = vpop.eup %3441  ;;  %v993_v32 = vmul.f32 %v3880_v52, %v4048_v44  ;;  %741 = vst.msk [vmem:[#allocation2 + $0x171] sm:$0xff] %vm655_vm1, %v3346_v6  ;;  %v4181_v6 = vld [vmem:[#allocation2 + $0xaa] sm:$0xff] }
 0x110   : > { %v924_v49 = vadd.f32 %v892_v47, %v791_v46  ;;  %v1095_v9 = vmul.f32 %v3889_v62, %v4095_v60  ;;  %3451 = vpow2.f32 %v2308_v36  ;;  %v1227_v14 = vadd.f32 %v1195_v25, %v1126_v56  ;;  %v636_v19 = vpop.f32.mrf.mxu0  ;;  %v4173_v25 = vld [vmem:[#allocation2 + $0xa8] sm:$0xff] }
 0x111   : > { %v2271_v54 = vmul.f32 %v2239_v50, %v1791_v58  ;;  %v1531_v8 = vadd.f32 %v1499_v27, %v1430_v53  ;;  %v1855_v20 = vadd.f32 1.0, %v1823_v48  ;;  %v1601_v59 = vmul.f32 %v3934_v29, %v4151_v5  ;;  %740 = vst.msk [vmem:[#allocation2 + $0x169] sm:$0xff] %vm655_vm1, %v636_v19  ;;  %v4179_v56 = vld [vmem:[#allocation2 + $0xa9] sm:$0xff] }
 0x112   : > { %v1025_v35 = vadd.f32 %v993_v32, %v924_v49  ;;  %v1196_v2 = vmul.f32 %v3894_v63, %v4120_v17  ;;  %v4167_v44 = vpop.eup %3443  ;;  %v1328_v36 = vadd.f32 %v1296_v34, %v1227_v14  ;;  %v1297_v27 = vmul.f32 %v3899_v0, %v4104_v61  ;;  %v3349_v58 = vpop.f32.mrf.mxu0 }
 0x113   : > { %5654 = vst [vmem:[#allocation9_spill] sm:$0xff] %v4167_v44  ;;  %v2310_v46 = vmul.f32 1.442695, %v2271_v54  ;;  %v4169_v47 = vadd.f32 %v1600_v24, %v1531_v8  ;;  %v4175_v48 = vpop.eup %3445  ;;  %v1400_v53 = vmul.f32 %v3929_v28, %v4173_v25  ;;  %v792_v24 = vmul.f32 %v3866_v42, %v4060_v51  ;;  %743 = vst.msk [vmem:[#allocation2 + $0x189] sm:$0xff] %vm655_vm1, %v3349_v58 }
 0x114   : > { %v1127_v50 = vadd.f32 %v1095_v9, %v1025_v35  ;;  %v893_v34 = vmul.f32 %v3872_v43, %v4069_v13  ;;  %v1431_v32 = vadd.f32 %v1399_v40, %v1328_v36  ;;  %v1501_v9 = vmul.f32 %v3914_v18, %v4179_v56  ;;  %v646_v8 = vpop.f32.mrf.mxu0 }
 0x115   : > { %5655 = vst [vmem:[#allocation10_spill] sm:$0xff] %v4169_v47  ;;  %2568 = vrot.lane.b32.xlu0 %v4169_v47, %s3611_s28  ;;  %v4191_v49 = vmul.f32 0.70710677, %v4169_v47  ;;  %v994_v54 = vmul.f32 %v3880_v52, %v4071_v15  ;;  %3453 = vrcp.f32 %v1855_v20  ;;  %v1096_v13 = vmul.f32 %v3889_v62, %v4136_v38  ;;  %742 = vst.msk [vmem:[#allocation2 + $0x181] sm:$0xff] %vm655_vm1, %v646_v8  ;;  %v4215_v47 = vld [vmem:[#allocation2 + $0xb0] sm:$0xff] }
 0x116   : > { %v1228_v51 = vadd.f32 %v1196_v2, %v1127_v50  ;;  %v925_v14 = vadd.f32 %v893_v34, %v792_v24  ;;  %v4200_v19 = vpop.eup %3447  ;;  %3455 = vpow2.f32 %v2310_v46  ;;  %v1532_v35 = vadd.f32 %v1500_v39, %v1431_v32 }
 0x117   : > { %5656 = vst [vmem:[#allocation11_spill] sm:$0xff] %v4191_v49  ;;  %5657 = vst [vmem:[#allocation12_spill] sm:$0xff] %v4200_v19  ;;  %v1792_v40 = vand.u32 2147483647, %v4191_v49  ;;  %v1602_v36 = vmul.f32 %v3934_v29, %v4181_v6  ;;  %v1197_v20 = vmul.f32 %v3894_v63, %v4149_v4  ;;  %v1298_v2 = vmul.f32 %v3899_v0, %v4151_v5  ;;  %v4261_v19 = vld [vmem:[#allocation2 + $0xc2] sm:$0xff] }
 0x118   : > { %v1329_v58 = vadd.f32 %v1297_v27, %v1228_v51  ;;  %v1026_v15 = vadd.f32 %v994_v54, %v925_v14  ;;  %v4211_v8 = vadd.f32 %v1601_v59, %v1532_v35  ;;  %v793_v39 = vmul.f32 %v3866_v42, %v4095_v60  ;;  %v4217_v27 = vld [vmem:[#allocation2 + $0xb2] sm:$0xff] }
 0x119   : > { %v4209_v50 = vpop.eup %3449  ;;  %v1824_v24 = vmul.f32 0.3275911, %v1792_v40  ;;  %v2240_v34 = vsub.f32 0.0, %v1792_v40  ;;  %v894_v54 = vmul.f32 %v3872_v43, %v4120_v17  ;;  %v995_v51 = vmul.f32 %v3880_v52, %v4104_v61  ;;  %v4230_v35 = vld [vmem:[#allocation2 + $0xb1] sm:$0xff] }
 0x11a   : > { %5658 = vst [vmem:[#allocation13_spill] sm:$0xff] %v4211_v8  ;;  %v1432_v46 = vadd.f32 %v1400_v53, %v1329_v58  ;;  %v1128_v32 = vadd.f32 %v1096_v13, %v1026_v15  ;;  %2570 = vrot.lane.b32.xlu1 %v4211_v8, %s3611_s28  ;;  %v4226_v59 = vmul.f32 0.70710677, %v4211_v8  ;;  %v1401_v60 = vmul.f32 %v3929_v28, %v4215_v47  ;;  %v4948_v26 = vld [vmem:[#allocation2 + $0x18a] sm:$0xff] }
 0x11b   : > { %v1856_v14 = vadd.f32 1.0, %v1824_v24  ;;  %v2272_v49 = vmul.f32 %v2240_v34, %v1792_v40  ;;  %v926_v58 = vadd.f32 %v894_v54, %v793_v39  ;;  %v1097_v17 = vmul.f32 %v3889_v62, %v4173_v25 }
 0x11c   : > { %5659 = vst [vmem:[#allocation14_spill] sm:$0xff] %v4226_v59  ;;  %v1533_v53 = vadd.f32 %v1501_v9, %v1432_v46  ;;  %v1229_v13 = vadd.f32 %v1197_v20, %v1128_v32  ;;  %v1793_v61 = vand.u32 2147483647, %v4226_v59  ;;  %v1502_v40 = vmul.f32 %v3914_v18, %v4230_v35  ;;  %v4247_v59 = vld [vmem:[#allocation2 + $0xc0] sm:$0xff] }
 0x11d   : > { %v1603_v15 = vmul.f32 %v3934_v29, %v4217_v27  ;;  %v1198_v24 = vmul.f32 %v3894_v63, %v4179_v56  ;;  %v4241_v34 = vpop.eup %3451  ;;  %3457 = vrcp.f32 %v1856_v14  ;;  %v1027_v39 = vadd.f32 %v995_v51, %v926_v58 }
 0x11e   : > { %5660 = vst [vmem:[#allocation15_spill] sm:$0xff] %v4241_v34  ;;  %v4243_v9 = vadd.f32 %v1602_v36, %v1533_v53  ;;  %v1330_v20 = vadd.f32 %v1298_v2, %v1229_v13  ;;  %v2312_v46 = vmul.f32 1.442695, %v2272_v49  ;;  %v1825_v32 = vmul.f32 0.3275911, %v1793_v61 }
 0x11f   : > { %v2241_v54 = vsub.f32 0.0, %v1793_v61  ;;  %v1299_v8 = vmul.f32 %v3899_v0, %v4181_v6  ;;  %v1129_v14 = vadd.f32 %v1097_v17, %v1027_v39  ;;  %v1402_v36 = vmul.f32 %v3929_v28, %v4247_v59 }
 0x120   : > { %5661 = vst [vmem:[#allocation16_spill] sm:$0xff] %v4243_v9  ;;  %2572 = vrot.lane.b32.xlu0 %v4243_v9, %s3611_s28  ;;  %v4252_v55 = vmul.f32 0.70710677, %v4243_v9  ;;  %v1433_v34 = vadd.f32 %v1401_v60, %v1330_v20  ;;  %v1857_v2 = vadd.f32 1.0, %v1825_v32  ;;  %v794_v51 = vmul.f32 %v3866_v42, %v4136_v38 }
 0x121   : > { %v2273_v49 = vmul.f32 %v2241_v54, %v1793_v61  ;;  %v895_v53 = vmul.f32 %v3872_v43, %v4149_v4  ;;  %v1230_v12 = vadd.f32 %v1198_v24, %v1129_v14  ;;  %v996_v60 = vmul.f32 %v3880_v52, %v4151_v5  ;;  %v4273_v24 = vld [vmem:[#allocation2 + $0xc1] sm:$0xff] }
 0x122   : > { %5662 = vst [vmem:[#allocation17_spill] sm:$0xff] %v4252_v55  ;;  %v1794_v13 = vand.u32 2147483647, %v4252_v55  ;;  %v1534_v58 = vadd.f32 %v1502_v40, %v1433_v34  ;;  %v4265_v17 = vpop.eup %3453  ;;  %3459 = vpow2.f32 %v2312_v46  ;;  %v1098_v38 = vmul.f32 %v3889_v62, %v4215_v47  ;;  %v4293_v55 = vld [vmem:[#allocation2 + $0xc9] sm:$0xff] }
 0x123   : > { %5663 = vst [vmem:[#allocation18_spill] sm:$0xff] %v4265_v17  ;;  %v2314_v20 = vmul.f32 1.442695, %v2273_v49  ;;  %v927_v61 = vadd.f32 %v895_v53, %v794_v51  ;;  %v4269_v39 = vpop.eup %3455  ;;  %v1331_v40 = vadd.f32 %v1299_v8, %v1230_v12  ;;  %v1503_v5 = vmul.f32 %v3914_v18, %v4273_v24 }
 0x124   : > { %5664 = vst [vmem:[#allocation19_spill] sm:$0xff] %v4269_v39  ;;  %v1826_v4 = vmul.f32 0.3275911, %v1794_v13  ;;  %v2242_v32 = vsub.f32 0.0, %v1794_v13  ;;  %v4271_v54 = vadd.f32 %v1603_v15, %v1534_v58  ;;  %v1604_v34 = vmul.f32 %v3934_v29, %v4261_v19  ;;  %v4288_v58 = vld [vmem:[#allocation2 + $0xc8] sm:$0xff] }
 0x125   : > { %v1028_v46 = vadd.f32 %v996_v60, %v927_v61  ;;  %v1199_v14 = vmul.f32 %v3894_v63, %v4230_v35  ;;  %3461 = vrcp.f32 %v1857_v2  ;;  %v1434_v12 = vadd.f32 %v1402_v36, %v1331_v40 }
 0x126   : > { %5665 = vst [vmem:[#allocation20_spill] sm:$0xff] %v4271_v54  ;;  %v2274_v49 = vmul.f32 %v2242_v32, %v1794_v13  ;;  %2574 = vrot.lane.b32.xlu1 %v4271_v54, %s3611_s28  ;;  %v4284_v15 = vmul.f32 0.70710677, %v4271_v54  ;;  %3463 = vpow2.f32 %v2314_v20  ;;  %v1858_v8 = vadd.f32 1.0, %v1826_v4  ;;  %v4295_v54 = vld [vmem:[#allocation2 + $0xca] sm:$0xff] }
 0x127   : > { %v1130_v51 = vadd.f32 %v1098_v38, %v1028_v46  ;;  %v1300_v53 = vmul.f32 %v3899_v0, %v4217_v27  ;;  %v1535_v2 = vadd.f32 %v1503_v5, %v1434_v12  ;;  %v1403_v13 = vmul.f32 %v3929_v28, %v4288_v58 }
 0x128   : > { %5666 = vst [vmem:[#allocation21_spill] sm:$0xff] %v4284_v15  ;;  %v2316_v60 = vmul.f32 1.442695, %v2274_v49  ;;  %v1795_v61 = vand.u32 2147483647, %v4284_v15  ;;  %v795_v36 = vmul.f32 %v3866_v42, %v4173_v25  ;;  %v896_v20 = vmul.f32 %v3872_v43, %v4179_v56 }
 0x129   : > { %v1231_v32 = vadd.f32 %v1199_v14, %v1130_v51  ;;  %v997_v38 = vmul.f32 %v3880_v52, %v4181_v6  ;;  %v4303_v5 = vadd.f32 %v1604_v34, %v1535_v2  ;;  %v1504_v46 = vmul.f32 %v3914_v18, %v4293_v55 }
 0x12a   : > { %v1827_v4 = vmul.f32 0.3275911, %v1795_v61  ;;  %v2243_v40 = vsub.f32 0.0, %v1795_v61  ;;  %v4307_v14 = vpop.eup %3457  ;;  %3465 = vrcp.f32 %v1858_v8  ;;  %v928_v12 = vadd.f32 %v896_v20, %v795_v36 }
 0x12b   : > { %5667 = vst [vmem:[#allocation22_spill] sm:$0xff] %v4303_v5  ;;  %5668 = vst [vmem:[#allocation23_spill] sm:$0xff] %v4307_v14  ;;  %v1332_v49 = vadd.f32 %v1300_v53, %v1231_v32  ;;  %v1099_v25 = vmul.f32 %v3889_v62, %v4247_v59  ;;  %3467 = vpow2.f32 %v2316_v60  ;;  %2576 = vrot.lane.b32.xlu0 %v4303_v5, %s3611_s28  ;;  %v4314_v6 = vmul.f32 0.70710677, %v4303_v5  ;;  %v4320_v53 = vld [vmem:[#allocation2 + $0xd8] sm:$0xff] }
 0x12c   : > { %v2275_v56 = vmul.f32 %v2243_v40, %v1795_v61  ;;  %v1605_v34 = vmul.f32 %v3934_v29, %v4295_v54  ;;  %v1859_v51 = vadd.f32 1.0, %v1827_v4  ;;  %v1029_v15 = vadd.f32 %v997_v38, %v928_v12  ;;  %v4322_v32 = vld [vmem:[#allocation2 + $0xd9] sm:$0xff] }
 0x12d   : > { %5669 = vst [vmem:[#allocation24_spill] sm:$0xff] %v4314_v6  ;;  %v1435_v2 = vadd.f32 %v1403_v13, %v1332_v49  ;;  %v1200_v8 = vmul.f32 %v3894_v63, %v4273_v24  ;;  %v1796_v60 = vand.u32 2147483647, %v4314_v6  ;;  %v1301_v61 = vmul.f32 %v3899_v0, %v4261_v19  ;;  %v4331_v4 = vld [vmem:[#allocation2 + $0xda] sm:$0xff] }
 0x12e   : > { %v1404_v36 = vmul.f32 %v3929_v28, %v4320_v53  ;;  %v1505_v20 = vmul.f32 %v3914_v18, %v4322_v32  ;;  %v1131_v38 = vadd.f32 %v1099_v25, %v1029_v15  ;;  %v796_v40 = vmul.f32 %v3866_v42, %v4215_v47 }
 0x12f   : > { %v1536_v13 = vadd.f32 %v1504_v46, %v1435_v2  ;;  %v897_v49 = vmul.f32 %v3872_v43, %v4230_v35  ;;  %v4337_v12 = vpop.eup %3459  ;;  %v2318_v5 = vmul.f32 1.442695, %v2275_v56  ;;  %v1828_v6 = vmul.f32 0.3275911, %v1796_v60 }
 0x130   : > { %5670 = vst [vmem:[#allocation25_spill] sm:$0xff] %v4337_v12  ;;  %v2244_v9 = vsub.f32 0.0, %v1796_v60  ;;  %v998_v39 = vmul.f32 %v3880_v52, %v4217_v27  ;;  %v1232_v46 = vadd.f32 %v1200_v8, %v1131_v38  ;;  %v1100_v25 = vmul.f32 %v3889_v62, %v4288_v58 }
 0x131   : > { %v4341_v14 = vadd.f32 %v1605_v34, %v1536_v13  ;;  %v929_v15 = vadd.f32 %v897_v49, %v796_v40  ;;  %3469 = vrcp.f32 %v1859_v51  ;;  %v1860_v47 = vadd.f32 1.0, %v1828_v6  ;;  %v4356_v13 = vld [vmem:[#allocation2 + $0xe0] sm:$0xff] }
 0x132   : > { %v2276_v2 = vmul.f32 %v2244_v9, %v1796_v60  ;;  %v1606_v35 = vmul.f32 %v3934_v29, %v4331_v4  ;;  %v4347_v12 = vpop.eup %3461  ;;  %v1333_v56 = vadd.f32 %v1301_v61, %v1232_v46  ;;  %v1201_v8 = vmul.f32 %v3894_v63, %v4293_v55  ;;  %v4367_v49 = vld [vmem:[#allocation2 + $0xe2] sm:$0xff] }
 0x133   : > { %5671 = vst [vmem:[#allocation26_spill] sm:$0xff] %v4341_v14  ;;  %5672 = vst [vmem:[#allocation27_spill] sm:$0xff] %v4347_v12  ;;  %2578 = vrot.lane.b32.xlu1 %v4341_v14, %s3611_s28  ;;  %v4352_v27 = vmul.f32 0.70710677, %v4341_v14  ;;  %v1030_v34 = vadd.f32 %v998_v39, %v929_v15  ;;  %v4358_v6 = vpop.eup %3463  ;;  %3471 = vpow2.f32 %v2318_v5  ;;  %v1302_v51 = vmul.f32 %v3899_v0, %v4295_v54  ;;  %v4365_v39 = vld [vmem:[#allocation2 + $0xe1] sm:$0xff] }
 0x134   : > { %5674 = vst [vmem:[#allocation29_spill] sm:$0xff] %v4358_v6  ;;  %v2320_v9 = vmul.f32 1.442695, %v2276_v2  ;;  %v1405_v60 = vmul.f32 %v3929_v28, %v4356_v13  ;;  %v1436_v40 = vadd.f32 %v1404_v36, %v1333_v56  ;;  %v797_v46 = vmul.f32 %v3866_v42, %v4247_v59 }
 0x135   : > { %5673 = vst [vmem:[#allocation28_spill] sm:$0xff] %v4352_v27  ;;  %v1797_v38 = vand.u32 2147483647, %v4352_v27  ;;  %v1132_v61 = vadd.f32 %v1100_v25, %v1030_v34  ;;  %3473 = vrcp.f32 %v1860_v47  ;;  %v1506_v5 = vmul.f32 %v3914_v18, %v4365_v39 }
 0x136   : > { %v898_v15 = vmul.f32 %v3872_v43, %v4273_v24  ;;  %v999_v2 = vmul.f32 %v3880_v52, %v4261_v19  ;;  %v1537_v25 = vadd.f32 %v1505_v20, %v1436_v40  ;;  %3475 = vpow2.f32 %v2320_v9  ;;  %v4391_v9 = vld [vmem:[#allocation2 + $0xf0] sm:$0xff] }
 0x137   : > { %v1829_v14 = vmul.f32 0.3275911, %v1797_v38  ;;  %v2245_v36 = vsub.f32 0.0, %v1797_v38  ;;  %v1233_v56 = vadd.f32 %v1201_v8, %v1132_v61  ;;  %v4377_v34 = vpop.eup %3465  ;;  %v1607_v59 = vmul.f32 %v3934_v29, %v4367_v49  ;;  %v4393_v40 = vld [vmem:[#allocation2 + $0xf2] sm:$0xff] }
 0x138   : > { %5675 = vst [vmem:[#allocation30_spill] sm:$0xff] %v4377_v34  ;;  %v930_v47 = vadd.f32 %v898_v15, %v797_v46  ;;  %v1101_v27 = vmul.f32 %v3889_v62, %v4320_v53  ;;  %v4383_v6 = vpop.eup %3467  ;;  %v4385_v22 = vadd.f32 %v1606_v35, %v1537_v25  ;;  %v1202_v20 = vmul.f32 %v3894_v63, %v4322_v32 }
 0x139   : > { %5676 = vst [vmem:[#allocation31_spill] sm:$0xff] %v4383_v6  ;;  %v1861_v24 = vadd.f32 1.0, %v1829_v14  ;;  %v2277_v12 = vmul.f32 %v2245_v36, %v1797_v38  ;;  %v1334_v19 = vadd.f32 %v1302_v51, %v1233_v56  ;;  %v1303_v8 = vmul.f32 %v3899_v0, %v4331_v4  ;;  %v4404_v38 = vld [vmem:[#allocation2 + $0xf1] sm:$0xff] }
 0x13a   : > { %5677 = vst [vmem:[#allocation32_spill] sm:$0xff] %v4385_v22  ;;  %v1031_v44 = vadd.f32 %v999_v2, %v930_v47  ;;  %v798_v61 = vmul.f32 %v3866_v42, %v4288_v58  ;;  %2580 = vrot.lane.b32.xlu0 %v4385_v22, %s3611_s28  ;;  %v4400_v14 = vmul.f32 0.70710677, %v4385_v22  ;;  %v1406_v51 = vmul.f32 %v3929_v28, %v4391_v9 }
 0x13b   : > { %v2322_v46 = vmul.f32 1.442695, %v2277_v12  ;;  %v1437_v35 = vadd.f32 %v1405_v60, %v1334_v19  ;;  %v1507_v2 = vmul.f32 %v3914_v18, %v4404_v38  ;;  %v899_v42 = vmul.f32 %v3872_v43, %v4293_v55  ;;  %v4425_v19 = vld [vmem:[#allocation2 + $0xf8] sm:$0xff] }
 0x13c   : > { %5678 = vst [vmem:[#allocation33_spill] sm:$0xff] %v4400_v14  ;;  %v1133_v15 = vadd.f32 %v1101_v27, %v1031_v44  ;;  %v1000_v58 = vmul.f32 %v3880_v52, %v4295_v54  ;;  %3477 = vrcp.f32 %v1861_v24  ;;  %v1798_v12 = vand.u32 2147483647, %v4400_v14 }
 0x13d   : > { %v1538_v36 = vadd.f32 %v1506_v5, %v1437_v35  ;;  %v1608_v60 = vmul.f32 %v3934_v29, %v4393_v40  ;;  %3479 = vpow2.f32 %v2322_v46  ;;  %v931_v56 = vadd.f32 %v899_v42, %v798_v61  ;;  %v4448_v46 = vld [vmem:[%s5568_s3 + $0x1] ss:$0 sm:$0xff] }
 0x13e   : > { %v1234_v25 = vadd.f32 %v1202_v20, %v1133_v15  ;;  %v1102_v44 = vmul.f32 %v3889_v62, %v4356_v13  ;;  %v4417_v27 = vpop.eup %3469  ;;  %v1830_v47 = vmul.f32 0.3275911, %v1798_v12  ;;  %v2246_v43 = vsub.f32 0.0, %v1798_v12  ;;  %v4430_v62 = vld [vmem:[%s5568_s3] ss:$0 sm:$0xff] }
 0x13f   : > { %5679 = vst [vmem:[#allocation34_spill] sm:$0xff] %v4417_v27  ;;  %v4419_v55 = vadd.f32 %v1607_v59, %v1538_v36  ;;  %v1203_v52 = vmul.f32 %v3894_v63, %v4365_v39  ;;  %v1032_v5 = vadd.f32 %v1000_v58, %v931_v56  ;;  %v1304_v24 = vmul.f32 %v3899_v0, %v4367_v49  ;;  %v4455_v58 = vld [vmem:[%s5568_s3 + $0x2] ss:$0 sm:$0xff]  ;;  %v4462_v56 = vld [vmem:[#allocation2 + $0xf9] sm:$0xff]  ;;  %v4931_v27 = vld [vmem:[#allocation2 + $0x188] sm:$0xff] }
 0x140   : > { %v1335_v54 = vadd.f32 %v1303_v8, %v1234_v25  ;;  %v799_v20 = vmul.f32 %v4430_v62, %v4320_v53  ;;  %v4434_v59 = vpop.eup %3471  ;;  %v2278_v61 = vmul.f32 %v2246_v43, %v1798_v12  ;;  %v1407_v0 = vmul.f32 %v3929_v28, %v4425_v19  ;;  %v4443_v8 = vld [vmem:[#allocation2 + $0xfa] sm:$0xff] }
 0x141   : > { %5680 = vst [vmem:[#allocation35_spill] sm:$0xff] %v4419_v55  ;;  %5681 = vst [vmem:[#allocation36_spill] sm:$0xff] %v4434_v59  ;;  %2582 = vrot.lane.b32.xlu1 %v4419_v55, %s3611_s28  ;;  %v4439_v63 = vmul.f32 0.70710677, %v4419_v55  ;;  %v900_v53 = vmul.f32 %v4448_v46, %v4322_v32  ;;  %v1862_v35 = vadd.f32 1.0, %v1830_v47  ;;  %v1134_v42 = vadd.f32 %v1102_v44, %v1032_v5 }
 0x142   : > { %v1438_v15 = vadd.f32 %v1406_v51, %v1335_v54  ;;  %v1001_v28 = vmul.f32 %v4455_v58, %v4331_v4  ;;  %v4459_v12 = vpop.eup %3473  ;;  %v2324_v36 = vmul.f32 1.442695, %v2278_v61  ;;  %v4467_v32 = vld [vmem:[%s5568_s3 + $0x4] ss:$0 sm:$0xff]  ;;  %v1508_v4 = vmul.f32 %v3914_v18, %v4462_v56  ;;  %v4480_v55 = vld [vmem:[%s5568_s3 + $0x5] ss:$0 sm:$0xff] }
 0x143   : > { %5682 = vst [vmem:[#allocation37_spill] sm:$0xff] %v4439_v63  ;;  %5683 = vst [vmem:[#allocation38_spill] sm:$0xff] %v4459_v12  ;;  %v1799_v25 = vand.u32 2147483647, %v4439_v63  ;;  %v932_v43 = vadd.f32 %v900_v53, %v799_v20  ;;  %v1103_v51 = vmul.f32 %v4467_v32, %v4391_v9  ;;  %v1235_v47 = vadd.f32 %v1203_v52, %v1134_v42  ;;  %v4475_v5 = vpop.eup %3475  ;;  %v947_v63 = vld [vmem:[#allocation2 + $0x2] sm:$0xff] }
 0x144   : > { %v1539_v44 = vadd.f32 %v1507_v2, %v1438_v15  ;;  %v1609_v54 = vmul.f32 %v3934_v29, %v4443_v8  ;;  %5684 = vst [vmem:[#allocation39_spill] sm:$0xff] %v4475_v5  ;;  %v1204_v2 = vmul.f32 %v4480_v55, %v4404_v38  ;;  %3481 = vrcp.f32 %v1862_v35  ;;  %v4489_v29 = vld [vmem:[%s5568_s3 + $0x6] ss:$0 sm:$0xff] }
 0x145   : > { %v1831_v61 = vmul.f32 0.3275911, %v1799_v25  ;;  %v2247_v20 = vsub.f32 0.0, %v1799_v25  ;;  %v1033_v53 = vadd.f32 %v1001_v28, %v932_v43  ;;  %v1336_v18 = vadd.f32 %v1304_v24, %v1235_v47  ;;  %v4498_v24 = vld [vmem:[#allocation2 + $0x108] sm:$0xff] }
 0x146   : > { %v4484_v52 = vadd.f32 %v1608_v60, %v1539_v44  ;;  %v1305_v15 = vmul.f32 %v4489_v29, %v4393_v40  ;;  %3483 = vpow2.f32 %v2324_v36  ;;  %v800_v44 = vmul.f32 %v4430_v62, %v4356_v13 }
 0x147   : > { %v1863_v42 = vadd.f32 1.0, %v1831_v61  ;;  %v2279_v28 = vmul.f32 %v2247_v20, %v1799_v25  ;;  %v1135_v43 = vadd.f32 %v1103_v51, %v1033_v53  ;;  %v1439_v60 = vadd.f32 %v1407_v0, %v1336_v18  ;;  %v4507_v25 = vld [vmem:[%s5568_s3 + $0x8] ss:$0 sm:$0xff] }
 0x148   : > { %5685 = vst [vmem:[#allocation40_spill] sm:$0xff] %v4484_v52  ;;  %2584 = vrot.lane.b32.xlu0 %v4484_v52, %s3611_s28  ;;  %v4496_v35 = vmul.f32 0.70710677, %v4484_v52  ;;  %v901_v47 = vmul.f32 %v4448_v46, %v4365_v39  ;;  %v1408_v51 = vmul.f32 %v4507_v25, %v4498_v24  ;;  %v1002_v0 = vmul.f32 %v4455_v58, %v4367_v49  ;;  %v4516_v39 = vld [vmem:[#allocation2 + $0x10a] sm:$0xff] }
 0x149   : > { %v2326_v36 = vmul.f32 1.442695, %v2279_v28  ;;  %v1236_v61 = vadd.f32 %v1204_v2, %v1135_v43  ;;  %v4513_v20 = vpop.eup %3477  ;;  %v1540_v53 = vadd.f32 %v1508_v4, %v1439_v60  ;;  %v1104_v2 = vmul.f32 %v4467_v32, %v4425_v19  ;;  %v4531_v4 = vld [vmem:[#allocation2 + $0x109] sm:$0xff] }
 0x14a   : > { %5686 = vst [vmem:[#allocation41_spill] sm:$0xff] %v4496_v35  ;;  %5687 = vst [vmem:[#allocation42_spill] sm:$0xff] %v4513_v20  ;;  %v1800_v13 = vand.u32 2147483647, %v4496_v35  ;;  %v933_v18 = vadd.f32 %v901_v47, %v800_v44  ;;  %v4520_v28 = vpop.eup %3479  ;;  %3485 = vrcp.f32 %v1863_v42  ;;  %v4524_v52 = vadd.f32 %v4042_v37, %v3902_v1  ;;  %v4545_v37 = vld [vmem:[%s5568_s3 + $0xa] ss:$0 sm:$0xff] }
 0x14b   : > { %5688 = vst [vmem:[#allocation43_spill] sm:$0xff] %v4520_v28  ;;  %v1337_v43 = vadd.f32 %v1305_v15, %v1236_v61  ;;  %v4527_v49 = vmul.f32 %v4455_v58, %v947_v63  ;;  %v4529_v35 = vadd.f32 %v1609_v54, %v1540_v53  ;;  %v1205_v44 = vmul.f32 %v4480_v55, %v4462_v56  ;;  %v4538_v15 = vld [vmem:[%s5568_s3 + $0x9] ss:$0 sm:$0xff]  ;;  %v4558_v53 = vld [vmem:[#allocation2 + $0x112] sm:$0xff] }
 0x14c   : > { %v2248_v22 = vsub.f32 0.0, %v1800_v13  ;;  %v1034_v60 = vadd.f32 %v1002_v0, %v933_v18  ;;  %3487 = vpow2.f32 %v2326_v36  ;;  %v1509_v1 = vmul.f32 %v4538_v15, %v4531_v4  ;;  %v4556_v0 = vld [vmem:[#allocation2 + $0x110] sm:$0xff] }
 0x14d   : > { %5689 = vst [vmem:[#allocation44_spill] sm:$0xff] %v4529_v35  ;;  %v1440_v47 = vadd.f32 %v1408_v51, %v1337_v43  ;;  %v1610_v63 = vmul.f32 %v4545_v37, %v4516_v39  ;;  %v1832_v54 = vmul.f32 0.3275911, %v1800_v13  ;;  %2586 = vrot.lane.b32.xlu1 %v4529_v35, %s3611_s28  ;;  %v4552_v42 = vmul.f32 0.70710677, %v4529_v35 }
 0x14e   : > { %v1136_v36 = vadd.f32 %v1104_v2, %v1034_v60  ;;  %v1306_v61 = vmul.f32 %v4489_v29, %v4443_v8  ;;  %v801_v18 = vmul.f32 %v4430_v62, %v4391_v9  ;;  %v902_v43 = vmul.f32 %v4448_v46, %v4404_v38 }
 0x14f   : > { %5690 = vst [vmem:[#allocation45_spill] sm:$0xff] %v4552_v42  ;;  %v1541_v51 = vadd.f32 %v1509_v1, %v1440_v47  ;;  %v1003_v14 = vmul.f32 %v4455_v58, %v4393_v40  ;;  %v2280_v35 = vmul.f32 %v2248_v22, %v1800_v13  ;;  %v1801_v2 = vand.u32 2147483647, %v4552_v42  ;;  %v4569_v1 = vld [vmem:[#allocation2 + $0x111] sm:$0xff] }
 0x150   : > { %v1237_v60 = vadd.f32 %v1205_v44, %v1136_v36  ;;  %v1409_v47 = vmul.f32 %v4507_v25, %v4556_v0  ;;  %v1510_v9 = vmul.f32 %v4538_v15, %v4569_v1  ;;  %v934_v5 = vadd.f32 %v902_v43, %v801_v18 }
 0x151   : > { %v4571_v28 = vadd.f32 %v1610_v63, %v1541_v51  ;;  %v1105_v38 = vmul.f32 %v4467_v32, %v4498_v24  ;;  %v1833_v59 = vmul.f32 0.3275911, %v1801_v2  ;;  %v2249_v40 = vsub.f32 0.0, %v1801_v2  ;;  %v4579_v44 = vpop.eup %3481 }
 0x152   : > { %v1338_v22 = vadd.f32 %v1306_v61, %v1237_v60  ;;  %v1611_v13 = vmul.f32 %v4545_v37, %v4558_v53  ;;  %5692 = vst [vmem:[#allocation47_spill] sm:$0xff] %v4579_v44  ;;  %v1864_v36 = vadd.f32 1.0, %v1832_v54  ;;  %v1035_v51 = vadd.f32 %v1003_v14, %v934_v5  ;;  %v4592_v44 = vld [vmem:[#allocation2 + $0x120] sm:$0xff] }
 0x153   : > { %5691 = vst [vmem:[#allocation46_spill] sm:$0xff] %v4571_v28  ;;  %2588 = vrot.lane.b32.xlu0 %v4571_v28, %s3611_s28  ;;  %v4584_v63 = vmul.f32 0.70710677, %v4571_v28  ;;  %v1206_v18 = vmul.f32 %v4480_v55, %v4531_v4  ;;  %v4588_v43 = vpop.eup %3483  ;;  %v2328_v42 = vmul.f32 1.442695, %v2280_v35  ;;  %v2281_v61 = vmul.f32 %v2249_v40, %v1801_v2 }
 0x154   : > { %5694 = vst [vmem:[#allocation49_spill] sm:$0xff] %v4588_v43  ;;  %v1441_v60 = vadd.f32 %v1409_v47, %v1338_v22  ;;  %v1307_v6 = vmul.f32 %v4489_v29, %v4516_v39  ;;  %v1137_v20 = vadd.f32 %v1105_v38, %v1035_v51  ;;  %v1410_v28 = vmul.f32 %v4507_v25, %v4592_v44  ;;  %v4607_v51 = vld [vmem:[#allocation2 + $0x121] sm:$0xff] }
 0x155   : > { %5693 = vst [vmem:[#allocation48_spill] sm:$0xff] %v4584_v63  ;;  %v1802_v54 = vand.u32 2147483647, %v4584_v63  ;;  %v802_v14 = vmul.f32 %v4430_v62, %v4425_v19  ;;  %v1865_v5 = vadd.f32 1.0, %v1833_v59  ;;  %v2330_v12 = vmul.f32 1.442695, %v2281_v61 }
 0x156   : > { %v1542_v43 = vadd.f32 %v1510_v9, %v1441_v60  ;;  %v903_v35 = vmul.f32 %v4448_v46, %v4462_v56  ;;  %v1238_v40 = vadd.f32 %v1206_v18, %v1137_v20  ;;  %v1004_v22 = vmul.f32 %v4455_v58, %v4443_v8  ;;  %v4609_v19 = vld [vmem:[#allocation2 + $0x122] sm:$0xff] }
 0x157   : > { %v1834_v2 = vmul.f32 0.3275911, %v1802_v54  ;;  %v2250_v47 = vsub.f32 0.0, %v1802_v54  ;;  %v4603_v63 = vpop.eup %3485  ;;  %3489 = vrcp.f32 %v1864_v36  ;;  %v1106_v9 = vmul.f32 %v4467_v32, %v4556_v0 }
 0x158   : > { %5695 = vst [vmem:[#allocation50_spill] sm:$0xff] %v4603_v63  ;;  %v4605_v38 = vadd.f32 %v1611_v13, %v1542_v43  ;;  %v935_v59 = vadd.f32 %v903_v35, %v802_v14  ;;  %3491 = vpow2.f32 %v2328_v42  ;;  %v1339_v61 = vadd.f32 %v1307_v6, %v1238_v40  ;;  %v4631_v40 = vld [vmem:[#allocation2 + $0x128] sm:$0xff]  ;;  %v4747_v63 = vld [vmem:[#allocation2 + $0x151] sm:$0xff] }
 0x159   : > { %v2282_v56 = vmul.f32 %v2250_v47, %v1802_v54  ;;  %v1511_v20 = vmul.f32 %v4538_v15, %v4607_v51  ;;  %v4615_v8 = vpop.eup %3487  ;;  %3493 = vrcp.f32 %v1865_v5  ;;  %v1207_v18 = vmul.f32 %v4480_v55, %v4569_v1 }
 0x15a   : > { %5696 = vst [vmem:[#allocation51_spill] sm:$0xff] %v4605_v38  ;;  %5697 = vst [vmem:[#allocation52_spill] sm:$0xff] %v4615_v8  ;;  %2590 = vrot.lane.b32.xlu1 %v4605_v38, %s3611_s28  ;;  %v4620_v13 = vmul.f32 0.70710677, %v4605_v38  ;;  %v1036_v36 = vadd.f32 %v1004_v22, %v935_v59  ;;  %3495 = vpow2.f32 %v2330_v12  ;;  %v1866_v42 = vadd.f32 1.0, %v1834_v2  ;;  %v4633_v22 = vld [vmem:[#allocation2 + $0x12a] sm:$0xff] }
 0x15b   : > { %v1442_v43 = vadd.f32 %v1410_v28, %v1339_v61  ;;  %v1612_v6 = vmul.f32 %v4545_v37, %v4609_v19  ;;  %v1308_v14 = vmul.f32 %v4489_v29, %v4558_v53  ;;  %v803_v5 = vmul.f32 %v4430_v62, %v4498_v24  ;;  %v4677_v38 = vld [vmem:[#allocation2 + $0x139] sm:$0xff] }
 0x15c   : > { %5698 = vst [vmem:[#allocation53_spill] sm:$0xff] %v4620_v13  ;;  %v1803_v60 = vand.u32 2147483647, %v4620_v13  ;;  %v1138_v54 = vadd.f32 %v1106_v9, %v1036_v36  ;;  %v2332_v35 = vmul.f32 1.442695, %v2282_v56  ;;  %v904_v12 = vmul.f32 %v4448_v46, %v4531_v4  ;;  %v4643_v56 = vld [vmem:[#allocation2 + $0x129] sm:$0xff] }
 0x15d   : > { %v1543_v47 = vadd.f32 %v1511_v20, %v1442_v43  ;;  %v1005_v28 = vmul.f32 %v4455_v58, %v4516_v39  ;;  %v1411_v61 = vmul.f32 %v4507_v25, %v4631_v40  ;;  %3497 = vrcp.f32 %v1866_v42 }
 0x15e   : > { %v1835_v2 = vmul.f32 0.3275911, %v1803_v60  ;;  %v2251_v59 = vsub.f32 0.0, %v1803_v60  ;;  %v1239_v9 = vadd.f32 %v1207_v18, %v1138_v54  ;;  %v936_v20 = vadd.f32 %v904_v12, %v803_v5 }
 0x15f   : > { %v4641_v24 = vadd.f32 %v1612_v6, %v1543_v47  ;;  %v1107_v36 = vmul.f32 %v4467_v32, %v4592_v44  ;;  %v1512_v39 = vmul.f32 %v4538_v15, %v4643_v56  ;;  %v1613_v18 = vmul.f32 %v4545_v37, %v4633_v22 }
 0x160   : > { %v2283_v43 = vmul.f32 %v2251_v59, %v1803_v60  ;;  %v1340_v4 = vadd.f32 %v1308_v14, %v1239_v9  ;;  %3499 = vpow2.f32 %v2332_v35  ;;  %v1037_v6 = vadd.f32 %v1005_v28, %v936_v20  ;;  %v4661_v35 = vld [vmem:[#allocation2 + $0x138] sm:$0xff] }
 0x161   : > { %5699 = vst [vmem:[#allocation54_spill] sm:$0xff] %v4641_v24  ;;  %2592 = vrot.lane.b32.xlu0 %v4641_v24, %s3611_s28  ;;  %v4654_v42 = vmul.f32 0.70710677, %v4641_v24  ;;  %v1208_v54 = vmul.f32 %v4480_v55, %v4607_v51  ;;  %v1867_v5 = vadd.f32 1.0, %v1835_v2  ;;  %v804_v47 = vmul.f32 %v4430_v62, %v4556_v0  ;;  %v4663_v9 = vld [vmem:[#allocation2 + $0x13a] sm:$0xff] }
 0x162   : > { %v2334_v60 = vmul.f32 1.442695, %v2283_v43  ;;  %v1443_v14 = vadd.f32 %v1411_v61, %v1340_v4  ;;  %v1139_v59 = vadd.f32 %v1107_v36, %v1037_v6  ;;  %v905_v24 = vmul.f32 %v4448_v46, %v4569_v1 }
 0x163   : > { %5700 = vst [vmem:[#allocation55_spill] sm:$0xff] %v4654_v42  ;;  %v1804_v12 = vand.u32 2147483647, %v4654_v42  ;;  %v1006_v28 = vmul.f32 %v4455_v58, %v4558_v53  ;;  %v1309_v2 = vmul.f32 %v4489_v29, %v4609_v19  ;;  %v1412_v0 = vmul.f32 %v4507_v25, %v4661_v35 }
 0x164   : > { %v1544_v20 = vadd.f32 %v1512_v39, %v1443_v14  ;;  %v1108_v61 = vmul.f32 %v4467_v32, %v4631_v40  ;;  %v4675_v36 = vpop.eup %3489  ;;  %v1240_v6 = vadd.f32 %v1208_v54, %v1139_v59  ;;  %v937_v1 = vadd.f32 %v905_v24, %v804_v47 }
 0x165   : > { %5701 = vst [vmem:[#allocation56_spill] sm:$0xff] %v4675_v36  ;;  %v1836_v43 = vmul.f32 0.3275911, %v1804_v12  ;;  %v2252_v4 = vsub.f32 0.0, %v1804_v12  ;;  %v4679_v42 = vpop.eup %3491  ;;  %3501 = vrcp.f32 %v1867_v5  ;;  %v1513_v39 = vmul.f32 %v4538_v15, %v4677_v38 }
 0x166   : > { %5702 = vst [vmem:[#allocation57_spill] sm:$0xff] %v4679_v42  ;;  %v4681_v53 = vadd.f32 %v1613_v18, %v1544_v20  ;;  %v1614_v14 = vmul.f32 %v4545_v37, %v4663_v9  ;;  %v4687_v13 = vpop.eup %3493  ;;  %3503 = vpow2.f32 %v2334_v60  ;;  %v1341_v8 = vadd.f32 %v1309_v2, %v1240_v6 }
 0x167   : > { %5704 = vst [vmem:[#allocation59_spill] sm:$0xff] %v4687_v13  ;;  %v1038_v36 = vadd.f32 %v1006_v28, %v937_v1  ;;  %v1209_v54 = vmul.f32 %v4480_v55, %v4643_v56  ;;  %v4691_v24 = vpop.eup %3495  ;;  %v1310_v5 = vmul.f32 %v4489_v29, %v4633_v22  ;;  %v805_v47 = vmul.f32 %v4430_v62, %v4592_v44  ;;  %v4705_v1 = vld [vmem:[#allocation2 + $0x140] sm:$0xff] }
 0x168   : > { %5703 = vst [vmem:[#allocation58_spill] sm:$0xff] %v4681_v53  ;;  %5705 = vst [vmem:[#allocation60_spill] sm:$0xff] %v4691_v24  ;;  %2594 = vrot.lane.b32.xlu1 %v4681_v53, %s3611_s28  ;;  %v4696_v18 = vmul.f32 0.70710677, %v4681_v53  ;;  %v906_v60 = vmul.f32 %v4448_v46, %v4607_v51  ;;  %v1868_v59 = vadd.f32 1.0, %v1836_v43  ;;  %v2284_v28 = vmul.f32 %v2252_v4, %v1804_v12  ;;  %v4707_v24 = vld [vmem:[#allocation2 + $0x141] sm:$0xff] }
 0x169   : > { %v1444_v20 = vadd.f32 %v1412_v0, %v1341_v8  ;;  %v1140_v2 = vadd.f32 %v1108_v61, %v1038_v36  ;;  %v4709_v53 = vld [vmem:[#allocation2 + $0x142] sm:$0xff]  ;;  %v1007_v13 = vmul.f32 %v4455_v58, %v4609_v19  ;;  %v1109_v44 = vmul.f32 %v4467_v32, %v4661_v35 }
 0x16a   : > { %5706 = vst [vmem:[#allocation61_spill] sm:$0xff] %v4696_v18  ;;  %v1805_v6 = vand.u32 2147483647, %v4696_v18  ;;  %v938_v42 = vadd.f32 %v906_v60, %v805_v47  ;;  %v1413_v8 = vmul.f32 %v4507_v25, %v4705_v1  ;;  %v1514_v12 = vmul.f32 %v4538_v15, %v4707_v24  ;;  %v4719_v0 = vpop.eup %3497 }
 0x16b   : > { %v1545_v51 = vadd.f32 %v1513_v39, %v1444_v20  ;;  %v1241_v43 = vadd.f32 %v1209_v54, %v1140_v2  ;;  %5707 = vst [vmem:[#allocation62_spill] sm:$0xff] %v4719_v0  ;;  %v1210_v47 = vmul.f32 %v4480_v55, %v4677_v38  ;;  %3505 = vrcp.f32 %v1868_v59  ;;  %v4727_v54 = vld [vmem:[#allocation2 + $0x150] sm:$0xff] }
 0x16c   : > { %v1837_v61 = vmul.f32 0.3275911, %v1805_v6  ;;  %v2253_v36 = vsub.f32 0.0, %v1805_v6  ;;  %v1039_v4 = vadd.f32 %v1007_v13, %v938_v42  ;;  %v1615_v39 = vmul.f32 %v4545_v37, %v4709_v53 }
 0x16d   : > { %v4723_v19 = vadd.f32 %v1614_v14, %v1545_v51  ;;  %v1342_v60 = vadd.f32 %v1310_v5, %v1241_v43  ;;  %v4729_v20 = vpop.eup %3499  ;;  %v2336_v2 = vmul.f32 1.442695, %v2284_v28  ;;  %v1311_v0 = vmul.f32 %v4489_v29, %v4663_v9 }
 0x16e   : > { %5709 = vst [vmem:[#allocation64_spill] sm:$0xff] %v4729_v20  ;;  %v1141_v18 = vadd.f32 %v1109_v44, %v1039_v4  ;;  %v1414_v13 = vmul.f32 %v4507_v25, %v4727_v54  ;;  %v806_v5 = vmul.f32 %v4430_v62, %v4631_v40  ;;  %v907_v59 = vmul.f32 %v4448_v46, %v4643_v56 }
 0x16f   : > { %5708 = vst [vmem:[#allocation63_spill] sm:$0xff] %v4723_v19  ;;  %2596 = vrot.lane.b32.xlu0 %v4723_v19, %s3611_s28  ;;  %v4738_v42 = vmul.f32 0.70710677, %v4723_v19  ;;  %v1445_v14 = vadd.f32 %v1413_v8, %v1342_v60  ;;  %v1869_v28 = vadd.f32 1.0, %v1837_v61  ;;  %v2285_v44 = vmul.f32 %v2253_v36, %v1805_v6  ;;  %v4749_v19 = vld [vmem:[#allocation2 + $0x152] sm:$0xff] }
 0x170   : > { %v1242_v51 = vadd.f32 %v1210_v47, %v1141_v18  ;;  %v1008_v43 = vmul.f32 %v4455_v58, %v4633_v22  ;;  %v939_v8 = vadd.f32 %v907_v59, %v806_v5  ;;  %v1110_v40 = vmul.f32 %v4467_v32, %v4705_v1  ;;  %v4776_v59 = vld [vmem:[#allocation2 + $0x158] sm:$0xff] }
 0x171   : > { %5710 = vst [vmem:[#allocation65_spill] sm:$0xff] %v4738_v42  ;;  %v1806_v4 = vand.u32 2147483647, %v4738_v42  ;;  %v1546_v20 = vadd.f32 %v1514_v12, %v1445_v14  ;;  %3507 = vpow2.f32 %v2336_v2  ;;  %v1515_v56 = vmul.f32 %v4538_v15, %v4747_v63 }
 0x172   : > { %v1343_v60 = vadd.f32 %v1311_v0, %v1242_v51  ;;  %v4757_v18 = vadd.f32 %v4527_v49, %v4524_v52  ;;  %v4759_v22 = vpop.eup %3501  ;;  %v1040_v61 = vadd.f32 %v1008_v43, %v939_v8  ;;  %v1211_v36 = vmul.f32 %v4480_v55, %v4707_v24  ;;  %v1049_v51 = vld [vmem:[#allocation2 + $0x18] sm:$0xff] }
 0x173   : > { %5711 = vst [vmem:[#allocation66_spill] sm:$0xff] %v4759_v22  ;;  %v1838_v6 = vmul.f32 0.3275911, %v1806_v4  ;;  %v4761_v12 = vadd.f32 %v1615_v39, %v1546_v20  ;;  %v4765_v47 = vpop.eup %3503  ;;  %3509 = vrcp.f32 %v1869_v28  ;;  %v2254_v0 = vsub.f32 0.0, %v1806_v4 }
 0x174   : > { %5713 = vst [vmem:[#allocation68_spill] sm:$0xff] %v4765_v47  ;;  %v1446_v2 = vadd.f32 %v1414_v13, %v1343_v60  ;;  %v1616_v14 = vmul.f32 %v4545_v37, %v4749_v19  ;;  %v2338_v5 = vmul.f32 1.442695, %v2285_v44  ;;  %v1142_v49 = vadd.f32 %v1110_v40, %v1040_v61 }
 0x175   : > { %5712 = vst [vmem:[#allocation67_spill] sm:$0xff] %v4761_v12  ;;  %2598 = vrot.lane.b32.xlu1 %v4761_v12, %s3611_s28  ;;  %v4772_v52 = vmul.f32 0.70710677, %v4761_v12  ;;  %v1312_v39 = vmul.f32 %v4489_v29, %v4709_v53  ;;  %v807_v13 = vmul.f32 %v4430_v62, %v4661_v35  ;;  %v908_v28 = vmul.f32 %v4448_v46, %v4677_v38 }
 0x176   : > { %v1547_v20 = vadd.f32 %v1515_v56, %v1446_v2  ;;  %v1009_v44 = vmul.f32 %v4455_v58, %v4663_v9  ;;  %v1870_v43 = vadd.f32 1.0, %v1838_v6  ;;  %v1243_v40 = vadd.f32 %v1211_v36, %v1142_v49  ;;  %v4789_v2 = vld [vmem:[#allocation2 + $0x15a] sm:$0xff] }
 0x177   : > { %5714 = vst [vmem:[#allocation69_spill] sm:$0xff] %v4772_v52  ;;  %v1807_v8 = vand.u32 2147483647, %v4772_v52  ;;  %v1415_v60 = vmul.f32 %v4507_v25, %v4776_v59  ;;  %v2286_v56 = vmul.f32 %v2254_v0, %v1806_v4  ;;  %v940_v35 = vadd.f32 %v908_v28, %v807_v13  ;;  %v4803_v0 = vld [vmem:[#allocation2 + $0x159] sm:$0xff] }
 0x178   : > { %v4787_v61 = vadd.f32 %v1616_v14, %v1547_v20  ;;  %v1111_v38 = vmul.f32 %v4467_v32, %v4727_v54  ;;  %3511 = vpow2.f32 %v2338_v5  ;;  %v1344_v9 = vadd.f32 %v1312_v39, %v1243_v40  ;;  %v4796_v52 = vpop.eup %3505 }
 0x179   : > { %v2255_v12 = vsub.f32 0.0, %v1807_v8  ;;  %v4794_v6 = vmul.f32 %v4467_v32, %v1049_v51  ;;  %5716 = vst [vmem:[#allocation71_spill] sm:$0xff] %v4796_v52  ;;  %v1839_v36 = vmul.f32 0.3275911, %v1807_v8  ;;  %v1041_v14 = vadd.f32 %v1009_v44, %v940_v35 }
 0x17a   : > { %5715 = vst [vmem:[#allocation70_spill] sm:$0xff] %v4787_v61  ;;  %2600 = vrot.lane.b32.xlu0 %v4787_v61, %s3611_s28  ;;  %v4801_v4 = vmul.f32 0.70710677, %v4787_v61  ;;  %v1212_v5 = vmul.f32 %v4480_v55, %v4747_v63  ;;  %3513 = vrcp.f32 %v1870_v43  ;;  %v1447_v49 = vadd.f32 %v1415_v60, %v1344_v9  ;;  %v4816_v43 = vld [vmem:[#allocation2 + $0x168] sm:$0xff]  ;;  %v1150_v9 = vld [vmem:[#allocation2 + $0x19] sm:$0xff] }
 0x17b   : > { %v1516_v39 = vmul.f32 %v4538_v15, %v4803_v0  ;;  %v1617_v20 = vmul.f32 %v4545_v37, %v4789_v2  ;;  %v2340_v13 = vmul.f32 1.442695, %v2286_v56  ;;  %v1143_v51 = vadd.f32 %v1111_v38, %v1041_v14  ;;  %v4828_v14 = vld [vmem:[#allocation2 + $0x16a] sm:$0xff] }
 0x17c   : > { %5717 = vst [vmem:[#allocation72_spill] sm:$0xff] %v4801_v4  ;;  %v1808_v28 = vand.u32 2147483647, %v4801_v4  ;;  %v808_v40 = vmul.f32 %v4430_v62, %v4705_v1  ;;  %v2287_v61 = vmul.f32 %v2255_v12, %v1807_v8  ;;  %v1313_v35 = vmul.f32 %v4489_v29, %v4749_v19 }
 0x17d   : > { %v1548_v44 = vadd.f32 %v1516_v39, %v1447_v49  ;;  %v909_v60 = vmul.f32 %v4448_v46, %v4707_v24  ;;  %v1871_v42 = vadd.f32 1.0, %v1839_v36  ;;  %v1244_v47 = vadd.f32 %v1212_v5, %v1143_v51 }
 0x17e   : > { %v1416_v56 = vmul.f32 %v4507_v25, %v4816_v43  ;;  %v1010_v38 = vmul.f32 %v4455_v58, %v4709_v53  ;;  %v4824_v1 = vpop.eup %3507  ;;  %v1840_v12 = vmul.f32 0.3275911, %v1808_v28  ;;  %v1112_v24 = vmul.f32 %v4467_v32, %v4776_v59 }
 0x17f   : > { %5718 = vst [vmem:[#allocation73_spill] sm:$0xff] %v4824_v1  ;;  %v4826_v8 = vadd.f32 %v1617_v20, %v1548_v44  ;;  %v941_v49 = vadd.f32 %v909_v60, %v808_v40  ;;  %3515 = vpow2.f32 %v2340_v13  ;;  %v2256_v36 = vsub.f32 0.0, %v1808_v28  ;;  %v4842_v44 = vld [vmem:[#allocation2 + $0x169] sm:$0xff] }
 0x180   : > { %v1345_v5 = vadd.f32 %v1313_v35, %v1244_v47  ;;  %v4833_v39 = vmul.f32 %v4480_v55, %v1150_v9  ;;  %v4835_v51 = vpop.eup %3509  ;;  %v2342_v53 = vmul.f32 1.442695, %v2287_v61  ;;  %v1213_v13 = vmul.f32 %v4480_v55, %v4803_v0 }
 0x181   : > { %5719 = vst [vmem:[#allocation74_spill] sm:$0xff] %v4826_v8  ;;  %5720 = vst [vmem:[#allocation75_spill] sm:$0xff] %v4835_v51  ;;  %2602 = vrot.lane.b32.xlu1 %v4826_v8, %s3611_s28  ;;  %v4840_v20 = vmul.f32 0.70710677, %v4826_v8  ;;  %v1042_v40 = vadd.f32 %v1010_v38, %v941_v49  ;;  %3517 = vrcp.f32 %v1871_v42  ;;  %v1517_v35 = vmul.f32 %v4538_v15, %v4842_v44  ;;  %v4853_v49 = vld [vmem:[#allocation2 + $0x170] sm:$0xff]  ;;  %v1251_v51 = vld [vmem:[#allocation2 + $0x1a] sm:$0xff] }
 0x182   : > { %v1448_v47 = vadd.f32 %v1416_v56, %v1345_v5  ;;  %v1618_v61 = vmul.f32 %v4545_v37, %v4828_v14  ;;  %v1872_v60 = vadd.f32 1.0, %v1840_v12  ;;  %v809_v8 = vmul.f32 %v4430_v62, %v4727_v54 }
 0x183   : > { %5721 = vst [vmem:[#allocation76_spill] sm:$0xff] %v4840_v20  ;;  %v1809_v9 = vand.u32 2147483647, %v4840_v20  ;;  %v1144_v4 = vadd.f32 %v1112_v24, %v1042_v40  ;;  %v2288_v1 = vmul.f32 %v2256_v36, %v1808_v28  ;;  %v910_v42 = vmul.f32 %v4448_v46, %v4747_v63  ;;  %v4867_v36 = vld [vmem:[#allocation2 + $0x172] sm:$0xff]  ;;  %v4892_v20 = vld [vmem:[#allocation2 + $0x182] sm:$0xff] }
 0x184   : > { %v1549_v38 = vadd.f32 %v1517_v35, %v1448_v47  ;;  %v1011_v56 = vmul.f32 %v4455_v58, %v4749_v19  ;;  %3519 = vpow2.f32 %v2342_v53  ;;  %v1314_v12 = vmul.f32 %v4489_v29, %v4789_v2 }
 0x185   : > { %v1245_v5 = vadd.f32 %v1213_v13, %v1144_v4  ;;  %v1417_v24 = vmul.f32 %v4507_v25, %v4853_v49  ;;  %v4863_v40 = vpop.eup %3511  ;;  %v1841_v54 = vmul.f32 0.3275911, %v1809_v9  ;;  %v942_v47 = vadd.f32 %v910_v42, %v809_v8 }
 0x186   : > { %5722 = vst [vmem:[#allocation77_spill] sm:$0xff] %v4863_v40  ;;  %v4865_v28 = vadd.f32 %v1618_v61, %v1549_v38  ;;  %v1113_v63 = vmul.f32 %v4467_v32, %v4816_v43  ;;  %3521 = vrcp.f32 %v1872_v60  ;;  %v2257_v19 = vsub.f32 0.0, %v1809_v9  ;;  %v4880_v38 = vld [vmem:[#allocation2 + $0x171] sm:$0xff] }
 0x187   : > { %v1346_v4 = vadd.f32 %v1314_v12, %v1245_v5  ;;  %v1117_v53 = vadd.f32 %v4794_v6, %v4757_v18  ;;  %v4873_v13 = vpop.eup %3513  ;;  %v2344_v35 = vmul.f32 1.442695, %v2288_v1  ;;  %v1043_v8 = vadd.f32 %v1011_v56, %v942_v47 }
 0x188   : > { %5723 = vst [vmem:[#allocation78_spill] sm:$0xff] %v4865_v28  ;;  %5724 = vst [vmem:[#allocation79_spill] sm:$0xff] %v4873_v13  ;;  %2604 = vrot.lane.b32.xlu0 %v4865_v28, %s3611_s28  ;;  %v4878_v61 = vmul.f32 0.70710677, %v4865_v28  ;;  %v1214_v60 = vmul.f32 %v4480_v55, %v4842_v44  ;;  %v1518_v5 = vmul.f32 %v4538_v15, %v4880_v38  ;;  %v1873_v1 = vadd.f32 1.0, %v1841_v54  ;;  %v4890_v28 = vld [vmem:[#allocation2 + $0x181] sm:$0xff] }
 0x189   : > { %v1449_v42 = vadd.f32 %v1417_v24, %v1346_v4  ;;  %v1619_v18 = vmul.f32 %v4545_v37, %v4867_v36  ;;  %v810_v6 = vmul.f32 %v4430_v62, %v4776_v59  ;;  %v1145_v12 = vadd.f32 %v1113_v63, %v1043_v8  ;;  %v4901_v59 = vld [vmem:[#allocation2 + $0x180] sm:$0xff] }
 0x18a   : > { %5725 = vst [vmem:[#allocation80_spill] sm:$0xff] %v4878_v61  ;;  %v911_v56 = vmul.f32 %v4448_v46, %v4803_v0  ;;  %v1012_v24 = vmul.f32 %v4455_v58, %v4789_v2  ;;  %v2289_v47 = vmul.f32 %v2257_v19, %v1809_v9  ;;  %v1810_v4 = vand.u32 2147483647, %v4878_v61  ;;  %v1455_v61 = vld [vmem:[#allocation2 + $0x31] sm:$0xff] }
 0x18b   : > { %v1550_v40 = vadd.f32 %v1518_v5, %v1449_v42  ;;  %v1315_v13 = vmul.f32 %v4489_v29, %v4828_v14  ;;  %v1246_v54 = vadd.f32 %v1214_v60, %v1145_v12  ;;  %v1418_v63 = vmul.f32 %v4507_v25, %v4901_v59 }
 0x18c   : > { %v943_v8 = vadd.f32 %v911_v56, %v810_v6  ;;  %v1114_v0 = vmul.f32 %v4467_v32, %v4853_v49  ;;  %v4907_v52 = vpop.eup %3515  ;;  %3523 = vpow2.f32 %v2344_v35  ;;  %v1519_v9 = vmul.f32 %v4538_v15, %v4890_v28  ;;  %v1354_v6 = vld [vmem:[#allocation2 + $0x30] sm:$0xff] }
 0x18d   : > { %5726 = vst [vmem:[#allocation81_spill] sm:$0xff] %v4907_v52  ;;  %v4909_v2 = vadd.f32 %v1619_v18, %v1550_v40  ;;  %v1620_v19 = vmul.f32 %v4545_v37, %v4892_v20  ;;  %3525 = vrcp.f32 %v1873_v1  ;;  %v1347_v60 = vadd.f32 %v1315_v13, %v1246_v54  ;;  %v4924_v35 = vld [vmem:[#allocation2 + $0x189] sm:$0xff] }
 0x18e   : > { %v1044_v42 = vadd.f32 %v1012_v24, %v943_v8  ;;  %v1215_v5 = vmul.f32 %v4480_v55, %v4880_v38  ;;  %v4917_v12 = vpop.eup %3517  ;;  %v2258_v56 = vsub.f32 0.0, %v1810_v4  ;;  %v1218_v18 = vadd.f32 %v4833_v39, %v1117_v53  ;;  %v746_v52 = vld [vmem:[#allocation2 + $0x8] sm:$0xff] }
 0x18f   : > { %5727 = vst [vmem:[#allocation82_spill] sm:$0xff] %v4909_v2  ;;  %5728 = vst [vmem:[#allocation83_spill] sm:$0xff] %v4917_v12  ;;  %2606 = vrot.lane.b32.xlu1 %v4909_v2, %s3611_s28  ;;  %v4922_v40 = vmul.f32 0.70710677, %v4909_v2  ;;  %v1287_v13 = vmul.f32 %v4489_v29, %v1251_v51  ;;  %v2346_v1 = vmul.f32 1.442695, %v2289_v47  ;;  %v1450_v54 = vadd.f32 %v1418_v63, %v1347_v60 }
 0x190   : > { %v1842_v24 = vmul.f32 0.3275911, %v1810_v4  ;;  %v1146_v8 = vadd.f32 %v1114_v0, %v1044_v42  ;;  %v1316_v22 = vmul.f32 %v4489_v29, %v4867_v36  ;;  %v1390_v34 = vmul.f32 %v4507_v25, %v1354_v6  ;;  %v948_v39 = vld [vmem:[#allocation2 + $0xa] sm:$0xff]  ;;  %v1556_v60 = vld [vmem:[#allocation2 + $0x32] sm:$0xff]  ;;  %v1050_v6 = vld [vmem:[#allocation2 + $0x20] sm:$0xff] }
 0x191   : > { %5729 = vst [vmem:[#allocation84_spill] sm:$0xff] %v4922_v40  ;;  %v1811_v12 = vand.u32 2147483647, %v4922_v40  ;;  %v1319_v2 = vadd.f32 %v1287_v13, %v1218_v18  ;;  %v4934_v53 = vpop.eup %3519  ;;  %v1551_v51 = vadd.f32 %v1519_v9, %v1450_v54  ;;  %v1419_v63 = vmul.f32 %v4507_v25, %v4931_v27 }
 0x192   : > { %5730 = vst [vmem:[#allocation85_spill] sm:$0xff] %v4934_v53  ;;  %v1247_v47 = vadd.f32 %v1215_v5, %v1146_v8  ;;  %v1520_v0 = vmul.f32 %v4538_v15, %v4924_v35  ;;  %v2290_v42 = vmul.f32 %v2258_v56, %v1810_v4  ;;  %v1491_v3 = vmul.f32 %v4538_v15, %v1455_v61  ;;  %v1151_v56 = vld [vmem:[#allocation2 + $0x21] sm:$0xff] }
 0x193   : > { %v1422_v40 = vadd.f32 %v1390_v34, %v1319_v2  ;;  %v782_v18 = vmul.f32 %v4430_v62, %v746_v52  ;;  %v4942_v13 = vpop.eup %3521  ;;  %v4944_v17 = vadd.f32 %v1620_v19, %v1551_v51  ;;  %v883_v5 = vmul.f32 %v4448_v46, %v847_v11 }
 0x194   : > { %v1348_v9 = vadd.f32 %v1316_v22, %v1247_v47  ;;  %v984_v54 = vmul.f32 %v4455_v58, %v948_v39  ;;  %v1843_v8 = vmul.f32 0.3275911, %v1811_v12  ;;  %v2259_v53 = vsub.f32 0.0, %v1811_v12 }
 0x195   : > { %5731 = vst [vmem:[#allocation86_spill] sm:$0xff] %v4944_v17  ;;  %v1523_v4 = vadd.f32 %v1491_v3, %v1422_v40  ;;  %v1592_v34 = vmul.f32 %v4545_v37, %v1556_v60  ;;  %2608 = vrot.lane.b32.xlu0 %v4944_v17, %s3611_s28  ;;  %v4954_v52 = vmul.f32 0.70710677, %v4944_v17  ;;  %v915_v2 = vadd.f32 %v883_v5, %v782_v18  ;;  %v1252_v18 = vld [vmem:[#allocation2 + $0x22] sm:$0xff] }
 0x196   : > { %v1451_v61 = vadd.f32 %v1419_v63, %v1348_v9  ;;  %v1086_v22 = vmul.f32 %v4467_v32, %v1050_v6  ;;  %3527 = vpow2.f32 %v2346_v1  ;;  %v1874_v11 = vadd.f32 1.0, %v1842_v24 }
 0x197   : > { %v4957_v19 = vadd.f32 %v1592_v34, %v1523_v4  ;;  %v1812_v39 = vand.u32 2147483647, %v4954_v52  ;;  %v1621_v40 = vmul.f32 %v4545_v37, %v4948_v26  ;;  %v1016_v51 = vadd.f32 %v984_v54, %v915_v2 }
 0x198   : > { %v1552_v3 = vadd.f32 %v1520_v0, %v1451_v61  ;;  %v2348_v47 = vmul.f32 1.442695, %v2290_v42  ;;  %v1875_v60 = vadd.f32 1.0, %v1843_v8  ;;  %v2291_v17 = vmul.f32 %v2259_v53, %v1811_v12  ;;  %v1355_v12 = vld [vmem:[#allocation2 + $0x38] sm:$0xff] }
 0x199   : > { %5732 = vst [vmem:[#allocation87_spill] sm:$0xff] %v4957_v19  ;;  %v4963_v63 = vmul.f32 0.70710677, %v4957_v19  ;;  %v4965_v6 = vpop.eup %3523  ;;  %v1844_v1 = vmul.f32 0.3275911, %v1812_v39  ;;  %2552 = vrot.lane.b32.xlu0 %v4957_v19, %s3611_s28  ;;  %v1118_v0 = vadd.f32 %v1086_v22, %v1016_v51  ;;  %v1187_v9 = vmul.f32 %v4480_v55, %v1151_v56  ;;  %v1456_v56 = vld [vmem:[#allocation2 + $0x39] sm:$0xff] }
 0x19a   : > { %v4967_v24 = vadd.f32 %v1621_v40, %v1552_v3  ;;  %v4972_v5 = vpop.eup %3525  ;;  %v811_v53 = vmul.f32 %v4430_v62, %v4816_v43  ;;  %v912_v54 = vmul.f32 %v4448_v46, %v4842_v44  ;;  %v1013_v8 = vmul.f32 %v4455_v58, %v4828_v14  ;;  %v1557_v19 = vld [vmem:[#allocation2 + $0x3a] sm:$0xff] }
 0x19b   : > { %5733 = vst [vmem:[#allocation88_spill] sm:$0xff] %v4963_v63  ;;  %v1784_v42 = vand.u32 2147483647, %v4963_v63  ;;  %v2260_v4 = vsub.f32 0.0, %v1812_v39  ;;  %v1219_v61 = vadd.f32 %v1187_v9, %v1118_v0  ;;  %v1288_v2 = vmul.f32 %v4489_v29, %v1252_v18  ;;  %v1384_v9 = vld [vmem:[#allocation2 + $0x198] sm:$0xff] }
 0x19c   : > { %5734 = vst [vmem:[#allocation89_spill] sm:$0xff] %v4967_v24  ;;  %2610 = vrot.lane.b32.xlu1 %v4967_v24, %s3611_s28  ;;  %v4984_v34 = vmul.f32 0.70710677, %v4967_v24  ;;  %3529 = vrcp.f32 %v1874_v11  ;;  %v2350_v22 = vmul.f32 1.442695, %v2291_v17  ;;  %v944_v43 = vadd.f32 %v912_v54, %v811_v53 }
 0x19d   : > { %v1115_v44 = vmul.f32 %v4467_v32, %v4901_v59  ;;  %v2232_v14 = vsub.f32 0.0, %v1784_v42  ;;  %v1320_v40 = vadd.f32 %v1288_v2, %v1219_v61  ;;  %v1391_v51 = vmul.f32 %v4507_v25, %v1355_v12 }
 0x19e   : > { %v1813_v3 = vand.u32 2147483647, %v4984_v34  ;;  %3531 = vpow2.f32 %v2348_v47  ;;  %v1876_v24 = vadd.f32 1.0, %v1844_v1  ;;  %v1045_v63 = vadd.f32 %v1013_v8, %v944_v43  ;;  %v1485_v47 = vld [vmem:[#allocation2 + $0x199] sm:$0xff]  ;;  %v2685_v43 = vld [vmem:[%s5569_s4 + $0x28] sm:$0x3] }
 0x19f   : > { %v1216_v18 = vmul.f32 %v4480_v55, %v4890_v28  ;;  %3533 = vrcp.f32 %v1875_v60  ;;  %v2292_v17 = vmul.f32 %v2260_v4, %v1812_v39  ;;  %v1423_v11 = vadd.f32 %v1391_v51, %v1320_v40  ;;  %3410 = vmatprep.subr.msk.mxu1 %vm2783_vm3, %v2685_v43  ;;  %3350 = vmatprep.subr.msk.mxu0 %vm2783_vm3, %v2685_v43 }
 0x1a0   : > { %v1492_v0 = vmul.f32 %v4538_v15, %v1456_v56  ;;  %3535 = vpow2.f32 %v2350_v22  ;;  %v1593_v59 = vmul.f32 %v4545_v37, %v1557_v19  ;;  %v1147_v53 = vadd.f32 %v1115_v44, %v1045_v63  ;;  %v1586_v19 = vld [vmem:[#allocation2 + $0x19a] sm:$0xff]  ;;  %3416 = vmatpush3.msk.msra.mxu1 %vm2783_vm3, %v2685_v43  ;;  %3351 = vmatpush3.msk.msra.mxu0 %vm2783_vm3, %v2685_v43 }
 0x1a1   : > { %v2261_v54 = vsub.f32 0.0, %v1813_v3  ;;  %v1816_v61 = vmul.f32 0.3275911, %v1784_v42  ;;  %v2264_v12 = vmul.f32 %v2232_v14, %v1784_v42  ;;  %3537 = vrcp.f32 %v1876_v24 }
 0x1a2   : > { %v1524_v2 = vadd.f32 %v1492_v0, %v1423_v11  ;;  %v1248_v1 = vadd.f32 %v1216_v18, %v1147_v53  ;;  %v1317_v28 = vmul.f32 %v4489_v29, %v4892_v20  ;;  %v1420_v39 = vmul.f32 %v4507_v25, %v1384_v9 }
 0x1a3   : > { %v4998_v60 = vpop.eup %3527  ;;  %v2352_v8 = vmul.f32 1.442695, %v2292_v17  ;;  %v1845_v4 = vmul.f32 0.3275911, %v1813_v3  ;;  %v812_v63 = vmul.f32 %v4430_v62, %v4853_v49  ;;  %v1521_v56 = vmul.f32 %v4538_v15, %v1485_v47 }
 0x1a4   : > { %v5000_v22 = vadd.f32 %v1593_v59, %v1524_v2  ;;  %v1349_v42 = vadd.f32 %v1317_v28, %v1248_v1  ;;  %v913_v24 = vmul.f32 %v4448_v46, %v4880_v38  ;;  %v1014_v20 = vmul.f32 %v4455_v58, %v4867_v36  ;;  %v2684_v38 = vld [vmem:[%s5569_s4 + $0x20] sm:$0xff]  ;;  %v2682_v2 = vld [vmem:[%s5569_s4 + $0x10] sm:$0xff] }
 0x1a5   : > { %v2293_v44 = vmul.f32 %v2261_v54, %v1813_v3  ;;  %v1848_v14 = vadd.f32 1.0, %v1816_v61  ;;  %v2296_v40 = vmul.f32 1.442695, %v2264_v12  ;;  %v1622_v49 = vmul.f32 %v4545_v37, %v1586_v19  ;;  %3411 = vmatprep.subr.mxu1 %v2684_v38  ;;  %3352 = vmatprep.subr.mxu0 %v2684_v38  ;;  %v1486_v61 = vld [vmem:[#allocation2 + $0x1a1] sm:$0xff] }
 0x1a6   : > { %v5013_v51 = vmul.f32 0.70710677, %v5000_v22  ;;  %2554 = vrot.lane.b32.xlu0 %v5000_v22, %s3611_s28  ;;  %v1452_v62 = vadd.f32 %v1420_v39, %v1349_v42  ;;  %v945_v46 = vadd.f32 %v913_v24, %v812_v63  ;;  %v1116_v58 = vmul.f32 %v4467_v32, %v4931_v27  ;;  %v1385_v27 = vld [vmem:[#allocation2 + $0x1a0] sm:$0xff]  ;;  %v2683_v32 = vld [vmem:[%s5569_s4 + $0x18] sm:$0xff]  ;;  %3417 = vmatpush3.msra.mxu1 %v2684_v38  ;;  %v2681_v63 = vld [vmem:[%s5569_s4 + $0x8] sm:$0xff] }
 0x1a7   : > { %3539 = vpow2.f32 %v2352_v8  ;;  %v1877_v36 = vadd.f32 1.0, %v1845_v4  ;;  %v1217_v11 = vmul.f32 %v4480_v55, %v4924_v35  ;;  %v2354_v9 = vmul.f32 1.442695, %v2293_v44  ;;  %3353 = vmatpush3.msra.mxu0 %v2684_v38  ;;  %v1587_v8 = vld [vmem:[#allocation2 + $0x1a2] sm:$0xff]  ;;  %3412 = vmatprep.subr.mxu1 %v2683_v32 }
 0x1a8   : > { %v1785_v3 = vand.u32 2147483647, %v5013_v51  ;;  %v1553_v18 = vadd.f32 %v1521_v56, %v1452_v62  ;;  %v1046_v17 = vadd.f32 %v1014_v20, %v945_v46  ;;  %3541 = vrcp.f32 %v1848_v14  ;;  %3418 = vmatpush3.msra.mxu1 %v2683_v32  ;;  %3354 = vmatprep.subr.mxu0 %v2683_v32 }
 0x1a9   : > { %v5026_v0 = vpop.eup %3529  ;;  %v1946_v59 = vmul.f32 1.0614054, %v4113_v21  ;;  %3543 = vpow2.f32 %v2296_v40  ;;  %v1318_v35 = vmul.f32 %v4489_v29, %v4948_v26  ;;  %v1421_v39 = vmul.f32 %v4507_v25, %v1385_v27  ;;  %3413 = vmatprep.subr.mxu1 %v2682_v2  ;;  %3355 = vmatpush3.msra.mxu0 %v2683_v32  ;;  %v2680_v40 = vld [vmem:[%s5569_s4] sm:$0xff] }
 0x1aa   : > { %v5032_v53 = vadd.f32 %v1622_v49, %v1553_v18  ;;  %v1148_v54 = vadd.f32 %v1116_v58, %v1046_v17  ;;  %3545 = vrcp.f32 %v1877_v36  ;;  %v2233_v1 = vsub.f32 0.0, %v1785_v3  ;;  %3419 = vmatpush3.msra.mxu1 %v2682_v2  ;;  %3356 = vmatprep.subr.mxu0 %v2682_v2 }
 0x1ab   : > { %v5034_v55 = vpop.eup %3531  ;;  %v1978_v12 = vadd.f32 -1.4531521, %v1946_v59  ;;  %v1947_v26 = vmul.f32 1.0614054, %v4124_v23  ;;  %3547 = vpow2.f32 %v2354_v9  ;;  %v1817_v4 = vmul.f32 0.3275911, %v1785_v3  ;;  %3414 = vmatprep.subr.mxu1 %v2681_v63  ;;  %3357 = vmatpush3.msra.mxu0 %v2682_v2 }
 0x1ac   : > { %v5041_v47 = vpop.eup %3533  ;;  %2612 = vrot.lane.b32.xlu1 %v5032_v53, %s3611_s28  ;;  %v1249_v28 = vadd.f32 %v1217_v11, %v1148_v54  ;;  %v5054_v42 = vmul.f32 0.70710677, %v5032_v53  ;;  %v1522_v56 = vmul.f32 %v4538_v15, %v1486_v61  ;;  %v1623_v43 = vmul.f32 %v4545_v37, %v1587_v8  ;;  %3420 = vmatpush3.msra.mxu1 %v2681_v63 }
 0x1ad   : > { %v5047_v29 = vpop.eup %3535  ;;  %v2010_v19 = vmul.f32 %v4113_v21, %v1978_v12  ;;  %v1979_v24 = vadd.f32 -1.4531521, %v1947_v26  ;;  %v1948_v14 = vmul.f32 1.0614054, %v4153_v7  ;;  %v2265_v62 = vmul.f32 %v2233_v1, %v1785_v3  ;;  %3358 = vmatprep.subr.mxu0 %v2681_v63  ;;  %3415 = vmatprep.subr.mxu1 %v2680_v40 }
 0x1ae   : > { %v1350_v25 = vadd.f32 %v1318_v35, %v1249_v28  ;;  %v5057_v20 = vpop.eup %3537  ;;  %vm1722_vm4 = vcmp.ge.f32.partialorder %v3998_v33, 0.0  ;;  %v1849_v46 = vadd.f32 1.0, %v1817_v4  ;;  %v5067_v37 = vmul.f32 0.5, %v3985_v31  ;;  %3359 = vmatpush3.msra.mxu0 %v2681_v63  ;;  %3421 = vmatpush3.msra.mxu1 %v2680_v40 }
 0x1af   : > { %v2042_v44 = vadd.f32 1.4214138, %v2010_v19  ;;  %v2011_v15 = vmul.f32 %v4124_v23, %v1979_v24  ;;  %v1980_v36 = vadd.f32 -1.4531521, %v1948_v14  ;;  %v1814_v38 = vand.u32 2147483647, %v5054_v42  ;;  %3360 = vmatprep.subr.mxu0 %v2680_v40 }
 0x1b0   : > { %v1453_v49 = vadd.f32 %v1421_v39, %v1350_v25  ;;  %vm1723_vm5 = vcmp.ge.f32.partialorder %v4007_v45, 0.0  ;;  %v3612_v17 = vmov -1.0   ;;  %v1949_v27 = vmul.f32 1.0614054, %v4175_v48  ;;  %3361 = vmatpush3.msra.mxu0 %v2680_v40 }
 0x1b1   : > { %v2074_v58 = vmul.f32 %v4113_v21, %v2042_v44  ;;  %v2043_v3 = vadd.f32 1.4214138, %v2011_v15  ;;  %v1754_v11 = vsel %vm1722_vm4, 1.0, %v3612_v17  ;;  %v2012_v9 = vmul.f32 %v4153_v7, %v1980_v36 }
 0x1b2   : > { %v1554_v18 = vadd.f32 %v1522_v56, %v1453_v49  ;;  %v2298_v59 = vmul.f32 1.442695, %v2265_v62  ;;  %v5082_v35 = vmul.f32 0.5, %v3992_v30  ;;  %v1755_v12 = vsel %vm1723_vm5, 1.0, %v3612_v17 }
 0x1b3   : > { %v2106_v31 = vadd.f32 -0.28449672, %v2074_v58  ;;  %v2075_v61 = vmul.f32 %v4124_v23, %v2043_v3  ;;  %v2044_v2 = vadd.f32 1.4214138, %v2012_v9  ;;  %v1981_v1 = vadd.f32 -1.4531521, %v1949_v27 }
 0x1b4   : > { %v5077_v32 = vpop.eup %3539  ;;  %v5079_v54 = vadd.f32 %v1623_v43, %v1554_v18  ;;  %3549 = vrcp.f32 %v1849_v46  ;;  %v1846_v39 = vmul.f32 0.3275911, %v1814_v38  ;;  %v2262_v8 = vsub.f32 0.0, %v1814_v38  ;;  %v5735_v18 = vld [vmem:[#allocation3_spill] sm:$0xff] }
 0x1b5   : > { %v2138_v33 = vmul.f32 %v4113_v21, %v2106_v31  ;;  %v5089_v28 = vpop.eup %3541  ;;  %v2107_v30 = vadd.f32 -0.28449672, %v2075_v61  ;;  %vm1724_vm6 = vcmp.ge.f32.partialorder %v4030_v10, 0.0  ;;  %v2076_v19 = vmul.f32 %v4153_v7, %v2044_v2  ;;  %v5736_v31 = vld [vmem:[#allocation18_spill] sm:$0xff] }
 0x1b6   : > { %2614 = vrot.lane.b32.xlu1 %v5079_v54, %s3611_s28  ;;  %v5093_v26 = vpop.eup %3543  ;;  %v2013_v45 = vmul.f32 %v4175_v48, %v1981_v1  ;;  %3551 = vpow2.f32 %v2298_v59  ;;  %v5102_v56 = vmul.f32 0.5, %v4020_v57  ;;  %v1950_v24 = vmul.f32 1.0614054, %v4209_v50 }
 0x1b7   : > { %v2170_v4 = vadd.f32 0.2548296, %v2138_v33  ;;  %v5098_v63 = vpop.eup %3545  ;;  %v2139_v25 = vmul.f32 %v4124_v23, %v2107_v30  ;;  %v2108_v44 = vadd.f32 -0.28449672, %v2076_v19  ;;  %vm1725_vm7 = vcmp.ge.f32.partialorder %v4051_v41, 0.0  ;;  %v5737_v33 = vld [vmem:[#allocation8_spill] sm:$0xff] }
 0x1b8   : > { %v2045_v14 = vadd.f32 1.4214138, %v2013_v45  ;;  %v5107_v40 = vpop.eup %3547  ;;  %v1878_v62 = vadd.f32 1.0, %v1846_v39  ;;  %v2294_v49 = vmul.f32 %v2262_v8, %v1814_v38  ;;  %v1756_v46 = vsel %vm1724_vm6, 1.0, %v3612_v17  ;;  %v2557_v39 = vpop.permute.xlu0 %2556 }
 0x1b9   : > { %v2202_v43 = vmul.f32 %v4113_v21, %v2170_v4  ;;  %v2171_v15 = vadd.f32 0.2548296, %v2139_v25  ;;  %v2140_v58 = vmul.f32 %v4153_v7, %v2108_v44  ;;  %v1982_v21 = vadd.f32 -1.4531521, %v1950_v24  ;;  %v5738_v25 = vld [vmem:[#allocation4_spill] sm:$0xff] }
 0x1ba   : > { %v2077_v36 = vmul.f32 %v4175_v48, %v2045_v14  ;;  %v5117_v3 = vmul.f32 0.5, %v5735_v18  ;;  %v1757_v38 = vsel %vm1725_vm7, 1.0, %v3612_v17  ;;  %v1951_v9 = vmul.f32 1.0614054, %v5736_v31  ;;  %v5739_v14 = vld [vmem:[#allocation9_spill] sm:$0xff] }
 0x1bb   : > { %v2362_v57 = vmul.f32 %v4133_v16, %v2202_v43  ;;  %v2203_v41 = vmul.f32 %v4124_v23, %v2171_v15  ;;  %v2172_v10 = vadd.f32 0.2548296, %v2140_v58  ;;  %v2014_v16 = vmul.f32 %v4209_v50, %v1982_v21  ;;  %v5741_v58 = vld [vmem:[#allocation23_spill] sm:$0xff] }
 0x1bc   : > { %v2109_v59 = vadd.f32 -0.28449672, %v2077_v36  ;;  %3553 = vrcp.f32 %v1878_v62  ;;  %v2356_v61 = vmul.f32 1.442695, %v2294_v49  ;;  %v1983_v1 = vadd.f32 -1.4531521, %v1951_v9 }
 0x1bd   : > { %v2394_v27 = vsub.f32 1.0, %v2362_v57  ;;  %v2363_v2 = vmul.f32 %v5737_v33, %v2203_v41  ;;  %v2204_v23 = vmul.f32 %v4153_v7, %v2172_v10  ;;  %v2046_v4 = vadd.f32 1.4214138, %v2014_v16  ;;  %v5740_v7 = vld [vmem:[#allocation5_spill] sm:$0xff] }
 0x1be   : > { %v2141_v30 = vmul.f32 %v4175_v48, %v2109_v59  ;;  %v5126_v19 = vmul.f32 0.70710677, %v5079_v54  ;;  %v5129_v24 = vmul.f32 0.5, %v5738_v25  ;;  %v2015_v43 = vmul.f32 %v5736_v31, %v1983_v1  ;;  %v2559_v1 = vpop.permute.xlu0 %2558 }
 0x1bf   : > { %v2426_v8 = vmul.f32 %v2394_v27, %v1754_v11  ;;  %v2395_v45 = vsub.f32 1.0, %v2363_v2  ;;  %v2364_v62 = vmul.f32 %v5739_v14, %v2204_v23  ;;  %v2078_v11 = vmul.f32 %v4209_v50, %v2046_v4  ;;  %v5742_v23 = vld [vmem:[#allocation12_spill] sm:$0xff] }
 0x1c0   : > { %v2173_v49 = vadd.f32 0.2548296, %v2141_v30  ;;  %vm1726_vm9 = vcmp.ge.f32.partialorder %v5740_v7, 0.0  ;;  %v2047_v57 = vadd.f32 1.4214138, %v2015_v43  ;;  %3555 = vpow2.f32 %v2356_v61 }
 0x1c1   : > { %v2458_v44 = vadd.f32 1.0, %v2426_v8  ;;  %v2427_v15 = vmul.f32 %v2395_v45, %v1755_v12  ;;  %v1952_v36 = vmul.f32 1.0614054, %v5741_v58  ;;  %v5136_v21 = vpop.eup %3549  ;;  %v2396_v18 = vsub.f32 1.0, %v2364_v62 }
 0x1c2   : > { %v2205_v9 = vmul.f32 %v4175_v48, %v2173_v49  ;;  %v2110_v27 = vadd.f32 -0.28449672, %v2078_v11  ;;  %v1815_v10 = vand.u32 2147483647, %v5126_v19  ;;  %v2079_v16 = vmul.f32 %v5736_v31, %v2047_v57  ;;  %v2561_v48 = vpop.permute.xlu1 %2560  ;;  %v5743_v57 = vld [vmem:[#allocation27_spill] sm:$0xff] }
 0x1c3   : > { %v2490_v41 = vmul.f32 %v2458_v44, %v5067_v37  ;;  %v2459_v59 = vadd.f32 1.0, %v2427_v15  ;;  %v1984_v33 = vadd.f32 -1.4531521, %v1952_v36  ;;  %v5142_v12 = vpop.eup %3551  ;;  %v2428_v8 = vmul.f32 %v2396_v18, %v1756_v46  ;;  %v5744_v18 = vld [vmem:[#allocation7_spill] sm:$0xff] }
 0x1c4   : > { %v2365_v30 = vmul.f32 %v5742_v23, %v2205_v9  ;;  %v2142_v4 = vmul.f32 %v4209_v50, %v2110_v27  ;;  %v2111_v45 = vadd.f32 -0.28449672, %v2079_v16  ;;  %v1847_v14 = vmul.f32 0.3275911, %v1815_v10 }
 0x1c5   : > { %v2650_v2 = vmul.f32 %v2557_v39, %v2490_v41  ;;  %v2491_v37 = vmul.f32 %v2459_v59, %v5082_v35  ;;  %v2016_v25 = vmul.f32 %v5741_v58, %v1984_v33  ;;  %v2460_v43 = vadd.f32 1.0, %v2428_v8  ;;  %v5745_v33 = vld [vmem:[#allocation15_spill] sm:$0xff] }
 0x1c6   : > { %v2397_v44 = vsub.f32 1.0, %v2365_v30  ;;  %v1758_v39 = vsel %vm1726_vm9, 1.0, %v3612_v17  ;;  %v2174_v46 = vadd.f32 0.2548296, %v2142_v4  ;;  %v2143_v49 = vmul.f32 %v5736_v31, %v2111_v45  ;;  %v5747_v30 = vld [vmem:[#allocation30_spill] sm:$0xff] }
 0x1c7   : > { %3365 = vmatprep.mubr.msk.f32.mxu1 %vm2686_vm8, %v2650_v2  ;;  %v2651_v62 = vmul.f32 %v2559_v1, %v2491_v37  ;;  %v2048_v61 = vadd.f32 1.4214138, %v2016_v25  ;;  %v2492_v35 = vmul.f32 %v2460_v43, %v5102_v56  ;;  %v1953_v36 = vmul.f32 1.0614054, %v5743_v57  ;;  %v5746_v1 = vld [vmem:[#allocation6_spill] sm:$0xff] }
 0x1c8   : > { %v2429_v11 = vmul.f32 %v2397_v44, %v1757_v38  ;;  %v2206_v15 = vmul.f32 %v4209_v50, %v2174_v46  ;;  %v2263_v41 = vsub.f32 0.0, %v1815_v10  ;;  %vm1727_vm10 = vcmp.ge.f32.partialorder %v5744_v18, 0.0  ;;  %v2563_v38 = vpop.permute.xlu1 %2562  ;;  %v5748_v44 = vld [vmem:[#allocation19_spill] sm:$0xff] }
 0x1c9   : > { %3366 = vmatmul.mubr.msk.f32.vlgmr.msra.gmra.mxu1 %vm2686_vm8, %v2651_v62  ;;  %v2175_v7 = vadd.f32 0.2548296, %v2143_v49  ;;  %v2080_v9 = vmul.f32 %v5741_v58, %v2048_v61  ;;  %v5159_v27 = vpop.eup %3553  ;;  %v2652_v59 = vmul.f32 %v2561_v48, %v2492_v35  ;;  %v1985_v56 = vadd.f32 -1.4531521, %v1953_v36  ;;  %v5749_v36 = vld [vmem:[#allocation34_spill] sm:$0xff]  ;;  %v5750_v18 = vld [vmem:[#allocation11_spill] sm:$0xff] }
 0x1ca   : > { %v2461_v16 = vadd.f32 1.0, %v2429_v11  ;;  %v2366_v2 = vmul.f32 %v5745_v33, %v2206_v15  ;;  %v1663_v50 = vmul.f32 0.5, %v5746_v1  ;;  %v1954_v4 = vmul.f32 1.0614054, %v5747_v30 }
 0x1cb   : > { %v2207_v8 = vmul.f32 %v5736_v31, %v2175_v7  ;;  %v2112_v23 = vadd.f32 -0.28449672, %v2080_v9  ;;  %v1879_v37 = vadd.f32 1.0, %v1847_v14  ;;  %3368 = vmatprep.mubr.msk.f32.mxu1 %vm2686_vm8, %v2652_v59  ;;  %v2017_v48 = vmul.f32 %v5743_v57, %v1985_v56 }
 0x1cc   : > { %v2493_v45 = vmul.f32 %v2461_v16, %v5117_v3  ;;  %v2398_v25 = vsub.f32 1.0, %v2366_v2  ;;  %v1759_v43 = vsel %vm1727_vm10, 1.0, %v3612_v17  ;;  %v1986_v31 = vadd.f32 -1.4531521, %v1954_v4  ;;  %v2565_v16 = vpop.permute.xlu0 %2564 }
 0x1cd   : > { %v2367_v46 = vmul.f32 %v5748_v44, %v2207_v8  ;;  %v2144_v62 = vmul.f32 %v5741_v58, %v2112_v23  ;;  %v5173_v49 = vmul.f32 %v2263_v41, %v1815_v10  ;;  %v2049_v35 = vadd.f32 1.4214138, %v2017_v48  ;;  %v5181_v2 = vpop.eup %3555  ;;  %v5752_v23 = vld [vmem:[#allocation38_spill] sm:$0xff] }
 0x1ce   : > { %v2653_v61 = vmul.f32 %v2563_v38, %v2493_v45  ;;  %v2430_v14 = vmul.f32 %v2398_v25, %v1758_v39  ;;  %v2018_v15 = vmul.f32 %v5747_v30, %v1986_v31  ;;  %v1955_v7 = vmul.f32 1.0614054, %v5749_v36  ;;  %v5751_v38 = vld [vmem:[#allocation10_spill] sm:$0xff]  ;;  %v5753_v45 = vld [vmem:[#allocation25_spill] sm:$0xff] }
 0x1cf   : > { %v2399_v3 = vsub.f32 1.0, %v2367_v46  ;;  %v2176_v11 = vadd.f32 0.2548296, %v2144_v62  ;;  %3557 = vrcp.f32 %v1879_v37  ;;  %vm1728_vm11 = vcmp.ge.f32.partialorder %v5750_v18, 0.0 }
 0x1d0   : > { %v2462_v9 = vadd.f32 1.0, %v2430_v14  ;;  %3369 = vmatmul.mubr.msk.f32.gmra.mxu1 %vm2686_vm8, %v2653_v61  ;;  %v2081_v59 = vmul.f32 %v5743_v57, %v2049_v35  ;;  %v2050_v39 = vadd.f32 1.4214138, %v2018_v15  ;;  %v1987_v33 = vadd.f32 -1.4531521, %v1955_v7  ;;  %v5755_v7 = vld [vmem:[#allocation42_spill] sm:$0xff] }
 0x1d1   : > { %v2431_v10 = vmul.f32 %v2399_v3, %v1759_v43  ;;  %v2208_v41 = vmul.f32 %v5741_v58, %v2176_v11  ;;  %v1664_v1 = vmul.f32 0.5, %v5751_v38  ;;  %v1956_v4 = vmul.f32 1.0614054, %v5752_v23  ;;  %v2567_v58 = vpop.permute.xlu1 %2566  ;;  %v5754_v3 = vld [vmem:[#allocation14_spill] sm:$0xff] }
 0x1d2   : > { %v2494_v56 = vmul.f32 %v2462_v9, %v5129_v24  ;;  %v2113_v8 = vadd.f32 -0.28449672, %v2081_v59  ;;  %v2082_v48 = vmul.f32 %v5747_v30, %v2050_v39  ;;  %v2019_v43 = vmul.f32 %v5749_v36, %v1987_v33 }
 0x1d3   : > { %v2463_v37 = vadd.f32 1.0, %v2431_v10  ;;  %v2368_v25 = vmul.f32 %v5753_v45, %v2208_v41  ;;  %v1760_v46 = vsel %vm1728_vm11, 1.0, %v3612_v17  ;;  %v1988_v62 = vadd.f32 -1.4531521, %v1956_v4  ;;  %v5756_v41 = vld [vmem:[#allocation13_spill] sm:$0xff]  ;;  %v2569_v45 = vpop.permute.xlu0 %2568 }
 0x1d4   : > { %v2654_v44 = vmul.f32 %v2565_v16, %v2494_v56  ;;  %v2145_v24 = vmul.f32 %v5743_v57, %v2113_v8  ;;  %v2114_v14 = vadd.f32 -0.28449672, %v2082_v48  ;;  %v2051_v35 = vadd.f32 1.4214138, %v2019_v43  ;;  %v5758_v43 = vld [vmem:[#allocation16_spill] sm:$0xff] }
 0x1d5   : > { %v2495_v31 = vmul.f32 %v2463_v37, %v1663_v50  ;;  %v2400_v61 = vsub.f32 1.0, %v2368_v25  ;;  %vm1729_vm12 = vcmp.ge.f32.partialorder %v5754_v3, 0.0  ;;  %v2020_v15 = vmul.f32 %v5752_v23, %v1988_v62  ;;  %v5757_v25 = vld [vmem:[#allocation29_spill] sm:$0xff] }
 0x1d6   : > { %3371 = vmatprep.mubr.msk.f32.mxu1 %vm2686_vm8, %v2654_v44  ;;  %v2177_v11 = vadd.f32 0.2548296, %v2145_v24  ;;  %v1957_v9 = vmul.f32 1.0614054, %v5755_v7  ;;  %v2146_v18 = vmul.f32 %v5747_v30, %v2114_v14  ;;  %v2083_v10 = vmul.f32 %v5749_v36, %v2051_v35  ;;  %v5760_v14 = vld [vmem:[#allocation21_spill] sm:$0xff] }
 0x1d7   : > { %v2655_v59 = vmul.f32 %v2567_v58, %v2495_v31  ;;  %v2432_v16 = vmul.f32 %v2400_v61, %v1760_v46  ;;  %v1665_v50 = vmul.f32 0.5, %v5756_v41  ;;  %v2052_v33 = vadd.f32 1.4214138, %v2020_v15 }
 0x1d8   : > { %v2209_v39 = vmul.f32 %v5743_v57, %v2177_v11  ;;  %v1989_v56 = vadd.f32 -1.4531521, %v1957_v9  ;;  %v1761_v8 = vsel %vm1729_vm12, 1.0, %v3612_v17  ;;  %v2178_v4 = vadd.f32 0.2548296, %v2146_v18  ;;  %v5759_v57 = vld [vmem:[#allocation17_spill] sm:$0xff] }
 0x1d9   : > { %v2464_v38 = vadd.f32 1.0, %v2432_v16  ;;  %3372 = vmatmul.mubr.msk.f32.gmra.mxu1 %vm2686_vm8, %v2655_v59  ;;  %v2115_v37 = vadd.f32 -0.28449672, %v2083_v10  ;;  %v1666_v44 = vmul.f32 0.5, %v5758_v43  ;;  %v2084_v58 = vmul.f32 %v5752_v23, %v2052_v33  ;;  %v5761_v9 = vld [vmem:[#allocation31_spill] sm:$0xff]  ;;  %v2571_v43 = vpop.permute.xlu1 %2570 }
 0x1da   : > { %v2369_v48 = vmul.f32 %v5757_v25, %v2209_v39  ;;  %v2021_v46 = vmul.f32 %v5755_v7, %v1989_v56  ;;  %vm1730_vm13 = vcmp.ge.f32.partialorder %v5759_v57, 0.0  ;;  %v2210_v62 = vmul.f32 %v5747_v30, %v2178_v4  ;;  %v5762_v18 = vld [vmem:[#allocation47_spill] sm:$0xff]  ;;  %v5763_v56 = vld [vmem:[#allocation20_spill] sm:$0xff] }
 0x1db   : > { %v2496_v24 = vmul.f32 %v2464_v38, %v1664_v1  ;;  %v2147_v31 = vmul.f32 %v5749_v36, %v2115_v37  ;;  %vm1731_vm14 = vcmp.ge.f32.partialorder %v5760_v14, 0.0  ;;  %v2116_v35 = vadd.f32 -0.28449672, %v2084_v58 }
 0x1dc   : > { %v2401_v61 = vsub.f32 1.0, %v2369_v48  ;;  %v2053_v3 = vadd.f32 1.4214138, %v2021_v46  ;;  %v5211_v11 = vpop.eup %3557  ;;  %v2370_v59 = vmul.f32 %v5761_v9, %v2210_v62  ;;  %v1958_v10 = vmul.f32 1.0614054, %v5762_v18  ;;  %v5764_v46 = vld [vmem:[#allocation36_spill] sm:$0xff] }
 0x1dd   : > { %v2656_v15 = vmul.f32 %v2569_v45, %v2496_v24  ;;  %v2179_v16 = vadd.f32 0.2548296, %v2147_v31  ;;  %v1762_v41 = vsel %vm1730_vm13, 1.0, %v3612_v17  ;;  %v2148_v30 = vmul.f32 %v5752_v23, %v2116_v35  ;;  %v5765_v62 = vld [vmem:[#allocation50_spill] sm:$0xff]  ;;  %v5766_v35 = vld [vmem:[#allocation24_spill] sm:$0xff] }
 0x1de   : > { %v2433_v1 = vmul.f32 %v2401_v61, %v1761_v8  ;;  %v2085_v39 = vmul.f32 %v5755_v7, %v2053_v3  ;;  %v2402_v33 = vsub.f32 1.0, %v2370_v59  ;;  %v1667_v38 = vmul.f32 0.5, %v5763_v56 }
 0x1df   : > { %3374 = vmatprep.mubr.msk.f32.mxu1 %vm2686_vm8, %v2656_v15  ;;  %v2211_v4 = vmul.f32 %v5749_v36, %v2179_v16  ;;  %v1990_v37 = vadd.f32 -1.4531521, %v1958_v10  ;;  %v1763_v25 = vsel %vm1731_vm14, 1.0, %v3612_v17  ;;  %v2180_v8 = vadd.f32 0.2548296, %v2148_v30  ;;  %v2573_v10 = vpop.permute.xlu0 %2572  ;;  %v5768_v30 = vld [vmem:[#allocation39_spill] sm:$0xff] }
 0x1e0   : > { %v2465_v45 = vadd.f32 1.0, %v2433_v1  ;;  %v2117_v48 = vadd.f32 -0.28449672, %v2085_v39  ;;  %v2434_v58 = vmul.f32 %v2402_v33, %v1762_v41  ;;  %v1959_v31 = vmul.f32 1.0614054, %v5765_v62  ;;  %v5767_v1 = vld [vmem:[#allocation22_spill] sm:$0xff] }
 0x1e1   : > { %v2371_v24 = vmul.f32 %v5764_v46, %v2211_v4  ;;  %v2022_v57 = vmul.f32 %v5762_v18, %v1990_v37  ;;  %vm1732_vm15 = vcmp.ge.f32.partialorder %v5766_v35, 0.0  ;;  %v2212_v36 = vmul.f32 %v5752_v23, %v2180_v8  ;;  %v5772_v35 = vld [vmem:[#allocation26_spill] sm:$0xff] }
 0x1e2   : > { %v2497_v61 = vmul.f32 %v2465_v45, %v1665_v50  ;;  %v2149_v3 = vmul.f32 %v5755_v7, %v2117_v48  ;;  %v2466_v15 = vadd.f32 1.0, %v2434_v58  ;;  %v1991_v59 = vadd.f32 -1.4531521, %v1959_v31  ;;  %v5769_v48 = vld [vmem:[#allocation56_spill] sm:$0xff] }
 0x1e3   : > { %v2403_v14 = vsub.f32 1.0, %v2371_v24  ;;  %v2054_v9 = vadd.f32 1.4214138, %v2022_v57  ;;  %v1668_v41 = vmul.f32 0.5, %v5767_v1  ;;  %v2372_v39 = vmul.f32 %v5768_v30, %v2212_v36  ;;  %v5770_v31 = vld [vmem:[#allocation28_spill] sm:$0xff]  ;;  %v5773_v1 = vld [vmem:[#allocation59_spill] sm:$0xff] }
 0x1e4   : > { %v2657_v16 = vmul.f32 %v2571_v43, %v2497_v61  ;;  %v2181_v33 = vadd.f32 0.2548296, %v2149_v3  ;;  %v2498_v56 = vmul.f32 %v2466_v15, %v1666_v44  ;;  %v2023_v37 = vmul.f32 %v5765_v62, %v1991_v59  ;;  %v5771_v61 = vld [vmem:[#allocation43_spill] sm:$0xff] }
 0x1e5   : > { %v2435_v4 = vmul.f32 %v2403_v14, %v1763_v25  ;;  %v2086_v50 = vmul.f32 %v5762_v18, %v2054_v9  ;;  %v1764_v23 = vsel %vm1732_vm15, 1.0, %v3612_v17  ;;  %v2404_v45 = vsub.f32 1.0, %v2372_v39  ;;  %v2575_v25 = vpop.permute.xlu1 %2574 }
 0x1e6   : > { %3375 = vmatmul.mubr.msk.f32.gmra.mxu1 %vm2686_vm8, %v2657_v16  ;;  %v2213_v8 = vmul.f32 %v5755_v7, %v2181_v33  ;;  %v1960_v43 = vmul.f32 1.0614054, %v5769_v48  ;;  %v2658_v58 = vmul.f32 %v2573_v10, %v2498_v56  ;;  %v2055_v44 = vadd.f32 1.4214138, %v2023_v37  ;;  %v2577_v33 = vpop.permute.xlu0 %2576 }
 0x1e7   : > { %v2467_v46 = vadd.f32 1.0, %v2435_v4  ;;  %v2118_v24 = vadd.f32 -0.28449672, %v2086_v50  ;;  %v2436_v57 = vmul.f32 %v2404_v45, %v1764_v23  ;;  %vm1733_vm1 = vcmp.ge.f32.partialorder %v5770_v31, 0.0 }
 0x1e8   : > { %v2373_v36 = vmul.f32 %v5771_v61, %v2213_v8  ;;  %v1992_v3 = vadd.f32 -1.4531521, %v1960_v43  ;;  %3377 = vmatprep.mubr.msk.f32.mxu1 %vm2686_vm8, %v2658_v58  ;;  %v1669_v14 = vmul.f32 0.5, %v5772_v35  ;;  %v2087_v9 = vmul.f32 %v5765_v62, %v2055_v44  ;;  %v5774_v8 = vld [vmem:[#allocation33_spill] sm:$0xff]  ;;  %v5776_v61 = vld [vmem:[#allocation32_spill] sm:$0xff] }
 0x1e9   : > { %v2499_v15 = vmul.f32 %v2467_v46, %v1667_v38  ;;  %v2150_v7 = vmul.f32 %v5762_v18, %v2118_v24  ;;  %v2468_v59 = vadd.f32 1.0, %v2436_v57  ;;  %v1961_v30 = vmul.f32 1.0614054, %v5773_v1  ;;  %v5775_v46 = vld [vmem:[#allocation62_spill] sm:$0xff] }
 0x1ea   : > { %v2405_v16 = vsub.f32 1.0, %v2373_v36  ;;  %v2024_v10 = vmul.f32 %v5769_v48, %v1992_v3  ;;  %v1765_v56 = vsel %vm1733_vm1, 1.0, %v3612_v17  ;;  %v2119_v38 = vadd.f32 -0.28449672, %v2087_v9  ;;  %v5777_v3 = vld [vmem:[#allocation49_spill] sm:$0xff] }
 0x1eb   : > { %v2659_v39 = vmul.f32 %v2575_v25, %v2499_v15  ;;  %v2182_v4 = vadd.f32 0.2548296, %v2150_v7  ;;  %v2500_v50 = vmul.f32 %v2468_v59, %v1668_v41  ;;  %v1993_v45 = vadd.f32 -1.4531521, %v1961_v30  ;;  %v2579_v41 = vpop.permute.xlu1 %2578  ;;  %v5778_v30 = vld [vmem:[#allocation37_spill] sm:$0xff] }
 0x1ec   : > { %v2437_v37 = vmul.f32 %v2405_v16, %v1765_v56  ;;  %v2056_v23 = vadd.f32 1.4214138, %v2024_v10  ;;  %vm1734_vm2 = vcmp.ge.f32.partialorder %v5774_v8, 0.0  ;;  %v2151_v58 = vmul.f32 %v5765_v62, %v2119_v38 }
 0x1ed   : > { %3378 = vmatmul.mubr.msk.f32.gmra.mxu1 %vm2686_vm8, %v2659_v39  ;;  %v2214_v43 = vmul.f32 %v5762_v18, %v2182_v4  ;;  %v1962_v24 = vmul.f32 1.0614054, %v5775_v46  ;;  %v2660_v44 = vmul.f32 %v2577_v33, %v2500_v50  ;;  %v2025_v31 = vmul.f32 %v5773_v1, %v1993_v45  ;;  %v5779_v4 = vld [vmem:[#allocation35_spill] sm:$0xff] }
 0x1ee   : > { %v2469_v25 = vadd.f32 1.0, %v2437_v37  ;;  %v2088_v57 = vmul.f32 %v5769_v48, %v2056_v23  ;;  %v1670_v36 = vmul.f32 0.5, %v5776_v61  ;;  %v2183_v35 = vadd.f32 0.2548296, %v2151_v58  ;;  %v5780_v23 = vld [vmem:[#allocation52_spill] sm:$0xff] }
 0x1ef   : > { %v2374_v15 = vmul.f32 %v5777_v3, %v2214_v43  ;;  %v1994_v7 = vadd.f32 -1.4531521, %v1962_v24  ;;  %3380 = vmatprep.mubr.msk.f32.mxu1 %vm2686_vm8, %v2660_v44  ;;  %v1766_v18 = vsel %vm1734_vm2, 1.0, %v3612_v17  ;;  %v2057_v16 = vadd.f32 1.4214138, %v2025_v31  ;;  %v5781_v43 = vld [vmem:[#allocation66_spill] sm:$0xff]  ;;  %v2581_v3 = vpop.permute.xlu0 %2580 }
 0x1f0   : > { %v2501_v9 = vmul.f32 %v2469_v25, %v1669_v14  ;;  %v2120_v59 = vadd.f32 -0.28449672, %v2088_v57  ;;  %vm1735_vm3 = vcmp.ge.f32.partialorder %v5778_v30, 0.0  ;;  %v2215_v39 = vmul.f32 %v5765_v62, %v2183_v35  ;;  %v5782_v62 = vld [vmem:[#allocation41_spill] sm:$0xff] }
 0x1f1   : > { %v2406_v10 = vsub.f32 1.0, %v2374_v15  ;;  %v2026_v33 = vmul.f32 %v5775_v46, %v1994_v7  ;;  %v1671_v38 = vmul.f32 0.5, %v5779_v4  ;;  %v2089_v14 = vmul.f32 %v5773_v1, %v2057_v16  ;;  %v5783_v15 = vld [vmem:[#allocation40_spill] sm:$0xff] }
 0x1f2   : > { %v2661_v56 = vmul.f32 %v2579_v41, %v2501_v9  ;;  %v2152_v50 = vmul.f32 %v5769_v48, %v2120_v59  ;;  %v2375_v45 = vmul.f32 %v5780_v23, %v2215_v39  ;;  %v1963_v58 = vmul.f32 1.0614054, %v5781_v43 }
 0x1f3   : > { %v2438_v37 = vmul.f32 %v2406_v10, %v1766_v18  ;;  %v2058_v8 = vadd.f32 1.4214138, %v2026_v33  ;;  %v1767_v24 = vsel %vm1735_vm3, 1.0, %v3612_v17  ;;  %vm1736_vm4 = vcmp.ge.f32.partialorder %v5782_v62, 0.0  ;;  %v5784_v18 = vld [vmem:[#allocation71_spill] sm:$0xff]  ;;  %v5787_v62 = vld [vmem:[#allocation45_spill] sm:$0xff] }
 0x1f4   : > { %3381 = vmatmul.mubr.msk.f32.gmra.mxu1 %vm2686_vm8, %v2661_v56  ;;  %v2184_v44 = vadd.f32 0.2548296, %v2152_v50  ;;  %v2121_v25 = vadd.f32 -0.28449672, %v2089_v14  ;;  %v2407_v31 = vsub.f32 1.0, %v2375_v45  ;;  %v1672_v35 = vmul.f32 0.5, %v5783_v15 }
 0x1f5   : > { %v2470_v57 = vadd.f32 1.0, %v2438_v37  ;;  %v2090_v41 = vmul.f32 %v5775_v46, %v2058_v8  ;;  %v1995_v61 = vadd.f32 -1.4531521, %v1963_v58  ;;  %v1964_v59 = vmul.f32 1.0614054, %v5784_v18  ;;  %v5785_v56 = vld [vmem:[#allocation57_spill] sm:$0xff]  ;;  %v2583_v8 = vpop.permute.xlu1 %2582 }
 0x1f6   : > { %v2216_v7 = vmul.f32 %v5769_v48, %v2184_v44  ;;  %v2153_v9 = vmul.f32 %v5773_v1, %v2121_v25  ;;  %v2439_v10 = vmul.f32 %v2407_v31, %v1767_v24  ;;  %v1768_v33 = vsel %vm1736_vm4, 1.0, %v3612_v17 }
 0x1f7   : > { %v2502_v16 = vmul.f32 %v2470_v57, %v1670_v36  ;;  %v2122_v30 = vadd.f32 -0.28449672, %v2090_v41  ;;  %v2027_v39 = vmul.f32 %v5781_v43, %v1995_v61  ;;  %v1996_v14 = vadd.f32 -1.4531521, %v1964_v59  ;;  %v5786_v36 = vld [vmem:[#allocation44_spill] sm:$0xff] }
 0x1f8   : > { %v2376_v4 = vmul.f32 %v5785_v56, %v2216_v7  ;;  %v2185_v50 = vadd.f32 0.2548296, %v2153_v9  ;;  %v2471_v23 = vadd.f32 1.0, %v2439_v10  ;;  %v1673_v24 = vmul.f32 0.5, %v5786_v36  ;;  %v5789_v9 = vld [vmem:[#allocation75_spill] sm:$0xff]  ;;  %v5790_v10 = vld [vmem:[#allocation48_spill] sm:$0xff] }
 0x1f9   : > { %v2662_v37 = vmul.f32 %v2581_v3, %v2502_v16  ;;  %v2154_v48 = vmul.f32 %v5775_v46, %v2122_v30  ;;  %v2059_v45 = vadd.f32 1.4214138, %v2027_v39  ;;  %v2028_v25 = vmul.f32 %v5784_v18, %v1996_v14  ;;  %v5788_v3 = vld [vmem:[#allocation60_spill] sm:$0xff] }
 0x1fa   : > { %v2408_v58 = vsub.f32 1.0, %v2376_v4  ;;  %v2217_v44 = vmul.f32 %v5773_v1, %v2185_v50  ;;  %v2503_v57 = vmul.f32 %v2471_v23, %v1671_v38  ;;  %vm1737_vm5 = vcmp.ge.f32.partialorder %v5787_v62, 0.0  ;;  %v2585_v50 = vpop.permute.xlu0 %2584  ;;  %v5791_v14 = vld [vmem:[#allocation64_spill] sm:$0xff] }
 0x1fb   : > { %3383 = vmatprep.mubr.msk.f32.mxu1 %vm2686_vm8, %v2662_v37  ;;  %v2186_v31 = vadd.f32 0.2548296, %v2154_v48  ;;  %v2091_v41 = vmul.f32 %v5781_v43, %v2059_v45  ;;  %v2060_v7 = vadd.f32 1.4214138, %v2028_v25  ;;  %v1965_v59 = vmul.f32 1.0614054, %v5789_v9 }
 0x1fc   : > { %v2440_v61 = vmul.f32 %v2408_v58, %v1768_v33  ;;  %v2377_v15 = vmul.f32 %v5788_v3, %v2217_v44  ;;  %v2663_v16 = vmul.f32 %v2583_v8, %v2503_v57  ;;  %vm1738_vm6 = vcmp.ge.f32.partialorder %v5790_v10, 0.0  ;;  %v5792_v48 = vld [vmem:[#allocation79_spill] sm:$0xff]  ;;  %v5793_v10 = vld [vmem:[#allocation53_spill] sm:$0xff] }
 0x1fd   : > { %v2218_v1 = vmul.f32 %v5775_v46, %v2186_v31  ;;  %v2123_v30 = vadd.f32 -0.28449672, %v2091_v41  ;;  %v2092_v56 = vmul.f32 %v5784_v18, %v2060_v7  ;;  %v1997_v4 = vadd.f32 -1.4531521, %v1965_v59 }
 0x1fe   : > { %v2472_v38 = vadd.f32 1.0, %v2440_v61  ;;  %v2409_v39 = vsub.f32 1.0, %v2377_v15  ;;  %3384 = vmatmul.mubr.msk.f32.gmra.mxu1 %vm2686_vm8, %v2663_v16  ;;  %v1769_v33 = vsel %vm1737_vm5, 1.0, %v3612_v17  ;;  %v1966_v45 = vmul.f32 1.0614054, %v5792_v48 }
 0x1ff   : > { %v2378_v37 = vmul.f32 %v5791_v14, %v2218_v1  ;;  %v2155_v23 = vmul.f32 %v5781_v43, %v2123_v30  ;;  %v2124_v58 = vadd.f32 -0.28449672, %v2092_v56  ;;  %v2029_v36 = vmul.f32 %v5789_v9, %v1997_v4 }
 0x200   : > { %v2504_v46 = vmul.f32 %v2472_v38, %v1672_v35  ;;  %v2441_v8 = vmul.f32 %v2409_v39, %v1769_v33  ;;  %v1770_v44 = vsel %vm1738_vm6, 1.0, %v3612_v17  ;;  %v1998_v31 = vadd.f32 -1.4531521, %v1966_v45  ;;  %v2587_v35 = vpop.permute.xlu1 %2586  ;;  %v5794_v39 = vld [vmem:[#allocation46_spill] sm:$0xff]  ;;  %v5796_v45 = vld [vmem:[#allocation83_spill] sm:$0xff] }
 0x201   : > { %v2410_v25 = vsub.f32 1.0, %v2378_v37  ;;  %v2187_v57 = vadd.f32 0.2548296, %v2155_v23  ;;  %v2156_v61 = vmul.f32 %v5784_v18, %v2124_v58  ;;  %v2061_v3 = vadd.f32 1.4214138, %v2029_v36  ;;  %v2589_v37 = vpop.permute.xlu0 %2588 }
 0x202   : > { %v2664_v62 = vmul.f32 %v2585_v50, %v2504_v46  ;;  %v2473_v41 = vadd.f32 1.0, %v2441_v8  ;;  %v5306_v15 = vmul.f32 1.442695, %v5173_v49  ;;  %v2030_v16 = vmul.f32 %v5792_v48, %v1998_v31  ;;  %v5795_v50 = vld [vmem:[#allocation68_spill] sm:$0xff] }
 0x203   : > { %v2442_v7 = vmul.f32 %v2410_v25, %v1770_v44  ;;  %v2219_v59 = vmul.f32 %v5781_v43, %v2187_v57  ;;  %vm1739_vm7 = vcmp.ge.f32.partialorder %v5793_v10, 0.0  ;;  %v2188_v30 = vadd.f32 0.2548296, %v2156_v61  ;;  %v5797_v44 = vld [vmem:[#allocation55_spill] sm:$0xff]  ;;  %v5798_v25 = vld [vmem:[#allocation73_spill] sm:$0xff] }
 0x204   : > { %v2505_v1 = vmul.f32 %v2473_v41, %v1673_v24  ;;  %3386 = vmatprep.mubr.msk.f32.mxu1 %vm2686_vm8, %v2664_v62  ;;  %v2093_v38 = vmul.f32 %v5789_v9, %v2061_v3  ;;  %v1674_v56 = vmul.f32 0.5, %v5794_v39  ;;  %v2062_v33 = vadd.f32 1.4214138, %v2030_v16 }
 0x205   : > { %v2474_v4 = vadd.f32 1.0, %v2442_v7  ;;  %v2379_v49 = vmul.f32 %v5795_v50, %v2219_v59  ;;  %v2220_v43 = vmul.f32 %v5784_v18, %v2188_v30  ;;  %v1967_v24 = vmul.f32 1.0614054, %v5796_v45  ;;  %v5799_v18 = vld [vmem:[#allocation51_spill] sm:$0xff] }
 0x206   : > { %v2665_v14 = vmul.f32 %v2587_v35, %v2505_v1  ;;  %v2125_v23 = vadd.f32 -0.28449672, %v2093_v38  ;;  %v1771_v8 = vsel %vm1739_vm7, 1.0, %v3612_v17  ;;  %v2094_v36 = vmul.f32 %v5792_v48, %v2062_v33  ;;  %v5800_v38 = vld [vmem:[#allocation61_spill] sm:$0xff] }
 0x207   : > { %v2506_v46 = vmul.f32 %v2474_v4, %v1674_v56  ;;  %v2411_v58 = vsub.f32 1.0, %v2379_v49  ;;  %vm1740_vm9 = vcmp.ge.f32.partialorder %v5797_v44, 0.0  ;;  %v2380_v57 = vmul.f32 %v5798_v25, %v2220_v43  ;;  %v2591_v56 = vpop.permute.xlu1 %2590 }
 0x208   : > { %3387 = vmatmul.mubr.msk.f32.gmra.mxu1 %vm2686_vm8, %v2665_v14  ;;  %v2157_v31 = vmul.f32 %v5789_v9, %v2125_v23  ;;  %v1999_v62 = vadd.f32 -1.4531521, %v1967_v24  ;;  %v1675_v61 = vmul.f32 0.5, %v5799_v18  ;;  %v2126_v35 = vadd.f32 -0.28449672, %v2094_v36 }
 0x209   : > { %v2666_v41 = vmul.f32 %v2589_v37, %v2506_v46  ;;  %v2443_v3 = vmul.f32 %v2411_v58, %v1771_v8  ;;  %v2412_v7 = vsub.f32 1.0, %v2380_v57  ;;  %v1968_v1 = vmul.f32 1.0614054, %v4942_v13  ;;  %v5801_v37 = vld [vmem:[#allocation54_spill] sm:$0xff]  ;;  %v5802_v8 = vld [vmem:[#allocation77_spill] sm:$0xff]  ;;  %v2593_v57 = vpop.permute.xlu0 %2592 }
 0x20a   : > { %v2189_v59 = vadd.f32 0.2548296, %v2157_v31  ;;  %v2031_v16 = vmul.f32 %v5796_v45, %v1999_v62  ;;  %v1772_v30 = vsel %vm1740_vm9, 1.0, %v3612_v17  ;;  %vm1741_vm10 = vcmp.ge.f32.partialorder %v5800_v38, 0.0 }
 0x20b   : > { %v2475_v10 = vadd.f32 1.0, %v2443_v3  ;;  %3389 = vmatprep.mubr.msk.f32.mxu1 %vm2686_vm8, %v2666_v41  ;;  %v2158_v39 = vmul.f32 %v5792_v48, %v2126_v35  ;;  %v2444_v4 = vmul.f32 %v2412_v7, %v1772_v30  ;;  %v2000_v33 = vadd.f32 -1.4531521, %v1968_v1  ;;  %v5803_v35 = vld [vmem:[#allocation65_spill] sm:$0xff] }
 0x20c   : > { %v2221_v50 = vmul.f32 %v5789_v9, %v2189_v59  ;;  %v2063_v49 = vadd.f32 1.4214138, %v2031_v16  ;;  %v1676_v43 = vmul.f32 0.5, %v5801_v37  ;;  %v1969_v24 = vmul.f32 1.0614054, %v4972_v5  ;;  %v5804_v7 = vld [vmem:[#allocation81_spill] sm:$0xff] }
 0x20d   : > { %v2507_v14 = vmul.f32 %v2475_v10, %v1675_v61  ;;  %v2190_v23 = vadd.f32 0.2548296, %v2158_v39  ;;  %v2476_v46 = vadd.f32 1.0, %v2444_v4  ;;  %v2032_v44 = vmul.f32 %v4942_v13, %v2000_v33  ;;  %v5805_v39 = vld [vmem:[#allocation58_spill] sm:$0xff] }
 0x20e   : > { %v2381_v58 = vmul.f32 %v5802_v8, %v2221_v50  ;;  %v2095_v36 = vmul.f32 %v5796_v45, %v2063_v49  ;;  %v1773_v9 = vsel %vm1741_vm10, 1.0, %v3612_v17  ;;  %v2001_v62 = vadd.f32 -1.4531521, %v1969_v24  ;;  %v5806_v24 = vld [vmem:[#allocation63_spill] sm:$0xff] }
 0x20f   : > { %v2667_v25 = vmul.f32 %v2591_v56, %v2507_v14  ;;  %v2222_v31 = vmul.f32 %v5792_v48, %v2190_v23  ;;  %v2508_v41 = vmul.f32 %v2476_v46, %v1676_v43  ;;  %v2064_v3 = vadd.f32 1.4214138, %v2032_v44  ;;  %v2595_v23 = vpop.permute.xlu1 %2594 }
 0x210   : > { %v2413_v18 = vsub.f32 1.0, %v2381_v58  ;;  %v2127_v61 = vadd.f32 -0.28449672, %v2095_v36  ;;  %vm1742_vm11 = vcmp.ge.f32.partialorder %v5803_v35, 0.0  ;;  %v2033_v16 = vmul.f32 %v4972_v5, %v2001_v62  ;;  %v5808_v62 = vld [vmem:[#allocation67_spill] sm:$0xff]  ;;  %v2597_v35 = vpop.permute.xlu0 %2596 }
 0x211   : > { %3390 = vmatmul.mubr.msk.f32.gmra.mxu1 %vm2686_vm8, %v2667_v25  ;;  %v2382_v59 = vmul.f32 %v5804_v7, %v2222_v31  ;;  %v1970_v1 = vmul.f32 1.0614054, %v5026_v0  ;;  %v2668_v10 = vmul.f32 %v2593_v57, %v2508_v41  ;;  %v2096_v48 = vmul.f32 %v4942_v13, %v2064_v3  ;;  %v5807_v25 = vld [vmem:[#allocation69_spill] sm:$0xff] }
 0x212   : > { %v2445_v30 = vmul.f32 %v2413_v18, %v1773_v9  ;;  %v2159_v38 = vmul.f32 %v5796_v45, %v2127_v61  ;;  %v1677_v56 = vmul.f32 0.5, %v5805_v39  ;;  %v2065_v50 = vadd.f32 1.4214138, %v2033_v16  ;;  %v5809_v7 = vld [vmem:[#allocation85_spill] sm:$0xff]  ;;  %v5810_v39 = vld [vmem:[#allocation72_spill] sm:$0xff] }
 0x213   : > { %v2414_v4 = vsub.f32 1.0, %v2382_v59  ;;  %v2002_v49 = vadd.f32 -1.4531521, %v1970_v1  ;;  %3392 = vmatprep.mubr.msk.f32.mxu1 %vm2686_vm8, %v2668_v10  ;;  %v1774_v14 = vsel %vm1742_vm11, 1.0, %v3612_v17  ;;  %v2128_v43 = vadd.f32 -0.28449672, %v2096_v48 }
 0x214   : > { %v2477_v33 = vadd.f32 1.0, %v2445_v30  ;;  %v2191_v37 = vadd.f32 0.2548296, %v2159_v38  ;;  %v1678_v46 = vmul.f32 0.5, %v5806_v24  ;;  %v2097_v58 = vmul.f32 %v4972_v5, %v2065_v50 }
 0x215   : > { %v2446_v8 = vmul.f32 %v2414_v4, %v1774_v14  ;;  %v2034_v36 = vmul.f32 %v5026_v0, %v2002_v49  ;;  %vm1743_vm12 = vcmp.ge.f32.partialorder %v5807_v25, 0.0  ;;  %v2160_v9 = vmul.f32 %v4942_v13, %v2128_v43  ;;  %v5811_v43 = vld [vmem:[#allocation70_spill] sm:$0xff] }
 0x216   : > { %v2509_v44 = vmul.f32 %v2477_v33, %v1677_v56  ;;  %v2223_v57 = vmul.f32 %v5796_v45, %v2191_v37  ;;  %v1679_v41 = vmul.f32 0.5, %v5808_v62  ;;  %v2129_v18 = vadd.f32 -0.28449672, %v2097_v58 }
 0x217   : > { %v2478_v31 = vadd.f32 1.0, %v2446_v8  ;;  %v2066_v61 = vadd.f32 1.4214138, %v2034_v36  ;;  %v2192_v16 = vadd.f32 0.2548296, %v2160_v9  ;;  %v1775_v30 = vsel %vm1743_vm12, 1.0, %v3612_v17 }
 0x218   : > { %v2669_v3 = vmul.f32 %v2595_v23, %v2509_v44  ;;  %v2383_v59 = vmul.f32 %v5809_v7, %v2223_v57  ;;  %v1971_v1 = vmul.f32 1.0614054, %v5041_v47  ;;  %v2161_v38 = vmul.f32 %v4972_v5, %v2129_v18  ;;  %v5812_v8 = vld [vmem:[#allocation76_spill] sm:$0xff] }
 0x219   : > { %v2510_v10 = vmul.f32 %v2478_v31, %v1678_v46  ;;  %v2098_v45 = vmul.f32 %v5026_v0, %v2066_v61  ;;  %vm1744_vm13 = vcmp.ge.f32.partialorder %v5810_v39, 0.0  ;;  %v2224_v56 = vmul.f32 %v4942_v13, %v2192_v16  ;;  %v2599_v31 = vpop.permute.xlu1 %2598 }
 0x21a   : > { %3393 = vmatmul.mubr.msk.f32.gmra.mxu1 %vm2686_vm8, %v2669_v3  ;;  %v2415_v48 = vsub.f32 1.0, %v2383_v59  ;;  %v2003_v4 = vadd.f32 -1.4531521, %v1971_v1  ;;  %v2193_v49 = vadd.f32 0.2548296, %v2161_v38  ;;  %v1680_v23 = vmul.f32 0.5, %v5811_v43 }
 0x21b   : > { %v2670_v50 = vmul.f32 %v2597_v35, %v2510_v10  ;;  %v2130_v33 = vadd.f32 -0.28449672, %v2098_v45  ;;  %v1972_v14 = vmul.f32 1.0614054, %v5057_v20  ;;  %v2384_v24 = vmul.f32 %v4965_v6, %v2224_v56  ;;  %v5813_v45 = vld [vmem:[#allocation80_spill] sm:$0xff] }
 0x21c   : > { %v2447_v37 = vmul.f32 %v2415_v48, %v1775_v30  ;;  %v2035_v46 = vmul.f32 %v5041_v47, %v2003_v4  ;;  %vm1745_vm14 = vcmp.ge.f32.partialorder %v5812_v8, 0.0  ;;  %v2225_v58 = vmul.f32 %v4972_v5, %v2193_v49  ;;  %v2601_v48 = vpop.permute.xlu0 %2600  ;;  %v5814_v49 = vld [vmem:[#allocation74_spill] sm:$0xff] }
 0x21d   : > { %3395 = vmatprep.mubr.msk.f32.mxu1 %vm2686_vm8, %v2670_v50  ;;  %v2162_v13 = vmul.f32 %v5026_v0, %v2130_v33  ;;  %v2004_v36 = vadd.f32 -1.4531521, %v1972_v14  ;;  %v1776_v25 = vsel %vm1744_vm13, 1.0, %v3612_v17  ;;  %v2416_v57 = vsub.f32 1.0, %v2384_v24 }
 0x21e   : > { %v2479_v44 = vadd.f32 1.0, %v2447_v37  ;;  %v2067_v9 = vadd.f32 1.4214138, %v2035_v46  ;;  %v2385_v6 = vmul.f32 %v4998_v60, %v2225_v58  ;;  %v1973_v61 = vmul.f32 1.0614054, %v5098_v63  ;;  %v2603_v58 = vpop.permute.xlu1 %2602 }
 0x21f   : > { %v2194_v62 = vadd.f32 0.2548296, %v2162_v13  ;;  %v2036_v18 = vmul.f32 %v5057_v20, %v2004_v36  ;;  %v2448_v5 = vmul.f32 %v2416_v57, %v1776_v25  ;;  %v1777_v35 = vsel %vm1745_vm14, 1.0, %v3612_v17 }
 0x220   : > { %v2511_v3 = vmul.f32 %v2479_v44, %v1679_v41  ;;  %v2099_v7 = vmul.f32 %v5041_v47, %v2067_v9  ;;  %v2417_v59 = vsub.f32 1.0, %v2385_v6  ;;  %v2005_v10 = vadd.f32 -1.4531521, %v1973_v61  ;;  %v5815_v9 = vld [vmem:[#allocation78_spill] sm:$0xff] }
 0x221   : > { %v2226_v16 = vmul.f32 %v5026_v0, %v2194_v62  ;;  %v2068_v1 = vadd.f32 1.4214138, %v2036_v18  ;;  %v2480_v38 = vadd.f32 1.0, %v2448_v5  ;;  %vm1746_vm15 = vcmp.ge.f32.partialorder %v5813_v45, 0.0 }
 0x222   : > { %v2671_v30 = vmul.f32 %v2599_v31, %v2511_v3  ;;  %v2131_v60 = vadd.f32 -0.28449672, %v2099_v7  ;;  %v2449_v39 = vmul.f32 %v2417_v59, %v1777_v35  ;;  %v2037_v4 = vmul.f32 %v5098_v63, %v2005_v10  ;;  %v2605_v7 = vpop.permute.xlu0 %2604  ;;  %v5816_v59 = vld [vmem:[#allocation84_spill] sm:$0xff] }
 0x223   : > { %v2386_v56 = vmul.f32 %v5034_v55, %v2226_v16  ;;  %v2100_v41 = vmul.f32 %v5057_v20, %v2068_v1  ;;  %v2512_v50 = vmul.f32 %v2480_v38, %v1680_v23  ;;  %v1681_v0 = vmul.f32 0.5, %v5814_v49  ;;  %v5817_v38 = vld [vmem:[#allocation82_spill] sm:$0xff] }
 0x224   : > { %3396 = vmatmul.mubr.msk.f32.gmra.mxu1 %vm2686_vm8, %v2671_v30  ;;  %v2163_v33 = vmul.f32 %v5041_v47, %v2131_v60  ;;  %v1944_v14 = vmul.f32 1.0614054, %v5089_v28  ;;  %v2481_v37 = vadd.f32 1.0, %v2449_v39  ;;  %v2069_v46 = vadd.f32 1.4214138, %v2037_v4 }
 0x225   : > { %v2418_v43 = vsub.f32 1.0, %v2386_v56  ;;  %v2132_v24 = vadd.f32 -0.28449672, %v2100_v41  ;;  %v2672_v8 = vmul.f32 %v2601_v48, %v2512_v50  ;;  %v1778_v55 = vsel %vm1746_vm15, 1.0, %v3612_v17 }
 0x226   : > { %v2195_v13 = vadd.f32 0.2548296, %v2163_v33  ;;  %v1976_v23 = vadd.f32 -1.4531521, %v1944_v14  ;;  %v2513_v36 = vmul.f32 %v2481_v37, %v1681_v0  ;;  %v2101_v57 = vmul.f32 %v5098_v63, %v2069_v46 }
 0x227   : > { %v2450_v44 = vmul.f32 %v2418_v43, %v1778_v55  ;;  %v2164_v25 = vmul.f32 %v5057_v20, %v2132_v24  ;;  %3398 = vmatprep.mubr.msk.f32.mxu1 %vm2686_vm8, %v2672_v8  ;;  %v1682_v31 = vmul.f32 0.5, %v5815_v9  ;;  %v1945_v18 = vmul.f32 1.0614054, %v5136_v21  ;;  %v2607_v8 = vpop.permute.xlu1 %2606 }
 0x228   : > { %v2227_v6 = vmul.f32 %v5041_v47, %v2195_v13  ;;  %v2008_v62 = vmul.f32 %v5089_v28, %v1976_v23  ;;  %v2673_v61 = vmul.f32 %v2603_v58, %v2513_v36  ;;  %v2133_v35 = vadd.f32 -0.28449672, %v2101_v57  ;;  %v5818_v58 = vld [vmem:[#allocation86_spill] sm:$0xff] }
 0x229   : > { %v2482_v3 = vadd.f32 1.0, %v2450_v44  ;;  %v2196_v5 = vadd.f32 0.2548296, %v2164_v25  ;;  %vm1747_vm1 = vcmp.ge.f32.partialorder %v5816_v59, 0.0  ;;  %v1977_v10 = vadd.f32 -1.4531521, %v1945_v18 }
 0x22a   : > { %v2387_v16 = vmul.f32 %v5047_v29, %v2227_v6  ;;  %v2040_v1 = vadd.f32 1.4214138, %v2008_v62  ;;  %3399 = vmatmul.mubr.msk.f32.gmra.mxu1 %vm2686_vm8, %v2673_v61  ;;  %v1683_v47 = vmul.f32 0.5, %v5817_v38  ;;  %v2165_v60 = vmul.f32 %v5098_v63, %v2133_v35  ;;  %v2609_v61 = vpop.permute.xlu0 %2608 }
 0x22b   : > { %v2514_v30 = vmul.f32 %v2482_v3, %v1682_v31  ;;  %v2228_v45 = vmul.f32 %v5057_v20, %v2196_v5  ;;  %vm1748_vm2 = vcmp.ge.f32.partialorder %v4954_v52, 0.0  ;;  %v2009_v56 = vmul.f32 %v5136_v21, %v1977_v10 }
 0x22c   : > { %v2419_v48 = vsub.f32 1.0, %v2387_v16  ;;  %v2072_v39 = vmul.f32 %v5089_v28, %v2040_v1  ;;  %v1779_v29 = vsel %vm1747_vm1, 1.0, %v3612_v17  ;;  %v2197_v50 = vadd.f32 0.2548296, %v2165_v60  ;;  %v5819_v16 = vld [vmem:[#allocation88_spill] sm:$0xff]  ;;  %v2611_v60 = vpop.permute.xlu1 %2610 }
 0x22d   : > { %v2674_v41 = vmul.f32 %v2605_v7, %v2514_v30  ;;  %v2388_v4 = vmul.f32 %v5077_v32, %v2228_v45  ;;  %v2041_v33 = vadd.f32 1.4214138, %v2009_v56  ;;  %v1974_v20 = vmul.f32 1.0614054, %v5159_v27 }
 0x22e   : > { %v2451_v49 = vmul.f32 %v2419_v48, %v1779_v29  ;;  %v2104_v0 = vadd.f32 -0.28449672, %v2072_v39  ;;  %v1780_v14 = vsel %vm1748_vm2, 1.0, %v3612_v17  ;;  %vm1749_vm3 = vcmp.ge.f32.partialorder %v4984_v34, 0.0 }
 0x22f   : > { %3401 = vmatprep.mubr.msk.f32.mxu1 %vm2686_vm8, %v2674_v41  ;;  %v2420_v52 = vsub.f32 1.0, %v2388_v4  ;;  %v2229_v37 = vmul.f32 %v5098_v63, %v2197_v50  ;;  %v2073_v32 = vmul.f32 %v5136_v21, %v2041_v33  ;;  %v2006_v46 = vadd.f32 -1.4531521, %v1974_v20  ;;  %v5821_v20 = vld [vmem:[#allocation87_spill] sm:$0xff] }
 0x230   : > { %v2483_v43 = vadd.f32 1.0, %v2451_v49  ;;  %v2136_v24 = vmul.f32 %v5089_v28, %v2104_v0  ;;  %v1684_v55 = vmul.f32 0.5, %v5818_v58  ;;  %v1975_v36 = vmul.f32 1.0614054, %v5211_v11  ;;  %v2553_v0 = vpop.permute.xlu0 %2552 }
 0x231   : > { %v2452_v13 = vmul.f32 %v2420_v52, %v1780_v14  ;;  %v2389_v23 = vmul.f32 %v5107_v40, %v2229_v37  ;;  %v2105_v57 = vadd.f32 -0.28449672, %v2073_v32  ;;  %v2038_v9 = vmul.f32 %v5159_v27, %v2006_v46 }
 0x232   : > { %v2515_v44 = vmul.f32 %v2483_v43, %v1683_v47  ;;  %v2168_v25 = vadd.f32 0.2548296, %v2136_v24  ;;  %v1781_v31 = vsel %vm1749_vm3, 1.0, %v3612_v17  ;;  %v2007_v62 = vadd.f32 -1.4531521, %v1975_v36 }
 0x233   : > { %v2484_v63 = vadd.f32 1.0, %v2452_v13  ;;  %v2421_v6 = vsub.f32 1.0, %v2389_v23  ;;  %v2137_v40 = vmul.f32 %v5136_v21, %v2105_v57  ;;  %v2070_v5 = vadd.f32 1.4214138, %v2038_v9 }
 0x234   : > { %v2675_v18 = vmul.f32 %v2607_v8, %v2515_v44  ;;  %v2200_v3 = vmul.f32 %v5089_v28, %v2168_v25  ;;  %3559 = vpow2.f32 %v5306_v15  ;;  %v2039_v59 = vmul.f32 %v5211_v11, %v2007_v62  ;;  %v5820_v28 = vld [vmem:[#allocation89_spill] sm:$0xff]  ;;  %v2555_v23 = vpop.permute.xlu0 %2554 }
 0x235   : > { %v2516_v35 = vmul.f32 %v2484_v63, %v1684_v55  ;;  %v2453_v7 = vmul.f32 %v2421_v6, %v1781_v31  ;;  %vm1720_vm4 = vcmp.ge.f32.partialorder %v5819_v16, 0.0  ;;  %v2169_v1 = vadd.f32 0.2548296, %v2137_v40  ;;  %v2613_v63 = vpop.permute.xlu1 %2612 }
 0x236   : > { %3402 = vmatmul.mubr.msk.f32.gmra.mxu1 %vm2686_vm8, %v2675_v18  ;;  %v2360_v34 = vmul.f32 %v5093_v26, %v2200_v3  ;;  %v2102_v10 = vmul.f32 %v5159_v27, %v2070_v5  ;;  %v1685_v38 = vmul.f32 0.5, %v5820_v28  ;;  %v2071_v45 = vadd.f32 1.4214138, %v2039_v59  ;;  %v3571_v59 = vld [vmem:[%s3670_s29 + $0x10] sm:$0xff]  ;;  %v3573_v28 = vld [vmem:[%s3670_s29 + $0x20] sm:$0xff] }
 0x237   : > { %v2676_v30 = vmul.f32 %v2609_v61, %v2516_v35  ;;  %v2485_v47 = vadd.f32 1.0, %v2453_v7  ;;  %v2201_v48 = vmul.f32 %v5136_v21, %v2169_v1  ;;  %v1752_v41 = vsel %vm1720_vm4, 1.0, %v3612_v17  ;;  %v3572_v1 = vld [vmem:[%s3670_s29 + $0x28] sm:$0xff] }
 0x238   : > { %v2392_v15 = vsub.f32 1.0, %v2360_v34  ;;  %v2134_v39 = vadd.f32 -0.28449672, %v2102_v10  ;;  %v2103_v26 = vmul.f32 %v5211_v11, %v2071_v45  ;;  %vm1721_vm5 = vcmp.ge.f32.partialorder %v5013_v51, 0.0  ;;  %v3574_v45 = vld [vmem:[%s3670_s29 + $0x38] sm:$0xff] }
 0x239   : > { %v2517_v56 = vmul.f32 %v2485_v47, %v1685_v38  ;;  %3404 = vmatprep.mubr.msk.f32.mxu1 %vm2686_vm8, %v2676_v30  ;;  %v2361_v4 = vmul.f32 %v5142_v12, %v2201_v48  ;;  %v1656_v21 = vmul.f32 0.5, %v5821_v20  ;;  %v1753_v43 = vsel %vm1721_vm5, 1.0, %v3612_v17  ;;  %v2615_v40 = vpop.permute.xlu1 %2614  ;;  %v3575_v48 = vld [vmem:[%s3670_s29 + $0x30] sm:$0xff] }
 0x23a   : > { %v2424_v29 = vmul.f32 %v2392_v15, %v1752_v41  ;;  %v2166_v50 = vmul.f32 %v5159_v27, %v2134_v39  ;;  %v2135_v33 = vadd.f32 -0.28449672, %v2103_v26  ;;  %v1657_v46 = vmul.f32 0.5, %v5000_v22  ;;  %v3576_v41 = vld [vmem:[%s3670_s29 + $0x48] sm:$0xff] }
 0x23b   : > { %v2677_v49 = vmul.f32 %v2611_v60, %v2517_v56  ;;  %v2393_v52 = vsub.f32 1.0, %v2361_v4  ;;  %vm1750_vm6 = vcmp.ge.f32.partialorder %v5054_v42, 0.0  ;;  %vm1751_vm7 = vcmp.ge.f32.partialorder %v5126_v19, 0.0  ;;  %v3577_v4 = vld [vmem:[%s3670_s29 + $0x40] sm:$0xff] }
 0x23c   : > { %v2456_v14 = vadd.f32 1.0, %v2424_v29  ;;  %v2198_v37 = vadd.f32 0.2548296, %v2166_v50  ;;  %v2167_v24 = vmul.f32 %v5211_v11, %v2135_v33  ;;  %v1782_v9 = vsel %vm1750_vm6, 1.0, %v3612_v17 }
 0x23d   : > { %3405 = vmatmul.mubr.msk.f32.gmra.mxu1 %vm2686_vm8, %v2677_v49  ;;  %v2425_v51 = vmul.f32 %v2393_v52, %v1753_v43  ;;  %v1687_v61 = vmul.f32 0.5, %v5079_v54 }
 0x23e   : > { %v2488_v32 = vmul.f32 %v2456_v14, %v1656_v21  ;;  %v2230_v12 = vmul.f32 %v5159_v27, %v2198_v37  ;;  %v2199_v8 = vadd.f32 0.2548296, %v2167_v24  ;;  %v3579_v21 = vld [vmem:[%s3670_s29 + $0x50] sm:$0xff]  ;;  %v3580_v37 = vld [vmem:[%s3670_s29 + $0x68] sm:$0xff] }
 0x23f   : > { %v2457_v55 = vadd.f32 1.0, %v2425_v51 }
 0x240   : > { %v2648_v58 = vmul.f32 %v2553_v0, %v2488_v32  ;;  %v2390_v13 = vmul.f32 %v5181_v2, %v2230_v12  ;;  %v2231_v36 = vmul.f32 %v5211_v11, %v2199_v8  ;;  %v1686_v2 = vmul.f32 0.5, %v5032_v53  ;;  %v3578_v0 = vld [vmem:[%s3670_s29 + $0x58] sm:$0xff]  ;;  %v3581_v32 = vld [vmem:[%s3670_s29 + $0x60] sm:$0xff] }
 0x241   : > { %v3560_v44 = vpop.eup %3559  ;;  %v2489_v25 = vmul.f32 %v2457_v55, %v1657_v46  ;;  %v1783_v11 = vsel %vm1751_vm7, 1.0, %v3612_v17  ;;  %v3570_v17 = vld [vmem:[%s3670_s29 + $0x18] sm:$0xff]  ;;  %v3583_v55 = vld [vmem:[%s3670_s29 + $0x70] sm:$0xff] }
 0x242   : > { %3362 = vmatprep.mubr.msk.f32.mxu0 %vm2686_vm8, %v2648_v58  ;;  %v2422_v57 = vsub.f32 1.0, %v2390_v13  ;;  %v2391_v22 = vmul.f32 %v3560_v44, %v2231_v36  ;;  %v3582_v46 = vld [vmem:[%s3670_s29 + $0x78] sm:$0xff]  ;;  %v3584_v36 = vld [vmem:[%s3670_s29 + $0x88] sm:$0xff] }
 0x243   : > { %v2649_v27 = vmul.f32 %v2555_v23, %v2489_v25 }
 0x244   : > { %v2454_v31 = vmul.f32 %v2422_v57, %v1782_v9  ;;  %v2423_v42 = vsub.f32 1.0, %v2391_v22  ;;  %v3585_v57 = vld [vmem:[%s3670_s29 + $0x80] sm:$0xff] }
 0x245   : > { %3363 = vmatmul.mubr.msk.f32.vlgmr.msra.gmra.mxu0 %vm2686_vm8, %v2649_v27  ;;  %v3586_v27 = vld [vmem:[%s3670_s29 + $0x98] sm:$0xff] }
 0x246   : > { %v2486_v6 = vadd.f32 1.0, %v2454_v31  ;;  %v2455_v62 = vmul.f32 %v2423_v42, %v1783_v11  ;;  %v3587_v42 = vld [vmem:[%s3670_s29 + $0x90] sm:$0xff]  ;;  %v3588_v11 = vld [vmem:[%s3670_s29 + $0xa8] sm:$0xff] }
 0x248   : > { %v2518_v18 = vmul.f32 %v2486_v6, %v1686_v2  ;;  %v2487_v19 = vadd.f32 1.0, %v2455_v62 }
 0x24a   : > { %v2678_v3 = vmul.f32 %v2613_v63, %v2518_v18  ;;  %v2519_v5 = vmul.f32 %v2487_v19, %v1687_v61  ;;  %v3589_v61 = vld [vmem:[%s3670_s29 + $0xa0] sm:$0xff] }
 0x24c   : > { %3407 = vmatprep.mubr.msk.f32.mxu1 %vm2686_vm8, %v2678_v3  ;;  %v2679_v35 = vmul.f32 %v2615_v40, %v2519_v5  ;;  %v3590_v40 = vld [vmem:[%s3670_s29 + $0xb8] sm:$0xff] }
 0x24e   : > { %3408 = vmatmul.mubr.msk.f32.gmra.mxu1 %vm2686_vm8, %v2679_v35 }
 0x289   : > { %v3367_v53 = vpop.f32.mrf.mxu1 }
 0x28a   : > { %v3015_v54 = vadd.f32 %v3570_v17, %v3367_v53  ;;  %v3591_v53 = vld [vmem:[%s3670_s29 + $0xb0] sm:$0xff] }
 0x28b   : > { %v2863_v7 = vpop.f32.mrf.mxu1 }
 0x28c   : > { %3047 = vst.msk [vmem:[%s5464_s16 + $0x18] sm:$0xff] %vm333_vm0, %v3015_v54  ;;  %v3014_v16 = vadd.f32 %v3571_v59, %v2863_v7  ;;  %v3592_v7 = vld [vmem:[%s3670_s29 + $0xc8] sm:$0xff] }
 0x28e   : > { %3046 = vst.msk [vmem:[%s5464_s16 + $0x10] sm:$0xff] %vm333_vm0, %v3014_v16 }
 0x290   : > { %v3370_v34 = vpop.f32.mrf.mxu1 }
 0x291   : > { %v3017_v10 = vadd.f32 %v3572_v1, %v3370_v34  ;;  %v3593_v34 = vld [vmem:[%s3670_s29 + $0xc0] sm:$0xff] }
 0x292   : > { %v2873_v30 = vpop.f32.mrf.mxu1 }
 0x293   : > { %3049 = vst.msk [vmem:[%s5464_s16 + $0x28] sm:$0xff] %vm333_vm0, %v3017_v10  ;;  %v3016_v38 = vadd.f32 %v3573_v28, %v2873_v30  ;;  %v3594_v30 = vld [vmem:[%s3670_s29 + $0xd8] sm:$0xff] }
 0x295   : > { %3048 = vst.msk [vmem:[%s5464_s16 + $0x20] sm:$0xff] %vm333_vm0, %v3016_v38 }
 0x299   : > { %v3373_v47 = vpop.f32.mrf.mxu1 }
 0x29a   : > { %v3019_v60 = vadd.f32 %v3574_v45, %v3373_v47  ;;  %v3595_v47 = vld [vmem:[%s3670_s29 + $0xd0] sm:$0xff] }
 0x29b   : > { %v2883_v15 = vpop.f32.mrf.mxu1 }
 0x29c   : > { %3051 = vst.msk [vmem:[%s5464_s16 + $0x38] sm:$0xff] %vm333_vm0, %v3019_v60  ;;  %v3018_v39 = vadd.f32 %v3575_v48, %v2883_v15  ;;  %v3596_v15 = vld [vmem:[%s3670_s29 + $0xe8] sm:$0xff] }
 0x29e   : > { %3050 = vst.msk [vmem:[%s5464_s16 + $0x30] sm:$0xff] %vm333_vm0, %v3018_v39 }
 0x2a6   : > { %v3376_v56 = vpop.f32.mrf.mxu1 }
 0x2a7   : > { %v3021_v26 = vadd.f32 %v3576_v41, %v3376_v56  ;;  %v3597_v56 = vld [vmem:[%s3670_s29 + $0xe0] sm:$0xff] }
 0x2a8   : > { %v2893_v29 = vpop.f32.mrf.mxu1 }
 0x2a9   : > { %3053 = vst.msk [vmem:[%s5464_s16 + $0x48] sm:$0xff] %vm333_vm0, %v3021_v26  ;;  %v3020_v50 = vadd.f32 %v3577_v4, %v2893_v29  ;;  %v3598_v29 = vld [vmem:[%s3670_s29 + $0x8] sm:$0xff] }
 0x2ab   : > { %3052 = vst.msk [vmem:[%s5464_s16 + $0x40] sm:$0xff] %vm333_vm0, %v3020_v50 }
 0x2ad   : > { %v3379_v49 = vpop.f32.mrf.mxu1 }
 0x2ae   : > { %v3023_v33 = vadd.f32 %v3578_v0, %v3379_v49  ;;  %v3599_v49 = vld [vmem:[%s3670_s29] sm:$0xff] }
 0x2af   : > { %v2903_v20 = vpop.f32.mrf.mxu1 }
 0x2b0   : > { %3055 = vst.msk [vmem:[%s5464_s16 + $0x58] sm:$0xff] %vm333_vm0, %v3023_v33  ;;  %v3022_v14 = vadd.f32 %v3579_v21, %v2903_v20  ;;  %v3600_v20 = vld [vmem:[%s3670_s29 + $0xf8] sm:$0xff] }
 0x2b2   : > { %3054 = vst.msk [vmem:[%s5464_s16 + $0x50] sm:$0xff] %vm333_vm0, %v3022_v14 }
 0x2b4   : > { %v3382_v52 = vpop.f32.mrf.mxu1 }
 0x2b5   : > { %v3025_v43 = vadd.f32 %v3580_v37, %v3382_v52  ;;  %v3601_v52 = vld [vmem:[%s3670_s29 + $0xf0] sm:$0xff] }
 0x2b6   : > { %v2913_v24 = vpop.f32.mrf.mxu1 }
 0x2b7   : > { %3057 = vst.msk [vmem:[%s5464_s16 + $0x68] sm:$0xff] %vm333_vm0, %v3025_v43  ;;  %v3024_v51 = vadd.f32 %v3581_v32, %v2913_v24 }
 0x2b9   : > { %3056 = vst.msk [vmem:[%s5464_s16 + $0x60] sm:$0xff] %vm333_vm0, %v3024_v51 }
 0x2be   : > { %v3385_v12 = vpop.f32.mrf.mxu1 }
 0x2bf   : > { %v3027_v8 = vadd.f32 %v3582_v46, %v3385_v12 }
 0x2c0   : > { %v2923_v58 = vpop.f32.mrf.mxu1 }
 0x2c1   : > { %3059 = vst.msk [vmem:[%s5464_s16 + $0x78] sm:$0xff] %vm333_vm0, %v3027_v8  ;;  %v3026_v13 = vadd.f32 %v3583_v55, %v2923_v58 }
 0x2c3   : > { %3058 = vst.msk [vmem:[%s5464_s16 + $0x70] sm:$0xff] %vm333_vm0, %v3026_v13 }
 0x2c8   : > { %v3388_v23 = vpop.f32.mrf.mxu1 }
 0x2c9   : > { %v3029_v44 = vadd.f32 %v3584_v36, %v3388_v23 }
 0x2ca   : > { %v2933_v25 = vpop.f32.mrf.mxu1 }
 0x2cb   : > { %3061 = vst.msk [vmem:[%s5464_s16 + $0x88] sm:$0xff] %vm333_vm0, %v3029_v44  ;;  %v3028_v9 = vadd.f32 %v3585_v57, %v2933_v25 }
 0x2cd   : > { %3060 = vst.msk [vmem:[%s5464_s16 + $0x80] sm:$0xff] %vm333_vm0, %v3028_v9 }
 0x2d1   : > { %v3391_v22 = vpop.f32.mrf.mxu1 }
 0x2d2   : > { %v3031_v63 = vadd.f32 %v3586_v27, %v3391_v22 }
 0x2d3   : > { %v2943_v31 = vpop.f32.mrf.mxu1 }
 0x2d4   : > { %3063 = vst.msk [vmem:[%s5464_s16 + $0x98] sm:$0xff] %vm333_vm0, %v3031_v63  ;;  %v3030_v2 = vadd.f32 %v3587_v42, %v2943_v31 }
 0x2d6   : > { %3062 = vst.msk [vmem:[%s5464_s16 + $0x90] sm:$0xff] %vm333_vm0, %v3030_v2 }
 0x2da   : > { %v3394_v6 = vpop.f32.mrf.mxu1 }
 0x2db   : > { %v3033_v62 = vadd.f32 %v3588_v11, %v3394_v6 }
 0x2dc   : > { %v2953_v18 = vpop.f32.mrf.mxu1 }
 0x2dd   : > { %3065 = vst.msk [vmem:[%s5464_s16 + $0xa8] sm:$0xff] %vm333_vm0, %v3033_v62  ;;  %v3032_v19 = vadd.f32 %v3589_v61, %v2953_v18 }
 0x2df   : > { %3064 = vst.msk [vmem:[%s5464_s16 + $0xa0] sm:$0xff] %vm333_vm0, %v3032_v19 }
 0x2e4   : > { %v3397_v3 = vpop.f32.mrf.mxu1 }
 0x2e5   : > { %v3035_v5 = vadd.f32 %v3590_v40, %v3397_v3 }
 0x2e6   : > { %v2963_v35 = vpop.f32.mrf.mxu1 }
 0x2e7   : > { %3067 = vst.msk [vmem:[%s5464_s16 + $0xb8] sm:$0xff] %vm333_vm0, %v3035_v5  ;;  %v3034_v17 = vadd.f32 %v3591_v53, %v2963_v35 }
 0x2e9   : > { %3066 = vst.msk [vmem:[%s5464_s16 + $0xb0] sm:$0xff] %vm333_vm0, %v3034_v17 }
 0x2ea   : > { %v3400_v54 = vpop.f32.mrf.mxu1 }
 0x2eb   : > { %v3037_v59 = vadd.f32 %v3592_v7, %v3400_v54 }
 0x2ec   : > { %v2973_v16 = vpop.f32.mrf.mxu1 }
 0x2ed   : > { %3069 = vst.msk [vmem:[%s5464_s16 + $0xc8] sm:$0xff] %vm333_vm0, %v3037_v59  ;;  %v3036_v1 = vadd.f32 %v3593_v34, %v2973_v16 }
 0x2ef   : > { %3068 = vst.msk [vmem:[%s5464_s16 + $0xc0] sm:$0xff] %vm333_vm0, %v3036_v1 }
 0x2f6   : > { %v3403_v10 = vpop.f32.mrf.mxu1 }
 0x2f7   : > { %v3039_v28 = vadd.f32 %v3594_v30, %v3403_v10 }
 0x2f8   : > { %v2983_v38 = vpop.f32.mrf.mxu1 }
 0x2f9   : > { %3071 = vst.msk [vmem:[%s5464_s16 + $0xd8] sm:$0xff] %vm333_vm0, %v3039_v28  ;;  %v3038_v45 = vadd.f32 %v3595_v47, %v2983_v38 }
 0x2fb   : > { %3070 = vst.msk [vmem:[%s5464_s16 + $0xd0] sm:$0xff] %vm333_vm0, %v3038_v45 }
 0x2fd   : > { %v3406_v60 = vpop.f32.mrf.mxu1 }
 0x2fe   : > { %v3041_v48 = vadd.f32 %v3596_v15, %v3406_v60 }
 0x2ff   : > { %v2993_v39 = vpop.f32.mrf.mxu1 }
 0x300   : > { %3073 = vst.msk [vmem:[%s5464_s16 + $0xe8] sm:$0xff] %vm333_vm0, %v3041_v48  ;;  %v3040_v41 = vadd.f32 %v3597_v56, %v2993_v39 }
 0x302   : > { %3072 = vst.msk [vmem:[%s5464_s16 + $0xe0] sm:$0xff] %vm333_vm0, %v3040_v41 }
 0x305   : > { %v3364_v26 = vpop.f32.mrf.mxu0 }
 0x306   : > { %v3013_v4 = vadd.f32 %v3598_v29, %v3364_v26 }
 0x307   : > { %v2853_v50 = vpop.f32.mrf.mxu0 }
 0x308   : > { %3045 = vst.msk [vmem:[%s5464_s16 + $0x8] sm:$0xff] %vm333_vm0, %v3013_v4  ;;  %v3012_v0 = vadd.f32 %v3599_v49, %v2853_v50 }
 0x30a   : > { %3044 = vst.msk [vmem:[%s5464_s16] sm:$0xff] %vm333_vm0, %v3012_v0 }
 0x30e   : > { %v3409_v33 = vpop.f32.mrf.mxu1 }
 0x30f   : > { %v3043_v21 = vadd.f32 %v3600_v20, %v3409_v33 }
 0x310   : > { %v3003_v14 = vpop.f32.mrf.mxu1 }
 0x311   : > { %3075 = vst.msk [vmem:[%s5464_s16 + $0xf8] sm:$0xff] %vm333_vm0, %v3043_v21  ;;  %v3042_v37 = vadd.f32 %v3601_v52, %v3003_v14 }
 0x313   : > { %3074 = vst.msk [vmem:[%s5464_s16 + $0xf0] sm:$0xff] %vm333_vm0, %v3042_v37 }
 0x314 PF: > { %s15_s18 = sadd.s32 1, %s3608_s18  }
 0x315   : > { %p12_p4 = scmp.ge.s32.totalorder %s15_s18, 4  }
 0x317   :  { %14 = sbr.rel (!%p12_p4) target bundleno = 1 (0x1), region = 74 }

// kernel: transformer_block.5
= control target key start
LH: loop header
LB: loop body
LE: loop exit
PB: predicated region body
PF: predicated region fallthrough
CT: control target
= control target key end

     0   :  { %11 = vsyncpa [#allocation4], 0  ;;  %s8831_s21 = smov 0   ;;  %s12639_s0 = inlined_call_operand.vmem [shape: f32[2,256,16], index: 0, kind: input, shape index: {}]   ;;  %s12640_s1 = inlined_call_operand.vmem [shape: f32[2,16], index: 1, kind: input, shape index: {}]   ;;  %s12641_s2 = inlined_call_operand.vmem [shape: f32[16,48], index: 2, kind: input, shape index: {}]   ;;  %s12642_s3 = inlined_call_operand.vmem [shape: f32[3,3,48], index: 3, kind: input, shape index: {}]   ;;  %s12643_s4 = inlined_call_operand.vmem [shape: f32[16,16], index: 4, kind: input, shape index: {}]   ;;  %s12644_s5 = inlined_call_operand.vmem [shape: f32[4], index: 5, kind: input, shape index: {}]   ;;  %s12645_s6 = inlined_call_operand.vmem [shape: f32[2,256,16], index: 6, kind: output, shape index: {}]  }
   0x1 LB: > { %s8837_s22 = sadd.s32 4294967295, %s8781_s21   ;;  %p7034_p0 = scmp.ge.s32.totalorder %s8781_s21, 1  ;;  %s8781_s21 = sphi %s8831_s21, %s17_s21  }
   0x2   : > { %p179_p1 = scmp.lt.s32.totalorder %s8781_s21, 3  ;;  %s204_s25 = sshll.u32 %s12644_s5, 4  ;;  %s205_s25 = int_to_ptr.vmem [resolvable:$true] %s204_s25 }
   0x3   : > { %p8263_p3 = scmp.eq.s32.totalorder %s8837_s22, 0  ;;  %s8756_s27 = scalar_lea.vmem %s205_s25, 16 }
   0x4   : > { %p8844_p2 = pnand %p7034_p0, %p179_p1  ;;  %p8757_p6 = scmp.ne.s32.totalorder %s205_s25, %s8756_s27 }
   0x5   : > { %p8764_p10 = scmp.lt.s32.totalorder %s205_s25, %s205_s25  ;;  %p8765_p11 = scmp.lt.s32.totalorder %s8756_s27, %s8756_s27 }
   0x6   : > { %p8259_p4 = pneg %p8844_p2 }
   0x7   : > { %p8766_p12 = por %p8765_p11, %p8764_p10 }
   0x8   : > { %p8260_p5 = pnand %p8263_p3, %p8259_p4 }
   0xa   : > { %p8758_p7 = pneg %p8260_p5 }
   0xc   : > { %p8759_p8 = pnand %p8758_p7, %p8757_p6 }
   0xe   : > { %p8760_p9 = pneg %p8759_p8 }
  0x10   : > { %p8767_p13 = pnand %p8766_p12, %p8760_p9 }
  0x12   : > { %8770 = shalt.err (!%p8767_p13)
}
  0x13   : > { %s8783_s28 = smov [#allocation3]   ;;  %225 = sbr.rel (%p8844_p2) target bundleno = 3454 (0xd7e), region = 44 }
  0x14   : > { %8262 = dma.vmem_to_smem (!%p8260_p5), %s205_s25, 16, %s8783_s28, [#allocation4]  }
  0x18   : > { %8776 = dma.done.wait (%p8263_p3), [#allocation4], 16  }
  0x19   : > { %8778 = vsyncadd (%p8263_p3), [#allocation4], 4294967280 }
  0x1a   : > { %231 = sfence }
  0x1b   : > { %v373_v0 = vld [vmem:[%s12641_s2 + $0x8] sm:$0xff]  ;;  %v372_v1 = vld [vmem:[%s12641_s2] sm:$0xff]  ;;  %p256_p0 = scmp.lt.s32.totalorder %s8837_s22, 1  ;;  %vm374_vm0 = vcmask 130048   ;;  %vm696_vm1 = vcmask 392192   ;;  %vm699_vm2 = vcmask 386048  }
  0x1c   : > { %7801 = vmatprep.subr.mxu0 %v373_v0  ;;  %v8873_v2 = vld [vmem:[%s12640_s1] ss:$0 sm:$0xff]  ;;  %v8885_v3 = vld [vmem:[%s12640_s1 + $0x1] ss:$0 sm:$0xff]  ;;  %vm1731_vm3 = vcmask 31744   ;;  %vm1835_vm4 = vcmask 162944  }
  0x1d   : > { %7802 = vmatpush3.msra.mxu0 %v373_v0  ;;  %s13013_s22 = smov (!%p256_p0, %s8837_s22), 1  ;;  %vm2961_vm5 = vcmask 64544   ;;  %vm3065_vm6 = vcmask 195744   ;;  %vm4285_vm7 = vcmask 97344   ;;  %vm4389_vm8 = vcmask 228544   ;;  %s8785_s10 = smov 112  }
  0x1e   : > { %7803 = vmatprep.subr.mxu0 %v372_v1  ;;  %s7361_s9 = sshll.u32 %s13013_s22, 8  ;;  %vm5609_vm9 = vcmask 130144   ;;  %vm5713_vm10 = vcmask 261344   ;;  %s8786_s11 = smov 96   ;;  %vm2204_vm11 = vcmask 27648   ;;  %vm2700_vm12 = vcmask 1043456  }
  0x1f   : > { %7804 = vmatpush3.msra.mxu0 %v372_v1  ;;  %s8880_s14 = scalar_lea.vmem %s12639_s0, %s7361_s9  ;;  %s8787_s12 = smov 124  }
  0x20   : > { %v266_v4 = vld [vmem:[%s8880_s14] sm:$0xff]  ;;  %v267_v5 = vld [vmem:[%s8880_s14 + $0x8] sm:$0xff]  ;;  %v268_v6 = vld [vmem:[%s8880_s14 + $0x10] sm:$0xff]  ;;  %s8788_s13 = smov 108   ;;  %s8789_s15 = smov 92  }
  0x21   : > { %v304_v7 = vmul.f32 %v8873_v2, %v266_v4  ;;  %v305_v8 = vmul.f32 %v8873_v2, %v267_v5  ;;  %v306_v9 = vmul.f32 %v8873_v2, %v268_v6  ;;  %v269_v10 = vld [vmem:[%s8880_s14 + $0x18] sm:$0xff]  ;;  %v270_v11 = vld [vmem:[%s8880_s14 + $0x20] sm:$0xff]  ;;  %v271_v17 = vld [vmem:[%s8880_s14 + $0x28] sm:$0xff]  ;;  %s8790_s16 = smov 120   ;;  %s2201_s17 = sld [smem:[#allocation3]] }
  0x22   : > { %v307_v12 = vmul.f32 %v8873_v2, %v269_v10  ;;  %v308_v16 = vmul.f32 %v8873_v2, %v270_v11  ;;  %v272_v18 = vld [vmem:[%s8880_s14 + $0x30] sm:$0xff]  ;;  %v309_v20 = vmul.f32 %v8873_v2, %v271_v17  ;;  %v273_v23 = vld [vmem:[%s8880_s14 + $0x38] sm:$0xff]  ;;  %v274_v24 = vld [vmem:[%s8880_s14 + $0x40] sm:$0xff]  ;;  %s8791_s18 = smov 104   ;;  %s8792_s23 = smov 88  }
  0x23   : > { %v340_v13 = vadd.f32 %v8885_v3, %v304_v7  ;;  %v341_v14 = vadd.f32 %v8885_v3, %v305_v8  ;;  %v342_v15 = vadd.f32 %v8885_v3, %v306_v9  ;;  %v310_v22 = vmul.f32 %v8873_v2, %v272_v18  ;;  %v275_v29 = vld [vmem:[%s8880_s14 + $0x48] sm:$0xff]  ;;  %v276_v30 = vld [vmem:[%s8880_s14 + $0x50] sm:$0xff]  ;;  %v277_v35 = vld [vmem:[%s8880_s14 + $0x58] sm:$0xff]  ;;  %s8793_s24 = smov 116   ;;  %s8794_s25 = smov 100  }
  0x24   : > { %v343_v19 = vadd.f32 %v8885_v3, %v307_v12  ;;  %v344_v21 = vadd.f32 %v8885_v3, %v308_v16  ;;  %v345_v25 = vadd.f32 %v8885_v3, %v309_v20  ;;  %v311_v26 = vmul.f32 %v8873_v2, %v273_v23  ;;  %v278_v36 = vld [vmem:[%s8880_s14 + $0x60] sm:$0xff]  ;;  %v279_v41 = vld [vmem:[%s8880_s14 + $0x68] sm:$0xff]  ;;  %v280_v42 = vld [vmem:[%s8880_s14 + $0x70] sm:$0xff]  ;;  %s7158_s26 = sld [smem:[#allocation3 + $0x1]]  ;;  %s8795_s28 = smov 84  }
  0x25   : > { %7805 = vmatprep.mubr.msk.f32.mxu0 %vm374_vm0, %v340_v13  ;;  %v346_v27 = vadd.f32 %v8885_v3, %v310_v22  ;;  %v312_v28 = vmul.f32 %v8873_v2, %v274_v24  ;;  %v313_v32 = vmul.f32 %v8873_v2, %v275_v29  ;;  %v314_v34 = vmul.f32 %v8873_v2, %v276_v30  ;;  %v281_v47 = vld [vmem:[%s8880_s14 + $0x78] sm:$0xff]  ;;  %v282_v48 = vld [vmem:[%s8880_s14 + $0x80] sm:$0xff]  ;;  %v283_v53 = vld [vmem:[%s8880_s14 + $0x88] sm:$0xff]  ;;  %s7225_s27 = sld [smem:[#allocation3 + $0x2]] }
  0x26   : > { %7806 = vmatmul.mubr.msk.f32.vlgmr.msra.gmra.mxu0 %vm374_vm0, %v341_v14  ;;  %v347_v31 = vadd.f32 %v8885_v3, %v311_v26  ;;  %v315_v38 = vmul.f32 %v8873_v2, %v277_v35  ;;  %v316_v40 = vmul.f32 %v8873_v2, %v278_v36  ;;  %v317_v44 = vmul.f32 %v8873_v2, %v279_v41  ;;  %v284_v54 = vld [vmem:[%s8880_s14 + $0x90] sm:$0xff]  ;;  %v285_v59 = vld [vmem:[%s8880_s14 + $0x98] sm:$0xff]  ;;  %v286_v60 = vld [vmem:[%s8880_s14 + $0xa0] sm:$0xff]  ;;  %s7292_s7 = sld [smem:[#allocation3 + $0x3]] }
  0x27   : > { %7808 = vmatprep.mubr.msk.f32.mxu0 %vm374_vm0, %v342_v15  ;;  %v348_v33 = vadd.f32 %v8885_v3, %v312_v28  ;;  %v349_v37 = vadd.f32 %v8885_v3, %v313_v32  ;;  %v350_v39 = vadd.f32 %v8885_v3, %v314_v34  ;;  %v318_v46 = vmul.f32 %v8873_v2, %v280_v42  ;;  %v287_v1 = vld [vmem:[%s8880_s14 + $0xa8] sm:$0xff]  ;;  %v288_v4 = vld [vmem:[%s8880_s14 + $0xb0] sm:$0xff]  ;;  %v289_v9 = vld [vmem:[%s8880_s14 + $0xb8] sm:$0xff] }
  0x28   : > { %v351_v43 = vadd.f32 %v8885_v3, %v315_v38  ;;  %v352_v45 = vadd.f32 %v8885_v3, %v316_v40  ;;  %v353_v49 = vadd.f32 %v8885_v3, %v317_v44  ;;  %v319_v50 = vmul.f32 %v8873_v2, %v281_v47  ;;  %v290_v10 = vld [vmem:[%s8880_s14 + $0xc0] sm:$0xff]  ;;  %v291_v15 = vld [vmem:[%s8880_s14 + $0xc8] sm:$0xff]  ;;  %v292_v16 = vld [vmem:[%s8880_s14 + $0xd0] sm:$0xff] }
  0x29   : > { %v354_v51 = vadd.f32 %v8885_v3, %v318_v46  ;;  %v320_v52 = vmul.f32 %v8873_v2, %v282_v48  ;;  %v321_v56 = vmul.f32 %v8873_v2, %v283_v53  ;;  %v322_v58 = vmul.f32 %v8873_v2, %v284_v54  ;;  %v294_v22 = vld [vmem:[%s8880_s14 + $0xe0] sm:$0xff]  ;;  %v296_v28 = vld [vmem:[%s8880_s14 + $0xf0] sm:$0xff] }
  0x2a   : > { %7809 = vmatmul.mubr.msk.f32.gmra.mxu0 %vm374_vm0, %v343_v19  ;;  %v355_v55 = vadd.f32 %v8885_v3, %v319_v50  ;;  %v323_v62 = vmul.f32 %v8873_v2, %v285_v59  ;;  %v324_v0 = vmul.f32 %v8873_v2, %v286_v60  ;;  %v325_v6 = vmul.f32 %v8873_v2, %v287_v1  ;;  %v9087_v48 = vld [vmem:[%s12642_s3 + $0x2] ss:$0 sm:$0xff]  ;;  %v9101_v59 = vld [vmem:[%s12642_s3 + $0x6] ss:$0 sm:$0xff] }
  0x2b   : > { %7811 = vmatprep.mubr.msk.f32.mxu0 %vm374_vm0, %v344_v21  ;;  %v356_v57 = vadd.f32 %v8885_v3, %v320_v52  ;;  %v357_v61 = vadd.f32 %v8885_v3, %v321_v56  ;;  %v358_v63 = vadd.f32 %v8885_v3, %v322_v58  ;;  %v326_v8 = vmul.f32 %v8873_v2, %v288_v4  ;;  %v293_v21 = vld [vmem:[%s8880_s14 + $0xd8] sm:$0xff]  ;;  %v9096_v58 = vld [vmem:[%s12642_s3 + $0x5] ss:$0 sm:$0xff] }
  0x2c   : > { %v359_v5 = vadd.f32 %v8885_v3, %v323_v62  ;;  %v360_v7 = vadd.f32 %v8885_v3, %v324_v0  ;;  %v361_v11 = vadd.f32 %v8885_v3, %v325_v6  ;;  %v327_v12 = vmul.f32 %v8873_v2, %v289_v9  ;;  %v9107_v62 = vld [vmem:[%s12642_s3 + $0x4] ss:$0 sm:$0xff] }
  0x2d   : > { %v362_v13 = vadd.f32 %v8885_v3, %v326_v8  ;;  %v328_v14 = vmul.f32 %v8873_v2, %v290_v10  ;;  %v329_v18 = vmul.f32 %v8873_v2, %v291_v15  ;;  %v330_v20 = vmul.f32 %v8873_v2, %v292_v16 }
  0x2e   : > { %7812 = vmatmul.mubr.msk.f32.gmra.mxu0 %vm374_vm0, %v345_v25  ;;  %v363_v17 = vadd.f32 %v8885_v3, %v327_v12  ;;  %v331_v24 = vmul.f32 %v8873_v2, %v293_v21  ;;  %v332_v26 = vmul.f32 %v8873_v2, %v294_v22  ;;  %v334_v32 = vmul.f32 %v8873_v2, %v296_v28 }
  0x2f   : > { %7814 = vmatprep.mubr.msk.f32.mxu0 %vm374_vm0, %v346_v27  ;;  %v364_v19 = vadd.f32 %v8885_v3, %v328_v14  ;;  %v365_v23 = vadd.f32 %v8885_v3, %v329_v18  ;;  %v366_v25 = vadd.f32 %v8885_v3, %v330_v20  ;;  %v295_v27 = vld [vmem:[%s8880_s14 + $0xe8] sm:$0xff]  ;;  %v8784_v38 = vmov 0.0  }
  0x30   : > { %v367_v29 = vadd.f32 %v8885_v3, %v331_v24  ;;  %v333_v30 = vmul.f32 %v8873_v2, %v295_v27  ;;  %v370_v36 = vadd.f32 %v8885_v3, %v334_v32  ;;  %702 = vst.msk [vmem:[#allocation2 + $0x20] sm:$0xff] %vm696_vm1, %v8784_v38  ;;  %697 = vst.msk [vmem:[#allocation2] sm:$0xff] %vm696_vm1, %v8784_v38  ;;  %v9131_v24 = vld [vmem:[%s12642_s3 + $0xa] ss:$0 sm:$0xff] }
  0x31   : > { %703 = vst.msk [vmem:[#allocation2 + $0x28] sm:$0x3] %vm699_vm2, %v8784_v38  ;;  %700 = vst.msk [vmem:[#allocation2 + $0x10] sm:$0x3] %vm699_vm2, %v8784_v38 }
  0x32   : > { %7815 = vmatmul.mubr.msk.f32.gmra.mxu0 %vm374_vm0, %v347_v31  ;;  %v368_v31 = vadd.f32 %v8885_v3, %v332_v26  ;;  %v369_v34 = vadd.f32 %v8885_v3, %v333_v30  ;;  %698 = vst.msk [vmem:[#allocation2 + $0x8] sm:$0xff] %vm696_vm1, %v8784_v38  ;;  %701 = vst.msk [vmem:[#allocation2 + $0x18] sm:$0xff] %vm696_vm1, %v8784_v38 }
  0x33   : > { %7817 = vmatprep.mubr.msk.f32.mxu0 %vm374_vm0, %v348_v33  ;;  %v297_v33 = vld [vmem:[%s8880_s14 + $0xf8] sm:$0xff]  ;;  %704 = vst.msk [vmem:[#allocation2 + $0x30] sm:$0xff] %vm696_vm1, %v8784_v38  ;;  %705 = vst.msk [vmem:[#allocation2 + $0x38] sm:$0xff] %vm696_vm1, %v8784_v38 }
  0x34   : > { %v335_v35 = vmul.f32 %v8873_v2, %v297_v33  ;;  %706 = vst.msk [vmem:[#allocation2 + $0x40] sm:$0x3] %vm699_vm2, %v8784_v38  ;;  %709 = vst.msk [vmem:[#allocation2 + $0x58] sm:$0x3] %vm699_vm2, %v8784_v38  ;;  %v9072_v2 = vld [vmem:[%s12642_s3 + $0x1] ss:$0 sm:$0xff] }
  0x35   : > { %707 = vst.msk [vmem:[#allocation2 + $0x48] sm:$0xff] %vm696_vm1, %v8784_v38  ;;  %708 = vst.msk [vmem:[#allocation2 + $0x50] sm:$0xff] %vm696_vm1, %v8784_v38 }
  0x36   : > { %7818 = vmatmul.mubr.msk.f32.gmra.mxu0 %vm374_vm0, %v349_v37  ;;  %v371_v37 = vadd.f32 %v8885_v3, %v335_v35  ;;  %710 = vst.msk [vmem:[#allocation2 + $0x60] sm:$0xff] %vm696_vm1, %v8784_v38  ;;  %711 = vst.msk [vmem:[#allocation2 + $0x68] sm:$0xff] %vm696_vm1, %v8784_v38  ;;  %v9077_v3 = vld [vmem:[%s12642_s3] ss:$0 sm:$0xff] }
  0x37   : > { %7820 = vmatprep.mubr.msk.f32.mxu0 %vm374_vm0, %v350_v39  ;;  %712 = vst.msk [vmem:[#allocation2 + $0x70] sm:$0x3] %vm699_vm2, %v8784_v38  ;;  %715 = vst.msk [vmem:[#allocation2 + $0x88] sm:$0x3] %vm699_vm2, %v8784_v38  ;;  %v786_v39 = vld [vmem:[#allocation2] sm:$0xff] }
  0x38   : > { %713 = vst.msk [vmem:[#allocation2 + $0x78] sm:$0xff] %vm696_vm1, %v8784_v38  ;;  %714 = vst.msk [vmem:[#allocation2 + $0x80] sm:$0xff] %vm696_vm1, %v8784_v38  ;;  %v822_v44 = vmul.f32 %v9077_v3, %v786_v39 }
  0x39   : > { %716 = vst.msk [vmem:[#allocation2 + $0x90] sm:$0xff] %vm696_vm1, %v8784_v38  ;;  %717 = vst.msk [vmem:[#allocation2 + $0x98] sm:$0xff] %vm696_vm1, %v8784_v38  ;;  %v787_v40 = vld [vmem:[#allocation2 + $0x8] sm:$0xff] }
  0x3a   : > { %7821 = vmatmul.mubr.msk.f32.gmra.mxu0 %vm374_vm0, %v351_v43  ;;  %718 = vst.msk [vmem:[#allocation2 + $0xa0] sm:$0x3] %vm699_vm2, %v8784_v38  ;;  %721 = vst.msk [vmem:[#allocation2 + $0xb8] sm:$0x3] %vm699_vm2, %v8784_v38  ;;  %v887_v41 = vld [vmem:[#allocation2 + $0x1] sm:$0xff]  ;;  %v888_v42 = vld [vmem:[#allocation2 + $0x9] sm:$0xff] }
  0x3b   : > { %7823 = vmatprep.mubr.msk.f32.mxu0 %vm374_vm0, %v352_v45  ;;  %719 = vst.msk [vmem:[#allocation2 + $0xa8] sm:$0xff] %vm696_vm1, %v8784_v38  ;;  %720 = vst.msk [vmem:[#allocation2 + $0xb0] sm:$0xff] %vm696_vm1, %v8784_v38  ;;  %v823_v45 = vmul.f32 %v9077_v3, %v787_v40  ;;  %v923_v46 = vmul.f32 %v9072_v2, %v887_v41  ;;  %v924_v47 = vmul.f32 %v9072_v2, %v888_v42  ;;  %v988_v50 = vld [vmem:[#allocation2 + $0x2] sm:$0xff] }
  0x3c   : > { %722 = vst.msk [vmem:[#allocation2 + $0xc0] sm:$0xff] %vm696_vm1, %v8784_v38  ;;  %723 = vst.msk [vmem:[#allocation2 + $0xc8] sm:$0xff] %vm696_vm1, %v8784_v38 }
  0x3d   : > { %724 = vst.msk [vmem:[#allocation2 + $0xd0] sm:$0x3] %vm699_vm2, %v8784_v38  ;;  %727 = vst.msk [vmem:[#allocation2 + $0xe8] sm:$0x3] %vm699_vm2, %v8784_v38  ;;  %v955_v53 = vadd.f32 %v923_v46, %v822_v44  ;;  %v956_v54 = vadd.f32 %v924_v47, %v823_v45  ;;  %v9153_v47 = vld [vmem:[%s12642_s3 + $0x8] ss:$0 sm:$0xff] }
  0x3e   : > { %7824 = vmatmul.mubr.msk.f32.gmra.mxu0 %vm374_vm0, %v353_v49  ;;  %725 = vst.msk [vmem:[#allocation2 + $0xd8] sm:$0xff] %vm696_vm1, %v8784_v38  ;;  %726 = vst.msk [vmem:[#allocation2 + $0xe0] sm:$0xff] %vm696_vm1, %v8784_v38 }
  0x3f   : > { %7826 = vmatprep.mubr.msk.f32.mxu0 %vm374_vm0, %v354_v51  ;;  %728 = vst.msk [vmem:[#allocation2 + $0xf0] sm:$0xff] %vm696_vm1, %v8784_v38  ;;  %729 = vst.msk [vmem:[#allocation2 + $0xf8] sm:$0xff] %vm696_vm1, %v8784_v38  ;;  %v989_v51 = vld [vmem:[#allocation2 + $0xa] sm:$0xff] }
  0x40   : > { %730 = vst.msk [vmem:[#allocation2 + $0x100] sm:$0x3] %vm699_vm2, %v8784_v38  ;;  %733 = vst.msk [vmem:[#allocation2 + $0x118] sm:$0x3] %vm699_vm2, %v8784_v38  ;;  %v1025_v56 = vmul.f32 %v9087_v48, %v989_v51 }
  0x41   : > { %731 = vst.msk [vmem:[#allocation2 + $0x108] sm:$0xff] %vm696_vm1, %v8784_v38  ;;  %732 = vst.msk [vmem:[#allocation2 + $0x110] sm:$0xff] %vm696_vm1, %v8784_v38 }
  0x42   : > { %7827 = vmatmul.mubr.msk.f32.gmra.mxu0 %vm374_vm0, %v355_v55  ;;  %734 = vst.msk [vmem:[#allocation2 + $0x120] sm:$0xff] %vm696_vm1, %v8784_v38  ;;  %735 = vst.msk [vmem:[#allocation2 + $0x128] sm:$0xff] %vm696_vm1, %v8784_v38  ;;  %v1024_v55 = vmul.f32 %v9087_v48, %v988_v50  ;;  %v1057_v1 = vadd.f32 %v1025_v56, %v956_v54 }
  0x43   : > { %7829 = vmatprep.mubr.msk.f32.mxu0 %vm374_vm0, %v356_v57  ;;  %736 = vst.msk [vmem:[#allocation2 + $0x130] sm:$0x3] %vm699_vm2, %v8784_v38  ;;  %739 = vst.msk [vmem:[#allocation2 + $0x148] sm:$0x3] %vm699_vm2, %v8784_v38 }
  0x44   : > { %737 = vst.msk [vmem:[#allocation2 + $0x138] sm:$0xff] %vm696_vm1, %v8784_v38  ;;  %738 = vst.msk [vmem:[#allocation2 + $0x140] sm:$0xff] %vm696_vm1, %v8784_v38  ;;  %v1056_v0 = vadd.f32 %v1024_v55, %v955_v53 }
  0x45   : > { %740 = vst.msk [vmem:[#allocation2 + $0x150] sm:$0xff] %vm696_vm1, %v8784_v38  ;;  %741 = vst.msk [vmem:[#allocation2 + $0x158] sm:$0xff] %vm696_vm1, %v8784_v38 }
  0x46   : > { %7830 = vmatmul.mubr.msk.f32.gmra.mxu0 %vm374_vm0, %v357_v61  ;;  %742 = vst.msk [vmem:[#allocation2 + $0x160] sm:$0x3] %vm699_vm2, %v8784_v38  ;;  %745 = vst.msk [vmem:[#allocation2 + $0x178] sm:$0x3] %vm699_vm2, %v8784_v38 }
  0x47   : > { %7832 = vmatprep.mubr.msk.f32.mxu0 %vm374_vm0, %v358_v63  ;;  %743 = vst.msk [vmem:[#allocation2 + $0x168] sm:$0xff] %vm696_vm1, %v8784_v38  ;;  %744 = vst.msk [vmem:[#allocation2 + $0x170] sm:$0xff] %vm696_vm1, %v8784_v38 }
  0x48   : > { %746 = vst.msk [vmem:[#allocation2 + $0x180] sm:$0xff] %vm696_vm1, %v8784_v38  ;;  %747 = vst.msk [vmem:[#allocation2 + $0x188] sm:$0xff] %vm696_vm1, %v8784_v38 }
  0x49   : > { %748 = vst.msk [vmem:[#allocation2 + $0x190] sm:$0x3] %vm699_vm2, %v8784_v38  ;;  %751 = vst.msk [vmem:[#allocation2 + $0x1a8] sm:$0x3] %vm699_vm2, %v8784_v38 }
  0x4a   : > { %7833 = vmatmul.mubr.msk.f32.gmra.mxu0 %vm374_vm0, %v359_v5  ;;  %749 = vst.msk [vmem:[#allocation2 + $0x198] sm:$0xff] %vm696_vm1, %v8784_v38  ;;  %750 = vst.msk [vmem:[#allocation2 + $0x1a0] sm:$0xff] %vm696_vm1, %v8784_v38 }
  0x4b   : > { %7835 = vmatprep.mubr.msk.f32.mxu0 %vm374_vm0, %v360_v7 }
  0x4e   : > { %7836 = vmatmul.mubr.msk.f32.gmra.mxu0 %vm374_vm0, %v361_v11 }
  0x4f   : > { %7838 = vmatprep.mubr.msk.f32.mxu0 %vm374_vm0, %v362_v13 }
  0x52   : > { %7839 = vmatmul.mubr.msk.f32.gmra.mxu0 %vm374_vm0, %v363_v17  ;;  %v9121_v17 = vld [vmem:[%s12642_s3 + $0x9] ss:$0 sm:$0xff] }
  0x53   : > { %7841 = vmatprep.mubr.msk.f32.mxu0 %vm374_vm0, %v364_v19 }
  0x56   : > { %7842 = vmatmul.mubr.msk.f32.gmra.mxu0 %vm374_vm0, %v365_v23 }
  0x57   : > { %7844 = vmatprep.mubr.msk.f32.mxu0 %vm374_vm0, %v366_v25 }
  0x5a   : > { %7845 = vmatmul.mubr.msk.f32.gmra.mxu0 %vm374_vm0, %v367_v29 }
  0x5b   : > { %7847 = vmatprep.mubr.msk.f32.mxu0 %vm374_vm0, %v368_v31 }
  0x5e   : > { %7848 = vmatmul.mubr.msk.f32.gmra.mxu0 %vm374_vm0, %v369_v34 }
  0x5f   : > { %7850 = vmatprep.mubr.msk.f32.mxu0 %vm374_vm0, %v370_v36 }
  0x62   : > { %7851 = vmatmul.mubr.msk.f32.gmra.mxu0 %vm374_vm0, %v371_v37 }
  0xe6   : > { %v7807_v43 = vpop.f32.mrf.mxu0 }
  0xe7   : > { %754 = vst.msk [vmem:[#allocation2 + $0x21] sm:$0xff] %vm696_vm1, %v7807_v43 }
  0xe8   : > { %v537_v49 = vpop.f32.mrf.mxu0 }
  0xe9   : > { %753 = vst.msk [vmem:[#allocation2 + $0x19] sm:$0xff] %vm696_vm1, %v537_v49 }
  0xea   : > { %v7810_v52 = vpop.f32.mrf.mxu0 }
  0xeb   : > { %756 = vst.msk [vmem:[#allocation2 + $0x39] sm:$0xff] %vm696_vm1, %v7810_v52 }
  0xec   : > { %v547_v57 = vpop.f32.mrf.mxu0 }
  0xed   : > { %755 = vst.msk [vmem:[#allocation2 + $0x31] sm:$0xff] %vm696_vm1, %v547_v57 }
  0xee   : > { %v890_v60 = vld [vmem:[#allocation2 + $0x21] sm:$0xff]  ;;  %v7813_v63 = vpop.f32.mrf.mxu0 }
  0xef   : > { %v991_v61 = vld [vmem:[#allocation2 + $0x22] sm:$0xff]  ;;  %758 = vst.msk [vmem:[#allocation2 + $0x51] sm:$0xff] %vm696_vm1, %v7813_v63  ;;  %v926_v4 = vmul.f32 %v9072_v2, %v890_v60  ;;  %v1228_v6 = vmul.f32 %v9096_v58, %v890_v60 }
  0xf0   : > { %v1027_v5 = vmul.f32 %v9087_v48, %v991_v61  ;;  %v1329_v7 = vmul.f32 %v9101_v59, %v991_v61  ;;  %v788_v8 = vld [vmem:[#allocation2 + $0x18] sm:$0xff]  ;;  %v789_v9 = vld [vmem:[#allocation2 + $0x20] sm:$0xff]  ;;  %v557_v11 = vpop.f32.mrf.mxu0 }
  0xf1   : > { %v889_v10 = vld [vmem:[#allocation2 + $0x19] sm:$0xff]  ;;  %v824_v12 = vmul.f32 %v9077_v3, %v788_v8  ;;  %v825_v13 = vmul.f32 %v9077_v3, %v789_v9  ;;  %v1126_v16 = vmul.f32 %v9107_v62, %v788_v8  ;;  %757 = vst.msk [vmem:[#allocation2 + $0x49] sm:$0xff] %vm696_vm1, %v557_v11  ;;  %v1127_v19 = vmul.f32 %v9107_v62, %v789_v9 }
  0xf2   : > { %v925_v14 = vmul.f32 %v9072_v2, %v889_v10  ;;  %v990_v15 = vld [vmem:[#allocation2 + $0x1a] sm:$0xff]  ;;  %v1227_v20 = vmul.f32 %v9096_v58, %v889_v10  ;;  %v7816_v25 = vpop.f32.mrf.mxu0 }
  0xf3   : > { %v1026_v18 = vmul.f32 %v9087_v48, %v990_v15  ;;  %v1328_v21 = vmul.f32 %v9101_v59, %v990_v15  ;;  %v892_v22 = vld [vmem:[#allocation2 + $0x39] sm:$0xff]  ;;  %v958_v27 = vadd.f32 %v926_v4, %v825_v13  ;;  %v1158_v28 = vadd.f32 %v1126_v16, %v1056_v0  ;;  %760 = vst.msk [vmem:[#allocation2 + $0x69] sm:$0xff] %vm696_vm1, %v7816_v25 }
  0xf4   : > { %v993_v23 = vld [vmem:[#allocation2 + $0x3a] sm:$0xff]  ;;  %v957_v26 = vadd.f32 %v925_v14, %v824_v12  ;;  %v928_v29 = vmul.f32 %v9072_v2, %v892_v22  ;;  %v1159_v30 = vadd.f32 %v1127_v19, %v1057_v1  ;;  %v1230_v32 = vmul.f32 %v9096_v58, %v892_v22  ;;  %v790_v34 = vld [vmem:[#allocation2 + $0x30] sm:$0xff]  ;;  %v567_v37 = vpop.f32.mrf.mxu0 }
  0xf5   : > { %v9136_v31 = vmul.f32 %v9087_v48, %v993_v23  ;;  %v9140_v33 = vmul.f32 %v9101_v59, %v993_v23  ;;  %v791_v35 = vld [vmem:[#allocation2 + $0x38] sm:$0xff]  ;;  %v1259_v39 = vadd.f32 %v1227_v20, %v1158_v28  ;;  %v1533_v40 = vmul.f32 %v9121_v17, %v892_v22  ;;  %759 = vst.msk [vmem:[#allocation2 + $0x61] sm:$0xff] %vm696_vm1, %v567_v37 }
  0xf6   : > { %v891_v36 = vld [vmem:[#allocation2 + $0x31] sm:$0xff]  ;;  %v1058_v38 = vadd.f32 %v1026_v18, %v957_v26  ;;  %v9144_v41 = vmul.f32 %v9131_v24, %v993_v23  ;;  %v1260_v43 = vadd.f32 %v1228_v6, %v1159_v30  ;;  %v826_v44 = vmul.f32 %v9077_v3, %v790_v34  ;;  %v7819_v49 = vpop.f32.mrf.mxu0 }
  0xf7   : > { %v992_v42 = vld [vmem:[#allocation2 + $0x32] sm:$0xff]  ;;  %v827_v45 = vmul.f32 %v9077_v3, %v791_v35  ;;  %v927_v46 = vmul.f32 %v9072_v2, %v891_v36  ;;  %v1360_v50 = vadd.f32 %v1328_v21, %v1259_v39  ;;  %v1059_v52 = vadd.f32 %v1027_v5, %v958_v27  ;;  %762 = vst.msk [vmem:[#allocation2 + $0x81] sm:$0xff] %vm696_vm1, %v7819_v49 }
  0xf8   : > { %v1028_v51 = vmul.f32 %v9087_v48, %v992_v42  ;;  %v1128_v53 = vmul.f32 %v9107_v62, %v790_v34  ;;  %v1129_v56 = vmul.f32 %v9107_v62, %v791_v35  ;;  %v1229_v57 = vmul.f32 %v9096_v58, %v891_v36  ;;  %v894_v60 = vld [vmem:[#allocation2 + $0x51] sm:$0xff]  ;;  %v577_v61 = vpop.f32.mrf.mxu0  ;;  %v9167_v15 = vld [vmem:[#allocation2 + $0x48] sm:$0xff] }
  0xf9   : > { %v959_v54 = vadd.f32 %v927_v46, %v826_v44  ;;  %v960_v55 = vadd.f32 %v928_v29, %v827_v45  ;;  %v1330_v0 = vmul.f32 %v9101_v59, %v992_v42  ;;  %v1361_v1 = vadd.f32 %v1329_v7, %v1260_v43  ;;  %v995_v5 = vld [vmem:[#allocation2 + $0x52] sm:$0xff]  ;;  %761 = vst.msk [vmem:[#allocation2 + $0x79] sm:$0xff] %vm696_vm1, %v577_v61  ;;  %v9178_v22 = vld [vmem:[#allocation2 + $0x49] sm:$0xff] }
  0xfa   : > { %v1160_v63 = vadd.f32 %v1128_v53, %v1058_v38  ;;  %v1431_v4 = vmul.f32 %v9153_v47, %v790_v34  ;;  %v1161_v8 = vadd.f32 %v1129_v56, %v1059_v52  ;;  %v1432_v9 = vmul.f32 %v9153_v47, %v791_v35  ;;  %v7822_v11 = vpop.f32.mrf.mxu0  ;;  %v9169_v16 = vld [vmem:[#allocation2 + $0x50] sm:$0xff] }
  0xfb   : > { %v1060_v6 = vadd.f32 %v1028_v51, %v959_v54  ;;  %v1532_v10 = vmul.f32 %v9121_v17, %v891_v36  ;;  %v1633_v14 = vmul.f32 %v9131_v24, %v992_v42  ;;  %v930_v7 = vmul.f32 %v9072_v2, %v894_v60  ;;  %764 = vst.msk [vmem:[#allocation2 + $0x99] sm:$0xff] %vm696_vm1, %v7822_v11  ;;  %v9180_v23 = vld [vmem:[#allocation2 + $0x4a] sm:$0xff] }
  0xfc   : > { %v1261_v12 = vadd.f32 %v1229_v57, %v1160_v63  ;;  %v1463_v13 = vadd.f32 %v1431_v4, %v1360_v50  ;;  %v1262_v18 = vadd.f32 %v1230_v32, %v1161_v8  ;;  %v1464_v19 = vadd.f32 %v1432_v9, %v1361_v1  ;;  %v587_v25 = vpop.f32.mrf.mxu0 }
  0xfd   : > { %v9173_v20 = vmul.f32 %v9087_v48, %v995_v5  ;;  %v9176_v21 = vmul.f32 %v9096_v58, %v894_v60  ;;  %v9185_v28 = vmul.f32 %v9101_v59, %v995_v5  ;;  %v9188_v29 = vmul.f32 %v9121_v17, %v894_v60  ;;  %763 = vst.msk [vmem:[#allocation2 + $0x91] sm:$0xff] %vm696_vm1, %v587_v25 }
  0xfe   : > { %v9182_v26 = vadd.f32 %v1330_v0, %v1261_v12  ;;  %v1564_v27 = vadd.f32 %v1532_v10, %v1463_v13  ;;  %v1565_v30 = vadd.f32 %v1533_v40, %v1464_v19  ;;  %v9192_v32 = vmul.f32 %v9131_v24, %v995_v5  ;;  %v7825_v36 = vpop.f32.mrf.mxu0 }
  0xff   : > { %v828_v34 = vmul.f32 %v9077_v3, %v9167_v15  ;;  %v829_v35 = vmul.f32 %v9077_v3, %v9169_v16  ;;  %v929_v38 = vmul.f32 %v9072_v2, %v9178_v22  ;;  %v1030_v39 = vmul.f32 %v9087_v48, %v9180_v23  ;;  %766 = vst.msk [vmem:[#allocation2 + $0xb1] sm:$0xff] %vm696_vm1, %v7825_v36 }
 0x100   : > { %v9198_v37 = vadd.f32 %v1633_v14, %v1564_v27  ;;  %v1061_v40 = vadd.f32 %v9136_v31, %v960_v55  ;;  %v9207_v42 = vadd.f32 %v9144_v41, %v1565_v30  ;;  %v1130_v44 = vmul.f32 %v9107_v62, %v9167_v15  ;;  %v597_v46 = vpop.f32.mrf.mxu0  ;;  %v896_v27 = vld [vmem:[#allocation2 + $0x69] sm:$0xff] }
 0x101   : > { %v9209_v43 = vadd.f32 %v930_v7, %v829_v35  ;;  %v1131_v45 = vmul.f32 %v9107_v62, %v9169_v16  ;;  %v961_v50 = vadd.f32 %v929_v38, %v828_v34  ;;  %v1231_v31 = vmul.f32 %v9096_v58, %v9178_v22  ;;  %765 = vst.msk [vmem:[#allocation2 + $0xa9] sm:$0xff] %vm696_vm1, %v597_v46  ;;  %v997_v38 = vld [vmem:[#allocation2 + $0x6a] sm:$0xff] }
 0x102   : > { %12746 = vst [vmem:[#allocation6_spill] sm:$0xff] %v9198_v37  ;;  %12747 = vst [vmem:[#allocation7_spill] sm:$0xff] %v9207_v42  ;;  %v1699_v49 = vmul.f32 %v9198_v37, %v9198_v37  ;;  %v1332_v41 = vmul.f32 %v9101_v59, %v9180_v23  ;;  %v1700_v51 = vmul.f32 %v9207_v42, %v9207_v42  ;;  %v7828_v55 = vpop.f32.mrf.mxu0 }
 0x103   : > { %v1162_v52 = vadd.f32 %v1130_v44, %v1060_v6  ;;  %v1163_v53 = vadd.f32 %v1131_v45, %v1061_v40  ;;  %v1363_v54 = vadd.f32 %v9140_v33, %v1262_v18  ;;  %768 = vst.msk [vmem:[#allocation2 + $0xc9] sm:$0xff] %vm696_vm1, %v7828_v55  ;;  %v1062_v36 = vadd.f32 %v1030_v39, %v961_v50 }
 0x104   : > { %v1732_v56 = vsel %vm1731_vm3, %v1699_v49, 0.0  ;;  %v1836_v57 = vsel %vm1835_vm4, %v1699_v49, 0.0  ;;  %v2962_v60 = vsel %vm2961_vm5, %v1699_v49, 0.0  ;;  %v3066_v61 = vsel %vm3065_vm6, %v1699_v49, 0.0  ;;  %v607_v33 = vpop.f32.mrf.mxu0 }
 0x105   : > { %v1733_v63 = vsel %vm1731_vm3, %v1700_v51, 0.0  ;;  %v1837_v0 = vsel %vm1835_vm4, %v1700_v51, 0.0  ;;  %v2963_v1 = vsel %vm2961_vm5, %v1700_v51, 0.0  ;;  %v3067_v4 = vsel %vm3065_vm6, %v1700_v51, 0.0  ;;  %767 = vst.msk [vmem:[#allocation2 + $0xc1] sm:$0xff] %vm696_vm1, %v607_v33 }
 0x106   : > { %v9234_v5 = vadd.f32 %v1733_v63, %v1732_v56  ;;  %v9236_v6 = vadd.f32 %v1837_v0, %v1836_v57  ;;  %v9238_v8 = vadd.f32 %v2963_v1, %v2962_v60  ;;  %v9240_v9 = vadd.f32 %v3067_v4, %v3066_v61  ;;  %v7831_v14 = vpop.f32.mrf.mxu0  ;;  %v996_v60 = vld [vmem:[#allocation2 + $0x62] sm:$0xff] }
 0x107   : > { %v4286_v10 = vsel %vm4285_vm7, %v1699_v49, 0.0  ;;  %v4287_v11 = vsel %vm4285_vm7, %v1700_v51, 0.0  ;;  %v4390_v12 = vsel %vm4389_vm8, %v1699_v49, 0.0  ;;  %v4391_v13 = vsel %vm4389_vm8, %v1700_v51, 0.0  ;;  %770 = vst.msk [vmem:[#allocation2 + $0xe1] sm:$0xff] %vm696_vm1, %v7831_v14 }
 0x108   : > { %v9247_v7 = vadd.f32 %v4287_v11, %v4286_v10  ;;  %v9249_v18 = vadd.f32 %v4391_v13, %v4390_v12  ;;  %v5610_v19 = vsel %vm5609_vm9, %v1699_v49, 0.0  ;;  %v5611_v25 = vsel %vm5609_vm9, %v1700_v51, 0.0  ;;  %v617_v40 = vpop.f32.mrf.mxu0 }
 0x109   : > { %v9254_v30 = vadd.f32 %v5611_v25, %v5610_v19  ;;  %v5714_v34 = vsel %vm5713_vm10, %v1699_v49, 0.0  ;;  %v5715_v35 = vsel %vm5713_vm10, %v1700_v51, 0.0  ;;  %v1263_v45 = vadd.f32 %v1231_v31, %v1162_v52  ;;  %769 = vst.msk [vmem:[#allocation2 + $0xd9] sm:$0xff] %vm696_vm1, %v617_v40  ;;  %v794_v51 = vld [vmem:[#allocation2 + $0x60] sm:$0xff]  ;;  %v795_v31 = vld [vmem:[#allocation2 + $0x68] sm:$0xff] }
 0x10a   : > { %v9258_v44 = vadd.f32 %v5715_v35, %v5714_v34  ;;  %v1264_v46 = vadd.f32 %v9176_v21, %v1163_v53  ;;  %v1433_v55 = vmul.f32 %v9153_v47, %v9167_v15  ;;  %v1434_v56 = vmul.f32 %v9153_v47, %v9169_v16  ;;  %v9271_v52 = vld [vmem:[#allocation2 + $0x61] sm:$0xff]  ;;  %v7834_v21 = vpop.f32.mrf.mxu0 }
 0x10b   : > { %v1534_v49 = vmul.f32 %v9121_v17, %v9178_v22  ;;  %v1635_v39 = vmul.f32 %v9131_v24, %v9180_v23  ;;  %v932_v50 = vmul.f32 %v9072_v2, %v896_v27  ;;  %v1364_v53 = vadd.f32 %v1332_v41, %v1263_v45  ;;  %772 = vst.msk [vmem:[#allocation2 + $0xf9] sm:$0xff] %vm696_vm1, %v7834_v21 }
 0x10c   : > { %v1465_v15 = vadd.f32 %v1433_v55, %v9182_v26  ;;  %v9275_v57 = vmul.f32 %v9087_v48, %v997_v38  ;;  %v1234_v16 = vmul.f32 %v9096_v58, %v896_v27  ;;  %v1466_v22 = vadd.f32 %v1434_v56, %v1363_v54  ;;  %v627_v41 = vpop.f32.mrf.mxu0 }
 0x10d   : > { %v9280_v23 = vmul.f32 %v9101_v59, %v997_v38  ;;  %v1537_v61 = vmul.f32 %v9121_v17, %v896_v27  ;;  %v9284_v63 = vmul.f32 %v9131_v24, %v997_v38  ;;  %v830_v26 = vmul.f32 %v9077_v3, %v794_v51  ;;  %771 = vst.msk [vmem:[#allocation2 + $0xf1] sm:$0xff] %vm696_vm1, %v627_v41 }
 0x10e   : > { %v1566_v0 = vadd.f32 %v1534_v49, %v1465_v15  ;;  %v831_v1 = vmul.f32 %v9077_v3, %v795_v31  ;;  %v931_v4 = vmul.f32 %v9072_v2, %v9271_v52  ;;  %v1567_v54 = vadd.f32 %v9188_v29, %v1466_v22  ;;  %v7837_v12 = vpop.f32.mrf.mxu0 }
 0x10f   : > { %v1032_v33 = vmul.f32 %v9087_v48, %v996_v60  ;;  %v1063_v10 = vadd.f32 %v9173_v20, %v9209_v43  ;;  %v1132_v11 = vmul.f32 %v9107_v62, %v794_v51  ;;  %v1133_v25 = vmul.f32 %v9107_v62, %v795_v31  ;;  %774 = vst.msk [vmem:[#allocation2 + $0x111] sm:$0xff] %vm696_vm1, %v7837_v12 }
 0x110   : > { %v9296_v13 = vadd.f32 %v1635_v39, %v1566_v0  ;;  %v963_v14 = vadd.f32 %v931_v4, %v830_v26  ;;  %v9298_v19 = vadd.f32 %v932_v50, %v831_v1  ;;  %v9303_v27 = vadd.f32 %v9192_v32, %v1567_v54  ;;  %v637_v43 = vpop.f32.mrf.mxu0 }
 0x111   : > { %v1164_v29 = vadd.f32 %v1132_v11, %v1062_v36  ;;  %v1233_v34 = vmul.f32 %v9096_v58, %v9271_v52  ;;  %v1334_v20 = vmul.f32 %v9101_v59, %v996_v60  ;;  %v1165_v40 = vadd.f32 %v1133_v25, %v1063_v10  ;;  %773 = vst.msk [vmem:[#allocation2 + $0x109] sm:$0xff] %vm696_vm1, %v637_v43 }
 0x112   : > { %12748 = vst [vmem:[#allocation8_spill] sm:$0xff] %v9296_v13  ;;  %12749 = vst [vmem:[#allocation9_spill] sm:$0xff] %v9303_v27  ;;  %v1701_v35 = vmul.f32 %v9296_v13, %v9296_v13  ;;  %v9310_v38 = vadd.f32 %v1032_v33, %v963_v14  ;;  %v1365_v45 = vadd.f32 %v9185_v28, %v1264_v46  ;;  %v7840_v49 = vpop.f32.mrf.mxu0 }
 0x113   : > { %v1702_v32 = vmul.f32 %v9303_v27, %v9303_v27  ;;  %v1265_v36 = vadd.f32 %v1233_v34, %v1164_v29  ;;  %v1435_v55 = vmul.f32 %v9153_v47, %v794_v51  ;;  %v1436_v56 = vmul.f32 %v9153_v47, %v795_v31  ;;  %776 = vst.msk [vmem:[#allocation2 + $0x129] sm:$0xff] %vm696_vm1, %v7840_v49  ;;  %v796_v49 = vld [vmem:[#allocation2 + $0x78] sm:$0xff] }
 0x114   : > { %v1735_v39 = vsel %vm1731_vm3, %v1701_v35, 0.0  ;;  %v1839_v50 = vsel %vm1835_vm4, %v1701_v35, 0.0  ;;  %v2965_v21 = vsel %vm2961_vm5, %v1701_v35, 0.0  ;;  %v3069_v15 = vsel %vm3065_vm6, %v1701_v35, 0.0  ;;  %v647_v31 = vpop.f32.mrf.mxu0 }
 0x115   : > { %v1736_v28 = vadd.f32 %v1735_v39, %v9234_v5  ;;  %v1840_v46 = vadd.f32 %v1839_v50, %v9236_v6  ;;  %v2966_v22 = vadd.f32 %v2965_v21, %v9238_v8  ;;  %v3070_v51 = vadd.f32 %v3069_v15, %v9240_v9  ;;  %775 = vst.msk [vmem:[#allocation2 + $0x121] sm:$0xff] %vm696_vm1, %v647_v31  ;;  %v797_v39 = vld [vmem:[#allocation2 + $0x80] sm:$0xff] }
 0x116   : > { %v4289_v41 = vsel %vm4285_vm7, %v1701_v35, 0.0  ;;  %v4393_v0 = vsel %vm4389_vm8, %v1701_v35, 0.0  ;;  %v5613_v26 = vsel %vm5609_vm9, %v1701_v35, 0.0  ;;  %v5717_v1 = vsel %vm5713_vm10, %v1701_v35, 0.0  ;;  %v7843_v11 = vpop.f32.mrf.mxu0 }
 0x117   : > { %v4290_v4 = vadd.f32 %v4289_v41, %v9247_v7  ;;  %v4394_v5 = vadd.f32 %v4393_v0, %v9249_v18  ;;  %v5614_v6 = vadd.f32 %v5613_v26, %v9254_v30  ;;  %v5718_v8 = vadd.f32 %v5717_v1, %v9258_v44  ;;  %778 = vst.msk [vmem:[#allocation2 + $0x141] sm:$0xff] %vm696_vm1, %v7843_v11  ;;  %v897_v11 = vld [vmem:[#allocation2 + $0x79] sm:$0xff] }
 0x118   : > { %v9336_v9 = vadd.f32 %v1234_v16, %v1165_v40  ;;  %v9338_v54 = vadd.f32 %v1334_v20, %v1265_v36  ;;  %v1467_v33 = vadd.f32 %v1435_v55, %v1364_v53  ;;  %v1468_v10 = vadd.f32 %v1436_v56, %v1365_v45  ;;  %v999_v45 = vld [vmem:[#allocation2 + $0x82] sm:$0xff] }
 0x119   : > { %v1536_v12 = vmul.f32 %v9121_v17, %v9271_v52  ;;  %v1637_v14 = vmul.f32 %v9131_v24, %v996_v60  ;;  %v1737_v7 = vsel %vm1731_vm3, %v1702_v32, 0.0  ;;  %v1841_v18 = vsel %vm1835_vm4, %v1702_v32, 0.0  ;;  %v898_v52 = vld [vmem:[#allocation2 + $0x81] sm:$0xff] }
 0x11a   : > { %v1569_v30 = vadd.f32 %v1537_v61, %v1468_v10  ;;  %v1738_v44 = vadd.f32 %v1737_v7, %v1736_v28  ;;  %v1842_v16 = vadd.f32 %v1841_v18, %v1840_v46  ;;  %v2967_v25 = vsel %vm2961_vm5, %v1702_v32, 0.0 }
 0x11b   : > { %v1568_v29 = vadd.f32 %v1536_v12, %v1467_v33  ;;  %v2968_v53 = vadd.f32 %v2967_v25, %v2966_v22  ;;  %v3071_v34 = vsel %vm3065_vm6, %v1702_v32, 0.0  ;;  %v4291_v20 = vsel %vm4285_vm7, %v1702_v32, 0.0  ;;  %v998_v12 = vld [vmem:[#allocation2 + $0x7a] sm:$0xff] }
 0x11c   : > { %v9350_v60 = vadd.f32 %v9284_v63, %v1569_v30  ;;  %v3072_v43 = vadd.f32 %v3071_v34, %v3070_v51  ;;  %v4292_v35 = vadd.f32 %v4291_v20, %v4290_v4  ;;  %v4395_v40 = vsel %vm4389_vm8, %v1702_v32, 0.0 }
 0x11d   : > { %v9353_v61 = vadd.f32 %v1637_v14, %v1568_v29  ;;  %v4396_v36 = vadd.f32 %v4395_v40, %v4394_v5  ;;  %v5615_v55 = vsel %vm5609_vm9, %v1702_v32, 0.0  ;;  %v5719_v56 = vsel %vm5713_vm10, %v1702_v32, 0.0 }
 0x11e   : > { %12750 = vst [vmem:[#allocation10_spill] sm:$0xff] %v9350_v60  ;;  %v9359_v50 = vmul.f32 %v9350_v60, %v9350_v60  ;;  %v5616_v63 = vadd.f32 %v5615_v55, %v5614_v6  ;;  %v5720_v21 = vadd.f32 %v5719_v56, %v5718_v8  ;;  %v934_v15 = vmul.f32 %v9072_v2, %v898_v52 }
 0x11f   : > { %12751 = vst [vmem:[#allocation11_spill] sm:$0xff] %v9353_v61  ;;  %v1703_v28 = vmul.f32 %v9353_v61, %v9353_v61  ;;  %v9365_v46 = vmul.f32 %v9087_v48, %v999_v45  ;;  %v1236_v22 = vmul.f32 %v9096_v58, %v898_v52  ;;  %v9369_v32 = vmul.f32 %v9101_v59, %v999_v45 }
 0x120   : > { %v1539_v51 = vmul.f32 %v9121_v17, %v898_v52  ;;  %v1640_v31 = vmul.f32 %v9131_v24, %v999_v45  ;;  %v832_v41 = vmul.f32 %v9077_v3, %v796_v49  ;;  %v833_v0 = vmul.f32 %v9077_v3, %v797_v39 }
 0x121   : > { %v1739_v26 = vsel %vm1731_vm3, %v1703_v28, 0.0  ;;  %v1843_v1 = vsel %vm1835_vm4, %v1703_v28, 0.0  ;;  %v2969_v4 = vsel %vm2961_vm5, %v1703_v28, 0.0  ;;  %v3073_v5 = vsel %vm3065_vm6, %v1703_v28, 0.0 }
 0x122   : > { %v1740_v6 = vadd.f32 %v1739_v26, %v1738_v44  ;;  %v1844_v8 = vadd.f32 %v1843_v1, %v1842_v16  ;;  %v2970_v33 = vadd.f32 %v2969_v4, %v2968_v53  ;;  %v3074_v10 = vadd.f32 %v3073_v5, %v3072_v43  ;;  %v657_v43 = vpop.f32.mrf.mxu0 }
 0x123   : > { %v4293_v14 = vsel %vm4285_vm7, %v1703_v28, 0.0  ;;  %v4397_v7 = vsel %vm4389_vm8, %v1703_v28, 0.0  ;;  %v5617_v18 = vsel %vm5609_vm9, %v1703_v28, 0.0  ;;  %v5721_v30 = vsel %vm5713_vm10, %v1703_v28, 0.0  ;;  %777 = vst.msk [vmem:[#allocation2 + $0x139] sm:$0xff] %vm696_vm1, %v657_v43 }
 0x124   : > { %v4294_v25 = vadd.f32 %v4293_v14, %v4292_v35  ;;  %v4398_v29 = vadd.f32 %v4397_v7, %v4396_v36  ;;  %v5618_v34 = vadd.f32 %v5617_v18, %v5616_v63  ;;  %v5722_v20 = vadd.f32 %v5721_v30, %v5720_v21 }
 0x125   : > { %v933_v52 = vmul.f32 %v9072_v2, %v897_v11  ;;  %v9384_v44 = vadd.f32 %v934_v15, %v833_v0  ;;  %v1034_v16 = vmul.f32 %v9087_v48, %v998_v12  ;;  %v1065_v53 = vadd.f32 %v9275_v57, %v9298_v19 }
 0x126   : > { %v1134_v40 = vmul.f32 %v9107_v62, %v796_v49  ;;  %v1135_v45 = vmul.f32 %v9107_v62, %v797_v39  ;;  %v1235_v55 = vmul.f32 %v9096_v58, %v897_v11  ;;  %v1336_v35 = vmul.f32 %v9101_v59, %v998_v12 }
 0x127   : > { %v965_v36 = vadd.f32 %v933_v52, %v832_v41  ;;  %v1367_v56 = vadd.f32 %v9280_v23, %v9336_v9  ;;  %v1437_v63 = vmul.f32 %v9153_v47, %v796_v49  ;;  %v1438_v21 = vmul.f32 %v9153_v47, %v797_v39  ;;  %v7846_v23 = vpop.f32.mrf.mxu0 }
 0x128   : > { %v1166_v57 = vadd.f32 %v1134_v40, %v9310_v38  ;;  %v1167_v19 = vadd.f32 %v1135_v45, %v1065_v53  ;;  %v1538_v15 = vmul.f32 %v9121_v17, %v897_v11  ;;  %v1639_v28 = vmul.f32 %v9131_v24, %v998_v12  ;;  %780 = vst.msk [vmem:[#allocation2 + $0x159] sm:$0xff] %vm696_vm1, %v7846_v23  ;;  %v900_v12 = vld [vmem:[#allocation2 + $0x99] sm:$0xff]  ;;  %v899_v23 = vld [vmem:[#allocation2 + $0x91] sm:$0xff] }
 0x129   : > { %v9401_v0 = vadd.f32 %v1034_v16, %v965_v36  ;;  %v1469_v26 = vadd.f32 %v1437_v63, %v9338_v54  ;;  %v1470_v1 = vadd.f32 %v1438_v21, %v1367_v56  ;;  %v1741_v41 = vsel %vm1731_vm3, %v9359_v50, 0.0 }
 0x12a   : > { %v1267_v9 = vadd.f32 %v1235_v55, %v1166_v57  ;;  %v9406_v49 = vadd.f32 %v1236_v22, %v1167_v19  ;;  %v1742_v39 = vadd.f32 %v1741_v41, %v1740_v6  ;;  %v1845_v38 = vsel %vm1835_vm4, %v9359_v50, 0.0  ;;  %v798_v19 = vld [vmem:[#allocation2 + $0x90] sm:$0xff] }
 0x12b   : > { %v1570_v4 = vadd.f32 %v1538_v15, %v1469_v26  ;;  %v1571_v5 = vadd.f32 %v1539_v51, %v1470_v1  ;;  %v1846_v11 = vadd.f32 %v1845_v38, %v1844_v8  ;;  %v2971_v54 = vsel %vm2961_vm5, %v9359_v50, 0.0  ;;  %v1001_v8 = vld [vmem:[#allocation2 + $0x9a] sm:$0xff] }
 0x12c   : > { %v9413_v14 = vadd.f32 %v1336_v35, %v1267_v9  ;;  %v2972_v7 = vadd.f32 %v2971_v54, %v2970_v33  ;;  %v3075_v22 = vsel %vm3065_vm6, %v9359_v50, 0.0  ;;  %v4295_v6 = vsel %vm4285_vm7, %v9359_v50, 0.0  ;;  %v799_v15 = vld [vmem:[#allocation2 + $0x98] sm:$0xff] }
 0x12d   : > { %v9419_v18 = vadd.f32 %v1639_v28, %v1570_v4  ;;  %v9421_v30 = vadd.f32 %v1640_v31, %v1571_v5  ;;  %v3076_v52 = vadd.f32 %v3075_v22, %v3074_v10  ;;  %v4296_v51 = vadd.f32 %v4295_v6, %v4294_v25  ;;  %v1000_v9 = vld [vmem:[#allocation2 + $0x92] sm:$0xff] }
 0x12e   : > { %v4399_v16 = vsel %vm4389_vm8, %v9359_v50, 0.0  ;;  %v5619_v53 = vsel %vm5609_vm9, %v9359_v50, 0.0  ;;  %v5723_v33 = vsel %vm5713_vm10, %v9359_v50, 0.0  ;;  %v936_v43 = vmul.f32 %v9072_v2, %v900_v12 }
 0x12f   : > { %12752 = vst [vmem:[#allocation12_spill] sm:$0xff] %v9419_v18  ;;  %12753 = vst [vmem:[#allocation13_spill] sm:$0xff] %v9421_v30  ;;  %v1705_v40 = vmul.f32 %v9419_v18, %v9419_v18  ;;  %v9434_v31 = vmul.f32 %v9421_v30, %v9421_v30  ;;  %v4400_v10 = vadd.f32 %v4399_v16, %v4398_v29 }
 0x130   : > { %v5620_v25 = vadd.f32 %v5619_v53, %v5618_v34  ;;  %v5724_v45 = vadd.f32 %v5723_v33, %v5722_v20  ;;  %v9437_v55 = vmul.f32 %v9087_v48, %v1001_v8  ;;  %v1238_v35 = vmul.f32 %v9096_v58, %v900_v12  ;;  %v667_v53 = vpop.f32.mrf.mxu0 }
 0x131   : > { %v9441_v36 = vmul.f32 %v9101_v59, %v1001_v8  ;;  %v1743_v50 = vsel %vm1731_vm3, %v1705_v40, 0.0  ;;  %v1847_v56 = vsel %vm1835_vm4, %v1705_v40, 0.0  ;;  %v2973_v63 = vsel %vm2961_vm5, %v1705_v40, 0.0  ;;  %779 = vst.msk [vmem:[#allocation2 + $0x151] sm:$0xff] %vm696_vm1, %v667_v53 }
 0x132   : > { %v3077_v21 = vsel %vm3065_vm6, %v1705_v40, 0.0  ;;  %v1744_v57 = vadd.f32 %v1743_v50, %v1742_v39  ;;  %v1848_v29 = vadd.f32 %v1847_v56, %v1846_v11  ;;  %v2974_v34 = vadd.f32 %v2973_v63, %v2972_v7 }
 0x133   : > { %v3078_v20 = vadd.f32 %v3077_v21, %v3076_v52  ;;  %v4297_v28 = vsel %vm4285_vm7, %v1705_v40, 0.0  ;;  %v4401_v26 = vsel %vm4389_vm8, %v1705_v40, 0.0  ;;  %v5621_v1 = vsel %vm5609_vm9, %v1705_v40, 0.0 }
 0x134   : > { %v5725_v41 = vsel %vm5713_vm10, %v1705_v40, 0.0  ;;  %v4298_v38 = vadd.f32 %v4297_v28, %v4296_v51  ;;  %v4402_v4 = vadd.f32 %v4401_v26, %v4400_v10  ;;  %v5622_v5 = vadd.f32 %v5621_v1, %v5620_v25  ;;  %v7849_v26 = vpop.f32.mrf.mxu0 }
 0x135   : > { %v5726_v54 = vadd.f32 %v5725_v41, %v5724_v45  ;;  %v1541_v39 = vmul.f32 %v9121_v17, %v900_v12  ;;  %v1642_v11 = vmul.f32 %v9131_v24, %v1001_v8  ;;  %v834_v7 = vmul.f32 %v9077_v3, %v798_v19  ;;  %782 = vst.msk [vmem:[#allocation2 + $0x171] sm:$0xff] %vm696_vm1, %v7849_v26 }
 0x136   : > { %v835_v22 = vmul.f32 %v9077_v3, %v799_v15  ;;  %v935_v6 = vmul.f32 %v9072_v2, %v899_v23  ;;  %v1036_v52 = vmul.f32 %v9087_v48, %v1000_v9  ;;  %v1067_v16 = vadd.f32 %v9365_v46, %v9384_v44 }
 0x137   : > { %v1136_v51 = vmul.f32 %v9107_v62, %v798_v19  ;;  %v1137_v12 = vmul.f32 %v9107_v62, %v799_v15  ;;  %v1237_v8 = vmul.f32 %v9096_v58, %v899_v23  ;;  %v1338_v40 = vmul.f32 %v9101_v59, %v1000_v9 }
 0x138   : > { %v9460_v33 = vadd.f32 %v936_v43, %v835_v22  ;;  %v967_v10 = vadd.f32 %v935_v6, %v834_v7  ;;  %v1369_v45 = vadd.f32 %v9369_v32, %v9406_v49  ;;  %v1439_v46 = vmul.f32 %v9153_v47, %v798_v19  ;;  %v902_v22 = vld [vmem:[#allocation2 + $0xb1] sm:$0xff] }
 0x139   : > { %v1168_v25 = vadd.f32 %v1136_v51, %v9401_v0  ;;  %v1169_v44 = vadd.f32 %v1137_v12, %v1067_v16  ;;  %v1440_v43 = vmul.f32 %v9153_v47, %v799_v15  ;;  %v1540_v50 = vmul.f32 %v9121_v17, %v899_v23 }
 0x13a   : > { %v1641_v56 = vmul.f32 %v9131_v24, %v1000_v9  ;;  %v9473_v63 = vadd.f32 %v1036_v52, %v967_v10  ;;  %v1471_v28 = vadd.f32 %v1439_v46, %v9413_v14  ;;  %v1745_v0 = vsel %vm1731_vm3, %v9434_v31, 0.0 }
 0x13b   : > { %v1269_v21 = vadd.f32 %v1237_v8, %v1168_v25  ;;  %v9478_v1 = vadd.f32 %v1238_v35, %v1169_v44  ;;  %v1472_v32 = vadd.f32 %v1440_v43, %v1369_v45  ;;  %v1746_v49 = vadd.f32 %v1745_v0, %v1744_v57 }
 0x13c   : > { %v1849_v19 = vsel %vm1835_vm4, %v9434_v31, 0.0  ;;  %v1572_v41 = vadd.f32 %v1540_v50, %v1471_v28  ;;  %v2975_v14 = vsel %vm2961_vm5, %v9434_v31, 0.0  ;;  %v3079_v35 = vsel %vm3065_vm6, %v9434_v31, 0.0 }
 0x13d   : > { %v9483_v15 = vadd.f32 %v1338_v40, %v1269_v21  ;;  %v1850_v23 = vadd.f32 %v1849_v19, %v1848_v29  ;;  %v1573_v9 = vadd.f32 %v1541_v39, %v1472_v32  ;;  %v2976_v7 = vadd.f32 %v2975_v14, %v2974_v34  ;;  %v1003_v29 = vld [vmem:[#allocation2 + $0xb2] sm:$0xff]  ;;  %v901_v19 = vld [vmem:[#allocation2 + $0xa9] sm:$0xff] }
 0x13e   : > { %v4299_v57 = vsel %vm4285_vm7, %v9434_v31, 0.0  ;;  %v9491_v6 = vadd.f32 %v1641_v56, %v1572_v41  ;;  %v3080_v52 = vadd.f32 %v3079_v35, %v3078_v20  ;;  %v4403_v51 = vsel %vm4389_vm8, %v9434_v31, 0.0  ;;  %v800_v56 = vld [vmem:[#allocation2 + $0xa8] sm:$0xff]  ;;  %v801_v21 = vld [vmem:[#allocation2 + $0xb0] sm:$0xff] }
 0x13f   : > { %v4300_v16 = vadd.f32 %v4299_v57, %v4298_v38  ;;  %v9495_v53 = vadd.f32 %v1642_v11, %v1573_v9  ;;  %v4404_v12 = vadd.f32 %v4403_v51, %v4402_v4  ;;  %v5623_v34 = vsel %vm5609_vm9, %v9434_v31, 0.0  ;;  %v1002_v41 = vld [vmem:[#allocation2 + $0xaa] sm:$0xff] }
 0x140   : > { %12754 = vst [vmem:[#allocation14_spill] sm:$0xff] %v9491_v6  ;;  %v5727_v39 = vsel %vm5713_vm10, %v9434_v31, 0.0  ;;  %v1707_v8 = vmul.f32 %v9491_v6, %v9491_v6  ;;  %v5624_v40 = vadd.f32 %v5623_v34, %v5622_v5  ;;  %v938_v20 = vmul.f32 %v9072_v2, %v902_v22 }
 0x141   : > { %12755 = vst [vmem:[#allocation15_spill] sm:$0xff] %v9495_v53  ;;  %v5728_v10 = vadd.f32 %v5727_v39, %v5726_v54  ;;  %v9506_v38 = vmul.f32 %v9495_v53, %v9495_v53  ;;  %v9509_v11 = vmul.f32 %v9087_v48, %v1003_v29  ;;  %v1240_v4 = vmul.f32 %v9096_v58, %v902_v22 }
 0x142   : > { %v9513_v25 = vmul.f32 %v9101_v59, %v1003_v29  ;;  %v1747_v31 = vsel %vm1731_vm3, %v1707_v8, 0.0  ;;  %v1851_v45 = vsel %vm1835_vm4, %v1707_v8, 0.0  ;;  %v2977_v5 = vsel %vm2961_vm5, %v1707_v8, 0.0 }
 0x143   : > { %v3081_v54 = vsel %vm3065_vm6, %v1707_v8, 0.0  ;;  %v1748_v46 = vadd.f32 %v1747_v31, %v1746_v49  ;;  %v1852_v44 = vadd.f32 %v1851_v45, %v1850_v23  ;;  %v2978_v43 = vadd.f32 %v2977_v5, %v2976_v7 }
 0x144   : > { %v3082_v50 = vadd.f32 %v3081_v54, %v3080_v52  ;;  %v4301_v28 = vsel %vm4285_vm7, %v1707_v8, 0.0  ;;  %v4405_v0 = vsel %vm4389_vm8, %v1707_v8, 0.0  ;;  %v5625_v26 = vsel %vm5609_vm9, %v1707_v8, 0.0 }
 0x145   : > { %v5729_v32 = vsel %vm5713_vm10, %v1707_v8, 0.0  ;;  %v4302_v14 = vadd.f32 %v4301_v28, %v4300_v16  ;;  %v4406_v9 = vadd.f32 %v4405_v0, %v4404_v12  ;;  %v5626_v35 = vadd.f32 %v5625_v26, %v5624_v40  ;;  %v677_v12 = vpop.f32.mrf.mxu0 }
 0x146   : > { %v5730_v57 = vadd.f32 %v5729_v32, %v5728_v10  ;;  %v1543_v49 = vmul.f32 %v9121_v17, %v902_v22  ;;  %v1644_v23 = vmul.f32 %v9131_v24, %v1003_v29  ;;  %v836_v7 = vmul.f32 %v9077_v3, %v800_v56  ;;  %781 = vst.msk [vmem:[#allocation2 + $0x169] sm:$0xff] %vm696_vm1, %v677_v12 }
 0x147   : > { %v837_v52 = vmul.f32 %v9077_v3, %v801_v21  ;;  %v937_v51 = vmul.f32 %v9072_v2, %v901_v19  ;;  %v1038_v34 = vmul.f32 %v9087_v48, %v1002_v41  ;;  %v1069_v39 = vadd.f32 %v9437_v55, %v9460_v33  ;;  %v7852_v54 = vpop.f32.mrf.mxu0 }
 0x148   : > { %v1138_v16 = vmul.f32 %v9107_v62, %v800_v56  ;;  %v1139_v22 = vmul.f32 %v9107_v62, %v801_v21  ;;  %v1239_v29 = vmul.f32 %v9096_v58, %v901_v19  ;;  %v1340_v40 = vmul.f32 %v9101_v59, %v1002_v41  ;;  %784 = vst.msk [vmem:[#allocation2 + $0x189] sm:$0xff] %vm696_vm1, %v7852_v54 }
 0x149   : > { %v9532_v8 = vadd.f32 %v938_v20, %v837_v52  ;;  %v969_v3 = vadd.f32 %v937_v51, %v836_v7  ;;  %v1371_v48 = vadd.f32 %v9441_v36, %v9478_v1  ;;  %v1441_v55 = vmul.f32 %v9153_v47, %v800_v56 }
 0x14a   : > { %v1170_v2 = vadd.f32 %v1138_v16, %v9473_v63  ;;  %v1171_v33 = vadd.f32 %v1139_v22, %v1069_v39  ;;  %v1442_v10 = vmul.f32 %v9153_v47, %v801_v21  ;;  %v1542_v20 = vmul.f32 %v9121_v17, %v901_v19 }
 0x14b   : > { %v1643_v62 = vmul.f32 %v9131_v24, %v1002_v41  ;;  %v9545_v31 = vadd.f32 %v1038_v34, %v969_v3  ;;  %v1473_v5 = vadd.f32 %v1441_v55, %v9483_v15  ;;  %v1749_v63 = vsel %vm1731_vm3, %v9506_v38, 0.0  ;;  %v904_v41 = vld [vmem:[#allocation2 + $0xc9] sm:$0xff]  ;;  %v687_v55 = vpop.f32.mrf.mxu0 }
 0x14c   : > { %v1271_v45 = vadd.f32 %v1239_v29, %v1170_v2  ;;  %v9550_v28 = vadd.f32 %v1240_v4, %v1171_v33  ;;  %v1474_v36 = vadd.f32 %v1442_v10, %v1371_v48  ;;  %v1750_v1 = vadd.f32 %v1749_v63, %v1748_v46  ;;  %783 = vst.msk [vmem:[#allocation2 + $0x181] sm:$0xff] %vm696_vm1, %v687_v55  ;;  %v9654_v55 = vld [vmem:[%s12642_s3 + $0xa] ss:$0 sm:$0xff] }
 0x14d   : > { %v1853_v56 = vsel %vm1835_vm4, %v9506_v38, 0.0  ;;  %v1574_v0 = vadd.f32 %v1542_v20, %v1473_v5  ;;  %v2979_v15 = vsel %vm2961_vm5, %v9506_v38, 0.0  ;;  %v3083_v4 = vsel %vm3065_vm6, %v9506_v38, 0.0  ;;  %v803_v5 = vld [vmem:[#allocation2 + $0xc8] sm:$0xff] }
 0x14e   : > { %v9555_v21 = vadd.f32 %v1340_v40, %v1271_v45  ;;  %v1854_v26 = vadd.f32 %v1853_v56, %v1852_v44  ;;  %v1575_v32 = vadd.f32 %v1543_v49, %v1474_v36  ;;  %v2980_v19 = vadd.f32 %v2979_v15, %v2978_v43  ;;  %v1005_v44 = vld [vmem:[#allocation2 + $0xca] sm:$0xff]  ;;  %v802_v45 = vld [vmem:[#allocation2 + $0xc0] sm:$0xff] }
 0x14f   : > { %v4303_v46 = vsel %vm4285_vm7, %v9506_v38, 0.0  ;;  %v9563_v7 = vadd.f32 %v1643_v62, %v1574_v0  ;;  %v3084_v52 = vadd.f32 %v3083_v4, %v3082_v50  ;;  %v4407_v34 = vsel %vm4389_vm8, %v9506_v38, 0.0  ;;  %v9578_v50 = vld [vmem:[%s12642_s3 + $0x1] ss:$0 sm:$0xff]  ;;  %v1004_v56 = vld [vmem:[#allocation2 + $0xc2] sm:$0xff] }
 0x150   : > { %v4304_v51 = vadd.f32 %v4303_v46, %v4302_v14  ;;  %v9567_v39 = vadd.f32 %v1644_v23, %v1575_v32  ;;  %v4408_v16 = vadd.f32 %v4407_v34, %v4406_v9  ;;  %v5627_v43 = vsel %vm5609_vm9, %v9506_v38, 0.0  ;;  %v903_v36 = vld [vmem:[#allocation2 + $0xc1] sm:$0xff]  ;;  %v9611_v4 = vld [vmem:[%s12642_s3] ss:$0 sm:$0xff] }
 0x151   : > { %12756 = vst [vmem:[#allocation16_spill] sm:$0xff] %v9563_v7  ;;  %v5731_v49 = vsel %vm5713_vm10, %v9506_v38, 0.0  ;;  %v1709_v12 = vmul.f32 %v9563_v7, %v9563_v7  ;;  %v5628_v22 = vadd.f32 %v5627_v43, %v5626_v35  ;;  %v940_v14 = vmul.f32 %v9578_v50, %v904_v41  ;;  %v9588_v38 = vld [vmem:[%s12642_s3 + $0x2] ss:$0 sm:$0xff]  ;;  %v9631_v43 = vld [vmem:[%s12642_s3 + $0x5] ss:$0 sm:$0xff] }
 0x152   : > { %12757 = vst [vmem:[#allocation17_spill] sm:$0xff] %v9567_v39  ;;  %v5732_v29 = vadd.f32 %v5731_v49, %v5730_v57  ;;  %v9583_v9 = vmul.f32 %v9567_v39, %v9567_v39  ;;  %v9591_v23 = vmul.f32 %v9588_v38, %v1005_v44  ;;  %v1242_v35 = vmul.f32 %v9096_v58, %v904_v41 }
 0x153   : > { %v9595_v57 = vmul.f32 %v9101_v59, %v1005_v44  ;;  %v1751_v40 = vsel %vm1731_vm3, %v1709_v12, 0.0  ;;  %v1855_v3 = vsel %vm1835_vm4, %v1709_v12, 0.0  ;;  %v2981_v2 = vsel %vm2961_vm5, %v1709_v12, 0.0 }
 0x154   : > { %v3085_v48 = vsel %vm3065_vm6, %v1709_v12, 0.0  ;;  %v1752_v33 = vadd.f32 %v1751_v40, %v1750_v1  ;;  %v1856_v10 = vadd.f32 %v1855_v3, %v1854_v26  ;;  %v2982_v20 = vadd.f32 %v2981_v2, %v2980_v19  ;;  %v9648_v2 = vld [vmem:[%s12642_s3 + $0x9] ss:$0 sm:$0xff] }
 0x155   : > { %v3086_v62 = vadd.f32 %v3085_v48, %v3084_v52  ;;  %v4305_v58 = vsel %vm4285_vm7, %v1709_v12, 0.0  ;;  %v4409_v59 = vsel %vm4389_vm8, %v1709_v12, 0.0  ;;  %v5629_v63 = vsel %vm5609_vm9, %v1709_v12, 0.0 }
 0x156   : > { %v5733_v54 = vsel %vm5713_vm10, %v1709_v12, 0.0  ;;  %v4306_v0 = vadd.f32 %v4305_v58, %v4304_v51  ;;  %v4410_v15 = vadd.f32 %v4409_v59, %v4408_v16  ;;  %v5630_v1 = vadd.f32 %v5629_v63, %v5628_v22 }
 0x157   : > { %v5734_v26 = vadd.f32 %v5733_v54, %v5732_v29  ;;  %v1545_v32 = vmul.f32 %v9121_v17, %v904_v41  ;;  %v1646_v19 = vmul.f32 %v9131_v24, %v1005_v44  ;;  %v838_v46 = vmul.f32 %v9611_v4, %v802_v45  ;;  %v9622_v17 = vld [vmem:[%s12642_s3 + $0x4] ss:$0 sm:$0xff] }
 0x158   : > { %v839_v52 = vmul.f32 %v9611_v4, %v803_v5  ;;  %v939_v34 = vmul.f32 %v9578_v50, %v903_v36  ;;  %v1040_v51 = vmul.f32 %v9588_v38, %v1004_v56  ;;  %v1071_v16 = vadd.f32 %v9509_v11, %v9532_v8  ;;  %v9637_v11 = vld [vmem:[%s12642_s3 + $0x6] ss:$0 sm:$0xff] }
 0x159   : > { %v1140_v24 = vmul.f32 %v9622_v17, %v802_v45  ;;  %v1141_v44 = vmul.f32 %v9622_v17, %v803_v5  ;;  %v1241_v49 = vmul.f32 %v9631_v43, %v903_v36  ;;  %v1342_v8 = vmul.f32 %v9637_v11, %v1004_v56 }
 0x15a   : > { %v9625_v41 = vadd.f32 %v940_v14, %v839_v52  ;;  %v971_v12 = vadd.f32 %v939_v34, %v838_v46  ;;  %v1373_v29 = vadd.f32 %v9513_v25, %v9550_v28  ;;  %v1443_v14 = vmul.f32 %v9153_v47, %v802_v45 }
 0x15b   : > { %v1172_v22 = vadd.f32 %v1140_v24, %v9545_v31  ;;  %v1173_v40 = vadd.f32 %v1141_v44, %v1071_v16  ;;  %v1444_v3 = vmul.f32 %v9153_v47, %v803_v5  ;;  %v1544_v48 = vmul.f32 %v9648_v2, %v903_v36 }
 0x15c   : > { %v1645_v31 = vmul.f32 %v9654_v55, %v1004_v56  ;;  %v9657_v25 = vadd.f32 %v1040_v51, %v971_v12  ;;  %v1475_v45 = vadd.f32 %v1443_v14, %v9555_v21  ;;  %v1753_v47 = vsel %vm1731_vm3, %v9583_v9, 0.0  ;;  %v906_v51 = vld [vmem:[#allocation2 + $0xe1] sm:$0xff] }
 0x15d   : > { %v1273_v28 = vadd.f32 %v1241_v49, %v1172_v22  ;;  %v9662_v5 = vadd.f32 %v1242_v35, %v1173_v40  ;;  %v1476_v58 = vadd.f32 %v1444_v3, %v1373_v29  ;;  %v1754_v59 = vadd.f32 %v1753_v47, %v1752_v33  ;;  %v805_v47 = vld [vmem:[#allocation2 + $0xe0] sm:$0xff] }
 0x15e   : > { %v1857_v63 = vsel %vm1835_vm4, %v9583_v9, 0.0  ;;  %v1576_v36 = vadd.f32 %v1544_v48, %v1475_v45  ;;  %v2983_v56 = vsel %vm2961_vm5, %v9583_v9, 0.0  ;;  %v3087_v21 = vsel %vm3065_vm6, %v9583_v9, 0.0  ;;  %v804_v45 = vld [vmem:[#allocation2 + $0xd8] sm:$0xff] }
 0x15f   : > { %v9666_v54 = vadd.f32 %v1342_v8, %v1273_v28  ;;  %v1858_v46 = vadd.f32 %v1857_v63, %v1856_v10  ;;  %v1577_v52 = vadd.f32 %v1545_v32, %v1476_v58  ;;  %v2984_v34 = vadd.f32 %v2983_v56, %v2982_v20  ;;  %v1007_v10 = vld [vmem:[#allocation2 + $0xe2] sm:$0xff] }
 0x160   : > { %v4307_v35 = vsel %vm4285_vm7, %v9583_v9, 0.0  ;;  %v9674_v33 = vadd.f32 %v1645_v31, %v1576_v36  ;;  %v3088_v16 = vadd.f32 %v3087_v21, %v3086_v62  ;;  %v4411_v44 = vsel %vm4389_vm8, %v9583_v9, 0.0  ;;  %v1006_v21 = vld [vmem:[#allocation2 + $0xda] sm:$0xff] }
 0x161   : > { %v4308_v24 = vadd.f32 %v4307_v35, %v4306_v0  ;;  %v9678_v49 = vadd.f32 %v1646_v19, %v1577_v52  ;;  %v4412_v8 = vadd.f32 %v4411_v44, %v4410_v15  ;;  %v5631_v20 = vsel %vm5609_vm9, %v9583_v9, 0.0  ;;  %v905_v52 = vld [vmem:[#allocation2 + $0xd9] sm:$0xff] }
 0x162   : > { %12758 = vst [vmem:[#allocation18_spill] sm:$0xff] %v9674_v33  ;;  %v5735_v32 = vsel %vm5713_vm10, %v9583_v9, 0.0  ;;  %v1711_v12 = vmul.f32 %v9674_v33, %v9674_v33  ;;  %v5632_v22 = vadd.f32 %v5631_v20, %v5630_v1  ;;  %v942_v62 = vmul.f32 %v9578_v50, %v906_v51 }
 0x163   : > { %12759 = vst [vmem:[#allocation19_spill] sm:$0xff] %v9678_v49  ;;  %v5736_v29 = vadd.f32 %v5735_v32, %v5734_v26  ;;  %v9689_v0 = vmul.f32 %v9678_v49, %v9678_v49  ;;  %v9692_v19 = vmul.f32 %v9588_v38, %v1007_v10  ;;  %v1244_v15 = vmul.f32 %v9631_v43, %v906_v51 }
 0x164   : > { %v9696_v14 = vmul.f32 %v9637_v11, %v1007_v10  ;;  %v1755_v9 = vsel %vm1731_vm3, %v1711_v12, 0.0  ;;  %v1859_v40 = vsel %vm1835_vm4, %v1711_v12, 0.0  ;;  %v2985_v1 = vsel %vm2961_vm5, %v1711_v12, 0.0 }
 0x165   : > { %v3089_v26 = vsel %vm3065_vm6, %v1711_v12, 0.0  ;;  %v1756_v3 = vadd.f32 %v1755_v9, %v1754_v59  ;;  %v1860_v48 = vadd.f32 %v1859_v40, %v1858_v46  ;;  %v2986_v31 = vadd.f32 %v2985_v1, %v2984_v34 }
 0x166   : > { %v3090_v28 = vadd.f32 %v3089_v26, %v3088_v16  ;;  %v4309_v58 = vsel %vm4285_vm7, %v1711_v12, 0.0  ;;  %v4413_v63 = vsel %vm4389_vm8, %v1711_v12, 0.0  ;;  %v5633_v36 = vsel %vm5609_vm9, %v1711_v12, 0.0 }
 0x167   : > { %v5737_v56 = vsel %vm5713_vm10, %v1711_v12, 0.0  ;;  %v4310_v35 = vadd.f32 %v4309_v58, %v4308_v24  ;;  %v4414_v44 = vadd.f32 %v4413_v63, %v4412_v8  ;;  %v5634_v20 = vadd.f32 %v5633_v36, %v5632_v22 }
 0x168   : > { %v5738_v32 = vadd.f32 %v5737_v56, %v5736_v29  ;;  %v1547_v59 = vmul.f32 %v9648_v2, %v906_v51  ;;  %v1648_v46 = vmul.f32 %v9654_v55, %v1007_v10  ;;  %v840_v34 = vmul.f32 %v9611_v4, %v804_v45 }
 0x169   : > { %v841_v16 = vmul.f32 %v9611_v4, %v805_v47  ;;  %v941_v9 = vmul.f32 %v9578_v50, %v905_v52  ;;  %v1042_v40 = vmul.f32 %v9588_v38, %v1006_v21  ;;  %v1073_v12 = vadd.f32 %v9591_v23, %v9625_v41  ;;  %v9726_v23 = vld [vmem:[%s12642_s3 + $0x8] ss:$0 sm:$0xff] }
 0x16a   : > { %v1142_v24 = vmul.f32 %v9622_v17, %v804_v45  ;;  %v1143_v22 = vmul.f32 %v9622_v17, %v805_v47  ;;  %v1243_v51 = vmul.f32 %v9631_v43, %v905_v52  ;;  %v1344_v10 = vmul.f32 %v9637_v11, %v1006_v21 }
 0x16b   : > { %v9715_v8 = vadd.f32 %v942_v62, %v841_v16  ;;  %v973_v29 = vadd.f32 %v941_v9, %v840_v34  ;;  %v1375_v26 = vadd.f32 %v9595_v57, %v9662_v5  ;;  %v1445_v41 = vmul.f32 %v9726_v23, %v804_v45 }
 0x16c   : > { %v1174_v1 = vadd.f32 %v1142_v24, %v9657_v25  ;;  %v1175_v62 = vadd.f32 %v1143_v22, %v1073_v12  ;;  %v1446_v58 = vmul.f32 %v9726_v23, %v805_v47  ;;  %v1546_v63 = vmul.f32 %v9648_v2, %v905_v52  ;;  %v908_v22 = vld [vmem:[#allocation2 + $0xf9] sm:$0xff] }
 0x16d   : > { %v1647_v36 = vmul.f32 %v9654_v55, %v1006_v21  ;;  %v9732_v56 = vadd.f32 %v1042_v40, %v973_v29  ;;  %v1477_v34 = vadd.f32 %v1445_v41, %v9666_v54  ;;  %v1757_v57 = vsel %vm1731_vm3, %v9689_v0, 0.0 }
 0x16e   : > { %v1275_v25 = vadd.f32 %v1243_v51, %v1174_v1  ;;  %v9737_v5 = vadd.f32 %v1244_v15, %v1175_v62  ;;  %v1478_v16 = vadd.f32 %v1446_v58, %v1375_v26  ;;  %v1758_v9 = vadd.f32 %v1757_v57, %v1756_v3 }
 0x16f   : > { %v1861_v45 = vsel %vm1835_vm4, %v9689_v0, 0.0  ;;  %v1578_v52 = vadd.f32 %v1546_v63, %v1477_v34  ;;  %v2987_v21 = vsel %vm2961_vm5, %v9689_v0, 0.0  ;;  %v3091_v54 = vsel %vm3065_vm6, %v9689_v0, 0.0 }
 0x170   : > { %v9741_v47 = vadd.f32 %v1344_v10, %v1275_v25  ;;  %v1862_v12 = vadd.f32 %v1861_v45, %v1860_v48  ;;  %v1579_v40 = vadd.f32 %v1547_v59, %v1478_v16  ;;  %v2988_v24 = vadd.f32 %v2987_v21, %v2986_v31  ;;  %v1009_v48 = vld [vmem:[#allocation2 + $0xfa] sm:$0xff]  ;;  %v806_v45 = vld [vmem:[#allocation2 + $0xf0] sm:$0xff] }
 0x171   : > { %v4311_v15 = vsel %vm4285_vm7, %v9689_v0, 0.0  ;;  %v9749_v3 = vadd.f32 %v1647_v36, %v1578_v52  ;;  %v3092_v51 = vadd.f32 %v3091_v54, %v3090_v28  ;;  %v4415_v10 = vsel %vm4389_vm8, %v9689_v0, 0.0  ;;  %v807_v52 = vld [vmem:[#allocation2 + $0xf8] sm:$0xff] }
 0x172   : > { %v4312_v29 = vadd.f32 %v4311_v15, %v4310_v35  ;;  %v9753_v1 = vadd.f32 %v1648_v46, %v1579_v40  ;;  %v4416_v26 = vadd.f32 %v4415_v10, %v4414_v44  ;;  %v5635_v31 = vsel %vm5609_vm9, %v9689_v0, 0.0  ;;  %v907_v10 = vld [vmem:[#allocation2 + $0xf1] sm:$0xff] }
 0x173   : > { %12760 = vst [vmem:[#allocation20_spill] sm:$0xff] %v9749_v3  ;;  %v5739_v59 = vsel %vm5713_vm10, %v9689_v0, 0.0  ;;  %v1713_v41 = vmul.f32 %v9749_v3, %v9749_v3  ;;  %v5636_v62 = vadd.f32 %v5635_v31, %v5634_v20  ;;  %v944_v28 = vmul.f32 %v9578_v50, %v908_v22  ;;  %v1008_v31 = vld [vmem:[#allocation2 + $0xf2] sm:$0xff] }
 0x174   : > { %12761 = vst [vmem:[#allocation21_spill] sm:$0xff] %v9753_v1  ;;  %v5740_v58 = vadd.f32 %v5739_v59, %v5738_v32  ;;  %v9764_v35 = vmul.f32 %v9753_v1, %v9753_v1  ;;  %v9767_v46 = vmul.f32 %v9588_v38, %v1009_v48  ;;  %v1246_v44 = vmul.f32 %v9631_v43, %v908_v22 }
 0x175   : > { %v9771_v63 = vmul.f32 %v9637_v11, %v1009_v48  ;;  %v1759_v0 = vsel %vm1731_vm3, %v1713_v41, 0.0  ;;  %v1863_v36 = vsel %vm1835_vm4, %v1713_v41, 0.0  ;;  %v2989_v20 = vsel %vm2961_vm5, %v1713_v41, 0.0 }
 0x176   : > { %v3093_v32 = vsel %vm3065_vm6, %v1713_v41, 0.0  ;;  %v1760_v25 = vadd.f32 %v1759_v0, %v1758_v9  ;;  %v1864_v34 = vadd.f32 %v1863_v36, %v1862_v12  ;;  %v2990_v57 = vadd.f32 %v2989_v20, %v2988_v24 }
 0x177   : > { %v3094_v16 = vadd.f32 %v3093_v32, %v3092_v51  ;;  %v4313_v21 = vsel %vm4285_vm7, %v1713_v41, 0.0  ;;  %v4417_v40 = vsel %vm4389_vm8, %v1713_v41, 0.0  ;;  %v5637_v54 = vsel %vm5609_vm9, %v1713_v41, 0.0 }
 0x178   : > { %v5741_v15 = vsel %vm5713_vm10, %v1713_v41, 0.0  ;;  %v4314_v59 = vadd.f32 %v4313_v21, %v4312_v29  ;;  %v4418_v37 = vadd.f32 %v4417_v40, %v4416_v26  ;;  %v5638_v42 = vadd.f32 %v5637_v54, %v5636_v62 }
 0x179   : > { %v5742_v13 = vadd.f32 %v5741_v15, %v5740_v58  ;;  %v1549_v9 = vmul.f32 %v9648_v2, %v908_v22  ;;  %v1650_v12 = vmul.f32 %v9654_v55, %v1009_v48  ;;  %v842_v24 = vmul.f32 %v9611_v4, %v806_v45 }
 0x17a   : > { %v843_v51 = vmul.f32 %v9611_v4, %v807_v52  ;;  %v943_v0 = vmul.f32 %v9578_v50, %v907_v10  ;;  %v1044_v36 = vmul.f32 %v9588_v38, %v1008_v31  ;;  %v1075_v41 = vadd.f32 %v9692_v19, %v9715_v8 }
 0x17b   : > { %v1144_v29 = vmul.f32 %v9622_v17, %v806_v45  ;;  %v1145_v62 = vmul.f32 %v9622_v17, %v807_v52  ;;  %v1245_v22 = vmul.f32 %v9631_v43, %v907_v10  ;;  %v1346_v48 = vmul.f32 %v9637_v11, %v1008_v31 }
 0x17c   : > { %v9790_v26 = vadd.f32 %v944_v28, %v843_v51  ;;  %v975_v58 = vadd.f32 %v943_v0, %v842_v24  ;;  %v1377_v32 = vadd.f32 %v9696_v14, %v9737_v5  ;;  %v1447_v21 = vmul.f32 %v9726_v23, %v806_v45 }
 0x17d   : > { %v1176_v20 = vadd.f32 %v1144_v29, %v9732_v56  ;;  %v1177_v40 = vadd.f32 %v1145_v62, %v1075_v41  ;;  %v1448_v19 = vmul.f32 %v9726_v23, %v807_v52  ;;  %v1548_v8 = vmul.f32 %v9648_v2, %v907_v10  ;;  %v910_v29 = vld [vmem:[#allocation2 + $0x111] sm:$0xff] }
 0x17e   : > { %v1649_v28 = vmul.f32 %v9654_v55, %v1008_v31  ;;  %v9802_v54 = vadd.f32 %v1044_v36, %v975_v58  ;;  %v1479_v51 = vadd.f32 %v1447_v21, %v9741_v47  ;;  %v1761_v56 = vsel %vm1731_vm3, %v9764_v35, 0.0 }
 0x17f   : > { %v1277_v15 = vadd.f32 %v1245_v22, %v1176_v20  ;;  %v9807_v24 = vadd.f32 %v1246_v44, %v1177_v40  ;;  %v1480_v14 = vadd.f32 %v1448_v19, %v1377_v32  ;;  %v1762_v5 = vadd.f32 %v1761_v56, %v1760_v25 }
 0x180   : > { %v1865_v45 = vsel %vm1835_vm4, %v9764_v35, 0.0  ;;  %v1580_v10 = vadd.f32 %v1548_v8, %v1479_v51  ;;  %v2991_v31 = vsel %vm2961_vm5, %v9764_v35, 0.0  ;;  %v3095_v47 = vsel %vm3065_vm6, %v9764_v35, 0.0 }
 0x181   : > { %v9811_v52 = vadd.f32 %v1346_v48, %v1277_v15  ;;  %v1866_v0 = vadd.f32 %v1865_v45, %v1864_v34  ;;  %v1581_v36 = vadd.f32 %v1549_v9, %v1480_v14  ;;  %v2992_v41 = vadd.f32 %v2991_v31, %v2990_v57  ;;  %v1011_v34 = vld [vmem:[#allocation2 + $0x112] sm:$0xff]  ;;  %v808_v14 = vld [vmem:[#allocation2 + $0x108] sm:$0xff] }
 0x182   : > { %v4315_v44 = vsel %vm4285_vm7, %v9764_v35, 0.0  ;;  %v9819_v25 = vadd.f32 %v1649_v28, %v1580_v10  ;;  %v3096_v62 = vadd.f32 %v3095_v47, %v3094_v16  ;;  %v4419_v48 = vsel %vm4389_vm8, %v9764_v35, 0.0  ;;  %v809_v45 = vld [vmem:[#allocation2 + $0x110] sm:$0xff] }
 0x183   : > { %v4316_v22 = vadd.f32 %v4315_v44, %v4314_v59  ;;  %v9823_v58 = vadd.f32 %v1650_v12, %v1581_v36  ;;  %v4420_v20 = vadd.f32 %v4419_v48, %v4418_v37  ;;  %v5639_v57 = vsel %vm5609_vm9, %v9764_v35, 0.0  ;;  %v909_v44 = vld [vmem:[#allocation2 + $0x109] sm:$0xff] }
 0x184   : > { %12762 = vst [vmem:[#allocation22_spill] sm:$0xff] %v9819_v25  ;;  %v5743_v9 = vsel %vm5713_vm10, %v9764_v35, 0.0  ;;  %v1715_v32 = vmul.f32 %v9819_v25, %v9819_v25  ;;  %v5640_v21 = vadd.f32 %v5639_v57, %v5638_v42  ;;  %v946_v16 = vmul.f32 %v9578_v50, %v910_v29  ;;  %v1010_v48 = vld [vmem:[#allocation2 + $0x10a] sm:$0xff] }
 0x185   : > { %12763 = vst [vmem:[#allocation23_spill] sm:$0xff] %v9823_v58  ;;  %v5744_v40 = vadd.f32 %v5743_v9, %v5742_v13  ;;  %v9834_v59 = vmul.f32 %v9823_v58, %v9823_v58  ;;  %v9837_v12 = vmul.f32 %v9588_v38, %v1011_v34  ;;  %v1248_v37 = vmul.f32 %v9631_v43, %v910_v29 }
 0x186   : > { %v9841_v19 = vmul.f32 %v9637_v11, %v1011_v34  ;;  %v1763_v35 = vsel %vm1731_vm3, %v1715_v32, 0.0  ;;  %v1867_v8 = vsel %vm1835_vm4, %v1715_v32, 0.0  ;;  %v2993_v42 = vsel %vm2961_vm5, %v1715_v32, 0.0 }
 0x187   : > { %v3097_v13 = vsel %vm3065_vm6, %v1715_v32, 0.0  ;;  %v1764_v28 = vadd.f32 %v1763_v35, %v1762_v5  ;;  %v1868_v15 = vadd.f32 %v1867_v8, %v1866_v0  ;;  %v2994_v51 = vadd.f32 %v2993_v42, %v2992_v41 }
 0x188   : > { %v3098_v56 = vadd.f32 %v3097_v13, %v3096_v62  ;;  %v4317_v10 = vsel %vm4285_vm7, %v1715_v32, 0.0  ;;  %v4421_v31 = vsel %vm4389_vm8, %v1715_v32, 0.0  ;;  %v5641_v36 = vsel %vm5609_vm9, %v1715_v32, 0.0 }
 0x189   : > { %v5745_v47 = vsel %vm5713_vm10, %v1715_v32, 0.0  ;;  %v4318_v57 = vadd.f32 %v4317_v10, %v4316_v22  ;;  %v4422_v9 = vadd.f32 %v4421_v31, %v4420_v20  ;;  %v5642_v25 = vadd.f32 %v5641_v36, %v5640_v21 }
 0x18a   : > { %v5746_v58 = vadd.f32 %v5745_v47, %v5744_v40  ;;  %v1551_v5 = vmul.f32 %v9648_v2, %v910_v29  ;;  %v1652_v0 = vmul.f32 %v9654_v55, %v1011_v34  ;;  %v844_v41 = vmul.f32 %v9611_v4, %v808_v14 }
 0x18b   : > { %v845_v62 = vmul.f32 %v9611_v4, %v809_v45  ;;  %v945_v35 = vmul.f32 %v9578_v50, %v909_v44  ;;  %v1046_v8 = vmul.f32 %v9588_v38, %v1010_v48  ;;  %v1077_v32 = vadd.f32 %v9767_v46, %v9790_v26 }
 0x18c   : > { %v1146_v22 = vmul.f32 %v9622_v17, %v808_v14  ;;  %v1147_v21 = vmul.f32 %v9622_v17, %v809_v45  ;;  %v1247_v29 = vmul.f32 %v9631_v43, %v909_v44  ;;  %v1348_v34 = vmul.f32 %v9637_v11, %v1010_v48 }
 0x18d   : > { %v9860_v20 = vadd.f32 %v946_v16, %v845_v62  ;;  %v977_v40 = vadd.f32 %v945_v35, %v844_v41  ;;  %v1379_v13 = vadd.f32 %v9771_v63, %v9807_v24  ;;  %v1449_v10 = vmul.f32 %v9726_v23, %v808_v14 }
 0x18e   : > { %v1178_v42 = vadd.f32 %v1146_v22, %v9802_v54  ;;  %v1179_v31 = vadd.f32 %v1147_v21, %v1077_v32  ;;  %v1450_v46 = vmul.f32 %v9726_v23, %v809_v45  ;;  %v1550_v26 = vmul.f32 %v9648_v2, %v909_v44  ;;  %v912_v22 = vld [vmem:[#allocation2 + $0x129] sm:$0xff] }
 0x18f   : > { %v1651_v16 = vmul.f32 %v9654_v55, %v1010_v48  ;;  %v9872_v36 = vadd.f32 %v1046_v8, %v977_v40  ;;  %v1481_v62 = vadd.f32 %v1449_v10, %v9811_v52  ;;  %v1765_v54 = vsel %vm1731_vm3, %v9834_v59, 0.0 }
 0x190   : > { %v1279_v47 = vadd.f32 %v1247_v29, %v1178_v42  ;;  %v9877_v41 = vadd.f32 %v1248_v37, %v1179_v31  ;;  %v1482_v63 = vadd.f32 %v1450_v46, %v1379_v13  ;;  %v1766_v24 = vadd.f32 %v1765_v54, %v1764_v28 }
 0x191   : > { %v1869_v14 = vsel %vm1835_vm4, %v9834_v59, 0.0  ;;  %v1582_v44 = vadd.f32 %v1550_v26, %v1481_v62  ;;  %v2995_v48 = vsel %vm2961_vm5, %v9834_v59, 0.0  ;;  %v3099_v52 = vsel %vm3065_vm6, %v9834_v59, 0.0 }
 0x192   : > { %v9881_v45 = vadd.f32 %v1348_v34, %v1279_v47  ;;  %v1870_v35 = vadd.f32 %v1869_v14, %v1868_v15  ;;  %v1583_v8 = vadd.f32 %v1551_v5, %v1482_v63  ;;  %v2996_v32 = vadd.f32 %v2995_v48, %v2994_v51  ;;  %v1013_v15 = vld [vmem:[#allocation2 + $0x12a] sm:$0xff]  ;;  %v810_v63 = vld [vmem:[#allocation2 + $0x120] sm:$0xff] }
 0x193   : > { %v4319_v37 = vsel %vm4285_vm7, %v9834_v59, 0.0  ;;  %v9889_v28 = vadd.f32 %v1651_v16, %v1582_v44  ;;  %v3100_v21 = vadd.f32 %v3099_v52, %v3098_v56  ;;  %v4423_v34 = vsel %vm4389_vm8, %v9834_v59, 0.0  ;;  %v811_v14 = vld [vmem:[#allocation2 + $0x128] sm:$0xff] }
 0x194   : > { %v4320_v29 = vadd.f32 %v4319_v37, %v4318_v57  ;;  %v9893_v40 = vadd.f32 %v1652_v0, %v1583_v8  ;;  %v4424_v42 = vadd.f32 %v4423_v34, %v4422_v9  ;;  %v5643_v51 = vsel %vm5609_vm9, %v9834_v59, 0.0  ;;  %v911_v37 = vld [vmem:[#allocation2 + $0x121] sm:$0xff] }
 0x195   : > { %12764 = vst [vmem:[#allocation24_spill] sm:$0xff] %v9889_v28  ;;  %v5747_v5 = vsel %vm5713_vm10, %v9834_v59, 0.0  ;;  %v1717_v13 = vmul.f32 %v9889_v28, %v9889_v28  ;;  %v5644_v10 = vadd.f32 %v5643_v51, %v5642_v25  ;;  %v948_v56 = vmul.f32 %v9578_v50, %v912_v22  ;;  %v1012_v34 = vld [vmem:[#allocation2 + $0x122] sm:$0xff] }
 0x196   : > { %12765 = vst [vmem:[#allocation25_spill] sm:$0xff] %v9893_v40  ;;  %v5748_v31 = vadd.f32 %v5747_v5, %v5746_v58  ;;  %v9904_v57 = vmul.f32 %v9893_v40, %v9893_v40  ;;  %v9907_v0 = vmul.f32 %v9588_v38, %v1013_v15  ;;  %v1250_v9 = vmul.f32 %v9631_v43, %v912_v22 }
 0x197   : > { %v9911_v46 = vmul.f32 %v9637_v11, %v1013_v15  ;;  %v1767_v59 = vsel %vm1731_vm3, %v1717_v13, 0.0  ;;  %v1871_v26 = vsel %vm1835_vm4, %v1717_v13, 0.0  ;;  %v2997_v25 = vsel %vm2961_vm5, %v1717_v13, 0.0 }
 0x198   : > { %v3101_v58 = vsel %vm3065_vm6, %v1717_v13, 0.0  ;;  %v1768_v16 = vadd.f32 %v1767_v59, %v1766_v24  ;;  %v1872_v47 = vadd.f32 %v1871_v26, %v1870_v35  ;;  %v2998_v62 = vadd.f32 %v2997_v25, %v2996_v32 }
 0x199   : > { %v3102_v54 = vadd.f32 %v3101_v58, %v3100_v21  ;;  %v4321_v44 = vsel %vm4285_vm7, %v1717_v13, 0.0  ;;  %v4425_v48 = vsel %vm4389_vm8, %v1717_v13, 0.0  ;;  %v5645_v8 = vsel %vm5609_vm9, %v1717_v13, 0.0 }
 0x19a   : > { %v5749_v52 = vsel %vm5713_vm10, %v1717_v13, 0.0  ;;  %v4322_v51 = vadd.f32 %v4321_v44, %v4320_v29  ;;  %v4426_v5 = vadd.f32 %v4425_v48, %v4424_v42  ;;  %v5646_v28 = vadd.f32 %v5645_v8, %v5644_v10 }
 0x19b   : > { %v5750_v27 = vadd.f32 %v5749_v52, %v5748_v31  ;;  %v1553_v24 = vmul.f32 %v9648_v2, %v912_v22  ;;  %v1654_v35 = vmul.f32 %v9654_v55, %v1013_v15  ;;  %v846_v32 = vmul.f32 %v9611_v4, %v810_v63 }
 0x19c   : > { %v847_v21 = vmul.f32 %v9611_v4, %v811_v14  ;;  %v947_v59 = vmul.f32 %v9578_v50, %v911_v37  ;;  %v1048_v26 = vmul.f32 %v9588_v38, %v1012_v34  ;;  %v1079_v13 = vadd.f32 %v9837_v12, %v9860_v20 }
 0x19d   : > { %v1148_v29 = vmul.f32 %v9622_v17, %v810_v63  ;;  %v1149_v10 = vmul.f32 %v9622_v17, %v811_v14  ;;  %v1249_v22 = vmul.f32 %v9631_v43, %v911_v37  ;;  %v1350_v15 = vmul.f32 %v9637_v11, %v1012_v34 }
 0x19e   : > { %v9930_v42 = vadd.f32 %v948_v56, %v847_v21  ;;  %v979_v31 = vadd.f32 %v947_v59, %v846_v32  ;;  %v1381_v58 = vadd.f32 %v9841_v19, %v9877_v41  ;;  %v1451_v44 = vmul.f32 %v9726_v23, %v810_v63 }
 0x19f   : > { %v1180_v25 = vadd.f32 %v1148_v29, %v9872_v36  ;;  %v1181_v48 = vadd.f32 %v1149_v10, %v1079_v13  ;;  %v1452_v12 = vmul.f32 %v9726_v23, %v811_v14  ;;  %v1552_v20 = vmul.f32 %v9648_v2, %v911_v37  ;;  %v914_v29 = vld [vmem:[#allocation2 + $0x141] sm:$0xff] }
 0x1a0   : > { %v1653_v56 = vmul.f32 %v9654_v55, %v1012_v34  ;;  %v9942_v8 = vadd.f32 %v1048_v26, %v979_v31  ;;  %v1483_v21 = vadd.f32 %v1451_v44, %v9881_v45  ;;  %v1769_v36 = vsel %vm1731_vm3, %v9904_v57, 0.0 }
 0x1a1   : > { %v1281_v52 = vadd.f32 %v1249_v22, %v1180_v25  ;;  %v9947_v32 = vadd.f32 %v1250_v9, %v1181_v48  ;;  %v1484_v19 = vadd.f32 %v1452_v12, %v1381_v58  ;;  %v1770_v41 = vadd.f32 %v1769_v36, %v1768_v16 }
 0x1a2   : > { %v1873_v63 = vsel %vm1835_vm4, %v9904_v57, 0.0  ;;  %v1584_v37 = vadd.f32 %v1552_v20, %v1483_v21  ;;  %v2999_v34 = vsel %vm2961_vm5, %v9904_v57, 0.0  ;;  %v3103_v45 = vsel %vm3065_vm6, %v9904_v57, 0.0 }
 0x1a3   : > { %v9951_v14 = vadd.f32 %v1350_v15, %v1281_v52  ;;  %v1874_v59 = vadd.f32 %v1873_v63, %v1872_v47  ;;  %v1585_v26 = vadd.f32 %v1553_v24, %v1484_v19  ;;  %v3000_v13 = vadd.f32 %v2999_v34, %v2998_v62  ;;  %v1015_v47 = vld [vmem:[#allocation2 + $0x142] sm:$0xff]  ;;  %v812_v19 = vld [vmem:[#allocation2 + $0x138] sm:$0xff] }
 0x1a4   : > { %v4323_v9 = vsel %vm4285_vm7, %v9904_v57, 0.0  ;;  %v9959_v16 = vadd.f32 %v1653_v56, %v1584_v37  ;;  %v3104_v10 = vadd.f32 %v3103_v45, %v3102_v54  ;;  %v4427_v15 = vsel %vm4389_vm8, %v9904_v57, 0.0  ;;  %v813_v63 = vld [vmem:[#allocation2 + $0x140] sm:$0xff] }
 0x1a5   : > { %v4324_v22 = vadd.f32 %v4323_v9, %v4322_v51  ;;  %v9963_v31 = vadd.f32 %v1654_v35, %v1585_v26  ;;  %v4428_v25 = vadd.f32 %v4427_v15, %v4426_v5  ;;  %v5647_v62 = vsel %vm5609_vm9, %v9904_v57, 0.0  ;;  %v913_v9 = vld [vmem:[#allocation2 + $0x139] sm:$0xff] }
 0x1a6   : > { %12766 = vst [vmem:[#allocation26_spill] sm:$0xff] %v9959_v16  ;;  %v5751_v24 = vsel %vm5713_vm10, %v9904_v57, 0.0  ;;  %v1719_v58 = vmul.f32 %v9959_v16, %v9959_v16  ;;  %v5648_v44 = vadd.f32 %v5647_v62, %v5646_v28  ;;  %v950_v54 = vmul.f32 %v9578_v50, %v914_v29  ;;  %v1014_v15 = vld [vmem:[#allocation2 + $0x13a] sm:$0xff] }
 0x1a7   : > { %12767 = vst [vmem:[#allocation27_spill] sm:$0xff] %v9963_v31  ;;  %v5752_v48 = vadd.f32 %v5751_v24, %v5750_v27  ;;  %v9974_v51 = vmul.f32 %v9963_v31, %v9963_v31  ;;  %v9977_v35 = vmul.f32 %v9588_v38, %v1015_v47  ;;  %v1252_v5 = vmul.f32 %v9631_v43, %v914_v29 }
 0x1a8   : > { %v9981_v12 = vmul.f32 %v9637_v11, %v1015_v47  ;;  %v1771_v57 = vsel %vm1731_vm3, %v1719_v58, 0.0  ;;  %v1875_v20 = vsel %vm1835_vm4, %v1719_v58, 0.0  ;;  %v3001_v27 = vsel %vm2961_vm5, %v1719_v58, 0.0 }
 0x1a9   : > { %v3105_v28 = vsel %vm3065_vm6, %v1719_v58, 0.0  ;;  %v1772_v56 = vadd.f32 %v1771_v57, %v1770_v41  ;;  %v1876_v52 = vadd.f32 %v1875_v20, %v1874_v59  ;;  %v3002_v21 = vadd.f32 %v3001_v27, %v3000_v13 }
 0x1aa   : > { %v3106_v36 = vadd.f32 %v3105_v28, %v3104_v10  ;;  %v4325_v37 = vsel %vm4285_vm7, %v1719_v58, 0.0  ;;  %v4429_v34 = vsel %vm4389_vm8, %v1719_v58, 0.0  ;;  %v5649_v26 = vsel %vm5609_vm9, %v1719_v58, 0.0 }
 0x1ab   : > { %v5753_v45 = vsel %vm5713_vm10, %v1719_v58, 0.0  ;;  %v4326_v62 = vadd.f32 %v4325_v37, %v4324_v22  ;;  %v4430_v24 = vadd.f32 %v4429_v34, %v4428_v25  ;;  %v5650_v40 = vadd.f32 %v5649_v26, %v5648_v44 }
 0x1ac   : > { %v5754_v61 = vadd.f32 %v5753_v45, %v5752_v48  ;;  %v1555_v41 = vmul.f32 %v9648_v2, %v914_v29  ;;  %v1656_v59 = vmul.f32 %v9654_v55, %v1015_v47  ;;  %v848_v13 = vmul.f32 %v9611_v4, %v812_v19 }
 0x1ad   : > { %v849_v10 = vmul.f32 %v9611_v4, %v813_v63  ;;  %v949_v57 = vmul.f32 %v9578_v50, %v913_v9  ;;  %v1050_v20 = vmul.f32 %v9588_v38, %v1014_v15  ;;  %v1081_v58 = vadd.f32 %v9907_v0, %v9930_v42 }
 0x1ae   : > { %v1150_v22 = vmul.f32 %v9622_v17, %v812_v19  ;;  %v1151_v44 = vmul.f32 %v9622_v17, %v813_v63  ;;  %v1251_v29 = vmul.f32 %v9631_v43, %v913_v9  ;;  %v1352_v47 = vmul.f32 %v9637_v11, %v1014_v15 }
 0x1af   : > { %v10000_v25 = vadd.f32 %v950_v54, %v849_v10  ;;  %v981_v48 = vadd.f32 %v949_v57, %v848_v13  ;;  %v1383_v28 = vadd.f32 %v9911_v46, %v9947_v32  ;;  %v1453_v37 = vmul.f32 %v9726_v23, %v812_v19 }
 0x1b0   : > { %v1182_v27 = vadd.f32 %v1150_v22, %v9942_v8  ;;  %v1183_v34 = vadd.f32 %v1151_v44, %v1081_v58  ;;  %v1454_v0 = vmul.f32 %v9726_v23, %v813_v63  ;;  %v1554_v42 = vmul.f32 %v9648_v2, %v913_v9  ;;  %v916_v22 = vld [vmem:[#allocation2 + $0x159] sm:$0xff] }
 0x1b1   : > { %v1655_v54 = vmul.f32 %v9654_v55, %v1014_v15  ;;  %v10012_v26 = vadd.f32 %v1050_v20, %v981_v48  ;;  %v1485_v10 = vadd.f32 %v1453_v37, %v9951_v14  ;;  %v1773_v8 = vsel %vm1731_vm3, %v9974_v51, 0.0 }
 0x1b2   : > { %v1283_v45 = vadd.f32 %v1251_v29, %v1182_v27  ;;  %v10017_v13 = vadd.f32 %v1252_v5, %v1183_v34  ;;  %v1486_v46 = vadd.f32 %v1454_v0, %v1383_v28  ;;  %v1774_v32 = vadd.f32 %v1773_v8, %v1772_v56 }
 0x1b3   : > { %v1877_v19 = vsel %vm1835_vm4, %v9974_v51, 0.0  ;;  %v1586_v9 = vadd.f32 %v1554_v42, %v1485_v10  ;;  %v3003_v15 = vsel %vm2961_vm5, %v9974_v51, 0.0  ;;  %v3107_v14 = vsel %vm3065_vm6, %v9974_v51, 0.0 }
 0x1b4   : > { %v10021_v63 = vadd.f32 %v1352_v47, %v1283_v45  ;;  %v1878_v57 = vadd.f32 %v1877_v19, %v1876_v52  ;;  %v1587_v20 = vadd.f32 %v1555_v41, %v1486_v46  ;;  %v3004_v58 = vadd.f32 %v3003_v15, %v3002_v21  ;;  %v1017_v52 = vld [vmem:[#allocation2 + $0x15a] sm:$0xff]  ;;  %v814_v46 = vld [vmem:[#allocation2 + $0x150] sm:$0xff] }
 0x1b5   : > { %v4327_v5 = vsel %vm4285_vm7, %v9974_v51, 0.0  ;;  %v10029_v56 = vadd.f32 %v1655_v54, %v1586_v9  ;;  %v3108_v44 = vadd.f32 %v3107_v14, %v3106_v36  ;;  %v4431_v47 = vsel %vm4389_vm8, %v9974_v51, 0.0  ;;  %v815_v19 = vld [vmem:[#allocation2 + $0x158] sm:$0xff] }
 0x1b6   : > { %v4328_v29 = vadd.f32 %v4327_v5, %v4326_v62  ;;  %v10033_v48 = vadd.f32 %v1656_v59, %v1587_v20  ;;  %v4432_v27 = vadd.f32 %v4431_v47, %v4430_v24  ;;  %v5651_v21 = vsel %vm5609_vm9, %v9974_v51, 0.0  ;;  %v915_v5 = vld [vmem:[#allocation2 + $0x151] sm:$0xff] }
 0x1b7   : > { %12768 = vst [vmem:[#allocation28_spill] sm:$0xff] %v10029_v56  ;;  %v5755_v41 = vsel %vm5713_vm10, %v9974_v51, 0.0  ;;  %v1721_v28 = vmul.f32 %v10029_v56, %v10029_v56  ;;  %v5652_v37 = vadd.f32 %v5651_v21, %v5650_v40  ;;  %v952_v36 = vmul.f32 %v9578_v50, %v916_v22  ;;  %v1016_v47 = vld [vmem:[#allocation2 + $0x152] sm:$0xff] }
 0x1b8   : > { %12769 = vst [vmem:[#allocation29_spill] sm:$0xff] %v10033_v48  ;;  %v5756_v34 = vadd.f32 %v5755_v41, %v5754_v61  ;;  %v10044_v62 = vmul.f32 %v10033_v48, %v10033_v48  ;;  %v10047_v59 = vmul.f32 %v9588_v38, %v1017_v52  ;;  %v1254_v24 = vmul.f32 %v9631_v43, %v916_v22 }
 0x1b9   : > { %v10051_v0 = vmul.f32 %v9637_v11, %v1017_v52  ;;  %v1775_v51 = vsel %vm1731_vm3, %v1721_v28, 0.0  ;;  %v1879_v42 = vsel %vm1835_vm4, %v1721_v28, 0.0  ;;  %v3005_v61 = vsel %vm2961_vm5, %v1721_v28, 0.0 }
 0x1ba   : > { %v3109_v40 = vsel %vm3065_vm6, %v1721_v28, 0.0  ;;  %v1776_v54 = vadd.f32 %v1775_v51, %v1774_v32  ;;  %v1880_v45 = vadd.f32 %v1879_v42, %v1878_v57  ;;  %v3006_v10 = vadd.f32 %v3005_v61, %v3004_v58 }
 0x1bb   : > { %v3110_v8 = vadd.f32 %v3109_v40, %v3108_v44  ;;  %v4329_v9 = vsel %vm4285_vm7, %v1721_v28, 0.0  ;;  %v4433_v15 = vsel %vm4389_vm8, %v1721_v28, 0.0  ;;  %v5653_v20 = vsel %vm5609_vm9, %v1721_v28, 0.0 }
 0x1bc   : > { %v5757_v14 = vsel %vm5713_vm10, %v1721_v28, 0.0  ;;  %v4330_v21 = vadd.f32 %v4329_v9, %v4328_v29  ;;  %v4434_v41 = vadd.f32 %v4433_v15, %v4432_v27  ;;  %v5654_v16 = vadd.f32 %v5653_v20, %v5652_v37 }
 0x1bd   : > { %v5758_v60 = vadd.f32 %v5757_v14, %v5756_v34  ;;  %v1557_v32 = vmul.f32 %v9648_v2, %v916_v22  ;;  %v1658_v57 = vmul.f32 %v9654_v55, %v1017_v52  ;;  %v850_v58 = vmul.f32 %v9611_v4, %v814_v46 }
 0x1be   : > { %v851_v44 = vmul.f32 %v9611_v4, %v815_v19  ;;  %v951_v51 = vmul.f32 %v9578_v50, %v915_v5  ;;  %v1052_v42 = vmul.f32 %v9588_v38, %v1016_v47  ;;  %v1083_v28 = vadd.f32 %v9977_v35, %v10000_v25 }
 0x1bf   : > { %v1152_v29 = vmul.f32 %v9622_v17, %v814_v46  ;;  %v1153_v37 = vmul.f32 %v9622_v17, %v815_v19  ;;  %v1253_v22 = vmul.f32 %v9631_v43, %v915_v5  ;;  %v1354_v52 = vmul.f32 %v9637_v11, %v1016_v47 }
 0x1c0   : > { %v10070_v27 = vadd.f32 %v952_v36, %v851_v44  ;;  %v983_v34 = vadd.f32 %v951_v51, %v850_v58  ;;  %v1385_v50 = vadd.f32 %v9981_v12, %v10017_v13  ;;  %v1455_v38 = vmul.f32 %v9726_v23, %v814_v46  ;;  %v918_v44 = vld [vmem:[#allocation2 + $0x171] sm:$0xff] }
 0x1c1   : > { %v1184_v4 = vadd.f32 %v1152_v29, %v10012_v26  ;;  %v1185_v61 = vadd.f32 %v1153_v37, %v1083_v28  ;;  %v1456_v35 = vmul.f32 %v9726_v23, %v815_v19  ;;  %v1556_v25 = vmul.f32 %v9648_v2, %v915_v5 }
 0x1c2   : > { %v1657_v36 = vmul.f32 %v9654_v55, %v1016_v47  ;;  %v10082_v17 = vadd.f32 %v1052_v42, %v983_v34  ;;  %v1487_v9 = vadd.f32 %v1455_v38, %v10021_v63  ;;  %v1777_v26 = vsel %vm1731_vm3, %v10044_v62, 0.0 }
 0x1c3   : > { %v1285_v40 = vadd.f32 %v1253_v22, %v1184_v4  ;;  %v10087_v15 = vadd.f32 %v1254_v24, %v1185_v61  ;;  %v1488_v12 = vadd.f32 %v1456_v35, %v1385_v50  ;;  %v1778_v13 = vadd.f32 %v1777_v26, %v1776_v54  ;;  %v817_v26 = vld [vmem:[#allocation2 + $0x170] sm:$0xff] }
 0x1c4   : > { %v1881_v46 = vsel %vm1835_vm4, %v10044_v62, 0.0  ;;  %v1588_v20 = vadd.f32 %v1556_v25, %v1487_v9  ;;  %v3007_v5 = vsel %vm2961_vm5, %v10044_v62, 0.0  ;;  %v3111_v63 = vsel %vm3065_vm6, %v10044_v62, 0.0  ;;  %v816_v9 = vld [vmem:[#allocation2 + $0x168] sm:$0xff] }
 0x1c5   : > { %v10091_v19 = vadd.f32 %v1354_v52, %v1285_v40  ;;  %v1882_v14 = vadd.f32 %v1881_v46, %v1880_v45  ;;  %v1589_v47 = vadd.f32 %v1557_v32, %v1488_v12  ;;  %v3008_v58 = vadd.f32 %v3007_v5, %v3006_v10  ;;  %v1019_v45 = vld [vmem:[#allocation2 + $0x172] sm:$0xff]  ;;  %v1018_v5 = vld [vmem:[#allocation2 + $0x16a] sm:$0xff] }
 0x1c6   : > { %v4331_v24 = vsel %vm4285_vm7, %v10044_v62, 0.0  ;;  %v10099_v54 = vadd.f32 %v1657_v36, %v1588_v20  ;;  %v3112_v51 = vadd.f32 %v3111_v63, %v3110_v8  ;;  %v4435_v28 = vsel %vm4389_vm8, %v10044_v62, 0.0  ;;  %v8715_v8 = vld [vmem:[%s12642_s3 + $0x1] ss:$0 sm:$0xff]  ;;  %v917_v20 = vld [vmem:[#allocation2 + $0x169] sm:$0xff] }
 0x1c7   : > { %v4332_v42 = vadd.f32 %v4331_v24, %v4330_v21  ;;  %v10103_v29 = vadd.f32 %v1658_v57, %v1589_v47  ;;  %v4436_v37 = vadd.f32 %v4435_v28, %v4434_v41  ;;  %v5655_v10 = vsel %vm5609_vm9, %v10044_v62, 0.0  ;;  %v8716_v41 = vld [vmem:[%s12642_s3 + $0x2] ss:$0 sm:$0xff] }
 0x1c8   : > { %12770 = vst [vmem:[#allocation30_spill] sm:$0xff] %v10099_v54  ;;  %v5759_v32 = vsel %vm5713_vm10, %v10044_v62, 0.0  ;;  %v1723_v22 = vmul.f32 %v10099_v54, %v10099_v54  ;;  %v5656_v52 = vadd.f32 %v5655_v10, %v5654_v16  ;;  %v954_v21 = vmul.f32 %v8715_v8, %v918_v44 }
 0x1c9   : > { %12771 = vst [vmem:[#allocation31_spill] sm:$0xff] %v10103_v29  ;;  %v5760_v34 = vadd.f32 %v5759_v32, %v5758_v60  ;;  %v10116_v57 = vmul.f32 %v10103_v29, %v10103_v29  ;;  %v10121_v4 = vmul.f32 %v8716_v41, %v1019_v45  ;;  %v1256_v62 = vmul.f32 %v9631_v43, %v918_v44 }
 0x1ca   : > { %v10125_v16 = vmul.f32 %v9637_v11, %v1019_v45  ;;  %v1779_v60 = vsel %vm1731_vm3, %v1723_v22, 0.0  ;;  %v1883_v50 = vsel %vm1835_vm4, %v1723_v22, 0.0  ;;  %v3009_v38 = vsel %vm2961_vm5, %v1723_v22, 0.0 }
 0x1cb   : > { %v3113_v61 = vsel %vm3065_vm6, %v1723_v22, 0.0  ;;  %v1780_v35 = vadd.f32 %v1779_v60, %v1778_v13  ;;  %v1884_v25 = vadd.f32 %v1883_v50, %v1882_v14  ;;  %v3010_v36 = vadd.f32 %v3009_v38, %v3008_v58  ;;  %v8717_v58 = vld [vmem:[%s12642_s3] ss:$0 sm:$0xff]  ;;  %v10171_v38 = vld [vmem:[%s12642_s3 + $0x9] ss:$0 sm:$0xff] }
 0x1cc   : > { %v3114_v40 = vadd.f32 %v3113_v61, %v3112_v51  ;;  %v4333_v12 = vsel %vm4285_vm7, %v1723_v22, 0.0  ;;  %v4437_v43 = vsel %vm4389_vm8, %v1723_v22, 0.0  ;;  %v5657_v11 = vsel %vm5609_vm9, %v1723_v22, 0.0 }
 0x1cd   : > { %v5761_v46 = vsel %vm5713_vm10, %v1723_v22, 0.0  ;;  %v4334_v47 = vadd.f32 %v4333_v12, %v4332_v42  ;;  %v4438_v63 = vadd.f32 %v4437_v43, %v4436_v37  ;;  %v5658_v24 = vadd.f32 %v5657_v11, %v5656_v52  ;;  %v10145_v42 = vld [vmem:[%s12642_s3 + $0x4] ss:$0 sm:$0xff]  ;;  %v10177_v12 = vld [vmem:[%s12642_s3 + $0xa] ss:$0 sm:$0xff] }
 0x1ce   : > { %v5762_v28 = vadd.f32 %v5761_v46, %v5760_v34  ;;  %v1559_v13 = vmul.f32 %v9648_v2, %v918_v44  ;;  %v1660_v14 = vmul.f32 %v9654_v55, %v1019_v45  ;;  %v852_v51 = vmul.f32 %v8717_v58, %v816_v9  ;;  %v10154_v45 = vld [vmem:[%s12642_s3 + $0x5] ss:$0 sm:$0xff] }
 0x1cf   : > { %v853_v10 = vmul.f32 %v8717_v58, %v817_v26  ;;  %v953_v32 = vmul.f32 %v8715_v8, %v917_v20  ;;  %v1054_v60 = vmul.f32 %v8716_v41, %v1018_v5  ;;  %v1085_v22 = vadd.f32 %v10047_v59, %v10070_v27  ;;  %v10160_v59 = vld [vmem:[%s12642_s3 + $0x6] ss:$0 sm:$0xff] }
 0x1d0   : > { %v1154_v2 = vmul.f32 %v10145_v42, %v816_v9  ;;  %v1155_v55 = vmul.f32 %v10145_v42, %v817_v26  ;;  %v1255_v37 = vmul.f32 %v10154_v45, %v917_v20  ;;  %v1356_v27 = vmul.f32 %v10160_v59, %v1018_v5 }
 0x1d1   : > { %v10148_v44 = vadd.f32 %v954_v21, %v853_v10  ;;  %v985_v52 = vadd.f32 %v953_v32, %v852_v51  ;;  %v1387_v8 = vadd.f32 %v10051_v0, %v10087_v15  ;;  %v1457_v21 = vmul.f32 %v9726_v23, %v816_v9 }
 0x1d2   : > { %v1186_v34 = vadd.f32 %v1154_v2, %v10082_v17  ;;  %v1187_v41 = vadd.f32 %v1155_v55, %v1085_v22  ;;  %v1458_v50 = vmul.f32 %v9726_v23, %v817_v26  ;;  %v1558_v61 = vmul.f32 %v10171_v38, %v917_v20 }
 0x1d3   : > { %v1659_v17 = vmul.f32 %v10177_v12, %v1018_v5  ;;  %v10180_v0 = vadd.f32 %v1054_v60, %v985_v52  ;;  %v1489_v9 = vadd.f32 %v1457_v21, %v10091_v19  ;;  %v1781_v23 = vsel %vm1731_vm3, %v10116_v57, 0.0  ;;  %v1222_v60 = vld [vmem:[#allocation2 + $0x189] sm:$0xff] }
 0x1d4   : > { %v1287_v15 = vadd.f32 %v1255_v37, %v1186_v34  ;;  %v1288_v26 = vadd.f32 %v1256_v62, %v1187_v41  ;;  %v1490_v43 = vadd.f32 %v1458_v50, %v1387_v8  ;;  %v1782_v11 = vadd.f32 %v1781_v23, %v1780_v35  ;;  %v1121_v23 = vld [vmem:[#allocation2 + $0x188] sm:$0xff] }
 0x1d5   : > { %v1885_v46 = vsel %vm1835_vm4, %v10116_v57, 0.0  ;;  %v1590_v58 = vadd.f32 %v1558_v61, %v1489_v9  ;;  %v3011_v5 = vsel %vm2961_vm5, %v10116_v57, 0.0  ;;  %v3115_v19 = vsel %vm3065_vm6, %v10116_v57, 0.0  ;;  %v1120_v9 = vld [vmem:[#allocation2 + $0x180] sm:$0xff] }
 0x1d6   : > { %v10187_v20 = vadd.f32 %v1356_v27, %v1287_v15  ;;  %v1886_v51 = vadd.f32 %v1885_v46, %v1884_v25  ;;  %v1591_v10 = vadd.f32 %v1559_v13, %v1490_v43  ;;  %v3012_v32 = vadd.f32 %v3011_v5, %v3010_v36  ;;  %v1323_v25 = vld [vmem:[#allocation2 + $0x18a] sm:$0xff]  ;;  %v1221_v43 = vld [vmem:[#allocation2 + $0x181] sm:$0xff] }
 0x1d7   : > { %v4335_v62 = vsel %vm4285_vm7, %v10116_v57, 0.0  ;;  %v10195_v35 = vadd.f32 %v1659_v17, %v1590_v58  ;;  %v3116_v22 = vadd.f32 %v3115_v19, %v3114_v40  ;;  %v4439_v55 = vsel %vm4389_vm8, %v10116_v57, 0.0  ;;  %v1322_v19 = vld [vmem:[#allocation2 + $0x182] sm:$0xff] }
 0x1d8   : > { %v4336_v2 = vadd.f32 %v4335_v62, %v4334_v47  ;;  %v10199_v37 = vadd.f32 %v1660_v14, %v1591_v10  ;;  %v4440_v27 = vadd.f32 %v4439_v55, %v4438_v63  ;;  %v5659_v36 = vsel %vm5609_vm9, %v10116_v57, 0.0 }
 0x1d9   : > { %12772 = vst [vmem:[#allocation32_spill] sm:$0xff] %v10195_v35  ;;  %v5763_v13 = vsel %vm5713_vm10, %v10116_v57, 0.0  ;;  %v1725_v52 = vmul.f32 %v10195_v35, %v10195_v35  ;;  %v5660_v34 = vadd.f32 %v5659_v36, %v5658_v24  ;;  %v1258_v40 = vmul.f32 %v10154_v45, %v1222_v60 }
 0x1da   : > { %12773 = vst [vmem:[#allocation33_spill] sm:$0xff] %v10199_v37  ;;  %v5764_v8 = vadd.f32 %v5763_v13, %v5762_v28  ;;  %v10210_v47 = vmul.f32 %v10199_v37, %v10199_v37  ;;  %v1359_v14 = vmul.f32 %v10160_v59, %v1323_v25  ;;  %v1561_v63 = vmul.f32 %v10171_v38, %v1222_v60 }
 0x1db   : > { %v1662_v21 = vmul.f32 %v10177_v12, %v1323_v25  ;;  %v1783_v41 = vsel %vm1731_vm3, %v1725_v52, 0.0  ;;  %v1887_v57 = vsel %vm1835_vm4, %v1725_v52, 0.0  ;;  %v3013_v50 = vsel %vm2961_vm5, %v1725_v52, 0.0 }
 0x1dc   : > { %v3117_v24 = vsel %vm3065_vm6, %v1725_v52, 0.0  ;;  %v1784_v28 = vadd.f32 %v1783_v41, %v1782_v11  ;;  %v1888_v61 = vadd.f32 %v1887_v57, %v1886_v51  ;;  %v3014_v17 = vadd.f32 %v3013_v50, %v3012_v32  ;;  %v1425_v32 = vld [vmem:[#allocation2 + $0x198] sm:$0xff]  ;;  %v1527_v57 = vld [vmem:[#allocation2 + $0x1a1] sm:$0xff] }
 0x1dd   : > { %v3118_v15 = vadd.f32 %v3117_v24, %v3116_v22  ;;  %v4337_v46 = vsel %vm4285_vm7, %v1725_v52, 0.0  ;;  %v4441_v58 = vsel %vm4389_vm8, %v1725_v52, 0.0  ;;  %v5661_v5 = vsel %vm5609_vm9, %v1725_v52, 0.0  ;;  %v1426_v22 = vld [vmem:[#allocation2 + $0x1a0] sm:$0xff] }
 0x1de   : > { %v5765_v10 = vsel %vm5713_vm10, %v1725_v52, 0.0  ;;  %v10223_v62 = vadd.f32 %v4337_v46, %v4336_v2  ;;  %v10225_v60 = vadd.f32 %v4441_v58, %v4440_v27  ;;  %v10227_v11 = vadd.f32 %v5661_v5, %v5660_v34  ;;  %v1526_v52 = vld [vmem:[#allocation2 + $0x199] sm:$0xff]  ;;  %v8723_v34 = vld [vmem:[%s12642_s3 + $0x8] ss:$0 sm:$0xff] }
 0x1df   : > { %v10229_v51 = vadd.f32 %v5765_v10, %v5764_v8  ;;  %v1087_v55 = vadd.f32 %v10121_v4, %v10148_v44  ;;  %v1156_v25 = vmul.f32 %v10145_v42, %v1120_v9  ;;  %v1157_v36 = vmul.f32 %v10145_v42, %v1121_v23  ;;  %v1627_v42 = vld [vmem:[#allocation2 + $0x19a] sm:$0xff]  ;;  %v1628_v46 = vld [vmem:[#allocation2 + $0x1a2] sm:$0xff] }
 0x1e0   : > { %v1257_v13 = vmul.f32 %v10154_v45, %v1221_v43  ;;  %v1358_v2 = vmul.f32 %v10160_v59, %v1322_v19  ;;  %v1389_v27 = vadd.f32 %v10125_v16, %v1288_v26  ;;  %v1459_v8 = vmul.f32 %v8723_v34, %v1120_v9 }
 0x1e1   : > { %v1460_v41 = vmul.f32 %v8723_v34, %v1121_v23  ;;  %v1188_v4 = vadd.f32 %v1156_v25, %v10180_v0  ;;  %v1189_v44 = vadd.f32 %v1157_v36, %v1087_v55  ;;  %v1461_v50 = vmul.f32 %v8723_v34, %v1425_v32 }
 0x1e2   : > { %v1462_v24 = vmul.f32 %v8723_v34, %v1426_v22  ;;  %v1491_v45 = vadd.f32 %v1459_v8, %v10187_v20  ;;  %v1560_v59 = vmul.f32 %v10171_v38, %v1221_v43  ;;  %v1562_v16 = vmul.f32 %v10171_v38, %v1526_v52 }
 0x1e3   : > { %v1492_v58 = vadd.f32 %v1460_v41, %v1389_v27  ;;  %v1289_v26 = vadd.f32 %v1257_v13, %v1188_v4  ;;  %v1290_v5 = vadd.f32 %v1258_v40, %v1189_v44  ;;  %v1563_v9 = vmul.f32 %v10171_v38, %v1527_v57 }
 0x1e4   : > { %v1661_v23 = vmul.f32 %v10177_v12, %v1322_v19  ;;  %v1592_v10 = vadd.f32 %v1560_v59, %v1491_v45  ;;  %v1663_v32 = vmul.f32 %v10177_v12, %v1627_v42  ;;  %v1664_v22 = vmul.f32 %v10177_v12, %v1628_v46 }
 0x1e5   : > { %v1593_v0 = vadd.f32 %v1561_v63, %v1492_v58  ;;  %v1390_v55 = vadd.f32 %v1358_v2, %v1289_v26  ;;  %v1391_v25 = vadd.f32 %v1359_v14, %v1290_v5  ;;  %v1785_v20 = vsel %vm1731_vm3, %v10210_v47, 0.0 }
 0x1e6   : > { %v1889_v43 = vsel %vm1835_vm4, %v10210_v47, 0.0  ;;  %v10253_v36 = vadd.f32 %v1661_v23, %v1592_v10  ;;  %v1786_v38 = vadd.f32 %v1785_v20, %v1784_v28  ;;  %v3015_v52 = vsel %vm2961_vm5, %v10210_v47, 0.0 }
 0x1e7   : > { %v10255_v40 = vadd.f32 %v1662_v21, %v1593_v0  ;;  %v1890_v19 = vadd.f32 %v1889_v43, %v1888_v61  ;;  %v1493_v13 = vadd.f32 %v1461_v50, %v1390_v55  ;;  %v1494_v63 = vadd.f32 %v1462_v24, %v1391_v25 }
 0x1e8   : > { %12774 = vst [vmem:[#allocation34_spill] sm:$0xff] %v10253_v36  ;;  %v3119_v12 = vsel %vm3065_vm6, %v10210_v47, 0.0  ;;  %v10263_v14 = vmul.f32 %v10253_v36, %v10253_v36  ;;  %v3016_v21 = vadd.f32 %v3015_v52, %v3014_v17  ;;  %v4339_v41 = vsel %vm4285_vm7, %v10210_v47, 0.0 }
 0x1e9   : > { %12775 = vst [vmem:[#allocation35_spill] sm:$0xff] %v10255_v40  ;;  %v10267_v2 = vmul.f32 %v10255_v40, %v10255_v40  ;;  %v3120_v27 = vadd.f32 %v3119_v12, %v3118_v15  ;;  %v1594_v28 = vadd.f32 %v1562_v16, %v1493_v13  ;;  %v1595_v61 = vadd.f32 %v1563_v9, %v1494_v63 }
 0x1ea   : > { %v1787_v34 = vsel %vm1731_vm3, %v10263_v14, 0.0  ;;  %v1891_v8 = vsel %vm1835_vm4, %v10263_v14, 0.0  ;;  %v4443_v57 = vsel %vm4389_vm8, %v10210_v47, 0.0  ;;  %v3017_v42 = vsel %vm2961_vm5, %v10263_v14, 0.0 }
 0x1eb   : > { %v10277_v4 = vadd.f32 %v1663_v32, %v1594_v28  ;;  %v10279_v44 = vadd.f32 %v1664_v22, %v1595_v61  ;;  %v1788_v17 = vadd.f32 %v1787_v34, %v1786_v38  ;;  %v1892_v15 = vadd.f32 %v1891_v8, %v1890_v19 }
 0x1ec   : > { %v1789_v50 = vsel %vm1731_vm3, %v10267_v2, 0.0  ;;  %v1893_v24 = vsel %vm1835_vm4, %v10267_v2, 0.0  ;;  %v3121_v46 = vsel %vm3065_vm6, %v10263_v14, 0.0  ;;  %v3018_v26 = vadd.f32 %v3017_v42, %v3016_v21 }
 0x1ed   : > { %12776 = vst [vmem:[#allocation36_spill] sm:$0xff] %v10277_v4  ;;  %12777 = vst [vmem:[#allocation37_spill] sm:$0xff] %v10279_v44  ;;  %v10291_v45 = vmul.f32 %v10277_v4, %v10277_v4  ;;  %v10295_v58 = vmul.f32 %v10279_v44, %v10279_v44  ;;  %v1790_v59 = vadd.f32 %v1789_v50, %v1788_v17  ;;  %v3019_v5 = vsel %vm2961_vm5, %v10267_v2, 0.0 }
 0x1ee   : > { %v1894_v16 = vadd.f32 %v1893_v24, %v1892_v15  ;;  %v3122_v9 = vadd.f32 %v3121_v46, %v3120_v27  ;;  %v4340_v23 = vadd.f32 %v4339_v41, %v10223_v62  ;;  %v3123_v32 = vsel %vm3065_vm6, %v10267_v2, 0.0 }
 0x1ef   : > { %v1791_v10 = vsel %vm1731_vm3, %v10291_v45, 0.0  ;;  %v1895_v0 = vsel %vm1835_vm4, %v10291_v45, 0.0  ;;  %v4341_v22 = vsel %vm4285_vm7, %v10263_v14, 0.0  ;;  %v3020_v20 = vadd.f32 %v3019_v5, %v3018_v26 }
 0x1f0   : > { %v1792_v55 = vadd.f32 %v1791_v10, %v1790_v59  ;;  %v1896_v25 = vadd.f32 %v1895_v0, %v1894_v16  ;;  %v3021_v43 = vsel %vm2961_vm5, %v10291_v45, 0.0  ;;  %v1793_v62 = vsel %vm1731_vm3, %v10295_v58, 0.0 }
 0x1f1   : > { %v1897_v38 = vsel %vm1835_vm4, %v10295_v58, 0.0  ;;  %v3124_v19 = vadd.f32 %v3123_v32, %v3122_v9  ;;  %v3125_v13 = vsel %vm3065_vm6, %v10291_v45, 0.0  ;;  %v3022_v12 = vadd.f32 %v3021_v43, %v3020_v20 }
 0x1f2   : > { %v10316_v63 = vadd.f32 %v1793_v62, %v1792_v55  ;;  %v1898_v52 = vadd.f32 %v1897_v38, %v1896_v25  ;;  %v4342_v21 = vadd.f32 %v4341_v22, %v4340_v23  ;;  %v3023_v27 = vsel %vm2961_vm5, %v10295_v58, 0.0 }
 0x1f3   : > { %v3126_v28 = vadd.f32 %v3125_v13, %v3124_v19  ;;  %v4343_v61 = vsel %vm4285_vm7, %v10267_v2, 0.0  ;;  %v4345_v34 = vsel %vm4285_vm7, %v10291_v45, 0.0  ;;  %v10324_v41 = vadd.f32 %v3023_v27, %v3022_v12 }
 0x1f4   : > { %v1899_v8 = vrot.slane %v1898_v52, 4  ;;  %v3127_v17 = vsel %vm3065_vm6, %v10295_v58, 0.0  ;;  %v4344_v15 = vadd.f32 %v4343_v61, %v4342_v21  ;;  %v4444_v24 = vadd.f32 %v4443_v57, %v10225_v60 }
 0x1f5   : > { %v10328_v50 = vadd.f32 %v3127_v17, %v3126_v28  ;;  %v4445_v42 = vsel %vm4389_vm8, %v10263_v14, 0.0  ;;  %v4347_v16 = vsel %vm4285_vm7, %v10295_v58, 0.0  ;;  %v4447_v23 = vsel %vm4389_vm8, %v10267_v2, 0.0 }
 0x1f6   : > { %v1900_v46 = vadd.f32 %v1899_v8, %v1898_v52  ;;  %v4346_v59 = vadd.f32 %v4345_v34, %v4344_v15  ;;  %v4446_v26 = vadd.f32 %v4445_v42, %v4444_v24  ;;  %v4449_v10 = vsel %vm4389_vm8, %v10291_v45, 0.0 }
 0x1f7   : > { %v5663_v57 = vsel %vm5609_vm9, %v10210_v47, 0.0  ;;  %v5665_v32 = vsel %vm5609_vm9, %v10263_v14, 0.0  ;;  %v4451_v20 = vsel %vm4389_vm8, %v10295_v58, 0.0  ;;  %v5667_v19 = vsel %vm5609_vm9, %v10267_v2, 0.0 }
 0x1f8   : > { %v1901_v5 = vrot.slane %v1900_v46, 2  ;;  %v10335_v9 = vadd.f32 %v4347_v16, %v4346_v59  ;;  %v4448_v0 = vadd.f32 %v4447_v23, %v4446_v26  ;;  %v5664_v55 = vadd.f32 %v5663_v57, %v10227_v11 }
 0x1f9   : > { %v5669_v13 = vsel %vm5609_vm9, %v10291_v45, 0.0  ;;  %v5767_v11 = vsel %vm5713_vm10, %v10210_v47, 0.0  ;;  %v5671_v27 = vsel %vm5609_vm9, %v10295_v58, 0.0  ;;  %v5769_v34 = vsel %vm5713_vm10, %v10263_v14, 0.0 }
 0x1fa   : > { %v1902_v60 = vadd.f32 %v1901_v5, %v1900_v46  ;;  %v4450_v22 = vadd.f32 %v4449_v10, %v4448_v0  ;;  %v5666_v62 = vadd.f32 %v5665_v32, %v5664_v55  ;;  %v5768_v28 = vadd.f32 %v5767_v11, %v10229_v51  ;;  %v12780_v11 = vld [vmem:[#allocation10_spill] sm:$0xff] }
 0x1fb   : > { %v5771_v17 = vsel %vm5713_vm10, %v10267_v2, 0.0  ;;  %v5773_v15 = vsel %vm5713_vm10, %v10291_v45, 0.0  ;;  %v5775_v42 = vsel %vm5713_vm10, %v10295_v58, 0.0  ;;  %v3025_v57 = vrot.slane %v10324_v41, 4 }
 0x1fc   : > { %v1903_v25 = vrot.slane %v1902_v60, 1  ;;  %v10348_v43 = vadd.f32 %v4451_v20, %v4450_v22  ;;  %v5668_v52 = vadd.f32 %v5667_v19, %v5666_v62  ;;  %v5770_v8 = vadd.f32 %v5769_v34, %v5768_v28 }
 0x1fd   : > { %v3026_v55 = vadd.f32 %v3025_v57, %v10324_v41  ;;  %v1795_v28 = vrot.slane %v10316_v63, 4 }
 0x1fe   : > { %v1904_v38 = vadd.f32 %v1903_v25, %v1902_v60  ;;  %v5670_v21 = vadd.f32 %v5669_v13, %v5668_v52  ;;  %v5772_v24 = vadd.f32 %v5771_v17, %v5770_v8  ;;  %v12781_v8 = vld [vmem:[#allocation26_spill] sm:$0xff] }
 0x1ff   : > { %v3027_v62 = vrot.slane %v3026_v55, 2 }
 0x200   : > { %v1905_v12 = vmax.f32 %v1904_v38, 1e-24  ;;  %v10359_v61 = vadd.f32 %v5671_v27, %v5670_v21  ;;  %v5774_v47 = vadd.f32 %v5773_v15, %v5772_v24  ;;  %v12782_v15 = vld [vmem:[#allocation11_spill] sm:$0xff] }
 0x201   : > { %v3028_v41 = vadd.f32 %v3027_v62, %v3026_v55 }
 0x202   : > { %8674 = vrsqrt.f32 %v1905_v12  ;;  %12778 = vst [vmem:[#allocation38_spill] sm:$0xff] %v10359_v61  ;;  %v10369_v46 = vadd.f32 %v5775_v42, %v5774_v47  ;;  %v1796_v47 = vadd.f32 %v1795_v28, %v10316_v63 }
 0x203   : > { %v3029_v12 = vrot.slane %v3028_v41, 1 }
 0x204   : > { %12779 = vst [vmem:[#allocation39_spill] sm:$0xff] %v10369_v46 }
 0x205   : > { %v3030_v34 = vadd.f32 %v3029_v12, %v3028_v41 }
 0x207   : > { %v3031_v42 = vmax.f32 %v3030_v34, 1e-24 }
 0x209   : > { %8676 = vrsqrt.f32 %v3031_v42 }
 0x20f   : > { %v10371_v51 = vpop.eup %8674 }
 0x210   : > { %v1938_v59 = vmul.f32 %v10371_v51, %v10279_v44  ;;  %v1937_v14 = vmul.f32 %v10371_v51, %v10277_v4  ;;  %v1922_v2 = vmul.f32 %v10371_v51, %v9753_v1  ;;  %v1921_v45 = vmul.f32 %v10371_v51, %v9749_v3 }
 0x211   : > { %v1936_v58 = vmul.f32 %v10371_v51, %v10255_v40  ;;  %v1920_v16 = vmul.f32 %v10371_v51, %v9678_v49  ;;  %v1935_v26 = vmul.f32 %v10371_v51, %v10253_v36  ;;  %v1919_v5 = vmul.f32 %v10371_v51, %v9674_v33 }
 0x212   : > { %2097 = vrot.lane.b32.xlu0 %v1938_v59, %s8785_s10  ;;  %2095 = vrot.lane.b32.xlu1 %v1937_v14, %s8785_s10  ;;  %v1934_v23 = vmul.f32 %v10371_v51, %v10199_v37  ;;  %v1918_v10 = vmul.f32 %v10371_v51, %v9567_v39  ;;  %v1933_v0 = vmul.f32 %v10371_v51, %v10195_v35  ;;  %v12783_v59 = vld [vmem:[#allocation25_spill] sm:$0xff] }
 0x213   : > { %v1917_v60 = vmul.f32 %v10371_v51, %v9563_v7  ;;  %v1932_v32 = vmul.f32 %v10371_v51, %v10103_v29  ;;  %v1916_v22 = vmul.f32 %v10371_v51, %v9495_v53  ;;  %v1931_v25 = vmul.f32 %v10371_v51, %v10099_v54 }
 0x214   : > { %v1915_v20 = vmul.f32 %v10371_v51, %v9491_v6  ;;  %v1930_v38 = vmul.f32 %v10371_v51, %v10033_v48  ;;  %v1914_v19 = vmul.f32 %v10371_v51, %v9421_v30  ;;  %v1929_v13 = vmul.f32 %v10371_v51, %v10029_v56 }
 0x215   : > { %v1913_v52 = vmul.f32 %v10371_v51, %v9419_v18  ;;  %v1928_v21 = vmul.f32 %v10371_v51, %v9963_v31  ;;  %v1912_v27 = vmul.f32 %v10371_v51, %v12780_v11  ;;  %v1927_v17 = vmul.f32 %v10371_v51, %v12781_v8 }
 0x216   : > { %2065 = vrot.lane.b32.xlu0 %v1922_v2, %s8785_s10  ;;  %2063 = vrot.lane.b32.xlu1 %v1921_v45, %s8785_s10  ;;  %v1911_v24 = vmul.f32 %v10371_v51, %v12782_v15  ;;  %v1926_v14 = vmul.f32 %v10371_v51, %v12783_v59  ;;  %v12784_v2 = vld [vmem:[#allocation9_spill] sm:$0xff] }
 0x217   : > { %v1910_v45 = vmul.f32 %v10371_v51, %v12784_v2 }
 0x21a   : > { %2093 = vrot.lane.b32.xlu0 %v1936_v58, %s8785_s10  ;;  %2061 = vrot.lane.b32.xlu1 %v1920_v16, %s8785_s10  ;;  %v1797_v58 = vrot.slane %v1796_v47, 2  ;;  %v12785_v16 = vld [vmem:[#allocation24_spill] sm:$0xff] }
 0x21b   : > { %v1925_v63 = vmul.f32 %v10371_v51, %v12785_v16 }
 0x21e   : > { %2091 = vrot.lane.b32.xlu0 %v1935_v26, %s8785_s10  ;;  %2059 = vrot.lane.b32.xlu1 %v1919_v5, %s8785_s10  ;;  %v12786_v26 = vld [vmem:[#allocation8_spill] sm:$0xff] }
 0x21f   : > { %v1909_v5 = vmul.f32 %v10371_v51, %v12786_v26 }
 0x222   : > { %2089 = vrot.lane.b32.xlu0 %v1934_v23, %s8785_s10  ;;  %2057 = vrot.lane.b32.xlu1 %v1918_v10, %s8785_s10  ;;  %v1798_v23 = vadd.f32 %v1797_v58, %v1796_v47  ;;  %v12787_v10 = vld [vmem:[#allocation23_spill] sm:$0xff] }
 0x226   : > { %2087 = vrot.lane.b32.xlu0 %v1933_v0, %s8785_s10  ;;  %2055 = vrot.lane.b32.xlu1 %v1917_v60, %s8785_s10  ;;  %v1924_v0 = vmul.f32 %v10371_v51, %v12787_v10  ;;  %v12788_v60 = vld [vmem:[#allocation7_spill] sm:$0xff] }
 0x227   : > { %v1908_v57 = vmul.f32 %v10371_v51, %v12788_v60 }
 0x22a   : > { %2085 = vrot.lane.b32.xlu0 %v1932_v32, %s8785_s10  ;;  %2053 = vrot.lane.b32.xlu1 %v1916_v22, %s8785_s10  ;;  %v1799_v32 = vrot.slane %v1798_v23, 1  ;;  %v12789_v22 = vld [vmem:[#allocation22_spill] sm:$0xff] }
 0x22b   : > { %v1923_v55 = vmul.f32 %v10371_v51, %v12789_v22 }
 0x22c   : > { %v1800_v62 = vadd.f32 %v1799_v32, %v1798_v23 }
 0x22e   : > { %2083 = vrot.lane.b32.xlu0 %v1931_v25, %s8785_s10  ;;  %2051 = vrot.lane.b32.xlu1 %v1915_v20, %s8785_s10  ;;  %v12790_v25 = vld [vmem:[#allocation6_spill] sm:$0xff] }
 0x22f   : > { %v1907_v20 = vmul.f32 %v10371_v51, %v12790_v25 }
 0x232   : > { %2081 = vrot.lane.b32.xlu0 %v1930_v38, %s8785_s10  ;;  %2049 = vrot.lane.b32.xlu1 %v1914_v19, %s8785_s10  ;;  %v10473_v38 = vpop.eup %8676  ;;  %v1801_v19 = vmax.f32 %v1800_v62, 1e-24 }
 0x233   : > { %v3033_v41 = vmul.f32 %v10473_v38, %v12790_v25  ;;  %v3050_v12 = vmul.f32 %v10473_v38, %v12787_v10  ;;  %v3035_v28 = vmul.f32 %v10473_v38, %v12786_v26  ;;  %v3051_v34 = vmul.f32 %v10473_v38, %v12785_v16 }
 0x234   : > { %8678 = vrsqrt.f32 %v1801_v19  ;;  %v3036_v42 = vmul.f32 %v10473_v38, %v12784_v2  ;;  %v3038_v62 = vmul.f32 %v10473_v38, %v12780_v11  ;;  %v3054_v19 = vmul.f32 %v10473_v38, %v9963_v31 }
 0x235   : > { %v8333_v47 = vpack.i.bf16 %v3035_v28, %v3051_v34 }
 0x236   : > { %2079 = vrot.lane.b32.xlu0 %v1929_v13, %s8785_s10  ;;  %2047 = vrot.lane.b32.xlu1 %v1913_v52, %s8785_s10  ;;  %v3049_v13 = vmul.f32 %v10473_v38, %v12789_v22  ;;  %v3034_v52 = vmul.f32 %v10473_v38, %v12788_v60 }
 0x238   : > { %v8323_v51 = vpack.i.bf16 %v3033_v41, %v3049_v13 }
 0x23a   : > { %2077 = vrot.lane.b32.xlu0 %v1928_v21, %s8785_s10  ;;  %2045 = vrot.lane.b32.xlu1 %v1912_v27, %s8785_s10  ;;  %v8328_v21 = vpack.i.bf16 %v3034_v52, %v3050_v12  ;;  %v8348_v52 = vpack.i.bf16 %v3038_v62, %v3054_v19 }
 0x23e   : > { %2075 = vrot.lane.b32.xlu0 %v1927_v17, %s8785_s10  ;;  %2043 = vrot.lane.b32.xlu1 %v1911_v24, %s8785_s10 }
 0x241   : > { %v10491_v27 = vpop.eup %8678 }
 0x242   : > { %2073 = vrot.lane.b32.xlu0 %v1926_v14, %s8785_s10  ;;  %2041 = vrot.lane.b32.xlu1 %v1910_v45, %s8785_s10  ;;  %v1803_v17 = vmul.f32 %v10491_v27, %v12790_v25  ;;  %v1819_v24 = vmul.f32 %v10491_v27, %v12789_v22  ;;  %v3052_v14 = vmul.f32 %v10473_v38, %v12783_v59 }
 0x243   : > { %v1804_v58 = vmul.f32 %v10491_v27, %v12788_v60  ;;  %v1807_v13 = vmul.f32 %v10491_v27, %v12782_v15  ;;  %v1824_v28 = vmul.f32 %v10491_v27, %v9963_v31 }
 0x244   : > { %v8286_v45 = vpack.i.bf16 %v1803_v17, %v1819_v24  ;;  %v1809_v17 = vmul.f32 %v10491_v27, %v9419_v18  ;;  %v1825_v24 = vmul.f32 %v10491_v27, %v10029_v56 }
 0x246   : > { %2071 = vrot.lane.b32.xlu0 %v1925_v63, %s8785_s10  ;;  %2039 = vrot.lane.b32.xlu1 %v1909_v5, %s8785_s10  ;;  %v1820_v63 = vmul.f32 %v10491_v27, %v12787_v10  ;;  %v8338_v5 = vpack.i.bf16 %v3036_v42, %v3052_v14  ;;  %v3055_v42 = vmul.f32 %v10473_v38, %v10029_v56 }
 0x247   : > { %v8298_v14 = vpack.i.bf16 %v1809_v17, %v1825_v24  ;;  %v1813_v17 = vmul.f32 %v10491_v27, %v9563_v7  ;;  %v1829_v24 = vmul.f32 %v10491_v27, %v10195_v35 }
 0x248   : > { %v8288_v23 = vpack.i.bf16 %v1804_v58, %v1820_v63  ;;  %v1826_v58 = vmul.f32 %v10491_v27, %v10033_v48 }
 0x24a   : > { %2069 = vrot.lane.b32.xlu0 %v1924_v0, %s8785_s10  ;;  %2037 = vrot.lane.b32.xlu1 %v1908_v57, %s8785_s10  ;;  %v1805_v0 = vmul.f32 %v10491_v27, %v12786_v26  ;;  %v1821_v57 = vmul.f32 %v10491_v27, %v12785_v16 }
 0x24c   : > { %v8290_v32 = vpack.i.bf16 %v1805_v0, %v1821_v57  ;;  %v3040_v0 = vmul.f32 %v10473_v38, %v9421_v30  ;;  %v3056_v57 = vmul.f32 %v10473_v38, %v10033_v48 }
 0x24e   : > { %2067 = vrot.lane.b32.xlu0 %v1923_v55, %s8785_s10  ;;  %2035 = vrot.lane.b32.xlu1 %v1907_v20, %s8785_s10  ;;  %v1806_v55 = vmul.f32 %v10491_v27, %v12784_v2  ;;  %v1822_v20 = vmul.f32 %v10491_v27, %v12783_v59 }
 0x250   : > { %v8292_v41 = vpack.i.bf16 %v1806_v55, %v1822_v20  ;;  %v1811_v55 = vmul.f32 %v10491_v27, %v9491_v6  ;;  %v1827_v20 = vmul.f32 %v10491_v27, %v10099_v54 }
 0x252   : > { %2248 = vrot.lane.b32.xlu1 %v12790_v25, %s8786_s11 }
 0x256   : > { %2250 = vrot.lane.b32.xlu1 %v12788_v60, %s8786_s11 }
 0x25a   : > { %8324 = vrot.lane.b32.xlu1 %v8323_v51, %s8787_s12  ;;  %v1823_v51 = vmul.f32 %v10491_v27, %v12781_v8 }
 0x25c   : > { %v8294_v12 = vpack.i.bf16 %v1807_v13, %v1823_v51  ;;  %v8302_v13 = vpack.i.bf16 %v1811_v55, %v1827_v20  ;;  %v1812_v51 = vmul.f32 %v10491_v27, %v9495_v53  ;;  %v3042_v55 = vmul.f32 %v10473_v38, %v9495_v53 }
 0x25d   : > { %v3058_v20 = vmul.f32 %v10473_v38, %v10103_v29 }
 0x25e   : > { %8329 = vrot.lane.b32.xlu1 %v8328_v21, %s8787_s12  ;;  %v1808_v21 = vmul.f32 %v10491_v27, %v12780_v11 }
 0x260   : > { %v8296_v34 = vpack.i.bf16 %v1808_v21, %v1824_v28 }
 0x262   : > { %2252 = vrot.lane.b32.xlu1 %v12786_v26, %s8786_s11 }
 0x266   : > { %2254 = vrot.lane.b32.xlu1 %v12784_v2, %s8786_s11 }
 0x26a   : > { %8334 = vrot.lane.b32.xlu1 %v8333_v47, %s8787_s12  ;;  %v3039_v47 = vmul.f32 %v10473_v38, %v9419_v18 }
 0x26c   : > { %8287 = vxpose.xlu0.b32.start [1/16] (narrow) %v8286_v45, 8  ;;  %v1810_v45 = vmul.f32 %v10491_v27, %v9421_v30 }
 0x26e   : > { %8339 = vrot.lane.b32.xlu1 %v8338_v5, %s8787_s12 }
 0x270   : > { %8289 = vxpose.xlu0.b32.cont [2/16] (narrow) %v8288_v23, 8  ;;  %v8353_v23 = vpack.i.bf16 %v3039_v47, %v3055_v42 }
 0x272   : > { %2256 = vrot.lane.b32.xlu1 %v12782_v15, %s8786_s11 }
 0x274   : > { %8291 = vxpose.xlu0.b32.cont [3/16] (narrow) %v8290_v32, 8  ;;  %v8300_v32 = vpack.i.bf16 %v1810_v45, %v1826_v58  ;;  %v3041_v45 = vmul.f32 %v10473_v38, %v9491_v6  ;;  %v3057_v58 = vmul.f32 %v10473_v38, %v10099_v54 }
 0x276   : > { %2258 = vrot.lane.b32.xlu1 %v12780_v11, %s8786_s11 }
 0x278   : > { %8293 = vxpose.xlu0.b32.cont [4/16] (narrow) %v8292_v41, 8  ;;  %v8358_v41 = vpack.i.bf16 %v3040_v0, %v3056_v57 }
 0x27a   : > { %8349 = vrot.lane.b32.xlu1 %v8348_v52, %s8787_s12  ;;  %v1828_v52 = vmul.f32 %v10491_v27, %v10103_v29 }
 0x27c   : > { %8295 = vxpose.xlu0.b32.cont [5/16] (narrow) %v8294_v12, 8  ;;  %v3129_v12 = vrot.slane %v10328_v50, 4 }
 0x27e   : > { %2260 = vrot.lane.b32.xlu1 %v9419_v18, %s8786_s11  ;;  %v3130_v47 = vadd.f32 %v3129_v12, %v10328_v50  ;;  %v1830_v50 = vmul.f32 %v10491_v27, %v10199_v37  ;;  %v8368_v12 = vpack.i.bf16 %v3042_v55, %v3058_v20  ;;  %v1834_v55 = vmul.f32 %v10491_v27, %v10279_v44 }
 0x280   : > { %8297 = vxpose.xlu0.b32.cont [6/16] (narrow) %v8296_v34, 8  ;;  %v8304_v34 = vpack.i.bf16 %v1812_v51, %v1828_v52 }
 0x282   : > { %2262 = vrot.lane.b32.xlu1 %v9421_v30, %s8786_s11 }
 0x284   : > { %v2098_v63 = vpop.permute.xlu0 %2097  ;;  %v2096_v5 = vpop.permute.xlu1 %2095  ;;  %8299 = vxpose.xlu0.b32.cont [7/16] (narrow) %v8298_v14, 8 }
 0x285   : > { %7397 = vmatprep.subr.mxu1 %v2098_v63  ;;  %v8306_v63 = vpack.i.bf16 %v1813_v17, %v1829_v24 }
 0x286   : > { %8354 = vrot.lane.b32.xlu1 %v8353_v23, %s8787_s12  ;;  %v3131_v23 = vrot.slane %v3130_v47, 2 }
 0x288   : > { %v2066_v62 = vpop.permute.xlu0 %2065  ;;  %v2064_v19 = vpop.permute.xlu1 %2063  ;;  %8301 = vxpose.xlu0.b32.cont [8/16] (narrow) %v8300_v32, 8  ;;  %v8363_v32 = vpack.i.bf16 %v3041_v45, %v3057_v58  ;;  %v1817_v58 = vmul.f32 %v10491_v27, %v9749_v3 }
 0x289   : > { %7398 = vmatpush3.msra.mxu1 %v2066_v62 }
 0x28a   : > { %7399 = vmatprep.subr.mxu1 %v2096_v5  ;;  %8359 = vrot.lane.b32.xlu1 %v8358_v41, %s8787_s12  ;;  %v1814_v5 = vmul.f32 %v10491_v27, %v9567_v39  ;;  %v1831_v41 = vmul.f32 %v10491_v27, %v10253_v36 }
 0x28b   : > { %7400 = vmatpush3.msra.mxu1 %v2064_v19  ;;  %v1815_v19 = vmul.f32 %v10491_v27, %v9674_v33 }
 0x28c   : > { %v2094_v21 = vpop.permute.xlu0 %2093  ;;  %v2062_v28 = vpop.permute.xlu1 %2061  ;;  %8303 = vxpose.xlu0.b32.cont [9/16] (narrow) %v8302_v13, 8  ;;  %v8308_v62 = vpack.i.bf16 %v1814_v5, %v1830_v50  ;;  %v3132_v13 = vadd.f32 %v3131_v23, %v3130_v47  ;;  %v3043_v47 = vmul.f32 %v10473_v38, %v9563_v7 }
 0x28d   : > { %7401 = vmatprep.subr.mxu1 %v2094_v21  ;;  %v8310_v21 = vpack.i.bf16 %v1815_v19, %v1831_v41  ;;  %v3045_v41 = vmul.f32 %v10473_v38, %v9674_v33 }
 0x28e   : > { %7402 = vmatpush3.msra.mxu1 %v2062_v28  ;;  %2264 = vrot.lane.b32.xlu1 %v9491_v6, %s8786_s11  ;;  %v1816_v28 = vmul.f32 %v10491_v27, %v9678_v49  ;;  %v3133_v17 = vrot.slane %v3132_v13, 1 }
 0x290   : > { %v2092_v42 = vpop.permute.xlu0 %2091  ;;  %v2060_v14 = vpop.permute.xlu1 %2059  ;;  %8305 = vxpose.xlu0.b32.cont [10/16] (narrow) %v8304_v34, 8  ;;  %v1832_v34 = vmul.f32 %v10491_v27, %v10255_v40  ;;  %v3134_v5 = vadd.f32 %v3133_v17, %v3132_v13  ;;  %v3061_v13 = vmul.f32 %v10473_v38, %v10253_v36  ;;  %v3063_v17 = vmul.f32 %v10473_v38, %v10277_v4 }
 0x291   : > { %7403 = vmatprep.subr.mxu1 %v2092_v42 }
 0x292   : > { %7404 = vmatpush3.msra.mxu1 %v2060_v14  ;;  %2266 = vrot.lane.b32.xlu1 %v9495_v53, %s8786_s11  ;;  %v3059_v14 = vmul.f32 %v10473_v38, %v10195_v35  ;;  %v8312_v45 = vpack.i.bf16 %v1816_v28, %v1832_v34  ;;  %v3135_v20 = vmax.f32 %v3134_v5, 1e-24  ;;  %v3047_v34 = vmul.f32 %v10473_v38, %v9749_v3 }
 0x294   : > { %v2090_v0 = vpop.permute.xlu0 %2089  ;;  %v2058_v57 = vpop.permute.xlu1 %2057  ;;  %8307 = vxpose.xlu0.b32.cont [11/16] (narrow) %v8306_v63, 8  ;;  %v1833_v63 = vmul.f32 %v10491_v27, %v10277_v4  ;;  %8680 = vrsqrt.f32 %v3135_v20 }
 0x295   : > { %7405 = vmatprep.subr.mxu1 %v2090_v0  ;;  %v8373_v0 = vpack.i.bf16 %v3043_v47, %v3059_v14  ;;  %v8393_v47 = vpack.i.bf16 %v3047_v34, %v3063_v17 }
 0x296   : > { %7406 = vmatpush3.msra.mxu1 %v2058_v57  ;;  %8364 = vrot.lane.b32.xlu1 %v8363_v32, %s8787_s12  ;;  %v8314_v57 = vpack.i.bf16 %v1817_v58, %v1833_v63  ;;  %v1818_v32 = vmul.f32 %v10491_v27, %v9753_v1  ;;  %v8383_v27 = vpack.i.bf16 %v3045_v41, %v3061_v13 }
 0x297   : > { %v3037_v41 = vmul.f32 %v10473_v38, %v12782_v15  ;;  %v3053_v13 = vmul.f32 %v10473_v38, %v12781_v8 }
 0x298   : > { %v2088_v51 = vpop.permute.xlu0 %2087  ;;  %v2056_v52 = vpop.permute.xlu1 %2055  ;;  %8309 = vxpose.xlu0.b32.cont [12/16] (narrow) %v8308_v62, 8 }
 0x299   : > { %7407 = vmatprep.subr.mxu1 %v2088_v51  ;;  %v8316_v51 = vpack.i.bf16 %v1818_v32, %v1834_v55 }
 0x29a   : > { %7408 = vmatpush3.msra.mxu1 %v2056_v52  ;;  %8369 = vrot.lane.b32.xlu1 %v8368_v12, %s8787_s12 }
 0x29c   : > { %v2086_v24 = vpop.permute.xlu0 %2085  ;;  %v2054_v42 = vpop.permute.xlu1 %2053  ;;  %8311 = vxpose.xlu0.b32.cont [13/16] (narrow) %v8310_v21, 8 }
 0x29d   : > { %7409 = vmatprep.subr.mxu1 %v2086_v24 }
 0x29e   : > { %7410 = vmatpush3.msra.mxu1 %v2054_v42  ;;  %2268 = vrot.lane.b32.xlu1 %v9563_v7, %s8786_s11 }
 0x2a0   : > { %v2084_v50 = vpop.permute.xlu0 %2083  ;;  %v2052_v23 = vpop.permute.xlu1 %2051  ;;  %8313 = vxpose.xlu0.b32.cont [14/16] (narrow) %v8312_v45, 8 }
 0x2a1   : > { %7411 = vmatprep.subr.mxu1 %v2084_v50  ;;  %v10629_v58 = vpop.eup %8680 }
 0x2a2   : > { %7412 = vmatpush3.msra.mxu1 %v2052_v23  ;;  %8374 = vrot.lane.b32.xlu1 %v8373_v0, %s8787_s12  ;;  %v3168_v50 = vmul.f32 %v10629_v58, %v10279_v44  ;;  %v3151_v20 = vmul.f32 %v10629_v58, %v9749_v3  ;;  %v3147_v17 = vmul.f32 %v10629_v58, %v9563_v7 }
 0x2a4   : > { %v2082_v62 = vpop.permute.xlu0 %2081  ;;  %v2050_v19 = vpop.permute.xlu1 %2049  ;;  %8315 = vxpose.xlu0.b32.cont [15/16] (narrow) %v8314_v57, 8  ;;  %v3167_v57 = vmul.f32 %v10629_v58, %v10277_v4 }
 0x2a5   : > { %7413 = vmatprep.subr.mxu1 %v2082_v62  ;;  %v3166_v62 = vmul.f32 %v10629_v58, %v10255_v40 }
 0x2a6   : > { %7414 = vmatpush3.msra.mxu1 %v2050_v19  ;;  %2272 = vrot.lane.b32.xlu1 %v9674_v33, %s8786_s11  ;;  %v3165_v19 = vmul.f32 %v10629_v58, %v10253_v36 }
 0x2a8   : > { %v2080_v52 = vpop.permute.xlu0 %2079  ;;  %v2048_v12 = vpop.permute.xlu1 %2047  ;;  %8317 = vxpose.xlu0.b32.end [16/16] (narrow) %v8316_v51, 8  ;;  %v3149_v51 = vmul.f32 %v10629_v58, %v9674_v33 }
 0x2a9   : > { %7415 = vmatprep.subr.mxu1 %v2080_v52  ;;  %v8343_v52 = vpack.i.bf16 %v3037_v41, %v3053_v13  ;;  %v3158_v41 = vmul.f32 %v10629_v58, %v9963_v31  ;;  %v3150_v13 = vmul.f32 %v10629_v58, %v9678_v49 }
 0x2aa   : > { %7416 = vmatpush3.msra.mxu1 %v2048_v12  ;;  %8384 = vrot.lane.b32.xlu1 %v8383_v27, %s8787_s12  ;;  %v3164_v12 = vmul.f32 %v10629_v58, %v10199_v37  ;;  %v3044_v27 = vmul.f32 %v10473_v38, %v9567_v39 }
 0x2ac   : > { %v2078_v21 = vpop.permute.xlu0 %2077  ;;  %v2046_v28 = vpop.permute.xlu1 %2045 }
 0x2ad   : > { %7417 = vmatprep.subr.mxu1 %v2078_v21  ;;  %v3060_v21 = vmul.f32 %v10473_v38, %v10199_v37 }
 0x2ae   : > { %7418 = vmatpush3.msra.mxu1 %v2046_v28  ;;  %2276 = vrot.lane.b32.xlu1 %v9749_v3, %s8786_s11  ;;  %v3163_v28 = vmul.f32 %v10629_v58, %v10195_v35 }
 0x2af   : > { %v8378_v34 = vpack.i.bf16 %v3044_v27, %v3060_v21  ;;  %v4349_v27 = vrot.slane %v10335_v9, 4 }
 0x2b0   : > { %v2076_v24 = vpop.permute.xlu0 %2075  ;;  %v2044_v42 = vpop.permute.xlu1 %2043 }
 0x2b1   : > { %7419 = vmatprep.subr.mxu1 %v2076_v24  ;;  %v3046_v24 = vmul.f32 %v10473_v38, %v9678_v49  ;;  %v4350_v21 = vadd.f32 %v4349_v27, %v10335_v9  ;;  %v3140_v9 = vmul.f32 %v10629_v58, %v12784_v2 }
 0x2b2   : > { %7420 = vmatpush3.msra.mxu1 %v2044_v42  ;;  %8394 = vrot.lane.b32.xlu1 %v8393_v47, %s8787_s12  ;;  %v3062_v42 = vmul.f32 %v10473_v38, %v10255_v40  ;;  %v3162_v47 = vmul.f32 %v10629_v58, %v10103_v29 }
 0x2b4   : > { %v2074_v14 = vpop.permute.xlu0 %2073  ;;  %v2042_v45 = vpop.permute.xlu1 %2041 }
 0x2b5   : > { %7421 = vmatprep.subr.mxu1 %v2074_v14  ;;  %v8388_v14 = vpack.i.bf16 %v3046_v24, %v3062_v42 }
 0x2b6   : > { %7422 = vmatpush3.msra.mxu1 %v2042_v45  ;;  %2280 = vrot.lane.b32.xlu1 %v12789_v22, %s8786_s11  ;;  %v3161_v45 = vmul.f32 %v10629_v58, %v10099_v54 }
 0x2b8   : > { %v2072_v63 = vpop.permute.xlu0 %2071  ;;  %v2040_v5 = vpop.permute.xlu1 %2039 }
 0x2b9   : > { %7423 = vmatprep.subr.mxu1 %v2072_v63  ;;  %v3048_v63 = vmul.f32 %v10473_v38, %v9753_v1 }
 0x2ba   : > { %7424 = vmatpush3.msra.mxu1 %v2040_v5  ;;  %3455 = vrot.lane.b32.xlu1 %v3168_v50, %s8788_s13  ;;  %v3064_v5 = vmul.f32 %v10473_v38, %v10279_v44  ;;  %v3145_v50 = vmul.f32 %v10629_v58, %v9491_v6 }
 0x2bc   : > { %v2070_v23 = vpop.permute.xlu0 %2069  ;;  %v2038_v0 = vpop.permute.xlu1 %2037 }
 0x2bd   : > { %7425 = vmatprep.subr.mxu1 %v2070_v23  ;;  %v8398_v23 = vpack.i.bf16 %v3048_v63, %v3064_v5 }
 0x2be   : > { %7426 = vmatpush3.msra.mxu1 %v2038_v0  ;;  %3453 = vrot.lane.b32.xlu1 %v3167_v57, %s8788_s13  ;;  %v3160_v57 = vmul.f32 %v10629_v58, %v10033_v48 }
 0x2c0   : > { %v2068_v32 = vpop.permute.xlu0 %2067  ;;  %v2036_v55 = vpop.permute.xlu1 %2035 }
 0x2c1   : > { %7427 = vmatprep.subr.mxu1 %v2068_v32 }
 0x2c2   : > { %3421 = vrot.lane.b32.xlu1 %v3151_v20, %s8788_s13  ;;  %7428 = vmatpush3.msra.mxu1 %v2036_v55  ;;  %v3159_v20 = vmul.f32 %v10629_v58, %v10029_v56 }
 0x2c4   : > { %v2249_v38 = vpop.permute.xlu1 %2248 }
 0x2c6   : > { %3451 = vrot.lane.b32.xlu1 %v3166_v62, %s8788_s13  ;;  %v3152_v62 = vmul.f32 %v10629_v58, %v9753_v1 }
 0x2c8   : > { %v10766_v63 = vpop.permute.xlu1 %2250 }
 0x2ca   : > { %3449 = vrot.lane.b32.xlu1 %v3165_v19, %s8788_s13  ;;  %v3143_v19 = vmul.f32 %v10629_v58, %v9419_v18 }
 0x2ce   : > { %3417 = vrot.lane.b32.xlu1 %v3149_v51, %s8788_s13  ;;  %v3148_v51 = vmul.f32 %v10629_v58, %v9567_v39 }
 0x2d1   : > { %8344 = vrot.lane.b32.xlu0 %v8343_v52, %s8787_s12  ;;  %v3146_v52 = vmul.f32 %v10629_v58, %v9495_v53 }
 0x2d2   : > { %3447 = vrot.lane.b32.xlu1 %v3164_v12, %s8788_s13  ;;  %v3144_v12 = vmul.f32 %v10629_v58, %v9421_v30 }
 0x2d5   : > { %2270 = vrot.lane.b32.xlu0 %v9567_v39, %s8786_s11 }
 0x2d6   : > { %3445 = vrot.lane.b32.xlu1 %v3163_v28, %s8788_s13  ;;  %v4351_v28 = vrot.slane %v4350_v21, 2 }
 0x2d9   : > { %8379 = vrot.lane.b32.xlu0 %v8378_v34, %s8787_s12  ;;  %v3142_v34 = vmul.f32 %v10629_v58, %v12780_v11 }
 0x2da   : > { %3413 = vrot.lane.b32.xlu1 %v3147_v17, %s8788_s13  ;;  %v4352_v17 = vadd.f32 %v4351_v28, %v4350_v21 }
 0x2dc   : > { %v4353_v24 = vrot.slane %v4352_v17, 1 }
 0x2dd   : > { %2274 = vrot.lane.b32.xlu0 %v9678_v49, %s8786_s11 }
 0x2de   : > { %3443 = vrot.lane.b32.xlu1 %v3162_v47, %s8788_s13  ;;  %v4354_v42 = vadd.f32 %v4353_v24, %v4352_v17 }
 0x2e0   : > { %v4355_v47 = vmax.f32 %v4354_v42, 1e-24 }
 0x2e1   : > { %8389 = vrot.lane.b32.xlu0 %v8388_v14, %s8787_s12  ;;  %v3138_v14 = vmul.f32 %v10629_v58, %v12788_v60 }
 0x2e2   : > { %3441 = vrot.lane.b32.xlu1 %v3161_v45, %s8788_s13  ;;  %8682 = vrsqrt.f32 %v4355_v47  ;;  %v3137_v45 = vmul.f32 %v10629_v58, %v12790_v25 }
 0x2e5   : > { %2278 = vrot.lane.b32.xlu0 %v9753_v1, %s8786_s11 }
 0x2e6   : > { %3409 = vrot.lane.b32.xlu1 %v3145_v50, %s8788_s13  ;;  %v10773_v50 = vpop.permute.xlu1 %8324 }
 0x2e8   : > { %v8318_v0 = vpop.trf.xlu0 }
 0x2e9   : > { %8399 = vrot.lane.b32.xlu0 %v8398_v23, %s8787_s12  ;;  %v8319_v32 = vunpack.i.l.bf16 %v8318_v0  ;;  %v8322_v55 = vunpack.i.h.bf16 %v8318_v0 }
 0x2ea   : > { %3439 = vrot.lane.b32.xlu1 %v3160_v57, %s8788_s13 }
 0x2eb   : > { %2195 = vmatprep.mubr.f32.mxu1 %v8319_v32 }
 0x2ec   : > { %2196 = vmatmul.mubr.f32.vlgmr.msra.gmra.mxu1 %v8322_v55 }
 0x2ed   : > { %2282 = vrot.lane.b32.xlu0 %v12787_v10, %s8786_s11  ;;  %7855 = vmatprep.mubr.msk.f32.mxu1 %vm1731_vm3, %v2249_v38  ;;  %v10785_v38 = vpop.permute.xlu1 %8329 }
 0x2ee   : > { %3437 = vrot.lane.b32.xlu1 %v3159_v20, %s8788_s13 }
 0x2ef   : > { %v10769_v5 = vpop.eup %8682 }
 0x2f0   : > { %v4357_v23 = vmul.f32 %v10769_v5, %v12790_v25  ;;  %v4373_v0 = vmul.f32 %v10769_v5, %v12789_v22  ;;  %v4358_v32 = vmul.f32 %v10769_v5, %v12788_v60  ;;  %v4374_v55 = vmul.f32 %v10769_v5, %v12787_v10 }
 0x2f1   : > { %3423 = vrot.lane.b32.xlu0 %v3152_v62, %s8788_s13  ;;  %v10789_v62 = vpop.permute.xlu1 %2252  ;;  %v4361_v17 = vmul.f32 %v10769_v5, %v12782_v15  ;;  %v4377_v24 = vmul.f32 %v10769_v5, %v12781_v8  ;;  %v4362_v47 = vmul.f32 %v10769_v5, %v12780_v11 }
 0x2f2   : > { %3405 = vrot.lane.b32.xlu1 %v3143_v19, %s8788_s13  ;;  %v8440_v57 = vpack.i.bf16 %v4357_v23, %v4373_v0  ;;  %v8445_v20 = vpack.i.bf16 %v4358_v32, %v4374_v55  ;;  %v4359_v19 = vmul.f32 %v10769_v5, %v12786_v26  ;;  %v4363_v32 = vmul.f32 %v10769_v5, %v9419_v18 }
 0x2f3   : > { %v4379_v55 = vmul.f32 %v10769_v5, %v10029_v56 }
 0x2f5   : > { %2284 = vrot.lane.b32.xlu0 %v12785_v16, %s8786_s11 }
 0x2f6   : > { %3435 = vrot.lane.b32.xlu1 %v3158_v41, %s8788_s13  ;;  %v4375_v41 = vmul.f32 %v10769_v5, %v12785_v16 }
 0x2f9   : > { %2286 = vrot.lane.b32.xlu0 %v12783_v59, %s8786_s11 }
 0x2fd   : > { %3419 = vrot.lane.b32.xlu0 %v3150_v13, %s8788_s13  ;;  %v10797_v13 = vpop.permute.xlu1 %2254 }
 0x301   : > { %2288 = vrot.lane.b32.xlu0 %v12781_v8, %s8786_s11  ;;  %v10806_v27 = vpop.permute.xlu1 %8334 }
 0x305   : > { %2290 = vrot.lane.b32.xlu0 %v9963_v31, %s8786_s11  ;;  %v10809_v28 = vpop.permute.xlu1 %8339 }
 0x309   : > { %3415 = vrot.lane.b32.xlu0 %v3148_v51, %s8788_s13  ;;  %v8450_v51 = vpack.i.bf16 %v4359_v19, %v4375_v41  ;;  %v10821_v42 = vpop.permute.xlu1 %2256  ;;  %v8470_v19 = vpack.i.bf16 %v4363_v32, %v4379_v55  ;;  %v4364_v41 = vmul.f32 %v10769_v5, %v9421_v30 }
 0x30d   : > { %2292 = vrot.lane.b32.xlu0 %v10029_v56, %s8786_s11  ;;  %v10830_v0 = vpop.permute.xlu1 %2258 }
 0x311   : > { %2294 = vrot.lane.b32.xlu0 %v10033_v48, %s8786_s11 }
 0x315   : > { %3411 = vrot.lane.b32.xlu0 %v3146_v52, %s8788_s13  ;;  %v4360_v52 = vmul.f32 %v10769_v5, %v12784_v2 }
 0x319   : > { %2296 = vrot.lane.b32.xlu0 %v10099_v54, %s8786_s11 }
 0x31d   : > { %2298 = vrot.lane.b32.xlu0 %v10103_v29, %s8786_s11 }
 0x321   : > { %3407 = vrot.lane.b32.xlu0 %v3144_v12, %s8788_s13  ;;  %v4376_v12 = vmul.f32 %v10769_v5, %v12783_v59 }
 0x323   : > { %v8455_v21 = vpack.i.bf16 %v4360_v52, %v4376_v12 }
 0x325   : > { %2300 = vrot.lane.b32.xlu0 %v10195_v35, %s8786_s11 }
 0x329   : > { %2302 = vrot.lane.b32.xlu0 %v10199_v37, %s8786_s11 }
 0x32d   : > { %3403 = vrot.lane.b32.xlu0 %v3142_v34, %s8788_s13 }
 0x331   : > { %2304 = vrot.lane.b32.xlu0 %v10253_v36, %s8786_s11 }
 0x335   : > { %2306 = vrot.lane.b32.xlu0 %v10255_v40, %s8786_s11 }
 0x339   : > { %3399 = vrot.lane.b32.xlu0 %v3140_v9, %s8788_s13  ;;  %v8460_v9 = vpack.i.bf16 %v4361_v17, %v4377_v24  ;;  %v4453_v17 = vrot.slane %v10348_v43, 4 }
 0x33d   : > { %2308 = vrot.lane.b32.xlu0 %v10277_v4, %s8786_s11 }
 0x341   : > { %2310 = vrot.lane.b32.xlu0 %v10279_v44, %s8786_s11  ;;  %s12503_s11 = scalar_lea.vmem %s12645_s6, %s7361_s9 }
 0x343   : > { %v10813_v34 = vpop.permute.xlu0 %8344 }
 0x345   : > { %3395 = vrot.lane.b32.xlu0 %v3138_v14, %s8788_s13  ;;  %v4378_v14 = vmul.f32 %v10769_v5, %v9963_v31 }
 0x347   : > { %v8465_v23 = vpack.i.bf16 %v4362_v47, %v4378_v14  ;;  %v4365_v14 = vmul.f32 %v10769_v5, %v9491_v6 }
 0x349   : > { %3393 = vrot.lane.b32.xlu0 %v3137_v45, %s8788_s13  ;;  %v10827_v45 = vpop.permute.xlu0 %2270 }
 0x34a   : > { %12791 = vst [vmem:[#allocation22_spill] sm:$0xff] %v10827_v45  ;;  %v3153_v45 = vmul.f32 %v10629_v58, %v12789_v22 }
 0x34d   : > { %3573 = vrot.lane.b32.xlu0 %v12790_v25, %s8789_s15 }
 0x351   : > { %3575 = vrot.lane.b32.xlu0 %v12788_v60, %s8789_s15 }
 0x355   : > { %8441 = vrot.lane.b32.xlu0 %v8440_v57, %s8790_s16  ;;  %v10833_v57 = vpop.permute.xlu0 %8379 }
 0x359   : > { %8446 = vrot.lane.b32.xlu0 %v8445_v20, %s8790_s16  ;;  %v10841_v20 = vpop.permute.xlu1 %8349  ;;  %v10847_v52 = vpop.permute.xlu0 %2274 }
 0x35a   : > { %12792 = vst [vmem:[#allocation40_spill] sm:$0xff] %v10847_v52 }
 0x35d   : > { %3577 = vrot.lane.b32.xlu0 %v12786_v26, %s8789_s15  ;;  %v10854_v24 = vpop.permute.xlu0 %8389 }
 0x361   : > { %3579 = vrot.lane.b32.xlu0 %v12784_v2, %s8789_s15  ;;  %v10865_v32 = vpop.permute.xlu0 %2278 }
 0x362   : > { %12793 = vst [vmem:[#allocation41_spill] sm:$0xff] %v10865_v32 }
 0x365   : > { %8451 = vrot.lane.b32.xlu0 %v8450_v51, %s8790_s16  ;;  %v4380_v51 = vmul.f32 %v10769_v5, %v10033_v48 }
 0x367   : > { %v8475_v12 = vpack.i.bf16 %v4364_v41, %v4380_v51  ;;  %v4366_v41 = vmul.f32 %v10769_v5, %v9495_v53 }
 0x369   : > { %8456 = vrot.lane.b32.xlu0 %v8455_v21, %s8790_s16  ;;  %v10850_v21 = vpop.permute.xlu1 %2260 }
 0x36d   : > { %3581 = vrot.lane.b32.xlu0 %v12782_v15, %s8789_s15  ;;  %v10859_v47 = vpop.permute.xlu1 %2262 }
 0x371   : > { %3583 = vrot.lane.b32.xlu0 %v12780_v11, %s8789_s15  ;;  %v10873_v51 = vpop.permute.xlu1 %8354  ;;  %v4385_v11 = vmul.f32 %v10769_v5, %v10253_v36 }
 0x375   : > { %8461 = vrot.lane.b32.xlu0 %v8460_v9, %s8790_s16  ;;  %v4454_v9 = vadd.f32 %v4453_v17, %v10348_v43  ;;  %v4382_v43 = vmul.f32 %v10769_v5, %v10103_v29  ;;  %v10876_v17 = vpop.permute.xlu0 %8399  ;;  %v10879_v60 = vpop.permute.xlu1 %8359 }
 0x377   : > { %v4455_v55 = vrot.slane %v4454_v9, 2  ;;  %v8485_v46 = vpack.i.bf16 %v4366_v41, %v4382_v43  ;;  %v4369_v43 = vmul.f32 %v10769_v5, %v9674_v33 }
 0x379   : > { %8466 = vrot.lane.b32.xlu0 %v8465_v23, %s8790_s16  ;;  %v4381_v23 = vmul.f32 %v10769_v5, %v10099_v54  ;;  %v10885_v2 = vpop.permute.xlu0 %2282 }
 0x37a   : > { %12794 = vst [vmem:[#allocation42_spill] sm:$0xff] %v10885_v2 }
 0x37d   : > { %3587 = vrot.lane.b32.xlu0 %v9421_v30, %s8789_s15  ;;  %v10892_v41 = vpop.permute.xlu0 %3423 }
 0x381   : > { %8471 = vrot.lane.b32.xlu0 %v8470_v19, %s8790_s16  ;;  %v8480_v19 = vpack.i.bf16 %v4365_v14, %v4381_v23  ;;  %v4367_v14 = vmul.f32 %v10769_v5, %v9563_v7  ;;  %v4383_v23 = vmul.f32 %v10769_v5, %v10195_v35 }
 0x385   : > { %8476 = vrot.lane.b32.xlu0 %v8475_v12, %s8790_s16  ;;  %v4456_v12 = vadd.f32 %v4455_v55, %v4454_v9  ;;  %v8490_v55 = vpack.i.bf16 %v4367_v14, %v4383_v23  ;;  %v4371_v14 = vmul.f32 %v10769_v5, %v9749_v3  ;;  %v4387_v23 = vmul.f32 %v10769_v5, %v10277_v4 }
 0x387   : > { %v4457_v25 = vrot.slane %v4456_v12, 1 }
 0x389   : > { %3589 = vrot.lane.b32.xlu0 %v9491_v6, %s8789_s15  ;;  %v4458_v9 = vadd.f32 %v4457_v25, %v4456_v12  ;;  %v8500_v25 = vpack.i.bf16 %v4369_v43, %v4385_v11  ;;  %v10902_v12 = vpop.permute.xlu0 %2284 }
 0x38a   : > { %12795 = vst [vmem:[#allocation43_spill] sm:$0xff] %v10902_v12 }
 0x38d   : > { %3591 = vrot.lane.b32.xlu0 %v9495_v53, %s8789_s15 }
 0x391   : > { %8481 = vrot.lane.b32.xlu0 %v8480_v19, %s8790_s16  ;;  %v10889_v19 = vpop.permute.xlu1 %2264 }
 0x395   : > { %8486 = vrot.lane.b32.xlu0 %v8485_v46, %s8790_s16  ;;  %v4459_v46 = vmax.f32 %v4458_v9, 1e-24  ;;  %v10900_v61 = vpop.permute.xlu1 %2266 }
 0x397   : > { %8684 = vrsqrt.f32 %v4459_v46  ;;  %v8510_v46 = vpack.i.bf16 %v4371_v14, %v4387_v23 }
 0x399   : > { %3593 = vrot.lane.b32.xlu0 %v9563_v7, %s8789_s15  ;;  %v10909_v9 = vpop.permute.xlu1 %8364 }
 0x39d   : > { %8491 = vrot.lane.b32.xlu0 %v8490_v55, %s8790_s16  ;;  %v10913_v55 = vpop.permute.xlu0 %2286  ;;  %v10916_v30 = vpop.permute.xlu1 %8369 }
 0x39e   : > { %12796 = vst [vmem:[#allocation44_spill] sm:$0xff] %v10913_v55 }
 0x3a1   : > { %3597 = vrot.lane.b32.xlu0 %v9674_v33, %s8789_s15  ;;  %v10920_v56 = vpop.permute.xlu0 %3419 }
 0x3a4   : > { %v10918_v48 = vpop.eup %8684 }
 0x3a5   : > { %8501 = vrot.lane.b32.xlu0 %v8500_v25, %s8790_s16  ;;  %v2202_v25 = vstv %s2201_s17  ;;  %12797 = vst [vmem:[#allocation45_spill] sm:$0xff] %v10918_v48  ;;  %v4492_v23 = vmul.f32 %v10918_v48, %v10279_v44 }
 0x3a9   : > { %3601 = vrot.lane.b32.xlu0 %v9749_v3, %s8789_s15 }
 0x3ac   : > { %v7429_v11 = vpop.f32.mrf.mxu1 }
 0x3ad   : > { %8511 = vrot.lane.b32.xlu0 %v8510_v46, %s8790_s16  ;;  %v10930_v46 = vpop.permute.xlu1 %2268 }
 0x3ae   : > { %v7430_v43 = vpop.f32.mrf.mxu1 }
 0x3af   : > { %v7431_v53 = vadd.f32 %v7430_v43, %v7429_v11  ;;  %v10933_v11 = vpop.permute.xlu0 %2288  ;;  %v4491_v43 = vmul.f32 %v10918_v48, %v10277_v4  ;;  %v3157_v4 = vmul.f32 %v10629_v58, %v12781_v8 }
 0x3b0   : > { %12798 = vst [vmem:[#allocation46_spill] sm:$0xff] %v10933_v11 }
 0x3b1   : > { %3605 = vrot.lane.b32.xlu0 %v12789_v22, %s8789_s15  ;;  %v10924_v31 = vmul.f32 %v7431_v53, %v2202_v25  ;;  %v10938_v53 = vpop.permute.xlu1 %8374  ;;  %v4475_v25 = vmul.f32 %v10918_v48, %v9749_v3  ;;  %v4473_v3 = vmul.f32 %v10918_v48, %v9674_v33 }
 0x3b3   : > { %v2205_v14 = vsel %vm2204_vm11, %v10924_v31, -inf  ;;  %v10942_v55 = vpop.permute.xlu0 %2290 }
 0x3b4   : > { %2206 = vmax.xlane.f32.xlu1 %v2205_v14  ;;  %12799 = vst [vmem:[#allocation47_spill] sm:$0xff] %v10942_v55  ;;  %v4490_v14 = vmul.f32 %v10918_v48, %v10255_v40 }
 0x3b5   : > { %4779 = vrot.lane.b32.xlu0 %v4492_v23, %s8791_s18  ;;  %v10947_v23 = vpop.permute.xlu1 %2272 }
 0x3b6   : > { %12800 = vst [vmem:[#allocation48_spill] sm:$0xff] %v10947_v23 }
 0x3b7   : > { %v10950_v11 = vpop.permute.xlu0 %3415 }
 0x3b9   : > { %4777 = vrot.lane.b32.xlu0 %v4491_v43, %s8791_s18  ;;  %v4489_v43 = vmul.f32 %v10918_v48, %v10253_v36  ;;  %v4488_v36 = vmul.f32 %v10918_v48, %v10199_v37 }
 0x3bb   : > { %v10964_v55 = vpop.permute.xlu0 %2292 }
 0x3bc   : > { %12801 = vst [vmem:[#allocation49_spill] sm:$0xff] %v10964_v55  ;;  %v4471_v55 = vmul.f32 %v10918_v48, %v9563_v7 }
 0x3bd   : > { %4745 = vrot.lane.b32.xlu0 %v4475_v25, %s8791_s18  ;;  %v10958_v25 = vpop.permute.xlu1 %8384 }
 0x3bf   : > { %v10976_v33 = vpop.permute.xlu0 %2294 }
 0x3c0   : > { %12803 = vst [vmem:[#allocation51_spill] sm:$0xff] %v10976_v33 }
 0x3c1   : > { %4775 = vrot.lane.b32.xlu0 %v4490_v14, %s8791_s18  ;;  %v3141_v14 = vmul.f32 %v10629_v58, %v12782_v15  ;;  %v4487_v15 = vmul.f32 %v10918_v48, %v10195_v35  ;;  %v4486_v35 = vmul.f32 %v10918_v48, %v10103_v29 }
 0x3c5   : > { %4773 = vrot.lane.b32.xlu0 %v4489_v43, %s8791_s18  ;;  %3433 = vrot.lane.b32.xlu1 %v3157_v4, %s8788_s13  ;;  %v3156_v4 = vmul.f32 %v10629_v58, %v12783_v59  ;;  %v10972_v43 = vpop.permute.xlu1 %2276 }
 0x3c6   : > { %12802 = vst [vmem:[#allocation50_spill] sm:$0xff] %v10972_v43 }
 0x3c9   : > { %4741 = vrot.lane.b32.xlu0 %v4473_v3, %s8791_s18  ;;  %3401 = vrot.lane.b32.xlu1 %v3141_v14, %s8788_s13  ;;  %v3155_v3 = vmul.f32 %v10629_v58, %v12785_v16  ;;  %v8395_v14 = vpop.permute.xlu1 %8394 }
 0x3cd   : > { %4771 = vrot.lane.b32.xlu0 %v4488_v36, %s8791_s18  ;;  %3431 = vrot.lane.b32.xlu1 %v3156_v4, %s8788_s13  ;;  %v3139_v36 = vmul.f32 %v10629_v58, %v12786_v26  ;;  %v10988_v4 = vpop.permute.xlu0 %3411  ;;  %v4485_v26 = vmul.f32 %v10918_v48, %v10099_v54 }
 0x3d1   : > { %4769 = vrot.lane.b32.xlu0 %v4487_v15, %s8791_s18  ;;  %3429 = vrot.lane.b32.xlu1 %v3155_v3, %s8788_s13  ;;  %v3154_v15 = vmul.f32 %v10629_v58, %v12787_v10  ;;  %v10996_v3 = vpop.permute.xlu1 %2280  ;;  %v11000_v7 = vpop.permute.xlu0 %2296 }
 0x3d2   : > { %12804 = vst [vmem:[#allocation52_spill] sm:$0xff] %v10996_v3  ;;  %12805 = vst [vmem:[#allocation53_spill] sm:$0xff] %v11000_v7 }
 0x3d5   : > { %4737 = vrot.lane.b32.xlu0 %v4471_v55, %s8791_s18  ;;  %3397 = vrot.lane.b32.xlu1 %v3139_v36, %s8788_s13  ;;  %v11005_v55 = vpop.permute.xlu1 %3455  ;;  %v4469_v36 = vmul.f32 %v10918_v48, %v9491_v6  ;;  %v11009_v29 = vpop.permute.xlu0 %2298 }
 0x3d6   : > { %12806 = vst [vmem:[#allocation54_spill] sm:$0xff] %v11009_v29 }
 0x3d9   : > { %4767 = vrot.lane.b32.xlu0 %v4486_v35, %s8791_s18  ;;  %3427 = vrot.lane.b32.xlu1 %v3154_v15, %s8788_s13  ;;  %v11012_v33 = vpop.permute.xlu1 %3453  ;;  %v3408_v58 = vpop.permute.xlu0 %3407 }
 0x3dd   : > { %4765 = vrot.lane.b32.xlu0 %v4485_v26, %s8791_s18  ;;  %v11014_v35 = vpop.permute.xlu1 %3421 }
 0x3e1   : > { %4733 = vrot.lane.b32.xlu0 %v4469_v36, %s8791_s18  ;;  %v11016_v15 = vpop.permute.xlu1 %3451 }
 0x3e5   : > { %v11018_v7 = vpop.permute.xlu1 %3449 }
 0x3e9   : > { %v11020_v54 = vpop.permute.xlu1 %3417 }
 0x3ed   : > { %v11022_v26 = vpop.permute.xlu1 %3447 }
 0x3f1   : > { %v11024_v8 = vpop.permute.xlu1 %3445 }
 0x3f5   : > { %v11026_v12 = vpop.permute.xlu1 %3413 }
 0x3f9   : > { %v11028_v6 = vpop.permute.xlu1 %3443 }
 0x3fd   : > { %v11030_v29 = vpop.permute.xlu1 %3441 }
 0x401   : > { %v11032_v36 = vpop.permute.xlu1 %3409 }
 0x405   : > { %v11034_v2 = vpop.permute.xlu1 %3439 }
 0x409   : > { %v11036_v59 = vpop.permute.xlu1 %3437 }
 0x40d   : > { %v11038_v3 = vpop.permute.xlu1 %3405 }
 0x411   : > { %v11040_v32 = vpop.permute.xlu1 %3435 }
 0x43d   : > { %v2207_v16 = vpop.xlane.xlu1 %2206 }
 0x43e   : > { %v2208_v43 = vsub.f32 %v10924_v31, %v2207_v16 }
 0x440   : > { %v2209_v52 = vmul.f32 1.442695, %v2208_v43  ;;  %v12820_v43 = vld [vmem:[#allocation26_spill] sm:$0xff] }
 0x441   : > { %v11059_v31 = vpop.permute.xlu1 %3433 }
 0x442   : > { %8686 = vpow2.f32 %v2209_v52 }
 0x44f   : > { %v8687_v23 = vpop.eup %8686 }
 0x450   : > { %v2211_v48 = vsel %vm2204_vm11, %v8687_v23, 0.0 }
 0x451   : > { %2212 = vadd.xlane.f32.xlu1 %v2211_v48  ;;  %v11062_v48 = vpop.permute.xlu1 %3401 }
 0x455   : > { %v11065_v16 = vpop.permute.xlu1 %3431 }
 0x462   : > { %3425 = vrot.lane.b32.xlu1 %v3153_v45, %s8788_s13  ;;  %v4368_v45 = vmul.f32 %v10769_v5, %v9567_v39 }
 0x48b   : > { %8404 = vxpose.xlu1.b32.start [1/16] (narrow) %v10773_v50, 8 }
 0x48f   : > { %8406 = vxpose.xlu1.b32.cont [2/16] (narrow) %v10785_v38, 8  ;;  %v11074_v38 = vpop.permute.xlu0 %2300 }
 0x493   : > { %8408 = vxpose.xlu1.b32.cont [3/16] (narrow) %v10806_v27, 8 }
 0x497   : > { %8410 = vxpose.xlu1.b32.cont [4/16] (narrow) %v10809_v28, 8  ;;  %v11076_v28 = vpop.permute.xlu0 %2302 }
 0x49b   : > { %8412 = vxpose.xlu1.b32.cont [5/16] (narrow) %v10813_v34, 8  ;;  %v3404_v34 = vpop.permute.xlu0 %3403 }
 0x49f   : > { %8414 = vxpose.xlu1.b32.cont [6/16] (narrow) %v10841_v20, 8  ;;  %v11084_v52 = vpop.permute.xlu0 %2304 }
 0x4a3   : > { %8416 = vxpose.xlu1.b32.cont [7/16] (narrow) %v10873_v51, 8 }
 0x4a7   : > { %8418 = vxpose.xlu1.b32.cont [8/16] (narrow) %v10879_v60, 8  ;;  %v11068_v60 = vpop.permute.xlu1 %3429 }
 0x4ab   : > { %8420 = vxpose.xlu1.b32.cont [9/16] (narrow) %v10909_v9, 8  ;;  %v4370_v9 = vmul.f32 %v10769_v5, %v9678_v49 }
 0x4af   : > { %8422 = vxpose.xlu1.b32.cont [10/16] (narrow) %v10916_v30, 8  ;;  %v11070_v30 = vpop.permute.xlu1 %3397 }
 0x4b3   : > { %8424 = vxpose.xlu1.b32.cont [11/16] (narrow) %v10938_v53, 8  ;;  %v11072_v50 = vpop.permute.xlu1 %3427  ;;  %v4386_v53 = vmul.f32 %v10769_v5, %v10255_v40 }
 0x4b7   : > { %8426 = vxpose.xlu1.b32.cont [12/16] (narrow) %v10833_v57, 8  ;;  %v4384_v57 = vmul.f32 %v10769_v5, %v10199_v37 }
 0x4b9   : > { %v8495_v51 = vpack.i.bf16 %v4368_v45, %v4384_v57  ;;  %v12833_v57 = vld [vmem:[#allocation38_spill] sm:$0xff] }
 0x4bb   : > { %8428 = vxpose.xlu1.b32.cont [13/16] (narrow) %v10958_v25, 8  ;;  %v12819_v25 = vld [vmem:[#allocation46_spill] sm:$0xff] }
 0x4bf   : > { %8430 = vxpose.xlu1.b32.cont [14/16] (narrow) %v10854_v24, 8 }
 0x4c3   : > { %8432 = vxpose.xlu1.b32.cont [15/16] (narrow) %v8395_v14, 8  ;;  %v12821_v14 = vld [vmem:[#allocation47_spill] sm:$0xff] }
 0x4c7   : > { %8434 = vxpose.xlu1.b32.end [16/16] (narrow) %v10876_v17, 8  ;;  %v11092_v17 = vpop.permute.xlu0 %2306 }
 0x4da   : > { %v2213_v27 = vpop.xlane.xlu1 %2212 }
 0x4db   : > { %8688 = vrcp.f32 %v2213_v27  ;;  %v11230_v27 = vld [vmem:[%s12643_s4] sm:$0xff] }
 0x4dc   : > { %7903 = vmatprep.subr.msk.mxu0 %vm2700_vm12, %v11230_v27 }
 0x4dd   : > { %7904 = vmatpush3.msk.msra.mxu0 %vm2700_vm12, %v11230_v27 }
 0x4e5   : > { %3585 = vrot.lane.b32.xlu1 %v9419_v18, %s8789_s15 }
 0x4e8   : > { %v8689_v20 = vpop.eup %8688 }
 0x4e9   : > { %3595 = vrot.lane.b32.xlu1 %v9567_v39, %s8789_s15  ;;  %v2215_v24 = vmul.f32 %v8689_v20, %v8687_v23  ;;  %v12818_v23 = vld [vmem:[#allocation44_spill] sm:$0xff]  ;;  %v5673_v20 = vrot.slane %v12833_v57, 4 }
 0x4eb   : > { %7853 = vmatprep.subr.msk.mxu1 %vm1731_vm3, %v2215_v24 }
 0x4ec   : > { %7854 = vmatpush3.xpose.msk.msra.mxu1 %vm1731_vm3, %v2215_v24  ;;  %v5674_v24 = vadd.f32 %v5673_v20, %v12833_v57 }
 0x4ed   : > { %8496 = vrot.lane.b32.xlu1 %v8495_v51, %s8790_s16  ;;  %7498 = vmatprep.subr.mxu1 %v11005_v55  ;;  %v12824_v55 = vld [vmem:[#allocation51_spill] sm:$0xff] }
 0x4ee   : > { %v5675_v51 = vrot.slane %v5674_v24, 2 }
 0x4ef   : > { %7856 = vmatmul.mubr.msk.f32.vlgmr.msra.gmra.mxu1 %vm1731_vm3, %v10766_v63  ;;  %v8505_v63 = vpack.i.bf16 %v4370_v9, %v4386_v53 }
 0x4f0   : > { %7858 = vmatprep.mubr.msk.f32.mxu1 %vm1731_vm3, %v10789_v62  ;;  %7499 = vmatpush3.msra.mxu1 %v10892_v41  ;;  %v3400_v62 = vpop.permute.xlu0 %3399  ;;  %v12815_v41 = vld [vmem:[#allocation25_spill] sm:$0xff]  ;;  %v5676_v53 = vadd.f32 %v5675_v51, %v5674_v24 }
 0x4f1   : > { %3599 = vrot.lane.b32.xlu1 %v9678_v49, %s8789_s15  ;;  %7500 = vmatprep.subr.mxu1 %v11012_v33  ;;  %v4372_v33 = vmul.f32 %v10769_v5, %v9753_v1 }
 0x4f2   : > { %7501 = vmatpush3.msra.mxu1 %v11014_v35 }
 0x4f3   : > { %7859 = vmatmul.mubr.msk.f32.gmra.mxu1 %vm1731_vm3, %v10797_v13  ;;  %7502 = vmatprep.subr.mxu1 %v11016_v15  ;;  %v4388_v13 = vmul.f32 %v10769_v5, %v10279_v44  ;;  %v12810_v5 = vld [vmem:[#allocation40_spill] sm:$0xff]  ;;  %v12825_v15 = vld [vmem:[#allocation53_spill] sm:$0xff] }
 0x4f4   : > { %7861 = vmatprep.mubr.msk.f32.mxu1 %vm1731_vm3, %v10821_v42  ;;  %7503 = vmatpush3.msra.mxu1 %v10920_v56 }
 0x4f5   : > { %8506 = vrot.lane.b32.xlu1 %v8505_v63, %s8790_s16  ;;  %7504 = vmatprep.subr.mxu1 %v11018_v7  ;;  %v11130_v7 = vpop.permute.xlu0 %2308  ;;  %v8515_v56 = vpack.i.bf16 %v4372_v33, %v4388_v13  ;;  %v12836_v63 = vld [vmem:[#allocation34_spill] sm:$0xff]  ;;  %v12837_v13 = vld [vmem:[#allocation9_spill] sm:$0xff] }
 0x4f6   : > { %7505 = vmatpush3.msra.mxu1 %v11020_v54  ;;  %v3426_v54 = vpop.permute.xlu1 %3425 }
 0x4f7   : > { %7862 = vmatmul.mubr.msk.f32.gmra.mxu1 %vm1731_vm3, %v10830_v0  ;;  %7506 = vmatprep.subr.mxu1 %v11022_v26  ;;  %v12811_v0 = vld [vmem:[#allocation50_spill] sm:$0xff] }
 0x4f8   : > { %7864 = vmatprep.mubr.msk.f32.mxu1 %vm1731_vm3, %v10850_v21  ;;  %7507 = vmatpush3.msra.mxu1 %v10950_v11  ;;  %v12812_v21 = vld [vmem:[#allocation24_spill] sm:$0xff]  ;;  %v12817_v11 = vld [vmem:[#allocation43_spill] sm:$0xff]  ;;  %v12826_v26 = vld [vmem:[#allocation54_spill] sm:$0xff] }
 0x4f9   : > { %3603 = vrot.lane.b32.xlu1 %v9753_v1, %s8789_s15  ;;  %7508 = vmatprep.subr.mxu1 %v11024_v8 }
 0x4fa   : > { %7509 = vmatpush3.msra.mxu1 %v11026_v12  ;;  %v12816_v12 = vld [vmem:[#allocation42_spill] sm:$0xff] }
 0x4fb   : > { %7865 = vmatmul.mubr.msk.f32.gmra.mxu1 %vm1731_vm3, %v10859_v47  ;;  %7510 = vmatprep.subr.mxu1 %v11028_v6  ;;  %v2311_v6 = vpop.permute.xlu0 %2310  ;;  %v12813_v47 = vld [vmem:[#allocation41_spill] sm:$0xff] }
 0x4fc   : > { %7867 = vmatprep.mubr.msk.f32.mxu1 %vm1731_vm3, %v10889_v19  ;;  %7511 = vmatpush3.msra.mxu1 %v10988_v4  ;;  %v12822_v4 = vld [vmem:[#allocation49_spill] sm:$0xff] }
 0x4fd   : > { %8516 = vrot.lane.b32.xlu1 %v8515_v56, %s8790_s16  ;;  %7512 = vmatprep.subr.mxu1 %v11030_v29  ;;  %v12807_v29 = vld [vmem:[#allocation22_spill] sm:$0xff] }
 0x4fe   : > { %7513 = vmatpush3.msra.mxu1 %v11032_v36  ;;  %v12827_v36 = vld [vmem:[#allocation28_spill] sm:$0xff] }
 0x4ff   : > { %7868 = vmatmul.mubr.msk.f32.gmra.mxu1 %vm1731_vm3, %v10900_v61  ;;  %7514 = vmatprep.subr.mxu1 %v11034_v2  ;;  %v12808_v61 = vld [vmem:[#allocation45_spill] sm:$0xff]  ;;  %v12809_v2 = vld [vmem:[#allocation48_spill] sm:$0xff] }
 0x500   : > { %7870 = vmatprep.mubr.msk.f32.mxu1 %vm1731_vm3, %v10930_v46  ;;  %7515 = vmatpush3.msra.mxu1 %v3408_v58  ;;  %v4476_v8 = vmul.f32 %v12808_v61, %v9753_v1  ;;  %v4474_v46 = vmul.f32 %v12808_v61, %v9678_v49  ;;  %v4472_v35 = vmul.f32 %v12808_v61, %v9567_v39  ;;  %v12830_v58 = vld [vmem:[#allocation30_spill] sm:$0xff] }
 0x501   : > { %3607 = vrot.lane.b32.xlu1 %v12787_v10, %s8789_s15  ;;  %7516 = vmatprep.subr.mxu1 %v11036_v59  ;;  %v3396_v59 = vpop.permute.xlu0 %3395 }
 0x502   : > { %7517 = vmatpush3.msra.mxu1 %v11038_v3  ;;  %v12823_v3 = vld [vmem:[#allocation27_spill] sm:$0xff] }
 0x503   : > { %7871 = vmatmul.mubr.msk.f32.gmra.mxu1 %vm1731_vm3, %v12807_v29  ;;  %7518 = vmatprep.subr.mxu1 %v11040_v32  ;;  %v12814_v32 = vld [vmem:[#allocation52_spill] sm:$0xff] }
 0x504   : > { %7873 = vmatprep.mubr.msk.f32.mxu1 %vm1731_vm3, %v12809_v2  ;;  %7519 = vmatpush3.msra.mxu1 %v3404_v34  ;;  %v12832_v34 = vld [vmem:[#allocation13_spill] sm:$0xff] }
 0x505   : > { %4747 = vrot.lane.b32.xlu1 %v4476_v8, %s8791_s18  ;;  %7520 = vmatprep.subr.mxu1 %v11059_v31  ;;  %v3394_v19 = vpop.permute.xlu0 %3393  ;;  %v12828_v31 = vld [vmem:[#allocation29_spill] sm:$0xff]  ;;  %v4468_v45 = vmul.f32 %v12808_v61, %v12832_v34  ;;  %v12840_v8 = vld [vmem:[#allocation6_spill] sm:$0xff] }
 0x506   : > { %7521 = vmatpush3.msra.mxu1 %v11062_v48  ;;  %v12829_v48 = vld [vmem:[#allocation15_spill] sm:$0xff]  ;;  %v4461_v2 = vmul.f32 %v12808_v61, %v12840_v8 }
 0x507   : > { %7874 = vmatmul.mubr.msk.f32.gmra.mxu1 %vm1731_vm3, %v12810_v5  ;;  %7522 = vmatprep.subr.mxu1 %v11065_v16  ;;  %v8435_v42 = vpop.trf.xlu1  ;;  %v4470_v16 = vmul.f32 %v12808_v61, %v12829_v48 }
 0x508   : > { %7876 = vmatprep.mubr.msk.f32.mxu1 %vm1731_vm3, %v12811_v0  ;;  %7523 = vmatpush3.msra.mxu1 %v3400_v62  ;;  %v5677_v62 = vrot.slane %v5676_v53, 1 }
 0x509   : > { %3609 = vrot.lane.b32.xlu1 %v12812_v21, %s8789_s15  ;;  %7524 = vmatprep.subr.mxu1 %v11068_v60  ;;  %v8436_v60 = vunpack.i.l.bf16 %v8435_v42 }
 0x50a   : > { %7525 = vmatpush3.msra.mxu1 %v11070_v30  ;;  %v8439_v30 = vunpack.i.h.bf16 %v8435_v42  ;;  %v5678_v33 = vadd.f32 %v5677_v62, %v5676_v53 }
 0x50b   : > { %7877 = vmatmul.mubr.msk.f32.gmra.mxu1 %vm1731_vm3, %v12813_v47  ;;  %7526 = vmatprep.subr.mxu1 %v11072_v50  ;;  %v3574_v50 = vpop.permute.xlu0 %3573 }
 0x50c   : > { %7879 = vmatprep.mubr.msk.f32.mxu1 %vm1731_vm3, %v12814_v32  ;;  %7527 = vmatpush3.msra.mxu1 %v3396_v59  ;;  %v5679_v56 = vmax.f32 %v5678_v33, 1e-24  ;;  %v12845_v33 = vld [vmem:[#allocation39_spill] sm:$0xff] }
 0x50d   : > { %3611 = vrot.lane.b32.xlu1 %v12815_v41, %s8789_s15  ;;  %7528 = vmatprep.subr.mxu1 %v3426_v54  ;;  %v12839_v54 = vld [vmem:[#allocation7_spill] sm:$0xff] }
 0x50e   : > { %7529 = vmatpush3.msra.mxu1 %v3394_v19  ;;  %8690 = vrsqrt.f32 %v5679_v56  ;;  %v4462_v29 = vmul.f32 %v12808_v61, %v12839_v54  ;;  %v12846_v56 = vld [vmem:[#allocation14_spill] sm:$0xff] }
 0x50f   : > { %7880 = vmatmul.mubr.msk.f32.gmra.mxu1 %vm1731_vm3, %v12816_v12  ;;  %v12841_v12 = vld [vmem:[#allocation8_spill] sm:$0xff] }
 0x510   : > { %7882 = vmatprep.mubr.msk.f32.mxu1 %vm1731_vm3, %v12817_v11 }
 0x511   : > { %4743 = vrot.lane.b32.xlu1 %v4474_v46, %s8791_s18 }
 0x513   : > { %7883 = vmatmul.mubr.msk.f32.gmra.mxu1 %vm1731_vm3, %v12818_v23 }
 0x514   : > { %7885 = vmatprep.mubr.msk.f32.mxu1 %vm1731_vm3, %v12819_v25 }
 0x515   : > { %3613 = vrot.lane.b32.xlu1 %v12820_v43, %s8789_s15 }
 0x517   : > { %7886 = vmatmul.mubr.msk.f32.gmra.mxu1 %vm1731_vm3, %v12821_v14 }
 0x518   : > { %7888 = vmatprep.mubr.msk.f32.mxu1 %vm1731_vm3, %v12822_v4 }
 0x519   : > { %3615 = vrot.lane.b32.xlu1 %v12823_v3, %s8789_s15 }
 0x51b   : > { %7889 = vmatmul.mubr.msk.f32.gmra.mxu1 %vm1731_vm3, %v12824_v55  ;;  %v11269_v59 = vpop.eup %8690 }
 0x51c   : > { %7891 = vmatprep.mubr.msk.f32.mxu1 %vm1731_vm3, %v12825_v15  ;;  %v5681_v5 = vmul.f32 %v11269_v59, %v12840_v8  ;;  %v5697_v42 = vmul.f32 %v11269_v59, %v12789_v22  ;;  %v5682_v47 = vmul.f32 %v11269_v59, %v12839_v54  ;;  %v5698_v32 = vmul.f32 %v11269_v59, %v12787_v10  ;;  %v12842_v15 = vld [vmem:[#allocation11_spill] sm:$0xff] }
 0x51d   : > { %4739 = vrot.lane.b32.xlu1 %v4472_v35, %s8791_s18  ;;  %v5683_v46 = vmul.f32 %v11269_v59, %v12841_v12  ;;  %v5699_v11 = vmul.f32 %v11269_v59, %v12812_v21  ;;  %v5684_v25 = vmul.f32 %v11269_v59, %v12837_v13  ;;  %v5700_v14 = vmul.f32 %v11269_v59, %v12815_v41 }
 0x51e   : > { %v8557_v0 = vpack.i.bf16 %v5681_v5, %v5697_v42  ;;  %v8562_v19 = vpack.i.bf16 %v5682_v47, %v5698_v32  ;;  %v5703_v57 = vmul.f32 %v11269_v59, %v12827_v36  ;;  %v5688_v51 = vmul.f32 %v11269_v59, %v12832_v34 }
 0x51f   : > { %7892 = vmatmul.mubr.msk.f32.gmra.mxu1 %vm1731_vm3, %v12826_v26  ;;  %v8567_v23 = vpack.i.bf16 %v5683_v46, %v5699_v11  ;;  %v8572_v55 = vpack.i.bf16 %v5684_v25, %v5700_v14  ;;  %v5689_v5 = vmul.f32 %v11269_v59, %v12846_v56  ;;  %v5705_v42 = vmul.f32 %v11269_v59, %v12830_v58  ;;  %v11350_v46 = vpop.permute.xlu0 %3575 }
 0x520   : > { %7894 = vmatprep.mubr.msk.f32.mxu1 %vm1731_vm3, %v11074_v38  ;;  %v12831_v38 = vld [vmem:[#allocation31_spill] sm:$0xff]  ;;  %v5690_v32 = vmul.f32 %v11269_v59, %v12829_v48 }
 0x521   : > { %3617 = vrot.lane.b32.xlu1 %v12827_v36, %s8789_s15  ;;  %v8597_v47 = vpack.i.bf16 %v5689_v5, %v5705_v42  ;;  %v12850_v5 = vld [vmem:[#allocation18_spill] sm:$0xff] }
 0x522   : > { %v5693_v42 = vmul.f32 %v11269_v59, %v12850_v5 }
 0x523   : > { %7895 = vmatmul.mubr.msk.f32.gmra.mxu1 %vm1731_vm3, %v11076_v28  ;;  %v3929_v28 = vrot.slane %v11230_v27, 4  ;;  %v11356_v14 = vpop.permute.xlu0 %8441 }
 0x524   : > { %7897 = vmatprep.mubr.msk.f32.mxu1 %vm1731_vm3, %v11084_v52  ;;  %v12834_v52 = vld [vmem:[#allocation32_spill] sm:$0xff] }
 0x525   : > { %3619 = vrot.lane.b32.xlu1 %v12828_v31, %s8789_s15  ;;  %8003 = vmatprep.subr.msk.mxu0 %vm2700_vm12, %v3929_v28 }
 0x527   : > { %7898 = vmatmul.mubr.msk.f32.gmra.mxu1 %vm1731_vm3, %v11092_v17  ;;  %v12835_v17 = vld [vmem:[#allocation10_spill] sm:$0xff] }
 0x528   : > { %7900 = vmatprep.mubr.msk.f32.mxu1 %vm1731_vm3, %v11130_v7  ;;  %v4466_v9 = vmul.f32 %v12808_v61, %v12835_v17  ;;  %v4464_v7 = vmul.f32 %v12808_v61, %v12837_v13  ;;  %v5686_v26 = vmul.f32 %v11269_v59, %v12835_v17 }
 0x529   : > { %4735 = vrot.lane.b32.xlu1 %v4470_v16, %s8791_s18  ;;  %v5702_v16 = vmul.f32 %v11269_v59, %v12823_v3 }
 0x52b   : > { %7901 = vmatmul.mubr.msk.f32.gmra.mxu1 %vm1731_vm3, %v2311_v6  ;;  %v12838_v6 = vld [vmem:[#allocation36_spill] sm:$0xff] }
 0x52c   : > { %3553 = vmatprep.mubr.f32.mxu1 %v8436_v60 }
 0x52d   : > { %3621 = vrot.lane.b32.xlu1 %v12830_v58, %s8789_s15 }
 0x52f   : > { %3554 = vmatmul.mubr.f32.vlgmr.msra.gmra.mxu1 %v8439_v30  ;;  %v8582_v30 = vpack.i.bf16 %v5686_v26, %v5702_v16  ;;  %v12848_v16 = vld [vmem:[#allocation16_spill] sm:$0xff] }
 0x530   : > { %7955 = vmatprep.mubr.msk.f32.mxu1 %vm1731_vm3, %v3574_v50 }
 0x531   : > { %3623 = vrot.lane.b32.xlu1 %v12831_v38, %s8789_s15 }
 0x535   : > { %4731 = vrot.lane.b32.xlu1 %v4468_v45, %s8791_s18  ;;  %v5687_v45 = vmul.f32 %v11269_v59, %v9419_v18 }
 0x537   : > { %v8587_v24 = vpack.i.bf16 %v5687_v45, %v5703_v57  ;;  %v5707_v45 = vmul.f32 %v11269_v59, %v12834_v52 }
 0x539   : > { %3625 = vrot.lane.b32.xlu1 %v12834_v52, %s8789_s15 }
 0x53d   : > { %3627 = vrot.lane.b32.xlu1 %v10199_v37, %s8789_s15 }
 0x541   : > { %4727 = vrot.lane.b32.xlu1 %v4466_v9, %s8791_s18  ;;  %v5704_v9 = vmul.f32 %v11269_v59, %v12828_v31 }
 0x543   : > { %v8592_v53 = vpack.i.bf16 %v5688_v51, %v5704_v9  ;;  %v11366_v9 = vpop.permute.xlu0 %8446 }
 0x545   : > { %3629 = vrot.lane.b32.xlu1 %v12836_v63, %s8789_s15 }
 0x549   : > { %3631 = vrot.lane.b32.xlu1 %v10255_v40, %s8789_s15 }
 0x54d   : > { %4723 = vrot.lane.b32.xlu1 %v4464_v7, %s8791_s18  ;;  %v5777_v7 = vrot.slane %v12845_v33, 4 }
 0x551   : > { %3633 = vrot.lane.b32.xlu1 %v12838_v6, %s8789_s15 }
 0x555   : > { %3635 = vrot.lane.b32.xlu1 %v10279_v44, %s8789_s15 }
 0x557   : > { %v11298_v4 = vpop.permute.xlu1 %3585 }
 0x559   : > { %4719 = vrot.lane.b32.xlu1 %v4462_v29, %s8791_s18  ;;  %v5778_v29 = vadd.f32 %v5777_v7, %v12845_v33 }
 0x55b   : > { %v11301_v35 = vpop.permute.xlu1 %3595 }
 0x55d   : > { %4717 = vrot.lane.b32.xlu1 %v4461_v2, %s8791_s18 }
 0x55f   : > { %v11311_v60 = vpop.permute.xlu1 %8496 }
 0x561   : > { %4897 = vrot.lane.b32.xlu1 %v12840_v8, %s8792_s23 }
 0x563   : > { %v11314_v50 = vpop.permute.xlu1 %3599 }
 0x564   : > { %12843 = vst [vmem:[#allocation22_spill] sm:$0xff] %v11314_v50 }
 0x565   : > { %4899 = vrot.lane.b32.xlu1 %v12839_v54, %s8792_s23 }
 0x567   : > { %v11324_v20 = vpop.permute.xlu1 %8506 }
 0x569   : > { %8558 = vrot.lane.b32.xlu1 %v8557_v0, %s8793_s24  ;;  %v5779_v0 = vrot.slane %v5778_v29, 2 }
 0x56b   : > { %v11331_v62 = vpop.permute.xlu1 %3603 }
 0x56c   : > { %12844 = vst [vmem:[#allocation45_spill] sm:$0xff] %v11331_v62 }
 0x56d   : > { %8563 = vrot.lane.b32.xlu1 %v8562_v19, %s8793_s24  ;;  %v5706_v19 = vmul.f32 %v11269_v59, %v12831_v38 }
 0x56f   : > { %v11338_v2 = vpop.permute.xlu1 %8516  ;;  %v8602_v25 = vpack.i.bf16 %v5690_v32, %v5706_v19  ;;  %v11382_v32 = vpop.permute.xlu0 %3577 }
 0x571   : > { %4901 = vrot.lane.b32.xlu1 %v12841_v12, %s8792_s23 }
 0x573   : > { %v11352_v11 = vpop.permute.xlu1 %3607 }
 0x574   : > { %12847 = vst [vmem:[#allocation48_spill] sm:$0xff] %v11352_v11 }
 0x575   : > { %4903 = vrot.lane.b32.xlu1 %v12837_v13, %s8792_s23 }
 0x577   : > { %v11358_v26 = vpop.permute.xlu1 %4747 }
 0x579   : > { %8568 = vrot.lane.b32.xlu1 %v8567_v23, %s8793_s24  ;;  %v5780_v23 = vadd.f32 %v5779_v0, %v5778_v29  ;;  %v5709_v0 = vmul.f32 %v11269_v59, %v12836_v63 }
 0x57d   : > { %8573 = vrot.lane.b32.xlu1 %v8572_v55, %s8793_s24  ;;  %v5781_v55 = vrot.slane %v5780_v23, 1 }
 0x57f   : > { %v5782_v57 = vadd.f32 %v5781_v55, %v5780_v23 }
 0x581   : > { %4905 = vrot.lane.b32.xlu1 %v12842_v15, %s8792_s23  ;;  %v5783_v7 = vmax.f32 %v5782_v57, 1e-24  ;;  %v11395_v57 = vpop.permute.xlu0 %3579 }
 0x583   : > { %8692 = vrsqrt.f32 %v5783_v7 }
 0x585   : > { %4907 = vrot.lane.b32.xlu1 %v12835_v17, %s8792_s23 }
 0x589   : > { %8583 = vrot.lane.b32.xlu1 %v8582_v30, %s8793_s24  ;;  %v5691_v30 = vmul.f32 %v11269_v59, %v12848_v16 }
 0x58b   : > { %v8607_v51 = vpack.i.bf16 %v5691_v30, %v5707_v45  ;;  %v5711_v45 = vmul.f32 %v11269_v59, %v12838_v6 }
 0x58d   : > { %4909 = vrot.lane.b32.xlu1 %v9419_v18, %s8792_s23 }
 0x591   : > { %4911 = vrot.lane.b32.xlu1 %v12832_v34, %s8792_s23 }
 0x595   : > { %8588 = vrot.lane.b32.xlu1 %v8587_v24, %s8793_s24 }
 0x599   : > { %8593 = vrot.lane.b32.xlu1 %v8592_v53, %s8793_s24  ;;  %v11368_v53 = vpop.permute.xlu1 %3609 }
 0x59a   : > { %12849 = vst [vmem:[#allocation40_spill] sm:$0xff] %v11368_v53 }
 0x59d   : > { %4913 = vrot.lane.b32.xlu1 %v12846_v56, %s8792_s23  ;;  %v11385_v19 = vpop.permute.xlu1 %3611 }
 0x59e   : > { %12851 = vst [vmem:[#allocation50_spill] sm:$0xff] %v11385_v19 }
 0x5a1   : > { %4915 = vrot.lane.b32.xlu1 %v12829_v48, %s8792_s23 }
 0x5a5   : > { %8598 = vrot.lane.b32.xlu1 %v8597_v47, %s8793_s24 }
 0x5a9   : > { %8603 = vrot.lane.b32.xlu1 %v8602_v25, %s8793_s24  ;;  %v8617_v25 = vpack.i.bf16 %v5693_v42, %v5709_v0  ;;  %v11404_v42 = vpop.permute.xlu0 %8451 }
 0x5ad   : > { %4917 = vrot.lane.b32.xlu1 %v12848_v16, %s8792_s23 }
 0x5af   : > { %v7857_v24 = vpop.f32.mrf.mxu1 }
 0x5b1   : > { %v2445_v33 = vpop.f32.mrf.mxu1  ;;  %8608 = vrot.lane.b32.xlu1 %v8607_v51, %s8793_s24 }
 0x5b2   : > { %7905 = vmatprep.mubr.msk.f32.mxu0 %vm1731_vm3, %v2445_v33 }
 0x5b3   : > { %v7860_v29 = vpop.f32.mrf.mxu1  ;;  %7906 = vmatmul.mubr.msk.f32.vlgmr.msra.gmra.mxu0 %vm1731_vm3, %v7857_v24  ;;  %v11397_v24 = vpop.permute.xlu1 %4743 }
 0x5b4   : > { %8004 = vmatpush3.msk.msra.mxu0 %vm2700_vm12, %v3929_v28  ;;  %v12852_v28 = vld [vmem:[#allocation20_spill] sm:$0xff] }
 0x5b5   : > { %v2455_v47 = vpop.f32.mrf.mxu1  ;;  %4921 = vrot.lane.b32.xlu1 %v12850_v5, %s8792_s23  ;;  %v5695_v30 = vmul.f32 %v11269_v59, %v12852_v28 }
 0x5b6   : > { %7908 = vmatprep.mubr.msk.f32.mxu0 %vm1731_vm3, %v2455_v47 }
 0x5b7   : > { %v7863_v23 = vpop.f32.mrf.mxu1  ;;  %7909 = vmatmul.mubr.msk.f32.gmra.mxu0 %vm1731_vm3, %v7860_v29  ;;  %v8627_v7 = vpack.i.bf16 %v5695_v30, %v5711_v45  ;;  %v11407_v0 = vpop.permute.xlu1 %3613 }
 0x5b8   : > { %12853 = vst [vmem:[#allocation41_spill] sm:$0xff] %v11407_v0  ;;  %v11418_v30 = vpop.permute.xlu0 %8456 }
 0x5b9   : > { %v2465_v55 = vpop.f32.mrf.mxu1  ;;  %8618 = vrot.lane.b32.xlu1 %v8617_v25, %s8793_s24 }
 0x5ba   : > { %7911 = vmatprep.mubr.msk.f32.mxu0 %vm1731_vm3, %v2465_v55 }
 0x5bb   : > { %v7866_v27 = vpop.f32.mrf.mxu1  ;;  %7912 = vmatmul.mubr.msk.f32.gmra.mxu0 %vm1731_vm3, %v7863_v23  ;;  %v11410_v23 = vpop.eup %8692 }
 0x5bc   : > { %12854 = vst [vmem:[#allocation52_spill] sm:$0xff] %v11410_v23  ;;  %v11420_v45 = vpop.permute.xlu1 %3615 }
 0x5bd   : > { %v2475_v51 = vpop.f32.mrf.mxu1  ;;  %4925 = vrot.lane.b32.xlu1 %v12852_v28, %s8792_s23  ;;  %12855 = vst [vmem:[#allocation42_spill] sm:$0xff] %v11420_v45 }
 0x5be   : > { %7914 = vmatprep.mubr.msk.f32.mxu0 %vm1731_vm3, %v2475_v51 }
 0x5bf   : > { %v7869_v33 = vpop.f32.mrf.mxu1  ;;  %7915 = vmatmul.mubr.msk.f32.gmra.mxu0 %vm1731_vm3, %v7866_v27  ;;  %v5816_v27 = vmul.f32 %v11410_v23, %v10279_v44 }
 0x5c1   : > { %v2485_v29 = vpop.f32.mrf.mxu1  ;;  %8628 = vrot.lane.b32.xlu1 %v8627_v7, %s8793_s24  ;;  %v5815_v7 = vmul.f32 %v11410_v23, %v12838_v6 }
 0x5c2   : > { %7917 = vmatprep.mubr.msk.f32.mxu0 %vm1731_vm3, %v2485_v29 }
 0x5c3   : > { %v7872_v47 = vpop.f32.mrf.mxu1  ;;  %7918 = vmatmul.mubr.msk.f32.gmra.mxu0 %vm1731_vm3, %v7869_v33 }
 0x5c5   : > { %v2495_v25 = vpop.f32.mrf.mxu1  ;;  %4929 = vrot.lane.b32.xlu1 %v12789_v22, %s8792_s23 }
 0x5c6   : > { %7920 = vmatprep.mubr.msk.f32.mxu0 %vm1731_vm3, %v2495_v25  ;;  %v11431_v25 = vpop.permute.xlu1 %4739 }
 0x5c7   : > { %v7875_v55 = vpop.f32.mrf.mxu1  ;;  %7921 = vmatmul.mubr.msk.f32.gmra.mxu0 %vm1731_vm3, %v7872_v47  ;;  %v11428_v47 = vpop.permute.xlu0 %3581 }
 0x5c9   : > { %v2505_v51 = vpop.f32.mrf.mxu1  ;;  %6103 = vrot.lane.b32.xlu1 %v5816_v27, %s8794_s25  ;;  %v5799_v27 = vmul.f32 %v11410_v23, %v12852_v28 }
 0x5ca   : > { %7923 = vmatprep.mubr.msk.f32.mxu0 %vm1731_vm3, %v2505_v51  ;;  %v11443_v54 = vpop.permute.xlu1 %3617 }
 0x5cb   : > { %v7878_v33 = vpop.f32.mrf.mxu1  ;;  %7924 = vmatmul.mubr.msk.f32.gmra.mxu0 %vm1731_vm3, %v7875_v55  ;;  %12856 = vst [vmem:[#allocation43_spill] sm:$0xff] %v11443_v54 }
 0x5cd   : > { %v2515_v29 = vpop.f32.mrf.mxu1  ;;  %6101 = vrot.lane.b32.xlu1 %v5815_v7, %s8794_s25  ;;  %v5814_v7 = vmul.f32 %v11410_v23, %v10255_v40 }
 0x5ce   : > { %7926 = vmatprep.mubr.msk.f32.mxu0 %vm1731_vm3, %v2515_v29  ;;  %v11441_v29 = vpop.permute.xlu0 %3583  ;;  %v11454_v28 = vpop.permute.xlu1 %3619 }
 0x5cf   : > { %v7881_v8 = vpop.f32.mrf.mxu1  ;;  %7927 = vmatmul.mubr.msk.f32.gmra.mxu0 %vm1731_vm3, %v7878_v33  ;;  %12857 = vst [vmem:[#allocation44_spill] sm:$0xff] %v11454_v28 }
 0x5d1   : > { %v2525_v51 = vpop.f32.mrf.mxu1  ;;  %6069 = vrot.lane.b32.xlu1 %v5799_v27, %s8794_s25  ;;  %v5813_v27 = vmul.f32 %v11410_v23, %v12836_v63 }
 0x5d2   : > { %7929 = vmatprep.mubr.msk.f32.mxu0 %vm1731_vm3, %v2525_v51  ;;  %v11466_v63 = vpop.permute.xlu1 %4735 }
 0x5d3   : > { %v7884_v55 = vpop.f32.mrf.mxu1  ;;  %7930 = vmatmul.mubr.msk.f32.gmra.mxu0 %vm1731_vm3, %v7881_v8  ;;  %v11451_v8 = vpop.permute.xlu0 %8461 }
 0x5d5   : > { %v2535_v6 = vpop.f32.mrf.mxu1  ;;  %6099 = vrot.lane.b32.xlu1 %v5814_v7, %s8794_s25 }
 0x5d6   : > { %7932 = vmatprep.mubr.msk.f32.mxu0 %vm1731_vm3, %v2535_v6  ;;  %v5797_v6 = vmul.f32 %v11410_v23, %v12850_v5  ;;  %v11477_v5 = vpop.permute.xlu1 %3621 }
 0x5d7   : > { %v7887_v33 = vpop.f32.mrf.mxu1  ;;  %7933 = vmatmul.mubr.msk.f32.gmra.mxu0 %vm1731_vm3, %v7884_v55  ;;  %12858 = vst [vmem:[#allocation46_spill] sm:$0xff] %v11477_v5 }
 0x5d9   : > { %v2545_v51 = vpop.f32.mrf.mxu1  ;;  %6097 = vrot.lane.b32.xlu1 %v5813_v27, %s8794_s25  ;;  %v5812_v27 = vmul.f32 %v11410_v23, %v10199_v37 }
 0x5da   : > { %7935 = vmatprep.mubr.msk.f32.mxu0 %vm1731_vm3, %v2545_v51  ;;  %v11464_v51 = vpop.permute.xlu0 %8466 }
 0x5db   : > { %v7890_v13 = vpop.f32.mrf.mxu1  ;;  %7936 = vmatmul.mubr.msk.f32.gmra.mxu0 %vm1731_vm3, %v7887_v33 }
 0x5dd   : > { %v2555_v7 = vpop.f32.mrf.mxu1  ;;  %6065 = vrot.lane.b32.xlu1 %v5797_v6, %s8794_s25  ;;  %v5811_v6 = vmul.f32 %v11410_v23, %v12834_v52  ;;  %v11489_v52 = vpop.permute.xlu1 %3623 }
 0x5de   : > { %7938 = vmatprep.mubr.msk.f32.mxu0 %vm1731_vm3, %v2555_v7  ;;  %12859 = vst [vmem:[#allocation47_spill] sm:$0xff] %v11489_v52 }
 0x5df   : > { %v7893_v55 = vpop.f32.mrf.mxu1  ;;  %7939 = vmatmul.mubr.msk.f32.gmra.mxu0 %vm1731_vm3, %v7890_v13  ;;  %v11474_v13 = vpop.permute.xlu0 %3587 }
 0x5e1   : > { %v2565_v17 = vpop.f32.mrf.mxu1  ;;  %6095 = vrot.lane.b32.xlu1 %v5812_v27, %s8794_s25  ;;  %v11499_v5 = vpop.permute.xlu1 %4731 }
 0x5e2   : > { %7941 = vmatprep.mubr.msk.f32.mxu0 %vm1731_vm3, %v2565_v17  ;;  %v5795_v17 = vmul.f32 %v11410_v23, %v12848_v16  ;;  %v3560_v16 = vstv %s7158_s26 }
 0x5e3   : > { %v7896_v33 = vpop.f32.mrf.mxu1  ;;  %7942 = vmatmul.mubr.msk.f32.gmra.mxu0 %vm1731_vm3, %v7893_v55 }
 0x5e5   : > { %v2575_v7 = vpop.f32.mrf.mxu1  ;;  %6093 = vrot.lane.b32.xlu1 %v5811_v6, %s8794_s25  ;;  %v5810_v6 = vmul.f32 %v11410_v23, %v12831_v38 }
 0x5e6   : > { %7944 = vmatprep.mubr.msk.f32.mxu0 %vm1731_vm3, %v2575_v7  ;;  %v11487_v7 = vpop.permute.xlu0 %8471 }
 0x5e7   : > { %v7899_v34 = vpop.f32.mrf.mxu1  ;;  %7945 = vmatmul.mubr.msk.f32.gmra.mxu0 %vm1731_vm3, %v7896_v33 }
 0x5e9   : > { %v2585_v27 = vpop.f32.mrf.mxu1  ;;  %6061 = vrot.lane.b32.xlu1 %v5795_v17, %s8794_s25 }
 0x5ea   : > { %7947 = vmatprep.mubr.msk.f32.mxu0 %vm1731_vm3, %v2585_v27  ;;  %v5809_v27 = vmul.f32 %v11410_v23, %v12830_v58  ;;  %v11497_v38 = vpop.permute.xlu0 %8476  ;;  %v11509_v58 = vpop.permute.xlu1 %3625 }
 0x5eb   : > { %v7902_v55 = vpop.f32.mrf.mxu1  ;;  %7948 = vmatmul.mubr.msk.f32.gmra.mxu0 %vm1731_vm3, %v7899_v34  ;;  %12860 = vst [vmem:[#allocation49_spill] sm:$0xff] %v11509_v58 }
 0x5ed   : > { %v2595_v33 = vpop.f32.mrf.mxu1  ;;  %6091 = vrot.lane.b32.xlu1 %v5810_v6, %s8794_s25  ;;  %v5793_v6 = vmul.f32 %v11410_v23, %v12846_v56 }
 0x5ee   : > { %7950 = vmatprep.mubr.msk.f32.mxu0 %vm1731_vm3, %v2595_v33  ;;  %v5808_v33 = vmul.f32 %v11410_v23, %v12828_v31 }
 0x5ef   : > { %7951 = vmatmul.mubr.msk.f32.gmra.mxu0 %vm1731_vm3, %v7902_v55  ;;  %v7530_v17 = vpop.f32.mrf.mxu1 }
 0x5f1   : > { %6089 = vrot.lane.b32.xlu1 %v5809_v27, %s8794_s25  ;;  %v7531_v34 = vpop.f32.mrf.mxu1  ;;  %v11507_v27 = vpop.permute.xlu0 %3589 }
 0x5f2   : > { %v7532_v48 = vadd.f32 %v7531_v34, %v7530_v17  ;;  %v5807_v17 = vmul.f32 %v11410_v23, %v12827_v36  ;;  %v5791_v34 = vmul.f32 %v11410_v23, %v9419_v18 }
 0x5f4   : > { %v3561_v52 = vmul.f32 %v7532_v48, %v3560_v16  ;;  %v11517_v16 = vpop.permute.xlu1 %3627 }
 0x5f5   : > { %6057 = vrot.lane.b32.xlu1 %v5793_v6, %s8794_s25  ;;  %v11515_v48 = vpop.permute.xlu0 %3591  ;;  %12861 = vst [vmem:[#allocation51_spill] sm:$0xff] %v11517_v16  ;;  %v5806_v6 = vmul.f32 %v11410_v23, %v12823_v3  ;;  %v4483_v16 = vmul.f32 %v12808_v61, %v12827_v36 }
 0x5f6   : > { %v3562_v55 = vsel %vm2204_vm11, %v3561_v52, -inf }
 0x5f7   : > { %3563 = vmax.xlane.f32.xlu0 %v3562_v55 }
 0x5f8   : > { %v11524_v56 = vpop.permute.xlu1 %4727 }
 0x5f9   : > { %6087 = vrot.lane.b32.xlu1 %v5808_v33, %s8794_s25  ;;  %v8482_v55 = vpop.permute.xlu0 %8481 }
 0x5fd   : > { %6085 = vrot.lane.b32.xlu1 %v5807_v17, %s8794_s25  ;;  %v8487_v33 = vpop.permute.xlu0 %8486  ;;  %v4484_v17 = vmul.f32 %v12808_v61, %v12828_v31 }
 0x601   : > { %6053 = vrot.lane.b32.xlu1 %v5791_v34, %s8794_s25  ;;  %v11532_v58 = vpop.permute.xlu0 %3593  ;;  %v4467_v34 = vmul.f32 %v12808_v61, %v9419_v18 }
 0x605   : > { %6083 = vrot.lane.b32.xlu1 %v5806_v6, %s8794_s25  ;;  %v8492_v28 = vpop.permute.xlu0 %8491  ;;  %v4482_v6 = vmul.f32 %v12808_v61, %v12823_v3 }
 0x609   : > { %v11543_v31 = vpop.permute.xlu0 %3597 }
 0x60d   : > { %4763 = vrot.lane.b32.xlu0 %v4484_v17, %s8791_s18  ;;  %v4481_v17 = vmul.f32 %v12808_v61, %v12820_v43  ;;  %v8502_v18 = vpop.permute.xlu0 %8501 }
 0x611   : > { %4761 = vrot.lane.b32.xlu0 %v4483_v16, %s8791_s18  ;;  %v4465_v16 = vmul.f32 %v12808_v61, %v12842_v15  ;;  %v11554_v36 = vpop.permute.xlu0 %3601 }
 0x612   : > { %12862 = vst [vmem:[#allocation53_spill] sm:$0xff] %v11554_v36 }
 0x615   : > { %4729 = vrot.lane.b32.xlu0 %v4467_v34, %s8791_s18  ;;  %v4480_v34 = vmul.f32 %v12808_v61, %v12815_v41  ;;  %v8512_v3 = vpop.permute.xlu0 %8511 }
 0x619   : > { %4759 = vrot.lane.b32.xlu0 %v4482_v6, %s8791_s18  ;;  %v4479_v6 = vmul.f32 %v12808_v61, %v12812_v21  ;;  %v11563_v54 = vpop.permute.xlu0 %3605 }
 0x61a   : > { %12863 = vst [vmem:[#allocation54_spill] sm:$0xff] %v11563_v54 }
 0x61d   : > { %4757 = vrot.lane.b32.xlu0 %v4481_v17, %s8791_s18  ;;  %v4463_v17 = vmul.f32 %v12808_v61, %v12841_v12 }
 0x621   : > { %4725 = vrot.lane.b32.xlu0 %v4465_v16, %s8791_s18  ;;  %v4478_v16 = vmul.f32 %v12808_v61, %v12787_v10  ;;  %v4477_v10 = vmul.f32 %v12808_v61, %v12789_v22 }
 0x625   : > { %4755 = vrot.lane.b32.xlu0 %v4480_v34, %s8791_s18  ;;  %v4780_v34 = vpop.permute.xlu0 %4779 }
 0x629   : > { %4753 = vrot.lane.b32.xlu0 %v4479_v6, %s8791_s18  ;;  %v11565_v45 = vpop.permute.xlu0 %4777 }
 0x62d   : > { %4721 = vrot.lane.b32.xlu0 %v4463_v17, %s8791_s18  ;;  %v11567_v0 = vpop.permute.xlu0 %4745 }
 0x631   : > { %4751 = vrot.lane.b32.xlu0 %v4478_v16, %s8791_s18  ;;  %v11569_v19 = vpop.permute.xlu0 %4775 }
 0x635   : > { %v11571_v6 = vpop.permute.xlu0 %4773 }
 0x639   : > { %v11573_v12 = vpop.permute.xlu0 %4741 }
 0x63d   : > { %v11575_v17 = vpop.permute.xlu0 %4771 }
 0x641   : > { %v11577_v41 = vpop.permute.xlu0 %4769 }
 0x645   : > { %v11579_v53 = vpop.permute.xlu0 %4737 }
 0x649   : > { %v11581_v16 = vpop.permute.xlu0 %4767 }
 0x64d   : > { %v11583_v11 = vpop.permute.xlu0 %4765 }
 0x651   : > { %v11585_v21 = vpop.permute.xlu0 %4733 }
 0x680   : > { %v3564_v54 = vpop.xlane.xlu0 %3563 }
 0x681   : > { %v3565_v62 = vsub.f32 %v3561_v52, %v3564_v54 }
 0x683   : > { %v3566_v23 = vmul.f32 1.442695, %v3565_v62 }
 0x684   : > { %v11598_v52 = vpop.permute.xlu0 %4763 }
 0x685   : > { %8694 = vpow2.f32 %v3566_v23  ;;  %v11626_v23 = vpop.permute.xlu1 %3629 }
 0x692   : > { %v8695_v36 = vpop.eup %8694 }
 0x693   : > { %v3568_v50 = vsel %vm2204_vm11, %v8695_v36, 0.0 }
 0x694   : > { %3569 = vadd.xlane.f32.xlu0 %v3568_v50 }
 0x6aa   : > { %4749 = vrot.lane.b32.xlu0 %v4477_v10, %s8791_s18  ;;  %v11601_v10 = vpop.permute.xlu0 %4761 }
 0x6ae   : > { %v11603_v61 = vpop.permute.xlu0 %4729 }
 0x6b2   : > { %v11606_v54 = vpop.permute.xlu0 %4759 }
 0x6b6   : > { %v11608_v50 = vpop.permute.xlu0 %4757 }
 0x6ba   : > { %v11611_v62 = vpop.permute.xlu0 %4725 }
 0x6c8   : > { %8521 = vxpose.xlu0.b32.start [1/16] (narrow) %v11356_v14, 8 }
 0x6cc   : > { %8523 = vxpose.xlu0.b32.cont [2/16] (narrow) %v11366_v9, 8 }
 0x6d0   : > { %8525 = vxpose.xlu0.b32.cont [3/16] (narrow) %v11404_v42, 8 }
 0x6d4   : > { %8527 = vxpose.xlu0.b32.cont [4/16] (narrow) %v11418_v30, 8  ;;  %v5692_v30 = vmul.f32 %v11269_v59, %v9567_v39 }
 0x6d8   : > { %8529 = vxpose.xlu0.b32.cont [5/16] (narrow) %v11451_v8, 8  ;;  %v5708_v8 = vmul.f32 %v11269_v59, %v10199_v37 }
 0x6dc   : > { %8531 = vxpose.xlu0.b32.cont [6/16] (narrow) %v11464_v51, 8  ;;  %v11637_v51 = vpop.permute.xlu1 %3631 }
 0x6e0   : > { %8533 = vxpose.xlu0.b32.cont [7/16] (narrow) %v11487_v7, 8  ;;  %v12875_v7 = vld [vmem:[#allocation41_spill] sm:$0xff] }
 0x6e4   : > { %8535 = vxpose.xlu0.b32.cont [8/16] (narrow) %v11497_v38, 8  ;;  %v11614_v38 = vpop.permute.xlu0 %4755 }
 0x6e8   : > { %8537 = vxpose.xlu0.b32.cont [9/16] (narrow) %v8482_v55, 8  ;;  %v11616_v14 = vpop.permute.xlu0 %4753  ;;  %v12877_v55 = vld [vmem:[#allocation43_spill] sm:$0xff] }
 0x6ec   : > { %8539 = vxpose.xlu0.b32.cont [10/16] (narrow) %v8487_v33, 8  ;;  %v11618_v9 = vpop.permute.xlu0 %4721  ;;  %v12878_v33 = vld [vmem:[#allocation44_spill] sm:$0xff] }
 0x6f0   : > { %8541 = vxpose.xlu0.b32.cont [11/16] (narrow) %v8492_v28, 8  ;;  %v11620_v28 = vpop.permute.xlu0 %4751 }
 0x6f4   : > { %8543 = vxpose.xlu0.b32.cont [12/16] (narrow) %v11311_v60, 8 }
 0x6f8   : > { %8545 = vxpose.xlu0.b32.cont [13/16] (narrow) %v8502_v18, 8  ;;  %v5685_v18 = vmul.f32 %v11269_v59, %v12842_v15 }
 0x6fc   : > { %8547 = vxpose.xlu0.b32.cont [14/16] (narrow) %v11324_v20, 8 }
 0x700   : > { %8549 = vxpose.xlu0.b32.cont [15/16] (narrow) %v8512_v3, 8  ;;  %v5701_v3 = vmul.f32 %v11269_v59, %v12820_v43 }
 0x702   : > { %v8577_v42 = vpack.i.bf16 %v5685_v18, %v5701_v3  ;;  %v12889_v18 = vld [vmem:[#allocation13_spill] sm:$0xff] }
 0x704   : > { %8551 = vxpose.xlu0.b32.end [16/16] (narrow) %v11338_v2, 8 }
 0x71d   : > { %v3570_v60 = vpop.xlane.xlu0 %3569 }
 0x71e   : > { %8696 = vrcp.f32 %v3570_v60  ;;  %v12888_v60 = vld [vmem:[#allocation31_spill] sm:$0xff] }
 0x72b   : > { %v8697_v20 = vpop.eup %8696 }
 0x72c   : > { %v3572_v2 = vmul.f32 %v8697_v20, %v8695_v36  ;;  %v8612_v36 = vpack.i.bf16 %v5692_v30, %v5708_v8  ;;  %v12890_v20 = vld [vmem:[#allocation32_spill] sm:$0xff]  ;;  %v12893_v30 = vld [vmem:[#allocation9_spill] sm:$0xff] }
 0x72d   : > { %8578 = vrot.lane.b32.xlu0 %v8577_v42, %s8793_s24  ;;  %v12891_v42 = vld [vmem:[#allocation10_spill] sm:$0xff] }
 0x72e   : > { %7953 = vmatprep.subr.msk.mxu1 %vm1731_vm3, %v3572_v2 }
 0x72f   : > { %7954 = vmatpush3.xpose.msk.msra.mxu1 %vm1731_vm3, %v3572_v2  ;;  %v12892_v2 = vld [vmem:[#allocation34_spill] sm:$0xff] }
 0x730   : > { %7599 = vmatprep.subr.mxu1 %v4780_v34  ;;  %v12879_v34 = vld [vmem:[#allocation46_spill] sm:$0xff] }
 0x731   : > { %4919 = vrot.lane.b32.xlu0 %v9567_v39, %s8792_s23 }
 0x732   : > { %7956 = vmatmul.mubr.msk.f32.vlgmr.msra.gmra.mxu1 %vm1731_vm3, %v11350_v46  ;;  %v5694_v46 = vmul.f32 %v11269_v59, %v9678_v49 }
 0x733   : > { %7958 = vmatprep.mubr.msk.f32.mxu1 %vm1731_vm3, %v11382_v32  ;;  %7600 = vmatpush3.msra.mxu1 %v11358_v26  ;;  %v5710_v26 = vmul.f32 %v11269_v59, %v10255_v40  ;;  %v4724_v32 = vpop.permute.xlu1 %4723 }
 0x734   : > { %7601 = vmatprep.subr.mxu1 %v11565_v45  ;;  %v12870_v45 = vld [vmem:[#allocation24_spill] sm:$0xff] }
 0x735   : > { %8613 = vrot.lane.b32.xlu0 %v8612_v36, %s8793_s24  ;;  %7602 = vmatpush3.msra.mxu1 %v11567_v0  ;;  %v12895_v36 = vld [vmem:[#allocation7_spill] sm:$0xff] }
 0x736   : > { %7959 = vmatmul.mubr.msk.f32.gmra.mxu1 %vm1731_vm3, %v11395_v57  ;;  %7603 = vmatprep.subr.mxu1 %v11569_v19  ;;  %v8622_v19 = vpack.i.bf16 %v5694_v46, %v5710_v26  ;;  %v12896_v26 = vld [vmem:[#allocation6_spill] sm:$0xff] }
 0x737   : > { %7961 = vmatprep.mubr.msk.f32.mxu1 %vm1731_vm3, %v11428_v47  ;;  %7604 = vmatpush3.msra.mxu1 %v11397_v24  ;;  %v11670_v57 = vpop.permute.xlu1 %3633  ;;  %v12869_v24 = vld [vmem:[#allocation54_spill] sm:$0xff]  ;;  %v12871_v47 = vld [vmem:[#allocation48_spill] sm:$0xff] }
 0x738   : > { %7605 = vmatprep.subr.mxu1 %v11571_v6  ;;  %v12880_v6 = vld [vmem:[#allocation27_spill] sm:$0xff] }
 0x739   : > { %4923 = vrot.lane.b32.xlu0 %v9678_v49, %s8792_s23  ;;  %7606 = vmatpush3.msra.mxu1 %v11573_v12  ;;  %v5696_v12 = vmul.f32 %v11269_v59, %v9753_v1 }
 0x73a   : > { %7962 = vmatmul.mubr.msk.f32.gmra.mxu1 %vm1731_vm3, %v11441_v29  ;;  %7607 = vmatprep.subr.mxu1 %v11575_v17  ;;  %v12873_v29 = vld [vmem:[#allocation25_spill] sm:$0xff]  ;;  %v12881_v17 = vld [vmem:[#allocation47_spill] sm:$0xff] }
 0x73b   : > { %7964 = vmatprep.mubr.msk.f32.mxu1 %vm1731_vm3, %v11298_v4  ;;  %7608 = vmatpush3.msra.mxu1 %v11431_v25  ;;  %v4750_v4 = vpop.permute.xlu0 %4749  ;;  %v12872_v25 = vld [vmem:[#allocation40_spill] sm:$0xff] }
 0x73c   : > { %7609 = vmatprep.subr.mxu1 %v11577_v41  ;;  %v5712_v41 = vmul.f32 %v11269_v59, %v10279_v44  ;;  %v3636_v59 = vpop.permute.xlu1 %3635 }
 0x73d   : > { %8623 = vrot.lane.b32.xlu0 %v8622_v19, %s8793_s24  ;;  %7610 = vmatpush3.msra.mxu1 %v11579_v53  ;;  %v12865_v53 = vld [vmem:[#allocation22_spill] sm:$0xff] }
 0x73e   : > { %7965 = vmatmul.mubr.msk.f32.gmra.mxu1 %vm1731_vm3, %v11474_v13  ;;  %7611 = vmatprep.subr.mxu1 %v11581_v16  ;;  %v12874_v13 = vld [vmem:[#allocation50_spill] sm:$0xff]  ;;  %v12882_v16 = vld [vmem:[#allocation49_spill] sm:$0xff] }
 0x73f   : > { %7967 = vmatprep.mubr.msk.f32.mxu1 %vm1731_vm3, %v11507_v27  ;;  %7612 = vmatpush3.msra.mxu1 %v11466_v63  ;;  %v8632_v63 = vpack.i.bf16 %v5696_v12, %v5712_v41 }
 0x740   : > { %7613 = vmatprep.subr.mxu1 %v11583_v11 }
 0x741   : > { %4927 = vrot.lane.b32.xlu0 %v9753_v1, %s8792_s23  ;;  %7614 = vmatpush3.msra.mxu1 %v11585_v21  ;;  %v12864_v21 = vld [vmem:[#allocation23_spill] sm:$0xff] }
 0x742   : > { %7968 = vmatmul.mubr.msk.f32.gmra.mxu1 %vm1731_vm3, %v11515_v48  ;;  %7615 = vmatprep.subr.mxu1 %v11598_v52  ;;  %v12876_v48 = vld [vmem:[#allocation42_spill] sm:$0xff] }
 0x743   : > { %7970 = vmatprep.mubr.msk.f32.mxu1 %vm1731_vm3, %v11532_v58  ;;  %7616 = vmatpush3.msra.mxu1 %v11499_v5  ;;  %v4720_v58 = vpop.permute.xlu1 %4719  ;;  %v12868_v5 = vld [vmem:[#allocation45_spill] sm:$0xff] }
 0x744   : > { %7617 = vmatprep.subr.mxu1 %v11601_v10  ;;  %v8552_v11 = vpop.trf.xlu0  ;;  %v12883_v10 = vld [vmem:[#allocation51_spill] sm:$0xff] }
 0x745   : > { %8633 = vrot.lane.b32.xlu0 %v8632_v63, %s8793_s24  ;;  %7618 = vmatpush3.msra.mxu1 %v11603_v61  ;;  %v12884_v61 = vld [vmem:[#allocation28_spill] sm:$0xff] }
 0x746   : > { %7971 = vmatmul.mubr.msk.f32.gmra.mxu1 %vm1731_vm3, %v11301_v35  ;;  %7619 = vmatprep.subr.mxu1 %v11606_v54  ;;  %v12866_v35 = vld [vmem:[#allocation53_spill] sm:$0xff]  ;;  %v8553_v54 = vunpack.i.l.bf16 %v8552_v11 }
 0x747   : > { %7973 = vmatprep.mubr.msk.f32.mxu1 %vm1731_vm3, %v11543_v31  ;;  %7620 = vmatpush3.msra.mxu1 %v11524_v56  ;;  %v12867_v31 = vld [vmem:[#allocation52_spill] sm:$0xff]  ;;  %v4718_v0 = vpop.permute.xlu1 %4717 }
 0x748   : > { %7621 = vmatprep.subr.mxu1 %v11608_v50  ;;  %v5800_v56 = vmul.f32 %v12867_v31, %v9753_v1  ;;  %v5798_v27 = vmul.f32 %v12867_v31, %v9678_v49  ;;  %v5796_v52 = vmul.f32 %v12867_v31, %v9567_v39  ;;  %v12885_v50 = vld [vmem:[#allocation29_spill] sm:$0xff]  ;;  %v5792_v3 = vmul.f32 %v12867_v31, %v12889_v18 }
 0x749   : > { %4931 = vrot.lane.b32.xlu0 %v12864_v21, %s8792_s23  ;;  %7622 = vmatpush3.msra.mxu1 %v11611_v62  ;;  %v8556_v62 = vunpack.i.h.bf16 %v8552_v11  ;;  %v5788_v8 = vmul.f32 %v12867_v31, %v12893_v30  ;;  %v5786_v46 = vmul.f32 %v12867_v31, %v12895_v36 }
 0x74a   : > { %7974 = vmatmul.mubr.msk.f32.gmra.mxu1 %vm1731_vm3, %v12865_v53  ;;  %7623 = vmatprep.subr.mxu1 %v11614_v38  ;;  %v12886_v38 = vld [vmem:[#allocation15_spill] sm:$0xff] }
 0x74b   : > { %7976 = vmatprep.mubr.msk.f32.mxu1 %vm1731_vm3, %v12866_v35  ;;  %7624 = vmatpush3.msra.mxu1 %v4724_v32  ;;  %v5785_v32 = vmul.f32 %v12867_v31, %v12896_v26 }
 0x74c   : > { %7625 = vmatprep.subr.mxu1 %v11616_v14  ;;  %v5794_v14 = vmul.f32 %v12867_v31, %v12886_v38 }
 0x74d   : > { %6071 = vrot.lane.b32.xlu0 %v5800_v56, %s8794_s25  ;;  %7626 = vmatpush3.msra.mxu1 %v11618_v9  ;;  %v4898_v9 = vpop.permute.xlu1 %4897 }
 0x74e   : > { %7977 = vmatmul.mubr.msk.f32.gmra.mxu1 %vm1731_vm3, %v12868_v5  ;;  %7627 = vmatprep.subr.mxu1 %v11620_v28  ;;  %v12887_v28 = vld [vmem:[#allocation30_spill] sm:$0xff] }
 0x74f   : > { %7979 = vmatprep.mubr.msk.f32.mxu1 %vm1731_vm3, %v12869_v24  ;;  %7628 = vmatpush3.msra.mxu1 %v4720_v58 }
 0x750   : > { %7629 = vmatprep.subr.mxu1 %v4750_v4 }
 0x751   : > { %4933 = vrot.lane.b32.xlu0 %v12870_v45, %s8792_s23  ;;  %7630 = vmatpush3.msra.mxu1 %v4718_v0  ;;  %v11802_v19 = vpop.permute.xlu1 %4899 }
 0x752   : > { %7980 = vmatmul.mubr.msk.f32.gmra.mxu1 %vm1731_vm3, %v12871_v47 }
 0x753   : > { %7982 = vmatprep.mubr.msk.f32.mxu1 %vm1731_vm3, %v12872_v25 }
 0x755   : > { %4935 = vrot.lane.b32.xlu0 %v12873_v29, %s8792_s23 }
 0x756   : > { %7983 = vmatmul.mubr.msk.f32.gmra.mxu1 %vm1731_vm3, %v12874_v13 }
 0x757   : > { %7985 = vmatprep.mubr.msk.f32.mxu1 %vm1731_vm3, %v12875_v7 }
 0x759   : > { %6067 = vrot.lane.b32.xlu0 %v5798_v27, %s8794_s25 }
 0x75a   : > { %7986 = vmatmul.mubr.msk.f32.gmra.mxu1 %vm1731_vm3, %v12876_v48 }
 0x75b   : > { %7988 = vmatprep.mubr.msk.f32.mxu1 %vm1731_vm3, %v12877_v55 }
 0x75d   : > { %4937 = vrot.lane.b32.xlu0 %v12820_v43, %s8792_s23 }
 0x75e   : > { %7989 = vmatmul.mubr.msk.f32.gmra.mxu1 %vm1731_vm3, %v12878_v33 }
 0x75f   : > { %7991 = vmatprep.mubr.msk.f32.mxu1 %vm1731_vm3, %v12879_v34 }
 0x761   : > { %4939 = vrot.lane.b32.xlu0 %v12880_v6, %s8792_s23 }
 0x762   : > { %7992 = vmatmul.mubr.msk.f32.gmra.mxu1 %vm1731_vm3, %v12881_v17 }
 0x763   : > { %7994 = vmatprep.mubr.msk.f32.mxu1 %vm1731_vm3, %v12882_v16 }
 0x765   : > { %6063 = vrot.lane.b32.xlu0 %v5796_v52, %s8794_s25 }
 0x766   : > { %7995 = vmatmul.mubr.msk.f32.gmra.mxu1 %vm1731_vm3, %v12883_v10 }
 0x767   : > { %7997 = vmatprep.mubr.msk.f32.mxu1 %vm1731_vm3, %v11626_v23  ;;  %v5790_v23 = vmul.f32 %v12867_v31, %v12891_v42 }
 0x769   : > { %4941 = vrot.lane.b32.xlu0 %v12884_v61, %s8792_s23 }
 0x76a   : > { %7998 = vmatmul.mubr.msk.f32.gmra.mxu1 %vm1731_vm3, %v11637_v51  ;;  %v12894_v51 = vld [vmem:[#allocation36_spill] sm:$0xff] }
 0x76b   : > { %8000 = vmatprep.mubr.msk.f32.mxu1 %vm1731_vm3, %v11670_v57  ;;  %v11804_v57 = vpop.permute.xlu1 %8558 }
 0x76d   : > { %4943 = vrot.lane.b32.xlu0 %v12885_v50, %s8792_s23 }
 0x76e   : > { %8001 = vmatmul.mubr.msk.f32.gmra.mxu1 %vm1731_vm3, %v3636_v59 }
 0x76f   : > { %4877 = vmatprep.mubr.f32.mxu1 %v8553_v54  ;;  %v11806_v12 = vpop.permute.xlu1 %8563 }
 0x771   : > { %6059 = vrot.lane.b32.xlu0 %v5794_v14, %s8794_s25 }
 0x772   : > { %4878 = vmatmul.mubr.f32.vlgmr.msra.gmra.mxu1 %v8556_v62 }
 0x773   : > { %8055 = vmatprep.mubr.msk.f32.mxu1 %vm1731_vm3, %v4898_v9  ;;  %v11808_v41 = vpop.permute.xlu1 %4901 }
 0x775   : > { %4945 = vrot.lane.b32.xlu0 %v12887_v28, %s8792_s23 }
 0x777   : > { %v11810_v4 = vpop.permute.xlu1 %4903 }
 0x779   : > { %4947 = vrot.lane.b32.xlu0 %v12888_v60, %s8792_s23 }
 0x77b   : > { %v11812_v63 = vpop.permute.xlu1 %8568 }
 0x77d   : > { %6055 = vrot.lane.b32.xlu0 %v5792_v3, %s8794_s25 }
 0x77f   : > { %v11814_v11 = vpop.permute.xlu1 %8573 }
 0x781   : > { %4949 = vrot.lane.b32.xlu0 %v12890_v20, %s8792_s23 }
 0x783   : > { %v11818_v56 = vpop.permute.xlu1 %4905 }
 0x785   : > { %4951 = vrot.lane.b32.xlu0 %v10199_v37, %s8792_s23 }
 0x787   : > { %v11824_v47 = vpop.permute.xlu1 %4907 }
 0x788   : > { %12897 = vst [vmem:[#allocation38_spill] sm:$0xff] %v11824_v47  ;;  %v8725_v47 = vld [vmem:[%s8880_s14 + $0x18] sm:$0xff] }
 0x789   : > { %6051 = vrot.lane.b32.xlu0 %v5790_v23, %s8794_s25 }
 0x78b   : > { %v11828_v27 = vpop.permute.xlu1 %8583 }
 0x78d   : > { %4953 = vrot.lane.b32.xlu0 %v12892_v2, %s8792_s23 }
 0x78f   : > { %v11834_v34 = vpop.permute.xlu1 %4909 }
 0x790   : > { %12898 = vst [vmem:[#allocation39_spill] sm:$0xff] %v11834_v34 }
 0x791   : > { %4955 = vrot.lane.b32.xlu0 %v10255_v40, %s8792_s23 }
 0x793   : > { %v11838_v10 = vpop.permute.xlu1 %4911 }
 0x794   : > { %12899 = vst [vmem:[#allocation22_spill] sm:$0xff] %v11838_v10 }
 0x795   : > { %6047 = vrot.lane.b32.xlu0 %v5788_v8, %s8794_s25 }
 0x797   : > { %v11844_v9 = vpop.permute.xlu1 %8588 }
 0x799   : > { %4957 = vrot.lane.b32.xlu0 %v12894_v51, %s8792_s23 }
 0x79d   : > { %4959 = vrot.lane.b32.xlu0 %v10279_v44, %s8792_s23 }
 0x7a1   : > { %6043 = vrot.lane.b32.xlu0 %v5786_v46, %s8794_s25  ;;  %v11848_v46 = vpop.permute.xlu1 %8593 }
 0x7a5   : > { %6041 = vrot.lane.b32.xlu0 %v5785_v32, %s8794_s25 }
 0x7f2   : > { %v7957_v59 = vpop.f32.mrf.mxu1 }
 0x7f4   : > { %v3770_v58 = vpop.f32.mrf.mxu1 }
 0x7f5   : > { %8005 = vmatprep.mubr.msk.f32.mxu0 %vm1731_vm3, %v3770_v58 }
 0x7f6   : > { %v7960_v53 = vpop.f32.mrf.mxu1  ;;  %8006 = vmatmul.mubr.msk.f32.vlgmr.msra.gmra.mxu0 %vm1731_vm3, %v7957_v59 }
 0x7f8   : > { %v3780_v35 = vpop.f32.mrf.mxu1 }
 0x7f9   : > { %8008 = vmatprep.mubr.msk.f32.mxu0 %vm1731_vm3, %v3780_v35 }
 0x7fa   : > { %v7963_v5 = vpop.f32.mrf.mxu1  ;;  %8009 = vmatmul.mubr.msk.f32.gmra.mxu0 %vm1731_vm3, %v7960_v53  ;;  %v11854_v53 = vpop.permute.xlu1 %4913 }
 0x7fb   : > { %12900 = vst [vmem:[#allocation53_spill] sm:$0xff] %v11854_v53 }
 0x7fc   : > { %v3790_v24 = vpop.f32.mrf.mxu1 }
 0x7fd   : > { %8011 = vmatprep.mubr.msk.f32.mxu0 %vm1731_vm3, %v3790_v24 }
 0x7fe   : > { %v7966_v0 = vpop.f32.mrf.mxu1  ;;  %8012 = vmatmul.mubr.msk.f32.gmra.mxu0 %vm1731_vm3, %v7963_v5 }
 0x800   : > { %v3800_v25 = vpop.f32.mrf.mxu1 }
 0x801   : > { %8014 = vmatprep.mubr.msk.f32.mxu0 %vm1731_vm3, %v3800_v25 }
 0x802   : > { %v7969_v13 = vpop.f32.mrf.mxu1  ;;  %8015 = vmatmul.mubr.msk.f32.gmra.mxu0 %vm1731_vm3, %v7966_v0  ;;  %v11858_v0 = vpop.permute.xlu1 %4915 }
 0x803   : > { %12901 = vst [vmem:[#allocation52_spill] sm:$0xff] %v11858_v0 }
 0x804   : > { %v3810_v7 = vpop.f32.mrf.mxu1 }
 0x805   : > { %8017 = vmatprep.mubr.msk.f32.mxu0 %vm1731_vm3, %v3810_v7 }
 0x806   : > { %v7972_v48 = vpop.f32.mrf.mxu1  ;;  %8018 = vmatmul.mubr.msk.f32.gmra.mxu0 %vm1731_vm3, %v7969_v13 }
 0x808   : > { %v3820_v55 = vpop.f32.mrf.mxu1 }
 0x809   : > { %8020 = vmatprep.mubr.msk.f32.mxu0 %vm1731_vm3, %v3820_v55 }
 0x80a   : > { %v7975_v33 = vpop.f32.mrf.mxu1  ;;  %8021 = vmatmul.mubr.msk.f32.gmra.mxu0 %vm1731_vm3, %v7972_v48  ;;  %v11864_v48 = vpop.permute.xlu1 %8598 }
 0x80c   : > { %v3830_v17 = vpop.f32.mrf.mxu1 }
 0x80d   : > { %8023 = vmatprep.mubr.msk.f32.mxu0 %vm1731_vm3, %v3830_v17 }
 0x80e   : > { %v7978_v16 = vpop.f32.mrf.mxu1  ;;  %8024 = vmatmul.mubr.msk.f32.gmra.mxu0 %vm1731_vm3, %v7975_v33 }
 0x810   : > { %v3840_v52 = vpop.f32.mrf.mxu1 }
 0x811   : > { %8026 = vmatprep.mubr.msk.f32.mxu0 %vm1731_vm3, %v3840_v52  ;;  %v11868_v52 = vpop.permute.xlu1 %8603 }
 0x812   : > { %v7981_v54 = vpop.f32.mrf.mxu1  ;;  %8027 = vmatmul.mubr.msk.f32.gmra.mxu0 %vm1731_vm3, %v7978_v16  ;;  %v4884_v16 = vstv %s7225_s27 }
 0x814   : > { %v3850_v62 = vpop.f32.mrf.mxu1 }
 0x815   : > { %8029 = vmatprep.mubr.msk.f32.mxu0 %vm1731_vm3, %v3850_v62 }
 0x816   : > { %v7984_v14 = vpop.f32.mrf.mxu1  ;;  %8030 = vmatmul.mubr.msk.f32.gmra.mxu0 %vm1731_vm3, %v7981_v54 }
 0x818   : > { %v3860_v3 = vpop.f32.mrf.mxu1 }
 0x819   : > { %8032 = vmatprep.mubr.msk.f32.mxu0 %vm1731_vm3, %v3860_v3 }
 0x81a   : > { %v7987_v23 = vpop.f32.mrf.mxu1  ;;  %8033 = vmatmul.mubr.msk.f32.gmra.mxu0 %vm1731_vm3, %v7984_v14  ;;  %v11872_v14 = vpop.f32.mrf.mxu0 }
 0x81c   : > { %v3870_v8 = vpop.f32.mrf.mxu1 }
 0x81d   : > { %8035 = vmatprep.mubr.msk.f32.mxu0 %vm1731_vm3, %v3870_v8  ;;  %v11878_v8 = vpop.f32.mrf.mxu0 }
 0x81e   : > { %v7990_v32 = vpop.f32.mrf.mxu1  ;;  %8036 = vmatmul.mubr.msk.f32.gmra.mxu0 %vm1731_vm3, %v7987_v23  ;;  %v11876_v23 = vpop.permute.xlu1 %4917  ;;  %12903 = vst [vmem:[#allocation54_spill] sm:$0xff] %v11878_v8 }
 0x81f   : > { %12902 = vst [vmem:[#allocation45_spill] sm:$0xff] %v11876_v23 }
 0x820   : > { %v3880_v59 = vpop.f32.mrf.mxu1 }
 0x821   : > { %8038 = vmatprep.mubr.msk.f32.mxu0 %vm1731_vm3, %v3880_v59 }
 0x822   : > { %v7993_v58 = vpop.f32.mrf.mxu1  ;;  %8039 = vmatmul.mubr.msk.f32.gmra.mxu0 %vm1731_vm3, %v7990_v32  ;;  %v11880_v32 = vpop.f32.mrf.mxu0 }
 0x823   : > { %v11882_v59 = vpop.permute.xlu1 %8608 }
 0x824   : > { %v3890_v35 = vpop.f32.mrf.mxu1 }
 0x825   : > { %8041 = vmatprep.mubr.msk.f32.mxu0 %vm1731_vm3, %v3890_v35 }
 0x826   : > { %v7996_v5 = vpop.f32.mrf.mxu1  ;;  %8042 = vmatmul.mubr.msk.f32.gmra.mxu0 %vm1731_vm3, %v7993_v58  ;;  %v11884_v58 = vpop.f32.mrf.mxu0 }
 0x827   : > { %12904 = vst [vmem:[#allocation48_spill] sm:$0xff] %v11884_v58  ;;  %v11886_v35 = vpop.permute.xlu1 %4921 }
 0x828   : > { %v3900_v24 = vpop.f32.mrf.mxu1  ;;  %12905 = vst [vmem:[#allocation40_spill] sm:$0xff] %v11886_v35 }
 0x829   : > { %8044 = vmatprep.mubr.msk.f32.mxu0 %vm1731_vm3, %v3900_v24  ;;  %v5805_v24 = vmul.f32 %v12867_v31, %v12820_v43 }
 0x82a   : > { %v7999_v25 = vpop.f32.mrf.mxu1  ;;  %8045 = vmatmul.mubr.msk.f32.gmra.mxu0 %vm1731_vm3, %v7996_v5  ;;  %v11888_v5 = vpop.f32.mrf.mxu0 }
 0x82c   : > { %v3910_v13 = vpop.f32.mrf.mxu1 }
 0x82d   : > { %8047 = vmatprep.mubr.msk.f32.mxu0 %vm1731_vm3, %v3910_v13  ;;  %v11895_v13 = vpop.permute.xlu1 %8618 }
 0x82e   : > { %v8002_v7 = vpop.f32.mrf.mxu1  ;;  %8048 = vmatmul.mubr.msk.f32.gmra.mxu0 %vm1731_vm3, %v7999_v25  ;;  %v11893_v25 = vpop.f32.mrf.mxu0 }
 0x82f   : > { %12906 = vst [vmem:[#allocation50_spill] sm:$0xff] %v11893_v25 }
 0x830   : > { %v3920_v55 = vpop.f32.mrf.mxu1 }
 0x831   : > { %8050 = vmatprep.mubr.msk.f32.mxu0 %vm1731_vm3, %v3920_v55  ;;  %v11900_v55 = vpop.f32.mrf.mxu0 }
 0x832   : > { %8051 = vmatmul.mubr.msk.f32.gmra.mxu0 %vm1731_vm3, %v8002_v7  ;;  %v7631_v33 = vpop.f32.mrf.mxu1  ;;  %v5789_v7 = vmul.f32 %v12867_v31, %v12842_v15 }
 0x834   : > { %v7632_v17 = vpop.f32.mrf.mxu1 }
 0x835   : > { %v7633_v54 = vadd.f32 %v7632_v17, %v7631_v33  ;;  %v5804_v33 = vmul.f32 %v12867_v31, %v12873_v29  ;;  %v11904_v17 = vpop.permute.xlu1 %4925 }
 0x836   : > { %12907 = vst [vmem:[#allocation41_spill] sm:$0xff] %v11904_v17 }
 0x837   : > { %v11870_v62 = vmul.f32 %v7633_v54, %v4884_v16  ;;  %v11907_v16 = vpop.f32.mrf.mxu0  ;;  %v5803_v54 = vmul.f32 %v12867_v31, %v12870_v45 }
 0x838   : > { %12908 = vst [vmem:[#allocation42_spill] sm:$0xff] %v11907_v16 }
 0x839   : > { %v4886_v3 = vsel %vm2204_vm11, %v11870_v62, -inf }
 0x83a   : > { %4887 = vmax.xlane.f32.xlu1 %v4886_v3  ;;  %v11912_v3 = vpop.f32.mrf.mxu0 }
 0x83c   : > { %v11919_v58 = vpop.f32.mrf.mxu0 }
 0x83d   : > { %12910 = vst [vmem:[#allocation43_spill] sm:$0xff] %v11919_v58 }
 0x83e   : > { %v11926_v8 = vpop.f32.mrf.mxu0 }
 0x84b   : > { %6081 = vrot.lane.b32.xlu1 %v5805_v24, %s8794_s25  ;;  %v11914_v24 = vpop.permute.xlu1 %8628 }
 0x84f   : > { %6049 = vrot.lane.b32.xlu1 %v5789_v7, %s8794_s25  ;;  %v12909_v7 = vld [vmem:[#allocation8_spill] sm:$0xff]  ;;  %v11923_v16 = vpop.permute.xlu1 %4929 }
 0x850   : > { %v5787_v25 = vmul.f32 %v12867_v31, %v12909_v7  ;;  %12911 = vst [vmem:[#allocation44_spill] sm:$0xff] %v11923_v16 }
 0x853   : > { %6079 = vrot.lane.b32.xlu1 %v5804_v33, %s8794_s25  ;;  %v5802_v33 = vmul.f32 %v12867_v31, %v12864_v21  ;;  %v11930_v51 = vpop.permute.xlu1 %6103 }
 0x857   : > { %6077 = vrot.lane.b32.xlu1 %v5803_v54, %s8794_s25  ;;  %v11928_v54 = vpop.f32.mrf.mxu0  ;;  %v11934_v20 = vpop.permute.xlu1 %6101 }
 0x858   : > { %12912 = vst [vmem:[#allocation46_spill] sm:$0xff] %v11928_v54 }
 0x859   : > { %v11932_v2 = vpop.f32.mrf.mxu0 }
 0x85b   : > { %6045 = vrot.lane.b32.xlu1 %v5787_v25, %s8794_s25  ;;  %v11936_v25 = vpop.f32.mrf.mxu0  ;;  %v11940_v28 = vpop.permute.xlu1 %6069 }
 0x85d   : > { %v11938_v58 = vpop.f32.mrf.mxu0 }
 0x85f   : > { %6075 = vrot.lane.b32.xlu1 %v5802_v33, %s8794_s25  ;;  %v11942_v61 = vpop.f32.mrf.mxu0  ;;  %v11944_v43 = vpop.permute.xlu1 %6099 }
 0x861   : > { %v11946_v33 = vpop.f32.mrf.mxu0 }
 0x863   : > { %v11948_v29 = vpop.f32.mrf.mxu0  ;;  %v11950_v54 = vpop.permute.xlu1 %6097 }
 0x864   : > { %12913 = vst [vmem:[#allocation27_spill] sm:$0xff] %v11950_v54 }
 0x865   : > { %v11952_v45 = vpop.f32.mrf.mxu0 }
 0x867   : > { %v11954_v21 = vpop.permute.xlu1 %6065  ;;  %v11956_v1 = vpop.f32.mrf.mxu0 }
 0x868   : > { %12914 = vst [vmem:[#allocation47_spill] sm:$0xff] %v11954_v21 }
 0x869   : > { %v11958_v49 = vpop.f32.mrf.mxu0 }
 0x86b   : > { %v11960_v39 = vpop.permute.xlu1 %6095  ;;  %v11962_v38 = vpop.f32.mrf.mxu0 }
 0x86c   : > { %12915 = vst [vmem:[#allocation49_spill] sm:$0xff] %v11960_v39 }
 0x86d   : > { %v11966_v42 = vpop.f32.mrf.mxu0 }
 0x86f   : > { %v11964_v18 = vpop.permute.xlu1 %6093  ;;  %v11968_v15 = vpop.f32.mrf.mxu0 }
 0x870   : > { %12916 = vst [vmem:[#allocation51_spill] sm:$0xff] %v11964_v18  ;;  %v8724_v18 = vld [vmem:[%s8880_s14 + $0x8] sm:$0xff] }
 0x871   : > { %v11972_v7 = vpop.f32.mrf.mxu0 }
 0x873   : > { %v11970_v30 = vpop.permute.xlu1 %6061  ;;  %v11976_v26 = vpop.f32.mrf.mxu0 }
 0x874   : > { %12917 = vst [vmem:[#allocation29_spill] sm:$0xff] %v11970_v30 }
 0x875   : > { %v11978_v16 = vpop.f32.mrf.mxu0 }
 0x877   : > { %v11974_v36 = vpop.permute.xlu1 %6091  ;;  %v11982_v35 = vpop.f32.mrf.mxu0 }
 0x878   : > { %12918 = vst [vmem:[#allocation31_spill] sm:$0xff] %v11974_v36 }
 0x879   : > { %v11986_v0 = vpop.f32.mrf.mxu0 }
 0x87b   : > { %v11980_v17 = vpop.permute.xlu1 %6089  ;;  %v11988_v44 = vpop.f32.mrf.mxu0 }
 0x87c   : > { %12919 = vst [vmem:[#allocation55_spill] sm:$0xff] %v11980_v17  ;;  %v2930_v17 = vadd.f32 %v8724_v18, %v11872_v14 }
 0x87d   : > { %v11992_v10 = vpop.f32.mrf.mxu0 }
 0x87f   : > { %v11984_v23 = vpop.permute.xlu1 %6057  ;;  %v11996_v30 = vpop.f32.mrf.mxu0 }
 0x880   : > { %12920 = vst [vmem:[#allocation56_spill] sm:$0xff] %v11984_v23  ;;  %12923 = vst [vmem:[#allocation59_spill] sm:$0xff] %v11996_v30  ;;  %v8726_v30 = vld [vmem:[%s8880_s14 + $0x28] sm:$0xff] }
 0x881   : > { %v2934_v18 = vadd.f32 %v8726_v30, %v11888_v5  ;;  %v8728_v30 = vld [vmem:[%s8880_s14 + $0x48] sm:$0xff] }
 0x882   : > { %v2938_v5 = vadd.f32 %v8728_v30, %v11912_v3  ;;  %v8731_v30 = vld [vmem:[%s8880_s14 + $0x60] sm:$0xff] }
 0x883   : > { %v11990_v53 = vpop.permute.xlu1 %6087 }
 0x884   : > { %12921 = vst [vmem:[#allocation57_spill] sm:$0xff] %v11990_v53  ;;  %v2932_v53 = vadd.f32 %v8725_v47, %v11880_v32 }
 0x887   : > { %v11994_v36 = vpop.permute.xlu1 %6085 }
 0x888   : > { %12922 = vst [vmem:[#allocation58_spill] sm:$0xff] %v11994_v36 }
 0x88b   : > { %v12004_v39 = vpop.permute.xlu1 %6053 }
 0x88f   : > { %v12014_v37 = vpop.permute.xlu1 %6083 }
 0x8b6   : > { %v8007_v40 = vpop.f32.mrf.mxu0 }
 0x8b7   : > { %v12000_v34 = vadd.f32 %v8007_v40, %v2930_v17 }
 0x8b8   : > { %v12002_v23 = vpop.f32.mrf.mxu0 }
 0x8b9   : > { %12924 = vst [vmem:[#allocation60_spill] sm:$0xff] %v12000_v34  ;;  %12925 = vst [vmem:[#allocation61_spill] sm:$0xff] %v12002_v23  ;;  %v8727_v34 = vld [vmem:[%s8880_s14 + $0x38] sm:$0xff] }
 0x8ba   : > { %v8010_v21 = vpop.f32.mrf.mxu0  ;;  %v2936_v47 = vadd.f32 %v8727_v34, %v11900_v55  ;;  %v8729_v55 = vld [vmem:[%s8880_s14 + $0x58] sm:$0xff] }
 0x8bb   : > { %v12008_v54 = vadd.f32 %v8010_v21, %v2932_v53 }
 0x8bc   : > { %v12010_v36 = vpop.f32.mrf.mxu0 }
 0x8bd   : > { %12926 = vst [vmem:[#allocation62_spill] sm:$0xff] %v12008_v54 }
 0x8be   : > { %v8013_v14 = vpop.f32.mrf.mxu0 }
 0x8bf   : > { %v12016_v40 = vadd.f32 %v8013_v14, %v2934_v18 }
 0x8c0   : > { %v12018_v17 = vpop.f32.mrf.mxu0 }
 0x8c1   : > { %12927 = vst [vmem:[#allocation63_spill] sm:$0xff] %v12016_v40 }
 0x8c2   : > { %v8016_v32 = vpop.f32.mrf.mxu0 }
 0x8c3   : > { %v12022_v23 = vadd.f32 %v8016_v32, %v2936_v47  ;;  %v4888_v21 = vpop.xlane.xlu1 %4887  ;;  %v2940_v47 = vadd.f32 %v8729_v55, %v11926_v8 }
 0x8c4   : > { %v4889_v53 = vsub.f32 %v11870_v62, %v4888_v21  ;;  %v12025_v54 = vpop.f32.mrf.mxu0 }
 0x8c5   : > { %12928 = vst [vmem:[#allocation64_spill] sm:$0xff] %v12022_v23  ;;  %v8730_v23 = vld [vmem:[%s8880_s14 + $0x68] sm:$0xff] }
 0x8c6   : > { %v4890_v18 = vmul.f32 1.442695, %v4889_v53  ;;  %v8019_v14 = vpop.f32.mrf.mxu0  ;;  %v2942_v3 = vadd.f32 %v8730_v23, %v11932_v2 }
 0x8c7   : > { %v12029_v40 = vadd.f32 %v8019_v14, %v2938_v5  ;;  %v2941_v5 = vadd.f32 %v8731_v30, %v11936_v25  ;;  %v8734_v25 = vld [vmem:[%s8880_s14 + $0x88] sm:$0xff]  ;;  %v8735_v30 = vld [vmem:[%s8880_s14 + $0x80] sm:$0xff] }
 0x8c8   : > { %8698 = vpow2.f32 %v4890_v18  ;;  %v12031_v34 = vpop.f32.mrf.mxu0 }
 0x8c9   : > { %12929 = vst [vmem:[#allocation65_spill] sm:$0xff] %v12029_v40  ;;  %v8732_v40 = vld [vmem:[%s8880_s14 + $0x78] sm:$0xff] }
 0x8ca   : > { %v8022_v32 = vpop.f32.mrf.mxu0  ;;  %v2944_v8 = vadd.f32 %v8732_v40, %v11938_v58 }
 0x8cb   : > { %v12035_v62 = vadd.f32 %v8022_v32, %v2940_v47  ;;  %v8733_v32 = vld [vmem:[%s8880_s14 + $0x70] sm:$0xff] }
 0x8cc   : > { %v12037_v21 = vpop.f32.mrf.mxu0 }
 0x8cd   : > { %12930 = vst [vmem:[#allocation66_spill] sm:$0xff] %v12035_v62  ;;  %12931 = vst [vmem:[#allocation67_spill] sm:$0xff] %v12037_v21  ;;  %v2943_v62 = vadd.f32 %v8733_v32, %v11942_v61  ;;  %v8737_v32 = vld [vmem:[%s8880_s14 + $0x90] sm:$0xff] }
 0x8ce   : > { %v8025_v53 = vpop.f32.mrf.mxu0 }
 0x8cf   : > { %v12043_v18 = vadd.f32 %v8025_v53, %v2942_v3  ;;  %v2946_v3 = vadd.f32 %v8734_v25, %v11946_v33 }
 0x8d0   : > { %v4154_v14 = vpop.f32.mrf.mxu0 }
 0x8d1   : > { %v12047_v55 = vadd.f32 %v4154_v14, %v2941_v5  ;;  %v2945_v5 = vadd.f32 %v8735_v30, %v11948_v29  ;;  %v8738_v29 = vld [vmem:[%s8880_s14 + $0xa8] sm:$0xff]  ;;  %v8739_v30 = vld [vmem:[%s8880_s14 + $0xa0] sm:$0xff] }
 0x8d2   : > { %v8028_v47 = vpop.f32.mrf.mxu0 }
 0x8d3   : > { %v12051_v21 = vadd.f32 %v8028_v47, %v2944_v8  ;;  %v8736_v8 = vld [vmem:[%s8880_s14 + $0x98] sm:$0xff] }
 0x8d4   : > { %v4164_v2 = vpop.f32.mrf.mxu0  ;;  %v2948_v47 = vadd.f32 %v8736_v8, %v11952_v45  ;;  %v2949_v45 = vadd.f32 %v8739_v30, %v11962_v38  ;;  %v8742_v38 = vld [vmem:[%s8880_s14 + $0xc8] sm:$0xff] }
 0x8d5   : > { %v12053_v23 = vpop.eup %8698  ;;  %v12057_v53 = vadd.f32 %v4164_v2, %v2943_v62  ;;  %v2947_v2 = vadd.f32 %v8737_v32, %v11956_v1  ;;  %v8740_v1 = vld [vmem:[%s8880_s14 + $0xb8] sm:$0xff] }
 0x8d6   : > { %v8031_v58 = vpop.f32.mrf.mxu0  ;;  %v4892_v40 = vsel %vm2204_vm11, %v12053_v23, 0.0 }
 0x8d7   : > { %12932 = vst [vmem:[#allocation68_spill] sm:$0xff] %v12057_v53  ;;  %v12063_v61 = vadd.f32 %v8031_v58, %v2946_v3  ;;  %4893 = vadd.xlane.f32.xlu1 %v4892_v40  ;;  %v2950_v3 = vadd.f32 %v8738_v29, %v11958_v49  ;;  %v8741_v49 = vld [vmem:[%s8880_s14 + $0xb0] sm:$0xff] }
 0x8d8   : > { %v4174_v14 = vpop.f32.mrf.mxu0 }
 0x8d9   : > { %v12067_v33 = vadd.f32 %v4174_v14, %v2945_v5  ;;  %v8579_v5 = vpop.permute.xlu0 %8578 }
 0x8da   : > { %v8034_v62 = vpop.f32.mrf.mxu0 }
 0x8db   : > { %v12071_v25 = vadd.f32 %v8034_v62, %v2948_v47  ;;  %v2952_v47 = vadd.f32 %v8740_v1, %v11966_v42  ;;  %v5801_v42 = vmul.f32 %v12867_v31, %v12789_v22 }
 0x8dc   : > { %v4184_v53 = vpop.f32.mrf.mxu0 }
 0x8dd   : > { %v12075_v58 = vadd.f32 %v4184_v53, %v2947_v2  ;;  %v2951_v53 = vadd.f32 %v8741_v49, %v11968_v15 }
 0x8de   : > { %v8037_v40 = vpop.f32.mrf.mxu0 }
 0x8df   : > { %v12079_v14 = vadd.f32 %v8037_v40, %v2950_v3  ;;  %v2954_v3 = vadd.f32 %v8742_v38, %v11972_v7  ;;  %v12091_v40 = vpop.permute.xlu0 %4919 }
 0x8e0   : > { %v4194_v8 = vpop.f32.mrf.mxu0 }
 0x8e1   : > { %12933 = vst [vmem:[#allocation69_spill] sm:$0xff] %v12079_v14  ;;  %v12083_v62 = vadd.f32 %v4194_v8, %v2949_v45  ;;  %v8743_v45 = vld [vmem:[%s8880_s14 + $0xc0] sm:$0xff] }
 0x8e2   : > { %v8040_v32 = vpop.f32.mrf.mxu0  ;;  %v2953_v8 = vadd.f32 %v8743_v45, %v11976_v26 }
 0x8e3   : > { %v12087_v2 = vadd.f32 %v8040_v32, %v2952_v47  ;;  %v8744_v47 = vld [vmem:[%s8880_s14 + $0xd8] sm:$0xff]  ;;  %v8614_v31 = vpop.permute.xlu0 %8613 }
 0x8e4   : > { %v4204_v29 = vpop.f32.mrf.mxu0  ;;  %v2956_v7 = vadd.f32 %v8744_v47, %v11978_v16 }
 0x8e5   : > { %v12093_v30 = vadd.f32 %v4204_v29, %v2951_v53  ;;  %v8745_v53 = vld [vmem:[%s8880_s14 + $0xd0] sm:$0xff] }
 0x8e6   : > { %v8043_v14 = vpop.f32.mrf.mxu0  ;;  %v2955_v29 = vadd.f32 %v8745_v53, %v11982_v35 }
 0x8e7   : > { %v12099_v15 = vadd.f32 %v8043_v14, %v2954_v3  ;;  %v8746_v14 = vld [vmem:[%s8880_s14 + $0xe8] sm:$0xff]  ;;  %v12120_v35 = vpop.permute.xlu0 %4923 }
 0x8e8   : > { %v4214_v1 = vpop.f32.mrf.mxu0  ;;  %6073 = vrot.lane.b32.xlu1 %v5801_v42, %s8794_s25  ;;  %v2958_v3 = vadd.f32 %v8746_v14, %v11986_v0 }
 0x8e9   : > { %12934 = vst [vmem:[#allocation70_spill] sm:$0xff] %v12099_v15  ;;  %v12104_v32 = vadd.f32 %v4214_v1, %v2953_v8  ;;  %v8747_v15 = vld [vmem:[%s8880_s14 + $0xe0] sm:$0xff]  ;;  %v8748_v1 = vld [vmem:[%s8880_s14 + $0xf8] sm:$0xff] }
 0x8ea   : > { %v8046_v49 = vpop.f32.mrf.mxu0  ;;  %v2957_v16 = vadd.f32 %v8747_v15, %v11988_v44 }
 0x8eb   : > { %12935 = vst [vmem:[#allocation71_spill] sm:$0xff] %v12104_v32  ;;  %v12108_v38 = vadd.f32 %v8046_v49, %v2956_v7  ;;  %v2960_v32 = vadd.f32 %v8748_v1, %v11992_v10  ;;  %v8624_v0 = vpop.permute.xlu0 %8623 }
 0x8ec   : > { %v4224_v26 = vpop.f32.mrf.mxu0 }
 0x8ed   : > { %v12112_v45 = vadd.f32 %v4224_v26, %v2955_v29 }
 0x8ee   : > { %v8049_v42 = vpop.f32.mrf.mxu0 }
 0x8ef   : > { %v12116_v47 = vadd.f32 %v8049_v42, %v2958_v3  ;;  %v12126_v29 = vpop.permute.xlu0 %4927 }
 0x8f0   : > { %v4234_v8 = vpop.f32.mrf.mxu0 }
 0x8f1   : > { %v12122_v7 = vadd.f32 %v4234_v8, %v2957_v16 }
 0x8f2   : > { %v8052_v49 = vpop.f32.mrf.mxu0 }
 0x8f3   : > { %v12124_v53 = vadd.f32 %v8052_v49, %v2960_v32  ;;  %v8634_v26 = vpop.permute.xlu0 %8633  ;;  %v12937_v49 = vld [vmem:[#allocation18_spill] sm:$0xff] }
 0x8f5   : > { %12936 = vst [vmem:[#allocation72_spill] sm:$0xff] %v12124_v53 }
 0x8f7   : > { %v12128_v14 = vpop.permute.xlu0 %4931 }
 0x8fb   : > { %v6072_v44 = vpop.permute.xlu0 %6071 }
 0x8ff   : > { %v12131_v15 = vpop.permute.xlu0 %4933 }
 0x903   : > { %v12135_v10 = vpop.permute.xlu0 %4935 }
 0x907   : > { %v6068_v32 = vpop.permute.xlu0 %6067 }
 0x90b   : > { %v12139_v3 = vpop.permute.xlu0 %4937 }
 0x90f   : > { %v12142_v42 = vpop.permute.xlu0 %4939 }
 0x911   : > { %8638 = vxpose.xlu1.b32.start [1/16] (narrow) %v11804_v57, 8 }
 0x913   : > { %v6064_v57 = vpop.permute.xlu0 %6063 }
 0x915   : > { %8640 = vxpose.xlu1.b32.cont [2/16] (narrow) %v11806_v12, 8 }
 0x917   : > { %v12147_v12 = vpop.permute.xlu0 %4941 }
 0x919   : > { %8642 = vxpose.xlu1.b32.cont [3/16] (narrow) %v11812_v63, 8  ;;  %v12150_v63 = vpop.permute.xlu1 %6081 }
 0x91d   : > { %8644 = vxpose.xlu1.b32.cont [4/16] (narrow) %v11814_v11, 8  ;;  %v12152_v11 = vpop.permute.xlu0 %4943 }
 0x921   : > { %8646 = vxpose.xlu1.b32.cont [5/16] (narrow) %v8579_v5, 8 }
 0x925   : > { %8648 = vxpose.xlu1.b32.cont [6/16] (narrow) %v11828_v27, 8  ;;  %v12155_v27 = vpop.permute.xlu1 %6049 }
 0x929   : > { %8650 = vxpose.xlu1.b32.cont [7/16] (narrow) %v11844_v9, 8  ;;  %v6060_v9 = vpop.permute.xlu0 %6059 }
 0x92d   : > { %8652 = vxpose.xlu1.b32.cont [8/16] (narrow) %v11848_v46, 8  ;;  %v12158_v46 = vpop.permute.xlu1 %6079 }
 0x931   : > { %8654 = vxpose.xlu1.b32.cont [9/16] (narrow) %v11864_v48, 8  ;;  %v12160_v48 = vpop.permute.xlu0 %4945 }
 0x935   : > { %8656 = vxpose.xlu1.b32.cont [10/16] (narrow) %v11868_v52, 8  ;;  %v12162_v52 = vpop.permute.xlu1 %6077 }
 0x939   : > { %8658 = vxpose.xlu1.b32.cont [11/16] (narrow) %v11882_v59, 8  ;;  %v12164_v59 = vpop.permute.xlu0 %4947  ;;  %v12166_v5 = vpop.permute.xlu1 %6045 }
 0x93d   : > { %8660 = vxpose.xlu1.b32.cont [12/16] (narrow) %v8614_v31, 8  ;;  %v6056_v31 = vpop.permute.xlu0 %6055  ;;  %v12168_v16 = vpop.permute.xlu1 %6075 }
 0x941   : > { %8662 = vxpose.xlu1.b32.cont [13/16] (narrow) %v11895_v13, 8  ;;  %v12170_v13 = vpop.permute.xlu0 %4949 }
 0x945   : > { %8664 = vxpose.xlu1.b32.cont [14/16] (narrow) %v8624_v0, 8  ;;  %v12172_v1 = vpop.permute.xlu0 %4951 }
 0x949   : > { %8666 = vxpose.xlu1.b32.cont [15/16] (narrow) %v11914_v24, 8  ;;  %v6052_v24 = vpop.permute.xlu0 %6051 }
 0x94d   : > { %8668 = vxpose.xlu1.b32.end [16/16] (narrow) %v8634_v26, 8  ;;  %v12176_v26 = vpop.permute.xlu0 %4953 }
 0x960   : > { %v4894_v8 = vpop.xlane.xlu1 %4893 }
 0x961   : > { %8700 = vrcp.f32 %v4894_v8  ;;  %v12186_v8 = vpop.permute.xlu0 %4955 }
 0x96b   : > { %6245 = vrot.lane.b32.xlu1 %v12937_v49, %s8795_s28  ;;  %v12952_v49 = vld [vmem:[#allocation56_spill] sm:$0xff] }
 0x96e   : > { %v8701_v0 = vpop.eup %8700 }
 0x96f   : > { %6263 = vrot.lane.b32.xlu1 %v12880_v6, %s8795_s28  ;;  %v4896_v53 = vmul.f32 %v8701_v0, %v12053_v23  ;;  %v6048_v6 = vpop.permute.xlu0 %6047  ;;  %v12947_v23 = vld [vmem:[#allocation22_spill] sm:$0xff]  ;;  %v12953_v0 = vld [vmem:[#allocation52_spill] sm:$0xff] }
 0x971   : > { %8053 = vmatprep.subr.msk.mxu1 %vm1731_vm3, %v4896_v53 }
 0x972   : > { %8054 = vmatpush3.xpose.msk.msra.mxu1 %vm1731_vm3, %v4896_v53  ;;  %v12948_v53 = vld [vmem:[#allocation31_spill] sm:$0xff] }
 0x973   : > { %6267 = vrot.lane.b32.xlu1 %v12885_v50, %s8795_s28  ;;  %7700 = vmatprep.subr.mxu1 %v11930_v51  ;;  %v12938_v50 = vld [vmem:[#allocation33_spill] sm:$0xff]  ;;  %v12939_v51 = vld [vmem:[#allocation27_spill] sm:$0xff] }
 0x975   : > { %8056 = vmatmul.mubr.msk.f32.vlgmr.msra.gmra.mxu1 %vm1731_vm3, %v11802_v19  ;;  %v12943_v19 = vld [vmem:[#allocation39_spill] sm:$0xff] }
 0x976   : > { %8058 = vmatprep.mubr.msk.f32.mxu1 %vm1731_vm3, %v11808_v41  ;;  %7701 = vmatpush3.msra.mxu1 %v6072_v44  ;;  %v12945_v41 = vld [vmem:[#allocation51_spill] sm:$0xff]  ;;  %v12949_v44 = vld [vmem:[#allocation53_spill] sm:$0xff] }
 0x977   : > { %6271 = vrot.lane.b32.xlu1 %v12888_v60, %s8795_s28  ;;  %7702 = vmatprep.subr.mxu1 %v11934_v20  ;;  %v12940_v60 = vld [vmem:[#allocation47_spill] sm:$0xff]  ;;  %v12941_v20 = vld [vmem:[#allocation38_spill] sm:$0xff] }
 0x978   : > { %7703 = vmatpush3.msra.mxu1 %v11940_v28  ;;  %v12942_v28 = vld [vmem:[#allocation49_spill] sm:$0xff] }
 0x979   : > { %8059 = vmatmul.mubr.msk.f32.gmra.mxu1 %vm1731_vm3, %v11810_v4  ;;  %7704 = vmatprep.subr.mxu1 %v11944_v43  ;;  %v12944_v43 = vld [vmem:[#allocation35_spill] sm:$0xff]  ;;  %v12946_v4 = vld [vmem:[#allocation29_spill] sm:$0xff] }
 0x97a   : > { %8061 = vmatprep.mubr.msk.f32.mxu1 %vm1731_vm3, %v11818_v56  ;;  %7705 = vmatpush3.msra.mxu1 %v6068_v32  ;;  %v4958_v56 = vpop.permute.xlu0 %4957  ;;  %v12950_v32 = vld [vmem:[#allocation37_spill] sm:$0xff] }
 0x97b   : > { %6275 = vrot.lane.b32.xlu1 %v12938_v50, %s8795_s28  ;;  %7706 = vmatprep.subr.mxu1 %v12939_v51  ;;  %v12954_v50 = vld [vmem:[#allocation57_spill] sm:$0xff] }
 0x97c   : > { %7707 = vmatpush3.msra.mxu1 %v12940_v60  ;;  %v12955_v51 = vld [vmem:[#allocation45_spill] sm:$0xff] }
 0x97d   : > { %8062 = vmatmul.mubr.msk.f32.gmra.mxu1 %vm1731_vm3, %v12941_v20  ;;  %7708 = vmatprep.subr.mxu1 %v12942_v28  ;;  %v12956_v20 = vld [vmem:[#allocation58_spill] sm:$0xff]  ;;  %v12957_v28 = vld [vmem:[#allocation40_spill] sm:$0xff] }
 0x97e   : > { %8064 = vmatprep.mubr.msk.f32.mxu1 %vm1731_vm3, %v12943_v19  ;;  %7709 = vmatpush3.msra.mxu1 %v6064_v57  ;;  %v12951_v57 = vld [vmem:[#allocation55_spill] sm:$0xff]  ;;  %v4960_v60 = vpop.permute.xlu0 %4959  ;;  %v12958_v19 = vld [vmem:[#allocation41_spill] sm:$0xff] }
 0x97f   : > { %6279 = vrot.lane.b32.xlu1 %v12944_v43, %s8795_s28  ;;  %7710 = vmatprep.subr.mxu1 %v12945_v41 }
 0x980   : > { %7711 = vmatpush3.msra.mxu1 %v12946_v4 }
 0x981   : > { %8065 = vmatmul.mubr.msk.f32.gmra.mxu1 %vm1731_vm3, %v12947_v23  ;;  %7712 = vmatprep.subr.mxu1 %v12948_v53 }
 0x982   : > { %8067 = vmatprep.mubr.msk.f32.mxu1 %vm1731_vm3, %v12949_v44  ;;  %7713 = vmatpush3.msra.mxu1 %v6060_v9  ;;  %v6074_v9 = vpop.permute.xlu1 %6073 }
 0x983   : > { %6283 = vrot.lane.b32.xlu1 %v12950_v32, %s8795_s28  ;;  %7714 = vmatprep.subr.mxu1 %v12951_v57 }
 0x984   : > { %7715 = vmatpush3.msra.mxu1 %v12952_v49 }
 0x985   : > { %8068 = vmatmul.mubr.msk.f32.gmra.mxu1 %vm1731_vm3, %v12953_v0  ;;  %7716 = vmatprep.subr.mxu1 %v12954_v50 }
 0x986   : > { %8070 = vmatprep.mubr.msk.f32.mxu1 %vm1731_vm3, %v12955_v51  ;;  %7717 = vmatpush3.msra.mxu1 %v6056_v31  ;;  %v6044_v31 = vpop.permute.xlu0 %6043 }
 0x987   : > { %7718 = vmatprep.subr.mxu1 %v12956_v20 }
 0x988   : > { %7719 = vmatpush3.msra.mxu1 %v12004_v39 }
 0x989   : > { %8071 = vmatmul.mubr.msk.f32.gmra.mxu1 %vm1731_vm3, %v12091_v40  ;;  %7720 = vmatprep.subr.mxu1 %v12014_v37  ;;  %v12959_v37 = vld [vmem:[#allocation44_spill] sm:$0xff] }
 0x98a   : > { %8073 = vmatprep.mubr.msk.f32.mxu1 %vm1731_vm3, %v12957_v28  ;;  %7721 = vmatpush3.msra.mxu1 %v6052_v24  ;;  %v6042_v40 = vpop.permute.xlu0 %6041 }
 0x98b   : > { %7722 = vmatprep.subr.mxu1 %v12150_v63 }
 0x98c   : > { %7723 = vmatpush3.msra.mxu1 %v12155_v27 }
 0x98d   : > { %8074 = vmatmul.mubr.msk.f32.gmra.mxu1 %vm1731_vm3, %v12120_v35  ;;  %7724 = vmatprep.subr.mxu1 %v12158_v46  ;;  %v8669_v39 = vpop.trf.xlu1 }
 0x98e   : > { %8076 = vmatprep.mubr.msk.f32.mxu1 %vm1731_vm3, %v12958_v19  ;;  %7725 = vmatpush3.msra.mxu1 %v6048_v6  ;;  %v8670_v35 = vunpack.i.l.bf16 %v8669_v39  ;;  %v12960_v19 = vld [vmem:[#allocation6_spill] sm:$0xff] }
 0x98f   : > { %7726 = vmatprep.subr.mxu1 %v12162_v52 }
 0x990   : > { %7727 = vmatpush3.msra.mxu1 %v12166_v5 }
 0x991   : > { %8077 = vmatmul.mubr.msk.f32.gmra.mxu1 %vm1731_vm3, %v12126_v29  ;;  %7728 = vmatprep.subr.mxu1 %v12168_v16  ;;  %v8673_v29 = vunpack.i.h.bf16 %v8669_v39 }
 0x992   : > { %8079 = vmatprep.mubr.msk.f32.mxu1 %vm1731_vm3, %v12959_v37  ;;  %7729 = vmatpush3.msra.mxu1 %v6044_v31  ;;  %v12961_v37 = vld [vmem:[#allocation7_spill] sm:$0xff] }
 0x993   : > { %7730 = vmatprep.subr.mxu1 %v6074_v9  ;;  %v6208_v9 = vstv %s7292_s7 }
 0x994   : > { %7731 = vmatpush3.msra.mxu1 %v6042_v40  ;;  %v12962_v40 = vld [vmem:[#allocation8_spill] sm:$0xff] }
 0x995   : > { %8080 = vmatmul.mubr.msk.f32.gmra.mxu1 %vm1731_vm3, %v12128_v14  ;;  %v1698_v14 = vld [vmem:[%s12643_s4 + $0x8] sm:$0xff] }
 0x996   : > { %8082 = vmatprep.mubr.msk.f32.mxu1 %vm1731_vm3, %v12131_v15  ;;  %8103 = vmatprep.subr.msk.mxu0 %vm2700_vm12, %v1698_v14  ;;  %v12281_v15 = vrot.slane %v1698_v14, 4 }
 0x997   : > { %8104 = vmatpush3.msk.msra.mxu0 %vm2700_vm12, %v1698_v14  ;;  %v12965_v14 = vld [vmem:[#allocation10_spill] sm:$0xff] }
 0x998   : > { %8203 = vmatprep.subr.msk.mxu0 %vm2700_vm12, %v12281_v15 }
 0x999   : > { %8083 = vmatmul.mubr.msk.f32.gmra.mxu1 %vm1731_vm3, %v12135_v10 }
 0x99a   : > { %8085 = vmatprep.mubr.msk.f32.mxu1 %vm1731_vm3, %v12139_v3 }
 0x99d   : > { %8086 = vmatmul.mubr.msk.f32.gmra.mxu1 %vm1731_vm3, %v12142_v42 }
 0x99e   : > { %8088 = vmatprep.mubr.msk.f32.mxu1 %vm1731_vm3, %v12147_v12 }
 0x9a1   : > { %8089 = vmatmul.mubr.msk.f32.gmra.mxu1 %vm1731_vm3, %v12152_v11 }
 0x9a2   : > { %8091 = vmatprep.mubr.msk.f32.mxu1 %vm1731_vm3, %v12160_v48 }
 0x9a5   : > { %8092 = vmatmul.mubr.msk.f32.gmra.mxu1 %vm1731_vm3, %v12164_v59 }
 0x9a6   : > { %8094 = vmatprep.mubr.msk.f32.mxu1 %vm1731_vm3, %v12170_v13 }
 0x9a9   : > { %8095 = vmatmul.mubr.msk.f32.gmra.mxu1 %vm1731_vm3, %v12172_v1 }
 0x9aa   : > { %8097 = vmatprep.mubr.msk.f32.mxu1 %vm1731_vm3, %v12176_v26 }
 0x9ad   : > { %8098 = vmatmul.mubr.msk.f32.gmra.mxu1 %vm1731_vm3, %v12186_v8 }
 0x9ae   : > { %8100 = vmatprep.mubr.msk.f32.mxu1 %vm1731_vm3, %v4958_v56 }
 0x9b1   : > { %8101 = vmatmul.mubr.msk.f32.gmra.mxu1 %vm1731_vm3, %v4960_v60 }
 0x9b2   : > { %6201 = vmatprep.mubr.f32.mxu1 %v8670_v35  ;;  %v12963_v35 = vld [vmem:[#allocation9_spill] sm:$0xff] }
 0x9b5   : > { %6202 = vmatmul.mubr.f32.vlgmr.msra.gmra.mxu1 %v8673_v29  ;;  %v12964_v29 = vld [vmem:[#allocation11_spill] sm:$0xff] }
 0xa35   : > { %v8057_v10 = vpop.f32.mrf.mxu1 }
 0xa37   : > { %v5094_v3 = vpop.f32.mrf.mxu1 }
 0xa38   : > { %8105 = vmatprep.mubr.msk.f32.mxu0 %vm1731_vm3, %v5094_v3  ;;  %v12967_v3 = vld [vmem:[#allocation13_spill] sm:$0xff] }
 0xa39   : > { %v8060_v42 = vpop.f32.mrf.mxu1  ;;  %8106 = vmatmul.mubr.msk.f32.vlgmr.msra.gmra.mxu0 %vm1731_vm3, %v8057_v10  ;;  %v12966_v10 = vld [vmem:[#allocation12_spill] sm:$0xff] }
 0xa3a   : > { %8204 = vmatpush3.msk.msra.mxu0 %vm2700_vm12, %v12281_v15 }
 0xa3b   : > { %v5104_v12 = vpop.f32.mrf.mxu1 }
 0xa3c   : > { %8108 = vmatprep.mubr.msk.f32.mxu0 %vm1731_vm3, %v5104_v12 }
 0xa3d   : > { %v8063_v63 = vpop.f32.mrf.mxu1  ;;  %8109 = vmatmul.mubr.msk.f32.gmra.mxu0 %vm1731_vm3, %v8060_v42  ;;  %v12968_v42 = vld [vmem:[#allocation14_spill] sm:$0xff] }
 0xa3f   : > { %v5114_v11 = vpop.f32.mrf.mxu1 }
 0xa40   : > { %8111 = vmatprep.mubr.msk.f32.mxu0 %vm1731_vm3, %v5114_v11 }
 0xa41   : > { %v8066_v27 = vpop.f32.mrf.mxu1  ;;  %8112 = vmatmul.mubr.msk.f32.gmra.mxu0 %vm1731_vm3, %v8063_v63 }
 0xa43   : > { %v5124_v46 = vpop.f32.mrf.mxu1 }
 0xa44   : > { %8114 = vmatprep.mubr.msk.f32.mxu0 %vm1731_vm3, %v5124_v46 }
 0xa45   : > { %v8069_v48 = vpop.f32.mrf.mxu1  ;;  %8115 = vmatmul.mubr.msk.f32.gmra.mxu0 %vm1731_vm3, %v8066_v27 }
 0xa47   : > { %v5134_v52 = vpop.f32.mrf.mxu1 }
 0xa48   : > { %8117 = vmatprep.mubr.msk.f32.mxu0 %vm1731_vm3, %v5134_v52  ;;  %v12969_v52 = vld [vmem:[#allocation15_spill] sm:$0xff] }
 0xa49   : > { %v8072_v59 = vpop.f32.mrf.mxu1  ;;  %8118 = vmatmul.mubr.msk.f32.gmra.mxu0 %vm1731_vm3, %v8069_v48 }
 0xa4b   : > { %v5144_v5 = vpop.f32.mrf.mxu1 }
 0xa4c   : > { %8120 = vmatprep.mubr.msk.f32.mxu0 %vm1731_vm3, %v5144_v5  ;;  %v12971_v5 = vld [vmem:[#allocation17_spill] sm:$0xff] }
 0xa4d   : > { %v8075_v16 = vpop.f32.mrf.mxu1  ;;  %8121 = vmatmul.mubr.msk.f32.gmra.mxu0 %vm1731_vm3, %v8072_v59  ;;  %v12970_v59 = vld [vmem:[#allocation16_spill] sm:$0xff] }
 0xa4f   : > { %v5154_v13 = vpop.f32.mrf.mxu1 }
 0xa50   : > { %8123 = vmatprep.mubr.msk.f32.mxu0 %vm1731_vm3, %v5154_v13  ;;  %v12973_v13 = vld [vmem:[#allocation20_spill] sm:$0xff] }
 0xa51   : > { %v8078_v1 = vpop.f32.mrf.mxu1  ;;  %8124 = vmatmul.mubr.msk.f32.gmra.mxu0 %vm1731_vm3, %v8075_v16  ;;  %v12972_v16 = vld [vmem:[#allocation19_spill] sm:$0xff] }
 0xa53   : > { %v5164_v24 = vpop.f32.mrf.mxu1 }
 0xa54   : > { %8126 = vmatprep.mubr.msk.f32.mxu0 %vm1731_vm3, %v5164_v24  ;;  %v12975_v24 = vld [vmem:[#allocation23_spill] sm:$0xff] }
 0xa55   : > { %v8081_v26 = vpop.f32.mrf.mxu1  ;;  %8127 = vmatmul.mubr.msk.f32.gmra.mxu0 %vm1731_vm3, %v8078_v1  ;;  %v12974_v1 = vld [vmem:[#allocation21_spill] sm:$0xff] }
 0xa57   : > { %v5174_v8 = vpop.f32.mrf.mxu1 }
 0xa58   : > { %8129 = vmatprep.mubr.msk.f32.mxu0 %vm1731_vm3, %v5174_v8  ;;  %v12977_v8 = vld [vmem:[#allocation25_spill] sm:$0xff] }
 0xa59   : > { %v8084_v6 = vpop.f32.mrf.mxu1  ;;  %8130 = vmatmul.mubr.msk.f32.gmra.mxu0 %vm1731_vm3, %v8081_v26  ;;  %v12976_v26 = vld [vmem:[#allocation24_spill] sm:$0xff] }
 0xa5b   : > { %v5184_v43 = vpop.f32.mrf.mxu1 }
 0xa5c   : > { %8132 = vmatprep.mubr.msk.f32.mxu0 %vm1731_vm3, %v5184_v43  ;;  %v12979_v43 = vld [vmem:[#allocation28_spill] sm:$0xff] }
 0xa5d   : > { %v8087_v41 = vpop.f32.mrf.mxu1  ;;  %8133 = vmatmul.mubr.msk.f32.gmra.mxu0 %vm1731_vm3, %v8084_v6  ;;  %v12978_v6 = vld [vmem:[#allocation26_spill] sm:$0xff] }
 0xa5f   : > { %v5194_v4 = vpop.f32.mrf.mxu1 }
 0xa60   : > { %8135 = vmatprep.mubr.msk.f32.mxu0 %vm1731_vm3, %v5194_v4  ;;  %v12982_v4 = vld [vmem:[#allocation34_spill] sm:$0xff] }
 0xa61   : > { %v8090_v56 = vpop.f32.mrf.mxu1  ;;  %8136 = vmatmul.mubr.msk.f32.gmra.mxu0 %vm1731_vm3, %v8087_v41  ;;  %v12980_v41 = vld [vmem:[#allocation30_spill] sm:$0xff] }
 0xa63   : > { %v5204_v23 = vpop.f32.mrf.mxu1 }
 0xa64   : > { %8138 = vmatprep.mubr.msk.f32.mxu0 %vm1731_vm3, %v5204_v23 }
 0xa65   : > { %v8093_v53 = vpop.f32.mrf.mxu1  ;;  %8139 = vmatmul.mubr.msk.f32.gmra.mxu0 %vm1731_vm3, %v8090_v56  ;;  %v12983_v56 = vld [vmem:[#allocation36_spill] sm:$0xff] }
 0xa67   : > { %v5214_v44 = vpop.f32.mrf.mxu1 }
 0xa68   : > { %8141 = vmatprep.mubr.msk.f32.mxu0 %vm1731_vm3, %v5214_v44 }
 0xa69   : > { %v8096_v32 = vpop.f32.mrf.mxu1  ;;  %8142 = vmatmul.mubr.msk.f32.gmra.mxu0 %vm1731_vm3, %v8093_v53 }
 0xa6b   : > { %v5224_v57 = vpop.f32.mrf.mxu1 }
 0xa6c   : > { %8144 = vmatprep.mubr.msk.f32.mxu0 %vm1731_vm3, %v5224_v57 }
 0xa6d   : > { %v8099_v49 = vpop.f32.mrf.mxu1  ;;  %8145 = vmatmul.mubr.msk.f32.gmra.mxu0 %vm1731_vm3, %v8096_v32 }
 0xa6f   : > { %v5234_v0 = vpop.f32.mrf.mxu1 }
 0xa70   : > { %8147 = vmatprep.mubr.msk.f32.mxu0 %vm1731_vm3, %v5234_v0 }
 0xa71   : > { %v8102_v50 = vpop.f32.mrf.mxu1  ;;  %8148 = vmatmul.mubr.msk.f32.gmra.mxu0 %vm1731_vm3, %v8099_v49 }
 0xa73   : > { %v5244_v51 = vpop.f32.mrf.mxu1 }
 0xa74   : > { %8150 = vmatprep.mubr.msk.f32.mxu0 %vm1731_vm3, %v5244_v51 }
 0xa75   : > { %8151 = vmatmul.mubr.msk.f32.gmra.mxu0 %vm1731_vm3, %v8102_v50  ;;  %v7732_v60 = vpop.f32.mrf.mxu1 }
 0xa77   : > { %v7733_v20 = vpop.f32.mrf.mxu1 }
 0xa78   : > { %v7734_v28 = vadd.f32 %v7733_v20, %v7732_v60 }
 0xa7a   : > { %v6209_v31 = vmul.f32 %v7734_v28, %v6208_v9 }
 0xa7c   : > { %v6210_v39 = vsel %vm2204_vm11, %v6209_v31, -inf }
 0xa7d   : > { %6211 = vmax.xlane.f32.xlu0 %v6210_v39 }
 0xa93   : > { %6221 = vrot.lane.b32.xlu0 %v12960_v19, %s8795_s28 }
 0xa97   : > { %6223 = vrot.lane.b32.xlu0 %v12961_v37, %s8795_s28 }
 0xa9b   : > { %6225 = vrot.lane.b32.xlu0 %v12962_v40, %s8795_s28 }
 0xa9f   : > { %6227 = vrot.lane.b32.xlu0 %v12963_v35, %s8795_s28 }
 0xaa3   : > { %6229 = vrot.lane.b32.xlu0 %v12964_v29, %s8795_s28 }
 0xaa7   : > { %6231 = vrot.lane.b32.xlu0 %v12965_v14, %s8795_s28 }
 0xaab   : > { %6233 = vrot.lane.b32.xlu0 %v12966_v10, %s8795_s28 }
 0xaaf   : > { %6235 = vrot.lane.b32.xlu0 %v12967_v3, %s8795_s28 }
 0xab3   : > { %6237 = vrot.lane.b32.xlu0 %v12968_v42, %s8795_s28 }
 0xb06   : > { %v6212_v12 = vpop.xlane.xlu0 %6211 }
 0xb07   : > { %v6213_v63 = vsub.f32 %v6209_v31, %v6212_v12 }
 0xb09   : > { %v6214_v11 = vmul.f32 1.442695, %v6213_v63 }
 0xb0a   : > { %v6222_v27 = vpop.permute.xlu0 %6221 }
 0xb0b   : > { %8702 = vpow2.f32 %v6214_v11  ;;  %8155 = vmatprep.mubr.msk.f32.mxu1 %vm1731_vm3, %v6222_v27 }
 0xb0e   : > { %v6224_v23 = vpop.permute.xlu0 %6223 }
 0xb12   : > { %v6226_v53 = vpop.permute.xlu0 %6225 }
 0xb16   : > { %v6228_v44 = vpop.permute.xlu0 %6227 }
 0xb18   : > { %v8703_v46 = vpop.eup %8702 }
 0xb19   : > { %v6216_v48 = vsel %vm2204_vm11, %v8703_v46, 0.0 }
 0xb1a   : > { %6217 = vadd.xlane.f32.xlu0 %v6216_v48  ;;  %v6230_v32 = vpop.permute.xlu0 %6229 }
 0xb1e   : > { %v6232_v57 = vpop.permute.xlu0 %6231 }
 0xb22   : > { %v6234_v49 = vpop.permute.xlu0 %6233 }
 0xb26   : > { %v6236_v0 = vpop.permute.xlu0 %6235 }
 0xb2a   : > { %v6238_v50 = vpop.permute.xlu0 %6237 }
 0xb30   : > { %6239 = vrot.lane.b32.xlu0 %v12969_v52, %s8795_s28 }
 0xb34   : > { %6241 = vrot.lane.b32.xlu0 %v12970_v59, %s8795_s28 }
 0xb38   : > { %6243 = vrot.lane.b32.xlu0 %v12971_v5, %s8795_s28 }
 0xb3c   : > { %6247 = vrot.lane.b32.xlu0 %v12972_v16, %s8795_s28 }
 0xb40   : > { %6249 = vrot.lane.b32.xlu0 %v12973_v13, %s8795_s28 }
 0xb44   : > { %6251 = vrot.lane.b32.xlu0 %v12974_v1, %s8795_s28 }
 0xb48   : > { %6253 = vrot.lane.b32.xlu0 %v12789_v22, %s8795_s28  ;;  %v12981_v22 = vld [vmem:[#allocation32_spill] sm:$0xff] }
 0xb4c   : > { %6255 = vrot.lane.b32.xlu0 %v12975_v24, %s8795_s28 }
 0xb50   : > { %6257 = vrot.lane.b32.xlu0 %v12976_v26, %s8795_s28 }
 0xb54   : > { %6259 = vrot.lane.b32.xlu0 %v12977_v8, %s8795_s28 }
 0xb58   : > { %6261 = vrot.lane.b32.xlu0 %v12978_v6, %s8795_s28 }
 0xb5c   : > { %6265 = vrot.lane.b32.xlu0 %v12979_v43, %s8795_s28 }
 0xb60   : > { %6269 = vrot.lane.b32.xlu0 %v12980_v41, %s8795_s28 }
 0xb64   : > { %6273 = vrot.lane.b32.xlu0 %v12981_v22, %s8795_s28 }
 0xb68   : > { %6277 = vrot.lane.b32.xlu0 %v12982_v4, %s8795_s28 }
 0xb6c   : > { %6281 = vrot.lane.b32.xlu0 %v12983_v56, %s8795_s28 }
 0xba3   : > { %v6218_v51 = vpop.xlane.xlu0 %6217 }
 0xba4   : > { %8704 = vrcp.f32 %v6218_v51 }
 0xba7   : > { %v6240_v60 = vpop.permute.xlu0 %6239 }
 0xbab   : > { %v6242_v20 = vpop.permute.xlu0 %6241 }
 0xbaf   : > { %v6244_v9 = vpop.permute.xlu0 %6243 }
 0xbb1   : > { %v8705_v28 = vpop.eup %8704 }
 0xbb2   : > { %v6220_v31 = vmul.f32 %v8705_v28, %v8703_v46 }
 0xbb3   : > { %v6248_v39 = vpop.permute.xlu0 %6247 }
 0xbb4   : > { %8153 = vmatprep.subr.msk.mxu1 %vm1731_vm3, %v6220_v31 }
 0xbb5   : > { %8154 = vmatpush3.xpose.msk.msra.mxu1 %vm1731_vm3, %v6220_v31 }
 0xbb6   : > { %8253 = vmatprep.subr.msk.mxu1 %vm2700_vm12, %v12281_v15 }
 0xbb7   : > { %v6250_v19 = vpop.permute.xlu0 %6249 }
 0xbb8   : > { %8156 = vmatmul.mubr.msk.f32.vlgmr.msra.gmra.mxu1 %vm1731_vm3, %v6224_v23 }
 0xbb9   : > { %8158 = vmatprep.mubr.msk.f32.mxu1 %vm1731_vm3, %v6226_v53  ;;  %8254 = vmatpush3.msk.msra.mxu1 %vm2700_vm12, %v12281_v15  ;;  %v6246_v15 = vpop.permute.xlu1 %6245 }
 0xbbb   : > { %v6252_v37 = vpop.permute.xlu0 %6251 }
 0xbbc   : > { %8159 = vmatmul.mubr.msk.f32.gmra.mxu1 %vm1731_vm3, %v6228_v44 }
 0xbbd   : > { %8161 = vmatprep.mubr.msk.f32.mxu1 %vm1731_vm3, %v6230_v32  ;;  %v6264_v3 = vpop.permute.xlu1 %6263 }
 0xbbf   : > { %v6254_v40 = vpop.permute.xlu0 %6253 }
 0xbc0   : > { %8162 = vmatmul.mubr.msk.f32.gmra.mxu1 %vm1731_vm3, %v6232_v57 }
 0xbc1   : > { %8164 = vmatprep.mubr.msk.f32.mxu1 %vm1731_vm3, %v6234_v49  ;;  %v6268_v12 = vpop.permute.xlu1 %6267 }
 0xbc3   : > { %v6256_v35 = vpop.permute.xlu0 %6255 }
 0xbc4   : > { %8165 = vmatmul.mubr.msk.f32.gmra.mxu1 %vm1731_vm3, %v6236_v0 }
 0xbc5   : > { %8167 = vmatprep.mubr.msk.f32.mxu1 %vm1731_vm3, %v6238_v50  ;;  %v6272_v11 = vpop.permute.xlu1 %6271 }
 0xbc7   : > { %v6258_v29 = vpop.permute.xlu0 %6257 }
 0xbc8   : > { %8168 = vmatmul.mubr.msk.f32.gmra.mxu1 %vm1731_vm3, %v6240_v60 }
 0xbc9   : > { %8170 = vmatprep.mubr.msk.f32.mxu1 %vm1731_vm3, %v6242_v20  ;;  %v6276_v46 = vpop.permute.xlu1 %6275 }
 0xbcb   : > { %v6260_v14 = vpop.permute.xlu0 %6259 }
 0xbcc   : > { %8171 = vmatmul.mubr.msk.f32.gmra.mxu1 %vm1731_vm3, %v6244_v9 }
 0xbcd   : > { %8173 = vmatprep.mubr.msk.f32.mxu1 %vm1731_vm3, %v6246_v15  ;;  %v6280_v52 = vpop.permute.xlu1 %6279  ;;  %v12442_v15 = vpop.f32.mrf.mxu0 }
 0xbce   : > { %12984 = vst [vmem:[#allocation18_spill] sm:$0xff] %v12442_v15 }
 0xbcf   : > { %v6262_v10 = vpop.permute.xlu0 %6261 }
 0xbd0   : > { %8174 = vmatmul.mubr.msk.f32.gmra.mxu1 %vm1731_vm3, %v6248_v39 }
 0xbd1   : > { %8176 = vmatprep.mubr.msk.f32.mxu1 %vm1731_vm3, %v6250_v19  ;;  %v6284_v5 = vpop.permute.xlu1 %6283 }
 0xbd3   : > { %v6266_v42 = vpop.permute.xlu0 %6265 }
 0xbd4   : > { %8177 = vmatmul.mubr.msk.f32.gmra.mxu1 %vm1731_vm3, %v6252_v37 }
 0xbd5   : > { %8179 = vmatprep.mubr.msk.f32.mxu1 %vm1731_vm3, %v6254_v40 }
 0xbd7   : > { %v6270_v63 = vpop.permute.xlu0 %6269 }
 0xbd8   : > { %8180 = vmatmul.mubr.msk.f32.gmra.mxu1 %vm1731_vm3, %v6256_v35 }
 0xbd9   : > { %8182 = vmatprep.mubr.msk.f32.mxu1 %vm1731_vm3, %v6258_v29 }
 0xbdb   : > { %v6274_v27 = vpop.permute.xlu0 %6273 }
 0xbdc   : > { %8183 = vmatmul.mubr.msk.f32.gmra.mxu1 %vm1731_vm3, %v6260_v14  ;;  %v8107_v14 = vpop.f32.mrf.mxu0 }
 0xbdd   : > { %8185 = vmatprep.mubr.msk.f32.mxu1 %vm1731_vm3, %v6262_v10 }
 0xbde   : > { %v5418_v10 = vpop.f32.mrf.mxu0 }
 0xbdf   : > { %v6278_v48 = vpop.permute.xlu0 %6277 }
 0xbe0   : > { %8186 = vmatmul.mubr.msk.f32.gmra.mxu1 %vm1731_vm3, %v6264_v3  ;;  %v8110_v3 = vpop.f32.mrf.mxu0 }
 0xbe1   : > { %8188 = vmatprep.mubr.msk.f32.mxu1 %vm1731_vm3, %v6266_v42 }
 0xbe2   : > { %v5428_v42 = vpop.f32.mrf.mxu0 }
 0xbe3   : > { %v6282_v59 = vpop.permute.xlu0 %6281 }
 0xbe4   : > { %8189 = vmatmul.mubr.msk.f32.gmra.mxu1 %vm1731_vm3, %v6268_v12  ;;  %v8113_v12 = vpop.f32.mrf.mxu0 }
 0xbe5   : > { %8191 = vmatprep.mubr.msk.f32.mxu1 %vm1731_vm3, %v6270_v63 }
 0xbe6   : > { %v5438_v63 = vpop.f32.mrf.mxu0 }
 0xbe8   : > { %8192 = vmatmul.mubr.msk.f32.gmra.mxu1 %vm1731_vm3, %v6272_v11  ;;  %v8116_v11 = vpop.f32.mrf.mxu0 }
 0xbe9   : > { %8194 = vmatprep.mubr.msk.f32.mxu1 %vm1731_vm3, %v6274_v27 }
 0xbea   : > { %v12444_v27 = vpop.f32.mrf.mxu0 }
 0xbec   : > { %8195 = vmatmul.mubr.msk.f32.gmra.mxu1 %vm1731_vm3, %v6276_v46  ;;  %v12446_v46 = vpop.f32.mrf.mxu0 }
 0xbed   : > { %8197 = vmatprep.mubr.msk.f32.mxu1 %vm1731_vm3, %v6278_v48 }
 0xbee   : > { %v12448_v48 = vpop.f32.mrf.mxu0 }
 0xbf0   : > { %8198 = vmatmul.mubr.msk.f32.gmra.mxu1 %vm1731_vm3, %v6280_v52  ;;  %v12450_v52 = vpop.f32.mrf.mxu0 }
 0xbf1   : > { %8200 = vmatprep.mubr.msk.f32.mxu1 %vm1731_vm3, %v6282_v59 }
 0xbf2   : > { %v12452_v59 = vpop.f32.mrf.mxu0 }
 0xbf4   : > { %8201 = vmatmul.mubr.msk.f32.gmra.mxu1 %vm1731_vm3, %v6284_v5  ;;  %v12454_v5 = vpop.f32.mrf.mxu0 }
 0xc78   : > { %v8157_v16 = vpop.f32.mrf.mxu1 }
 0xc7a   : > { %v6418_v13 = vpop.f32.mrf.mxu1 }
 0xc7b   : > { %8205 = vmatprep.mubr.msk.f32.mxu0 %vm1731_vm3, %v6418_v13 }
 0xc7c   : > { %v8160_v1 = vpop.f32.mrf.mxu1  ;;  %8206 = vmatmul.mubr.msk.f32.vlgmr.msra.gmra.mxu0 %vm1731_vm3, %v8157_v16  ;;  %v12456_v16 = vpop.f32.mrf.mxu0 }
 0xc7e   : > { %v6428_v24 = vpop.f32.mrf.mxu1  ;;  %v12458_v13 = vpop.f32.mrf.mxu0 }
 0xc7f   : > { %8208 = vmatprep.mubr.msk.f32.mxu0 %vm1731_vm3, %v6428_v24 }
 0xc80   : > { %v8163_v26 = vpop.f32.mrf.mxu1  ;;  %8209 = vmatmul.mubr.msk.f32.gmra.mxu0 %vm1731_vm3, %v8160_v1  ;;  %v12460_v1 = vpop.f32.mrf.mxu0 }
 0xc82   : > { %v6438_v8 = vpop.f32.mrf.mxu1  ;;  %v12462_v24 = vpop.f32.mrf.mxu0 }
 0xc83   : > { %8211 = vmatprep.mubr.msk.f32.mxu0 %vm1731_vm3, %v6438_v8 }
 0xc84   : > { %v8166_v6 = vpop.f32.mrf.mxu1  ;;  %8212 = vmatmul.mubr.msk.f32.gmra.mxu0 %vm1731_vm3, %v8163_v26  ;;  %v12464_v26 = vpop.f32.mrf.mxu0 }
 0xc86   : > { %v6448_v43 = vpop.f32.mrf.mxu1  ;;  %v12466_v8 = vpop.f32.mrf.mxu0 }
 0xc87   : > { %8214 = vmatprep.mubr.msk.f32.mxu0 %vm1731_vm3, %v6448_v43 }
 0xc88   : > { %v8169_v41 = vpop.f32.mrf.mxu1  ;;  %8215 = vmatmul.mubr.msk.f32.gmra.mxu0 %vm1731_vm3, %v8166_v6  ;;  %v12468_v6 = vpop.f32.mrf.mxu0 }
 0xc8a   : > { %v6458_v22 = vpop.f32.mrf.mxu1  ;;  %v12470_v43 = vpop.f32.mrf.mxu0 }
 0xc8b   : > { %8217 = vmatprep.mubr.msk.f32.mxu0 %vm1731_vm3, %v6458_v22 }
 0xc8c   : > { %v8172_v4 = vpop.f32.mrf.mxu1  ;;  %8218 = vmatmul.mubr.msk.f32.gmra.mxu0 %vm1731_vm3, %v8169_v41  ;;  %v12472_v41 = vpop.f32.mrf.mxu0 }
 0xc8e   : > { %v6468_v56 = vpop.f32.mrf.mxu1  ;;  %v12474_v22 = vpop.f32.mrf.mxu0 }
 0xc8f   : > { %8220 = vmatprep.mubr.msk.f32.mxu0 %vm1731_vm3, %v6468_v56 }
 0xc90   : > { %v8175_v23 = vpop.f32.mrf.mxu1  ;;  %8221 = vmatmul.mubr.msk.f32.gmra.mxu0 %vm1731_vm3, %v8172_v4  ;;  %v12476_v4 = vpop.f32.mrf.mxu0 }
 0xc92   : > { %v6478_v53 = vpop.f32.mrf.mxu1  ;;  %v12478_v56 = vpop.f32.mrf.mxu0 }
 0xc93   : > { %8223 = vmatprep.mubr.msk.f32.mxu0 %vm1731_vm3, %v6478_v53 }
 0xc94   : > { %v8178_v44 = vpop.f32.mrf.mxu1  ;;  %8224 = vmatmul.mubr.msk.f32.gmra.mxu0 %vm1731_vm3, %v8175_v23  ;;  %v12480_v23 = vpop.f32.mrf.mxu0 }
 0xc96   : > { %v6488_v32 = vpop.f32.mrf.mxu1  ;;  %v12482_v53 = vpop.f32.mrf.mxu0 }
 0xc97   : > { %8226 = vmatprep.mubr.msk.f32.mxu0 %vm1731_vm3, %v6488_v32 }
 0xc98   : > { %v8181_v57 = vpop.f32.mrf.mxu1  ;;  %8227 = vmatmul.mubr.msk.f32.gmra.mxu0 %vm1731_vm3, %v8178_v44  ;;  %v12484_v44 = vpop.f32.mrf.mxu0 }
 0xc9a   : > { %v6498_v49 = vpop.f32.mrf.mxu1  ;;  %v12486_v32 = vpop.f32.mrf.mxu0 }
 0xc9b   : > { %8229 = vmatprep.mubr.msk.f32.mxu0 %vm1731_vm3, %v6498_v49 }
 0xc9c   : > { %v8184_v0 = vpop.f32.mrf.mxu1  ;;  %8230 = vmatmul.mubr.msk.f32.gmra.mxu0 %vm1731_vm3, %v8181_v57  ;;  %v12488_v57 = vpop.f32.mrf.mxu0 }
 0xc9d   : > { %12985 = vst [vmem:[#allocation33_spill] sm:$0xff] %v12488_v57 }
 0xc9e   : > { %v6508_v50 = vpop.f32.mrf.mxu1  ;;  %v12490_v49 = vpop.f32.mrf.mxu0 }
 0xc9f   : > { %8232 = vmatprep.mubr.msk.f32.mxu0 %vm1731_vm3, %v6508_v50  ;;  %12986 = vst [vmem:[#allocation27_spill] sm:$0xff] %v12490_v49  ;;  %v12987_v50 = vld [vmem:[#allocation54_spill] sm:$0xff] }
 0xca0   : > { %v8187_v51 = vpop.f32.mrf.mxu1  ;;  %8233 = vmatmul.mubr.msk.f32.gmra.mxu0 %vm1731_vm3, %v8184_v0  ;;  %v8749_v0 = vld [vmem:[%s8880_s14] sm:$0xff]  ;;  %v12993_v49 = vld [vmem:[#allocation50_spill] sm:$0xff] }
 0xca2   : > { %v6518_v60 = vpop.f32.mrf.mxu1 }
 0xca3   : > { %8235 = vmatprep.mubr.msk.f32.mxu0 %vm1731_vm3, %v6518_v60  ;;  %v12494_v60 = vpop.f32.mrf.mxu0 }
 0xca4   : > { %v8190_v20 = vpop.f32.mrf.mxu1  ;;  %8236 = vmatmul.mubr.msk.f32.gmra.mxu0 %vm1731_vm3, %v8187_v51  ;;  %v2929_v51 = vadd.f32 %v8749_v0, %v12987_v50  ;;  %12988 = vst [vmem:[#allocation47_spill] sm:$0xff] %v12494_v60  ;;  %v8751_v60 = vld [vmem:[%s8880_s14 + $0x20] sm:$0xff] }
 0xca5   : > { %v2933_v15 = vadd.f32 %v8751_v60, %v12993_v49 }
 0xca6   : > { %v6528_v9 = vpop.f32.mrf.mxu1 }
 0xca7   : > { %8238 = vmatprep.mubr.msk.f32.mxu0 %vm1731_vm3, %v6528_v9 }
 0xca8   : > { %v8193_v28 = vpop.f32.mrf.mxu1  ;;  %8239 = vmatmul.mubr.msk.f32.gmra.mxu0 %vm1731_vm3, %v8190_v20  ;;  %v12989_v20 = vld [vmem:[#allocation61_spill] sm:$0xff] }
 0xca9   : > { %v4253_v9 = vadd.f32 %v12989_v20, %v2929_v51  ;;  %v12992_v51 = vld [vmem:[#allocation62_spill] sm:$0xff] }
 0xcaa   : > { %v6538_v31 = vpop.f32.mrf.mxu1 }
 0xcab   : > { %8241 = vmatprep.mubr.msk.f32.mxu0 %vm1731_vm3, %v6538_v31 }
 0xcac   : > { %v8196_v39 = vpop.f32.mrf.mxu1  ;;  %8242 = vmatmul.mubr.msk.f32.gmra.mxu0 %vm1731_vm3, %v8193_v28  ;;  %v12990_v28 = vld [vmem:[#allocation60_spill] sm:$0xff] }
 0xcad   : > { %v5578_v31 = vadd.f32 %v8107_v14, %v12990_v28  ;;  %v5580_v14 = vadd.f32 %v8110_v3, %v12992_v51 }
 0xcae   : > { %v6548_v19 = vpop.f32.mrf.mxu1 }
 0xcaf   : > { %8244 = vmatprep.mubr.msk.f32.mxu0 %vm1731_vm3, %v6548_v19  ;;  %v8750_v19 = vld [vmem:[%s8880_s14 + $0x10] sm:$0xff] }
 0xcb0   : > { %v8199_v37 = vpop.f32.mrf.mxu1  ;;  %8245 = vmatmul.mubr.msk.f32.gmra.mxu0 %vm1731_vm3, %v8196_v39 }
 0xcb2   : > { %v6558_v40 = vpop.f32.mrf.mxu1 }
 0xcb3   : > { %8247 = vmatprep.mubr.msk.f32.mxu1 %vm1731_vm3, %v6558_v40 }
 0xcb4   : > { %v8202_v35 = vpop.f32.mrf.mxu1  ;;  %8248 = vmatmul.mubr.msk.f32.vlgmr.msra.gmra.mxu1 %vm1731_vm3, %v8199_v37  ;;  %v12991_v37 = vld [vmem:[#allocation48_spill] sm:$0xff] }
 0xcb5   : > { %v2931_v40 = vadd.f32 %v8750_v19, %v12991_v37  ;;  %v8752_v37 = vld [vmem:[%s8880_s14 + $0x30] sm:$0xff] }
 0xcb6   : > { %v6568_v29 = vpop.f32.mrf.mxu1 }
 0xcb7   : > { %8250 = vmatprep.mubr.msk.f32.mxu1 %vm1731_vm3, %v6568_v29  ;;  %v4255_v50 = vadd.f32 %v12010_v36, %v2931_v40  ;;  %v12994_v36 = vld [vmem:[#allocation63_spill] sm:$0xff]  ;;  %v12995_v40 = vld [vmem:[#allocation42_spill] sm:$0xff] }
 0xcb8   : > { %8251 = vmatmul.mubr.msk.f32.gmra.mxu1 %vm1731_vm3, %v8202_v35  ;;  %v5577_v35 = vadd.f32 %v5418_v10, %v4253_v9 }
 0xcb9   : > { %v5579_v57 = vadd.f32 %v5428_v42, %v4255_v50  ;;  %v12997_v50 = vld [vmem:[#allocation43_spill] sm:$0xff] }
 0xd3c   : > { %v8207_v39 = vpop.f32.mrf.mxu0 }
 0xd3d   : > { %v6902_v29 = vadd.f32 %v8207_v39, %v5578_v31  ;;  %v4257_v31 = vadd.f32 %v12018_v17, %v2933_v15  ;;  %v5582_v39 = vadd.f32 %v8113_v12, %v12994_v36  ;;  %v12996_v17 = vld [vmem:[#allocation64_spill] sm:$0xff]  ;;  %v12999_v36 = vld [vmem:[#allocation46_spill] sm:$0xff] }
 0xd3e   : > { %v6742_v0 = vpop.f32.mrf.mxu0  ;;  %v5584_v15 = vadd.f32 %v8116_v11, %v12996_v17 }
 0xd3f   : > { %6934 = vst.msk [vmem:[%s12503_s11 + $0x8] sm:$0xff] %vm374_vm0, %v6902_v29  ;;  %v6901_v20 = vadd.f32 %v6742_v0, %v5577_v35  ;;  %v2935_v35 = vadd.f32 %v8752_v37, %v12995_v40  ;;  %v5581_v49 = vadd.f32 %v5438_v63, %v4257_v31  ;;  %v8753_v0 = vld [vmem:[%s8880_s14 + $0x40] sm:$0xff]  ;;  %v8754_v31 = vld [vmem:[%s8880_s14 + $0x50] sm:$0xff] }
 0xd40   : > { %v8210_v28 = vpop.f32.mrf.mxu0  ;;  %v2937_v51 = vadd.f32 %v8753_v0, %v12997_v50  ;;  %v13001_v40 = vld [vmem:[#allocation66_spill] sm:$0xff]  ;;  %v13002_v0 = vld [vmem:[#allocation68_spill] sm:$0xff] }
 0xd41   : > { %6933 = vst.msk [vmem:[%s12503_s11] sm:$0xff] %vm374_vm0, %v6901_v20  ;;  %v6904_v10 = vadd.f32 %v8210_v28, %v5580_v14  ;;  %v4259_v29 = vadd.f32 %v12025_v54, %v2935_v35  ;;  %v12998_v28 = vld [vmem:[#allocation65_spill] sm:$0xff]  ;;  %v5591_v50 = vadd.f32 %v12460_v1, %v13002_v0 }
 0xd42   : > { %v6752_v9 = vpop.f32.mrf.mxu0  ;;  %v4261_v54 = vadd.f32 %v12031_v34, %v2937_v51  ;;  %v5586_v11 = vadd.f32 %v12446_v46, %v12998_v28  ;;  %v13000_v34 = vld [vmem:[#allocation67_spill] sm:$0xff]  ;;  %v5588_v46 = vadd.f32 %v12450_v52, %v13001_v40  ;;  %v5594_v51 = vadd.f32 %v12462_v24, %v12063_v61  ;;  %v13003_v28 = vld [vmem:[#allocation69_spill] sm:$0xff] }
 0xd43   : > { %6936 = vst.msk [vmem:[%s12503_s11 + $0x18] sm:$0xff] %vm374_vm0, %v6904_v10  ;;  %v6903_v3 = vadd.f32 %v6752_v9, %v5579_v57  ;;  %v5583_v63 = vadd.f32 %v12444_v27, %v4259_v29  ;;  %v5590_v29 = vadd.f32 %v12454_v5, %v12043_v18  ;;  %v5603_v40 = vadd.f32 %v12484_v44, %v12112_v45 }
 0xd44   : > { %v8213_v19 = vpop.f32.mrf.mxu0  ;;  %v5585_v27 = vadd.f32 %v12448_v48, %v4261_v54  ;;  %v5595_v54 = vadd.f32 %v12468_v6, %v12075_v58 }
 0xd45   : > { %6935 = vst.msk [vmem:[%s12503_s11 + $0x10] sm:$0xff] %vm374_vm0, %v6903_v3  ;;  %v6906_v42 = vadd.f32 %v8213_v19, %v5582_v39  ;;  %v2939_v39 = vadd.f32 %v8754_v31, %v12999_v36  ;;  %v5599_v36 = vadd.f32 %v12476_v4, %v12093_v30 }
 0xd46   : > { %v6762_v60 = vpop.f32.mrf.mxu0 }
 0xd47   : > { %6938 = vst.msk [vmem:[%s12503_s11 + $0x28] sm:$0xff] %vm374_vm0, %v6906_v42  ;;  %v6905_v12 = vadd.f32 %v6762_v60, %v5581_v49  ;;  %v4263_v37 = vadd.f32 %v13000_v34, %v2939_v39  ;;  %v13004_v39 = vld [vmem:[#allocation70_spill] sm:$0xff]  ;;  %v5604_v34 = vadd.f32 %v12482_v53, %v12108_v38 }
 0xd48   : > { %v8216_v57 = vpop.f32.mrf.mxu0  ;;  %v8755_v53 = vld [vmem:[%s8880_s14 + $0xf0] sm:$0xff] }
 0xd49   : > { %6937 = vst.msk [vmem:[%s12503_s11 + $0x20] sm:$0xff] %vm374_vm0, %v6905_v12  ;;  %v6908_v14 = vadd.f32 %v8216_v57, %v5584_v15  ;;  %v5587_v42 = vadd.f32 %v12452_v59, %v4263_v37  ;;  %v5589_v15 = vadd.f32 %v12456_v16, %v12047_v55  ;;  %v5592_v57 = vadd.f32 %v12458_v13, %v12051_v21 }
 0xd4a   : > { %v6772_v20 = vpop.f32.mrf.mxu0 }
 0xd4b   : > { %6940 = vst.msk [vmem:[%s12503_s11 + $0x38] sm:$0xff] %vm374_vm0, %v6908_v14  ;;  %v6907_v10 = vadd.f32 %v6772_v20, %v5583_v63  ;;  %v5593_v63 = vadd.f32 %v12464_v26, %v12067_v33  ;;  %v5596_v20 = vadd.f32 %v12466_v8, %v12071_v25 }
 0xd4c   : > { %v8219_v9 = vpop.f32.mrf.mxu0 }
 0xd4d   : > { %6939 = vst.msk [vmem:[%s12503_s11 + $0x30] sm:$0xff] %vm374_vm0, %v6907_v10  ;;  %v6910_v3 = vadd.f32 %v8219_v9, %v5586_v11  ;;  %v5598_v11 = vadd.f32 %v12470_v43, %v13003_v28  ;;  %v5597_v10 = vadd.f32 %v12472_v41, %v12083_v62  ;;  %v5600_v9 = vadd.f32 %v12474_v22, %v12087_v2 }
 0xd4e   : > { %v6782_v19 = vpop.f32.mrf.mxu0 }
 0xd4f   : > { %6942 = vst.msk [vmem:[%s12503_s11 + $0x48] sm:$0xff] %vm374_vm0, %v6910_v3  ;;  %v6909_v35 = vadd.f32 %v6782_v19, %v5585_v27  ;;  %v5602_v27 = vadd.f32 %v12478_v56, %v13004_v39  ;;  %v13005_v3 = vld [vmem:[#allocation71_spill] sm:$0xff] }
 0xd50   : > { %v8222_v49 = vpop.f32.mrf.mxu0  ;;  %v5601_v19 = vadd.f32 %v12480_v23, %v13005_v3 }
 0xd51   : > { %6941 = vst.msk [vmem:[%s12503_s11 + $0x40] sm:$0xff] %vm374_vm0, %v6909_v35  ;;  %v6912_v48 = vadd.f32 %v8222_v49, %v5588_v46  ;;  %v5606_v35 = vadd.f32 %v12486_v32, %v12116_v47  ;;  %v13009_v47 = vld [vmem:[#allocation72_spill] sm:$0xff]  ;;  %v13010_v32 = vld [vmem:[#allocation27_spill] sm:$0xff] }
 0xd52   : > { %v6792_v60 = vpop.f32.mrf.mxu0 }
 0xd53   : > { %6944 = vst.msk [vmem:[%s12503_s11 + $0x58] sm:$0xff] %vm374_vm0, %v6912_v48  ;;  %v6911_v17 = vadd.f32 %v6792_v60, %v5587_v42  ;;  %v13006_v42 = vld [vmem:[#allocation59_spill] sm:$0xff]  ;;  %v13007_v60 = vld [vmem:[#allocation33_spill] sm:$0xff] }
 0xd54   : > { %v8225_v52 = vpop.f32.mrf.mxu0  ;;  %v2959_v48 = vadd.f32 %v8755_v53, %v13006_v42  ;;  %v5605_v45 = vadd.f32 %v13007_v60, %v12122_v7 }
 0xd55   : > { %6943 = vst.msk [vmem:[%s12503_s11 + $0x50] sm:$0xff] %vm374_vm0, %v6911_v17  ;;  %v6914_v59 = vadd.f32 %v8225_v52, %v5590_v29  ;;  %v13008_v17 = vld [vmem:[#allocation18_spill] sm:$0xff] }
 0xd56   : > { %v6802_v12 = vpop.f32.mrf.mxu0  ;;  %v4283_v52 = vadd.f32 %v13008_v17, %v2959_v48 }
 0xd57   : > { %6946 = vst.msk [vmem:[%s12503_s11 + $0x68] sm:$0xff] %vm374_vm0, %v6914_v59  ;;  %v6913_v18 = vadd.f32 %v6802_v12, %v5589_v15  ;;  %v5608_v15 = vadd.f32 %v13010_v32, %v13009_v47 }
 0xd58   : > { %v8228_v5 = vpop.f32.mrf.mxu0 }
 0xd59   : > { %6945 = vst.msk [vmem:[%s12503_s11 + $0x60] sm:$0xff] %vm374_vm0, %v6913_v18  ;;  %v6916_v55 = vadd.f32 %v8228_v5, %v5592_v57  ;;  %v13011_v57 = vld [vmem:[#allocation47_spill] sm:$0xff] }
 0xd5a   : > { %v6812_v16 = vpop.f32.mrf.mxu0  ;;  %v5607_v18 = vadd.f32 %v13011_v57, %v4283_v52 }
 0xd5b   : > { %6948 = vst.msk [vmem:[%s12503_s11 + $0x78] sm:$0xff] %vm374_vm0, %v6916_v55  ;;  %v6915_v21 = vadd.f32 %v6812_v16, %v5591_v50 }
 0xd5c   : > { %v8231_v13 = vpop.f32.mrf.mxu0 }
 0xd5d   : > { %6947 = vst.msk [vmem:[%s12503_s11 + $0x70] sm:$0xff] %vm374_vm0, %v6915_v21  ;;  %v6918_v1 = vadd.f32 %v8231_v13, %v5594_v51 }
 0xd5e   : > { %v6822_v14 = vpop.f32.mrf.mxu0 }
 0xd5f   : > { %6950 = vst.msk [vmem:[%s12503_s11 + $0x88] sm:$0xff] %vm374_vm0, %v6918_v1  ;;  %v6917_v61 = vadd.f32 %v6822_v14, %v5593_v63 }
 0xd60   : > { %v8234_v24 = vpop.f32.mrf.mxu0 }
 0xd61   : > { %6949 = vst.msk [vmem:[%s12503_s11 + $0x80] sm:$0xff] %vm374_vm0, %v6917_v61  ;;  %v6920_v33 = vadd.f32 %v8234_v24, %v5596_v20 }
 0xd62   : > { %v6832_v26 = vpop.f32.mrf.mxu0 }
 0xd63   : > { %6952 = vst.msk [vmem:[%s12503_s11 + $0x98] sm:$0xff] %vm374_vm0, %v6920_v33  ;;  %v6919_v25 = vadd.f32 %v6832_v26, %v5595_v54 }
 0xd64   : > { %v8237_v8 = vpop.f32.mrf.mxu0 }
 0xd65   : > { %6951 = vst.msk [vmem:[%s12503_s11 + $0x90] sm:$0xff] %vm374_vm0, %v6919_v25  ;;  %v6922_v58 = vadd.f32 %v8237_v8, %v5598_v11 }
 0xd66   : > { %v6842_v6 = vpop.f32.mrf.mxu0 }
 0xd67   : > { %6954 = vst.msk [vmem:[%s12503_s11 + $0xa8] sm:$0xff] %vm374_vm0, %v6922_v58  ;;  %v6921_v43 = vadd.f32 %v6842_v6, %v5597_v10 }
 0xd68   : > { %v8240_v31 = vpop.f32.mrf.mxu0 }
 0xd69   : > { %6953 = vst.msk [vmem:[%s12503_s11 + $0xa0] sm:$0xff] %vm374_vm0, %v6921_v43  ;;  %v6924_v62 = vadd.f32 %v8240_v31, %v5600_v9 }
 0xd6a   : > { %v6852_v41 = vpop.f32.mrf.mxu0 }
 0xd6b   : > { %6956 = vst.msk [vmem:[%s12503_s11 + $0xb8] sm:$0xff] %vm374_vm0, %v6924_v62  ;;  %v6923_v2 = vadd.f32 %v6852_v41, %v5599_v36 }
 0xd6c   : > { %v8243_v22 = vpop.f32.mrf.mxu0 }
 0xd6d   : > { %6955 = vst.msk [vmem:[%s12503_s11 + $0xb0] sm:$0xff] %vm374_vm0, %v6923_v2  ;;  %v6926_v30 = vadd.f32 %v8243_v22, %v5602_v27 }
 0xd6e   : > { %v6862_v4 = vpop.f32.mrf.mxu0 }
 0xd6f   : > { %6958 = vst.msk [vmem:[%s12503_s11 + $0xc8] sm:$0xff] %vm374_vm0, %v6926_v30  ;;  %v6925_v56 = vadd.f32 %v6862_v4, %v5601_v19 }
 0xd70   : > { %v8246_v37 = vpop.f32.mrf.mxu0 }
 0xd71   : > { %6957 = vst.msk [vmem:[%s12503_s11 + $0xc0] sm:$0xff] %vm374_vm0, %v6925_v56  ;;  %v6928_v23 = vadd.f32 %v8246_v37, %v5604_v34 }
 0xd72   : > { %v6872_v46 = vpop.f32.mrf.mxu0 }
 0xd73   : > { %6960 = vst.msk [vmem:[%s12503_s11 + $0xd8] sm:$0xff] %vm374_vm0, %v6928_v23  ;;  %v6927_v49 = vadd.f32 %v6872_v46, %v5603_v40 }
 0xd74   : > { %v8249_v38 = vpop.f32.mrf.mxu1 }
 0xd75   : > { %6959 = vst.msk [vmem:[%s12503_s11 + $0xd0] sm:$0xff] %vm374_vm0, %v6927_v49  ;;  %v6930_v44 = vadd.f32 %v8249_v38, %v5606_v35 }
 0xd76   : > { %v6882_v29 = vpop.f32.mrf.mxu1 }
 0xd77   : > { %6962 = vst.msk [vmem:[%s12503_s11 + $0xe8] sm:$0xff] %vm374_vm0, %v6930_v44  ;;  %v6929_v59 = vadd.f32 %v6882_v29, %v5605_v45 }
 0xd78   : > { %v8252_v12 = vpop.f32.mrf.mxu1 }
 0xd79   : > { %6961 = vst.msk [vmem:[%s12503_s11 + $0xe0] sm:$0xff] %vm374_vm0, %v6929_v59  ;;  %v6932_v5 = vadd.f32 %v8252_v12, %v5608_v15 }
 0xd7a   : > { %v6892_v0 = vpop.f32.mrf.mxu1 }
 0xd7b   : > { %6964 = vst.msk [vmem:[%s12503_s11 + $0xf8] sm:$0xff] %vm374_vm0, %v6932_v5  ;;  %v6931_v7 = vadd.f32 %v6892_v0, %v5607_v18 }
 0xd7d   : > { %6963 = vst.msk [vmem:[%s12503_s11 + $0xf0] sm:$0xff] %vm374_vm0, %v6931_v7 }
 0xd7e PF: > { %s17_s21 = sadd.s32 1, %s8781_s21  }
 0xd7f   : > { %p14_p1 = scmp.ge.s32.totalorder %s17_s21, 4  }
 0xd81   :  { %16 = sbr.rel (!%p14_p1) target bundleno = 1 (0x1), region = 83 }
 0xd86   :  { %6986 = vsyncpa [#allocation4], 1 }
 0xd87   :  { %6988 = vsyncpa [#allocation4 + $0x1], 1 }

</bundles_post_ra>
